<compile_context>
chip_gen: v5e
topology: v5e:2x2
jax: 0.10.0
libtpu: 0.0.40
codegen_flags: <defaults>
</compile_context>

<pallas_src>
import functools

import jax
import jax.numpy as jnp
from jax import lax
from jax.experimental import pallas as pl
from jax.experimental.pallas import tpu as pltpu

_PI = 3.141592653589793


# ----------------------------------------------------------------------------
# atan2 built only from ops guaranteed to lower in Mosaic (abs/min/max/div/
# mul/add/where).  Cephes-style range reduction + odd polynomial, |err|~1e-7.
# Single divide per element (perf review item): the big/small-branch selection
# happens on numerator/denominator, not on the ratio.  Used both inside the
# kernel and by the reference so the +/-pi branch-cut convention at
# analytically-real frequency bins is identical on both sides of the check.
# ----------------------------------------------------------------------------
def _atan_poly(z):
    z2 = z * z
    p = jnp.float32(8.05374449538e-2)
    p = p * z2 + jnp.float32(-1.38776856032e-1)
    p = p * z2 + jnp.float32(1.99777106478e-1)
    p = p * z2 + jnp.float32(-3.33329491539e-1)
    return p * z2 * z + z


def _atan2(y, x):
    ax = jnp.abs(x)
    ay = jnp.abs(y)
    hi = jnp.maximum(ax, ay)
    lo = jnp.minimum(ax, ay)
    big = lo > jnp.float32(0.41421356237309503) * hi          # tan(pi/8) * hi
    num = jnp.where(big, lo - hi, lo)
    den = jnp.maximum(jnp.where(big, lo + hi, hi), jnp.float32(1e-30))
    z = num / den                                              # the ONE divide
    a = _atan_poly(z) + jnp.where(big, jnp.float32(0.25 * _PI), jnp.float32(0.0))
    a = jnp.where(ay > ax, jnp.float32(0.5 * _PI) - a, a)
    a = jnp.where(x < 0.0, jnp.float32(_PI) - a, a)
    return jnp.where(y < 0.0, -a, a)


# ----------------------------------------------------------------------------
# Kernel: one batch tile.  Every activation is (rows, B_TILE) with rows
# ordered c*L + n on sublanes and the batch on lanes (lane-dense I/O, matmul
# N-dim == B_TILE).  No concatenates, no slices: the operators come in split.
# ----------------------------------------------------------------------------
def freqflow_kernel(x_ref, fcos_ref, fmsin_ref,
                    a1p_ref, b1p_ref, a1m_ref, b1m_ref,
                    a2p_ref, b2p_ref, a2m_ref, b2m_ref,
                    ire_ref, iim_ref, out_ref):
    x = x_ref[...]                                               # (CL, BT)

    # torch.fft.fft (norm='backward') as two real matmuls (cos / -sin halves).
    re = jnp.dot(fcos_ref[...], x, preferred_element_type=jnp.float32)
    im = jnp.dot(fmsin_ref[...], x, preferred_element_type=jnp.float32)
    pha = _atan2(im, re)                                         # torch.angle
    mag = jnp.sqrt(re * re + im * im)                            # torch.abs

    # pha_process / amp_process: Conv1d -> ReLU -> Conv1d, each conv layer is
    # ONE matmul against a precomputed (Cout*L, Cin*L) operator per branch.
    hp = jnp.maximum(
        jnp.dot(a1p_ref[...], pha, preferred_element_type=jnp.float32)
        + b1p_ref[...], 0.0)                                     # (MID*L, BT)
    hm = jnp.maximum(
        jnp.dot(a1m_ref[...], mag, preferred_element_type=jnp.float32)
        + b1m_ref[...], 0.0)
    rp = jnp.dot(a2p_ref[...], hp, preferred_element_type=jnp.float32) + b2p_ref[...]
    rm = jnp.dot(a2m_ref[...], hm, preferred_element_type=jnp.float32) + b2m_ref[...]

    # make_complex + torch.fft.ifft (norm='backward') + abs, with the inverse
    # DFT kept as its two (CL, CL) blocks (no concat, no zero blocks).
    ur = rm * jnp.cos(rp)
    ui = rm * jnp.sin(rp)
    ire = ire_ref[...]
    iim = iim_ref[...]
    zr = (jnp.dot(ire, ur, preferred_element_type=jnp.float32)
          - jnp.dot(iim, ui, preferred_element_type=jnp.float32))
    zi = (jnp.dot(iim, ur, preferred_element_type=jnp.float32)
          + jnp.dot(ire, ui, preferred_element_type=jnp.float32))
    out_ref[...] = jnp.sqrt(zr * zr + zi * zi)


# ----------------------------------------------------------------------------
# Host-side operator construction (run once, outside the hot path).
# ----------------------------------------------------------------------------
def _conv1d_as_matrix(w, L):
    """PyTorch Conv1d (stride 1, 'same' zero padding) as a (Cout*L, Cin*L)
    matrix acting on activations whose rows are ordered c*L + n."""
    cout, cin, k = w.shape
    p = k // 2
    m = jnp.arange(L)[:, None]
    n = jnp.arange(L)[None, :]
    tap = n - m + p                                              # (L, L)
    valid = (tap >= 0) & (tap < k)
    wk = w[:, :, jnp.clip(tap, 0, k - 1)]                        # (Cout, Cin, L, L)
    wk = jnp.where(valid[None, None], wk, 0.0)
    return jnp.transpose(wk, (0, 2, 1, 3)).reshape(cout * L, cin * L)


def build_freqflow_operators(params, feature_num, window_size):
    """Precompute the SPLIT fused DFT / conv operators consumed by the kernel.

    Returns (f_cos, f_msin, a1p, b1p, a1m, b1m, a2p, b2p, a2m, b2m, i_re, i_im).
    """
    C, L = feature_num, window_size
    pw1, pb1, pw2, pb2, aw1, ab1, aw2, ab2 = [
        p.astype(jnp.float32) for p in params]

    # (k*n mod L) keeps the trig argument in [0, 2*pi) for large L (precision).
    idx = jnp.arange(L)
    ang = (2.0 * _PI / L) * ((idx[:, None] * idx[None, :]) % L).astype(jnp.float32)
    eye_c = jnp.eye(C, dtype=jnp.float32)
    f_cos = jnp.kron(eye_c, jnp.cos(ang))                        # Re(fft) = f_cos @ x
    f_msin = jnp.kron(eye_c, -jnp.sin(ang))                      # Im(fft) = f_msin @ x
    i_re = jnp.kron(eye_c, jnp.cos(ang)) / L                     # ifft blocks (1/L norm)
    i_im = jnp.kron(eye_c, jnp.sin(ang)) / L

    a1p = _conv1d_as_matrix(pw1, L)                              # (MID*L, C*L)
    a1m = _conv1d_as_matrix(aw1, L)
    a2p = _conv1d_as_matrix(pw2, L)                              # (C*L, MID*L)
    a2m = _conv1d_as_matrix(aw2, L)
    b1p = jnp.repeat(pb1, L).reshape(-1, 1)
    b1m = jnp.repeat(ab1, L).reshape(-1, 1)
    b2p = jnp.repeat(pb2, L).reshape(-1, 1)
    b2m = jnp.repeat(ab2, L).reshape(-1, 1)
    return (f_cos, f_msin, a1p, b1p, a1m, b1m, a2p, b2p, a2m, b2m, i_re, i_im)


# ----------------------------------------------------------------------------
# Generation-aware batch tile selection (perf review item).
#   * single-TensorCore parts (v4/v5e/v6e): one big tile (up to 256 lanes),
#     grid=(1,) -> no per-step pipeline overhead, fills the 256-wide v6e MXU.
#   * dual-TC v7x: keep >= 2 grid steps of 128 lanes each so both cores work.
# ----------------------------------------------------------------------------
def _pick_batch_tile(B):
    Bp = max(128, ((B + 127) // 128) * 128)
    try:
        kind = jax.devices()[0].device_kind.lower()
    except Exception:  # pragma: no cover - be robust on exotic runtimes
        kind = ""
    dual_tc = ("v7" in kind) or ("tpu7" in kind)
    if dual_tc and Bp >= 256:
        return 128 * max(1, (Bp // 128) // 2)
    return min(Bp, 256)


# ----------------------------------------------------------------------------
# Wrapper: layout plumbing + pallas_call.
# ----------------------------------------------------------------------------
def frequency_flow(x, operators, *, batch_tile=None):
    """x: (B, feature_num, window_size) f32 -> (B, feature_num, window_size)."""
    if batch_tile is None:
        batch_tile = _pick_batch_tile(x.shape[0])
    return _frequency_flow_jit(x, operators, batch_tile)


@functools.partial(jax.jit, static_argnames=("batch_tile",))
def _frequency_flow_jit(x, operators, batch_tile):
    B, C, L = x.shape
    cl = C * L
    (f_cos, f_msin, a1p, b1p, a1m, b1m,
     a2p, b2p, a2m, b2m, i_re, i_im) = operators
    midl = a1p.shape[0]

    bt = batch_tile
    n_tiles = pl.cdiv(B, bt)
    Bp = n_tiles * bt

    # Batch on the lane axis: lane-dense loads/stores and matmul N == B_TILE.
    x2 = jnp.transpose(x, (1, 2, 0)).reshape(cl, B).astype(jnp.float32)
    if Bp != B:
        x2 = jnp.pad(x2, ((0, 0), (0, Bp - B)))

    def const(arr):
        # Constant operand: full array as one block, same index every step.
        # NOTE: pipeline_mode=pl.Buffered(1) is the knob if the operators ever
        # grow; at ~0.4 MiB total it is noise, so double-buffering is fine.
        return pl.BlockSpec(arr.shape, lambda i: (0, 0))

    consts = (f_cos, f_msin, a1p, b1p, a1m, b1m, a2p, b2p, a2m, b2m, i_re, i_im)

    # Advisory cost estimate for XLA's scheduler around this custom call.
    flops = int(2 * Bp * (6 * cl * cl + 4 * midl * cl))
    bytes_accessed = int(4 * (2 * cl * Bp + sum(int(c.size) for c in consts)))
    transcendentals = int(6 * Bp * cl)

    out2 = pl.pallas_call(
        freqflow_kernel,
        out_shape=jax.ShapeDtypeStruct((cl, Bp), jnp.float32),
        grid=(n_tiles,),
        in_specs=[pl.BlockSpec((cl, bt), lambda i: (0, i))] + [const(c) for c in consts],
        out_specs=pl.BlockSpec((cl, bt), lambda i: (0, i)),
        compiler_params=pltpu.CompilerParams(
            dimension_semantics=("parallel",),
            vmem_limit_bytes=32 * 1024 * 1024),
        cost_estimate=pl.CostEstimate(
            flops=flops, transcendentals=transcendentals,
            bytes_accessed=bytes_accessed),
    )(x2, *consts)

    return out2[:, :B].reshape(C, L, B).transpose(2, 0, 1)


# ----------------------------------------------------------------------------
# Pure-JAX reference mirroring the PyTorch FrequencyFlow forward.
# The forward transform is evaluated as an explicit real DFT (mathematically
# identical to torch.fft.fft; checked against jnp.fft.fft in __main__) and the
# phase with the same atan2 convention as the kernel: at bins whose imaginary
# part is analytically zero (DC/Nyquist of a real signal) the angle sits
# exactly on the +/-pi branch cut, where the sign is decided by rounding noise
# and legitimately differs between FFT implementations.  Pinning the
# convention keeps the comparison well-posed; _atan2 itself is validated
# against jnp.arctan2 on generic inputs in __main__.
# ----------------------------------------------------------------------------
def _reference(x, params, *, kernel_size):
    K = kernel_size
    P = K // 2
    pw1, pb1, pw2, pb2, aw1, ab1, aw2, ab2 = params
    B, C, L = x.shape

    idx = jnp.arange(L)
    ang = (2.0 * _PI / L) * ((idx[:, None] * idx[None, :]) % L).astype(jnp.float32)
    re = jnp.einsum('bcn,kn->bck', x, jnp.cos(ang), precision='highest')
    im = -jnp.einsum('bcn,kn->bck', x, jnp.sin(ang), precision='highest')
    pha = _atan2(im, re)
    mag = jnp.sqrt(re * re + im * im)

    def conv(h, w, b):
        y = lax.conv_general_dilated(
            h, w, window_strides=(1,), padding=[(P, P)],
            dimension_numbers=('NCH', 'OIH', 'NCH'),
            precision=lax.Precision.HIGHEST)
        return y + b[None, :, None]

    rp = conv(jnp.maximum(conv(pha, pw1, pb1), 0.0), pw2, pb2)
    rm = conv(jnp.maximum(conv(mag, aw1, ab1), 0.0), aw2, ab2)
    comp = (rm * jnp.cos(rp)) + 1j * (rm * jnp.sin(rp))
    return jnp.abs(jnp.fft.ifft(comp, axis=2))


if __name__ == "__main__":
    B, C, L = 256, 4, 16          # batch, feature_num, window_size
    MID, K = 8, 3                 # mid_channel, kernel_size (odd)

    key = jax.random.PRNGKey(0)
    kx, k1, k2, k3, k4, k5, k6, k7, k8, ka, kb = jax.random.split(key, 11)

    def conv_params(kw, kb_, cout, cin, ksz):
        bound = 1.0 / (cin * ksz) ** 0.5
        w = jax.random.uniform(kw, (cout, cin, ksz), jnp.float32, -bound, bound)
        b = jax.random.uniform(kb_, (cout,), jnp.float32, -bound, bound)
        return w, b

    pw1, pb1 = conv_params(k1, k2, MID, C, K)
    pw2, pb2 = conv_params(k3, k4, C, MID, K)
    aw1, ab1 = conv_params(k5, k6, MID, C, K)
    aw2, ab2 = conv_params(k7, k8, C, MID, K)
    params = (pw1, pb1, pw2, pb2, aw1, ab1, aw2, ab2)

    x = jax.random.normal(kx, (B, C, L), jnp.float32)

    # Build the split fused operators once, outside the traced hot path.
    ops = build_freqflow_operators(params, C, L)

    out = frequency_flow(x, ops)              # generation-aware batch tile
    out = jax.block_until_ready(out)

    # --- sanity check 1: the explicit real DFT matches jnp.fft.fft ---
    idx = jnp.arange(L)
    ang = (2.0 * _PI / L) * ((idx[:, None] * idx[None, :]) % L).astype(jnp.float32)
    re_d = jnp.einsum('bcn,kn->bck', x, jnp.cos(ang), precision='highest')
    im_d = -jnp.einsum('bcn,kn->bck', x, jnp.sin(ang), precision='highest')
    freq = jnp.fft.fft(x, axis=2)
    assert jnp.allclose(re_d, freq.real, atol=1e-3), "DFT real mismatch"
    assert jnp.allclose(im_d, freq.imag, atol=1e-3), "DFT imag mismatch"

    # --- sanity check 2: hand-rolled atan2 matches jnp.arctan2 (generic pts) ---
    yv = 3.0 * jax.random.normal(ka, (4096,), jnp.float32)
    xv = 3.0 * jax.random.normal(kb, (4096,), jnp.float32)
    assert jnp.allclose(_atan2(yv, xv), jnp.arctan2(yv, xv), atol=1e-4), \
        float(jnp.max(jnp.abs(_atan2(yv, xv) - jnp.arctan2(yv, xv))))

    # --- main check: kernel vs pure-JAX reference ---
    ref = _reference(x, params, kernel_size=K)
    assert out.shape == (B, C, L), out.shape
    assert jnp.allclose(out, ref, rtol=2e-3, atol=2e-3), \
        float(jnp.max(jnp.abs(out - ref)))
    print("KERNEL_OK")
</pallas_src>

<mosaic_0001>
module attributes {stable_mosaic.version = 11 : i64} {
  func.func @freqflow_kernel(%arg0: i32, %arg1: memref<64x256xf32, #tpu.memory_space<vmem>>, %arg2: memref<64x64xf32, #tpu.memory_space<vmem>>, %arg3: memref<64x64xf32, #tpu.memory_space<vmem>>, %arg4: memref<128x64xf32, #tpu.memory_space<vmem>>, %arg5: memref<128x1xf32, #tpu.memory_space<vmem>>, %arg6: memref<128x64xf32, #tpu.memory_space<vmem>>, %arg7: memref<128x1xf32, #tpu.memory_space<vmem>>, %arg8: memref<64x128xf32, #tpu.memory_space<vmem>>, %arg9: memref<64x1xf32, #tpu.memory_space<vmem>>, %arg10: memref<64x128xf32, #tpu.memory_space<vmem>>, %arg11: memref<64x1xf32, #tpu.memory_space<vmem>>, %arg12: memref<64x64xf32, #tpu.memory_space<vmem>>, %arg13: memref<64x64xf32, #tpu.memory_space<vmem>>, %arg14: memref<64x256xf32, #tpu.memory_space<vmem>>) attributes {dimension_semantics = [#tpu.dimension_semantics<parallel>], iteration_bounds = array<i64: 1>, scalar_prefetch = 0 : i64, scratch_operands = 0 : i64, tpu.core_type = #tpu.core_type<tc>, window_params = [{transform_indices = @transform_0, window_bounds = array<i64: 64, 256>}, {pipeline_mode = #tpu.pipeline_mode<synchronous>, transform_indices = @transform_1, window_bounds = array<i64: 64, 64>}, {pipeline_mode = #tpu.pipeline_mode<synchronous>, transform_indices = @transform_2, window_bounds = array<i64: 64, 64>}, {pipeline_mode = #tpu.pipeline_mode<synchronous>, transform_indices = @transform_3, window_bounds = array<i64: 128, 64>}, {pipeline_mode = #tpu.pipeline_mode<synchronous>, transform_indices = @transform_4, window_bounds = array<i64: 128, 1>}, {pipeline_mode = #tpu.pipeline_mode<synchronous>, transform_indices = @transform_5, window_bounds = array<i64: 128, 64>}, {pipeline_mode = #tpu.pipeline_mode<synchronous>, transform_indices = @transform_6, window_bounds = array<i64: 128, 1>}, {pipeline_mode = #tpu.pipeline_mode<synchronous>, transform_indices = @transform_7, window_bounds = array<i64: 64, 128>}, {pipeline_mode = #tpu.pipeline_mode<synchronous>, transform_indices = @transform_8, window_bounds = array<i64: 64, 1>}, {pipeline_mode = #tpu.pipeline_mode<synchronous>, transform_indices = @transform_9, window_bounds = array<i64: 64, 128>}, {pipeline_mode = #tpu.pipeline_mode<synchronous>, transform_indices = @transform_10, window_bounds = array<i64: 64, 1>}, {pipeline_mode = #tpu.pipeline_mode<synchronous>, transform_indices = @transform_11, window_bounds = array<i64: 64, 64>}, {pipeline_mode = #tpu.pipeline_mode<synchronous>, transform_indices = @transform_12, window_bounds = array<i64: 64, 64>}, {transform_indices = @transform_13, window_bounds = array<i64: 64, 256>}]} {
    %c0 = arith.constant 0 : index
    %c0_0 = arith.constant 0 : index
    %0 = vector.load %arg1[%c0, %c0_0] : memref<64x256xf32, #tpu.memory_space<vmem>>, vector<64x256xf32>
    %c0_1 = arith.constant 0 : index
    %c0_2 = arith.constant 0 : index
    %1 = vector.load %arg2[%c0_1, %c0_2] : memref<64x64xf32, #tpu.memory_space<vmem>>, vector<64x64xf32>
    %cst = arith.constant dense<0.000000e+00> : vector<64x256xf32>
    %2 = tpu.matmul %1, %0, %cst {dimension_numbers = #tpu.dot_dimension_numbers<[1], [0], [0], [1], [0, 0, 1, 1], [], []>} : vector<64x64xf32>, vector<64x256xf32>, vector<64x256xf32> -> vector<64x256xf32>
    %c0_3 = arith.constant 0 : index
    %c0_4 = arith.constant 0 : index
    %3 = vector.load %arg3[%c0_3, %c0_4] : memref<64x64xf32, #tpu.memory_space<vmem>>, vector<64x64xf32>
    %cst_5 = arith.constant dense<0.000000e+00> : vector<64x256xf32>
    %4 = tpu.matmul %3, %0, %cst_5 {dimension_numbers = #tpu.dot_dimension_numbers<[1], [0], [0], [1], [0, 0, 1, 1], [], []>} : vector<64x64xf32>, vector<64x256xf32>, vector<64x256xf32> -> vector<64x256xf32>
    %5 = math.absf %2 : vector<64x256xf32>
    %6 = math.absf %4 : vector<64x256xf32>
    %7 = arith.maximumf %5, %6 : vector<64x256xf32>
    %8 = arith.minimumf %5, %6 : vector<64x256xf32>
    %cst_6 = arith.constant 0.414213568 : f32
    %9 = vector.broadcast %cst_6 : f32 to vector<64x256xf32>
    %10 = arith.mulf %9, %7 : vector<64x256xf32>
    %11 = arith.cmpf ogt, %8, %10 : vector<64x256xf32>
    %12 = arith.subf %8, %7 : vector<64x256xf32>
    %13 = arith.select %11, %12, %8 : vector<64x256xi1>, vector<64x256xf32>
    %14 = arith.addf %8, %7 : vector<64x256xf32>
    %15 = arith.select %11, %14, %7 : vector<64x256xi1>, vector<64x256xf32>
    %cst_7 = arith.constant 1.000000e-30 : f32
    %16 = vector.broadcast %cst_7 : f32 to vector<64x256xf32>
    %17 = arith.maximumf %15, %16 : vector<64x256xf32>
    %18 = arith.divf %13, %17 : vector<64x256xf32>
    %19 = arith.mulf %18, %18 : vector<64x256xf32>
    %cst_8 = arith.constant 0.0805374458 : f32
    %20 = vector.broadcast %cst_8 : f32 to vector<64x256xf32>
    %21 = arith.mulf %20, %19 : vector<64x256xf32>
    %cst_9 = arith.constant -0.138776854 : f32
    %22 = vector.broadcast %cst_9 : f32 to vector<64x256xf32>
    %23 = arith.addf %21, %22 : vector<64x256xf32>
    %24 = arith.mulf %23, %19 : vector<64x256xf32>
    %cst_10 = arith.constant 0.199777111 : f32
    %25 = vector.broadcast %cst_10 : f32 to vector<64x256xf32>
    %26 = arith.addf %24, %25 : vector<64x256xf32>
    %27 = arith.mulf %26, %19 : vector<64x256xf32>
    %cst_11 = arith.constant -0.333329499 : f32
    %28 = vector.broadcast %cst_11 : f32 to vector<64x256xf32>
    %29 = arith.addf %27, %28 : vector<64x256xf32>
    %30 = arith.mulf %29, %19 : vector<64x256xf32>
    %31 = arith.mulf %30, %18 : vector<64x256xf32>
    %32 = arith.addf %31, %18 : vector<64x256xf32>
    %cst_12 = arith.constant 0.785398185 : f32
    %cst_13 = arith.constant 0.000000e+00 : f32
    %33 = vector.broadcast %cst_12 : f32 to vector<64x256xf32>
    %34 = vector.broadcast %cst_13 : f32 to vector<64x256xf32>
    %35 = arith.select %11, %33, %34 : vector<64x256xi1>, vector<64x256xf32>
    %36 = arith.addf %32, %35 : vector<64x256xf32>
    %37 = arith.cmpf ogt, %6, %5 : vector<64x256xf32>
    %cst_14 = arith.constant 1.57079637 : f32
    %38 = vector.broadcast %cst_14 : f32 to vector<64x256xf32>
    %39 = arith.subf %38, %36 : vector<64x256xf32>
    %40 = arith.select %37, %39, %36 : vector<64x256xi1>, vector<64x256xf32>
    %cst_15 = arith.constant 0.000000e+00 : f32
    %41 = vector.broadcast %cst_15 : f32 to vector<64x256xf32>
    %42 = arith.cmpf olt, %2, %41 : vector<64x256xf32>
    %cst_16 = arith.constant 3.14159274 : f32
    %43 = vector.broadcast %cst_16 : f32 to vector<64x256xf32>
    %44 = arith.subf %43, %40 : vector<64x256xf32>
    %45 = arith.select %42, %44, %40 : vector<64x256xi1>, vector<64x256xf32>
    %cst_17 = arith.constant 0.000000e+00 : f32
    %46 = vector.broadcast %cst_17 : f32 to vector<64x256xf32>
    %47 = arith.cmpf olt, %4, %46 : vector<64x256xf32>
    %cst_18 = arith.constant 0.000000e+00 : f32
    %48 = vector.broadcast %cst_18 : f32 to vector<64x256xf32>
    %49 = arith.subf %48, %45 : vector<64x256xf32>
    %50 = arith.select %47, %49, %45 : vector<64x256xi1>, vector<64x256xf32>
    %51 = arith.mulf %2, %2 : vector<64x256xf32>
    %52 = arith.mulf %4, %4 : vector<64x256xf32>
    %53 = arith.addf %51, %52 : vector<64x256xf32>
    %54 = math.sqrt %53 : vector<64x256xf32>
    %c0_19 = arith.constant 0 : index
    %c0_20 = arith.constant 0 : index
    %55 = vector.load %arg4[%c0_19, %c0_20] : memref<128x64xf32, #tpu.memory_space<vmem>>, vector<128x64xf32>
    %cst_21 = arith.constant dense<0.000000e+00> : vector<128x256xf32>
    %56 = tpu.matmul %55, %50, %cst_21 {dimension_numbers = #tpu.dot_dimension_numbers<[1], [0], [0], [1], [0, 0, 1, 1], [], []>} : vector<128x64xf32>, vector<64x256xf32>, vector<128x256xf32> -> vector<128x256xf32>
    %c0_22 = arith.constant 0 : index
    %c0_23 = arith.constant 0 : index
    %57 = vector.load %arg5[%c0_22, %c0_23] : memref<128x1xf32, #tpu.memory_space<vmem>>, vector<128x1xf32>
    %58 = vector.broadcast %57 : vector<128x1xf32> to vector<128x256xf32>
    %59 = arith.addf %56, %58 : vector<128x256xf32>
    %cst_24 = arith.constant 0.000000e+00 : f32
    %60 = vector.broadcast %cst_24 : f32 to vector<128x256xf32>
    %61 = arith.maximumf %59, %60 : vector<128x256xf32>
    %c0_25 = arith.constant 0 : index
    %c0_26 = arith.constant 0 : index
    %62 = vector.load %arg6[%c0_25, %c0_26] : memref<128x64xf32, #tpu.memory_space<vmem>>, vector<128x64xf32>
    %cst_27 = arith.constant dense<0.000000e+00> : vector<128x256xf32>
    %63 = tpu.matmul %62, %54, %cst_27 {dimension_numbers = #tpu.dot_dimension_numbers<[1], [0], [0], [1], [0, 0, 1, 1], [], []>} : vector<128x64xf32>, vector<64x256xf32>, vector<128x256xf32> -> vector<128x256xf32>
    %c0_28 = arith.constant 0 : index
    %c0_29 = arith.constant 0 : index
    %64 = vector.load %arg7[%c0_28, %c0_29] : memref<128x1xf32, #tpu.memory_space<vmem>>, vector<128x1xf32>
    %65 = vector.broadcast %64 : vector<128x1xf32> to vector<128x256xf32>
    %66 = arith.addf %63, %65 : vector<128x256xf32>
    %cst_30 = arith.constant 0.000000e+00 : f32
    %67 = vector.broadcast %cst_30 : f32 to vector<128x256xf32>
    %68 = arith.maximumf %66, %67 : vector<128x256xf32>
    %c0_31 = arith.constant 0 : index
    %c0_32 = arith.constant 0 : index
    %69 = vector.load %arg8[%c0_31, %c0_32] : memref<64x128xf32, #tpu.memory_space<vmem>>, vector<64x128xf32>
    %cst_33 = arith.constant dense<0.000000e+00> : vector<64x256xf32>
    %70 = tpu.matmul %69, %61, %cst_33 {dimension_numbers = #tpu.dot_dimension_numbers<[1], [0], [0], [1], [0, 0, 1, 1], [], []>} : vector<64x128xf32>, vector<128x256xf32>, vector<64x256xf32> -> vector<64x256xf32>
    %c0_34 = arith.constant 0 : index
    %c0_35 = arith.constant 0 : index
    %71 = vector.load %arg9[%c0_34, %c0_35] : memref<64x1xf32, #tpu.memory_space<vmem>>, vector<64x1xf32>
    %72 = vector.broadcast %71 : vector<64x1xf32> to vector<64x256xf32>
    %73 = arith.addf %70, %72 : vector<64x256xf32>
    %c0_36 = arith.constant 0 : index
    %c0_37 = arith.constant 0 : index
    %74 = vector.load %arg10[%c0_36, %c0_37] : memref<64x128xf32, #tpu.memory_space<vmem>>, vector<64x128xf32>
    %cst_38 = arith.constant dense<0.000000e+00> : vector<64x256xf32>
    %75 = tpu.matmul %74, %68, %cst_38 {dimension_numbers = #tpu.dot_dimension_numbers<[1], [0], [0], [1], [0, 0, 1, 1], [], []>} : vector<64x128xf32>, vector<128x256xf32>, vector<64x256xf32> -> vector<64x256xf32>
    %c0_39 = arith.constant 0 : index
    %c0_40 = arith.constant 0 : index
    %76 = vector.load %arg11[%c0_39, %c0_40] : memref<64x1xf32, #tpu.memory_space<vmem>>, vector<64x1xf32>
    %77 = vector.broadcast %76 : vector<64x1xf32> to vector<64x256xf32>
    %78 = arith.addf %75, %77 : vector<64x256xf32>
    %79 = math.cos %73 : vector<64x256xf32>
    %80 = arith.mulf %78, %79 : vector<64x256xf32>
    %81 = math.sin %73 : vector<64x256xf32>
    %82 = arith.mulf %78, %81 : vector<64x256xf32>
    %c0_41 = arith.constant 0 : index
    %c0_42 = arith.constant 0 : index
    %83 = vector.load %arg12[%c0_41, %c0_42] : memref<64x64xf32, #tpu.memory_space<vmem>>, vector<64x64xf32>
    %c0_43 = arith.constant 0 : index
    %c0_44 = arith.constant 0 : index
    %84 = vector.load %arg13[%c0_43, %c0_44] : memref<64x64xf32, #tpu.memory_space<vmem>>, vector<64x64xf32>
    %cst_45 = arith.constant dense<0.000000e+00> : vector<64x256xf32>
    %85 = tpu.matmul %83, %80, %cst_45 {dimension_numbers = #tpu.dot_dimension_numbers<[1], [0], [0], [1], [0, 0, 1, 1], [], []>} : vector<64x64xf32>, vector<64x256xf32>, vector<64x256xf32> -> vector<64x256xf32>
    %cst_46 = arith.constant dense<0.000000e+00> : vector<64x256xf32>
    %86 = tpu.matmul %84, %82, %cst_46 {dimension_numbers = #tpu.dot_dimension_numbers<[1], [0], [0], [1], [0, 0, 1, 1], [], []>} : vector<64x64xf32>, vector<64x256xf32>, vector<64x256xf32> -> vector<64x256xf32>
    %87 = arith.subf %85, %86 : vector<64x256xf32>
    %cst_47 = arith.constant dense<0.000000e+00> : vector<64x256xf32>
    %88 = tpu.matmul %84, %80, %cst_47 {dimension_numbers = #tpu.dot_dimension_numbers<[1], [0], [0], [1], [0, 0, 1, 1], [], []>} : vector<64x64xf32>, vector<64x256xf32>, vector<64x256xf32> -> vector<64x256xf32>
    %cst_48 = arith.constant dense<0.000000e+00> : vector<64x256xf32>
    %89 = tpu.matmul %83, %82, %cst_48 {dimension_numbers = #tpu.dot_dimension_numbers<[1], [0], [0], [1], [0, 0, 1, 1], [], []>} : vector<64x64xf32>, vector<64x256xf32>, vector<64x256xf32> -> vector<64x256xf32>
    %90 = arith.addf %88, %89 : vector<64x256xf32>
    %91 = arith.mulf %87, %87 : vector<64x256xf32>
    %92 = arith.mulf %90, %90 : vector<64x256xf32>
    %93 = arith.addf %91, %92 : vector<64x256xf32>
    %94 = math.sqrt %93 : vector<64x256xf32>
    %c0_49 = arith.constant 0 : index
    %c0_50 = arith.constant 0 : index
    %95 = vector.load %arg14[%c0_49, %c0_50] : memref<64x256xf32, #tpu.memory_space<vmem>>, vector<64x256xf32>
    tpu.vector_store %arg14[%c0_49, %c0_50], %94 {strides = array<i32>} : memref<64x256xf32, #tpu.memory_space<vmem>>, vector<64x256xf32>,
    return
  }
  func.func @transform_0(%arg0: i32) -> (i32, i32) {
    %c0_i32 = arith.constant 0 : i32
    %c0_i32_0 = arith.constant 0 : i32
    return %c0_i32, %arg0 : i32, i32
  }
  func.func @transform_1(%arg0: i32) -> (i32, i32) {
    %c0_i32 = arith.constant 0 : i32
    %c0_i32_0 = arith.constant 0 : i32
    %c0_i32_1 = arith.constant 0 : i32
    return %c0_i32, %c0_i32_0 : i32, i32
  }
  func.func @transform_2(%arg0: i32) -> (i32, i32) {
    %c0_i32 = arith.constant 0 : i32
    %c0_i32_0 = arith.constant 0 : i32
    %c0_i32_1 = arith.constant 0 : i32
    return %c0_i32, %c0_i32_0 : i32, i32
  }
  func.func @transform_3(%arg0: i32) -> (i32, i32) {
    %c0_i32 = arith.constant 0 : i32
    %c0_i32_0 = arith.constant 0 : i32
    %c0_i32_1 = arith.constant 0 : i32
    return %c0_i32, %c0_i32_0 : i32, i32
  }
  func.func @transform_4(%arg0: i32) -> (i32, i32) {
    %c0_i32 = arith.constant 0 : i32
    %c0_i32_0 = arith.constant 0 : i32
    %c0_i32_1 = arith.constant 0 : i32
    return %c0_i32, %c0_i32_0 : i32, i32
  }
  func.func @transform_5(%arg0: i32) -> (i32, i32) {
    %c0_i32 = arith.constant 0 : i32
    %c0_i32_0 = arith.constant 0 : i32
    %c0_i32_1 = arith.constant 0 : i32
    return %c0_i32, %c0_i32_0 : i32, i32
  }
  func.func @transform_6(%arg0: i32) -> (i32, i32) {
    %c0_i32 = arith.constant 0 : i32
    %c0_i32_0 = arith.constant 0 : i32
    %c0_i32_1 = arith.constant 0 : i32
    return %c0_i32, %c0_i32_0 : i32, i32
  }
  func.func @transform_7(%arg0: i32) -> (i32, i32) {
    %c0_i32 = arith.constant 0 : i32
    %c0_i32_0 = arith.constant 0 : i32
    %c0_i32_1 = arith.constant 0 : i32
    return %c0_i32, %c0_i32_0 : i32, i32
  }
  func.func @transform_8(%arg0: i32) -> (i32, i32) {
    %c0_i32 = arith.constant 0 : i32
    %c0_i32_0 = arith.constant 0 : i32
    %c0_i32_1 = arith.constant 0 : i32
    return %c0_i32, %c0_i32_0 : i32, i32
  }
  func.func @transform_9(%arg0: i32) -> (i32, i32) {
    %c0_i32 = arith.constant 0 : i32
    %c0_i32_0 = arith.constant 0 : i32
    %c0_i32_1 = arith.constant 0 : i32
    return %c0_i32, %c0_i32_0 : i32, i32
  }
  func.func @transform_10(%arg0: i32) -> (i32, i32) {
    %c0_i32 = arith.constant 0 : i32
    %c0_i32_0 = arith.constant 0 : i32
    %c0_i32_1 = arith.constant 0 : i32
    return %c0_i32, %c0_i32_0 : i32, i32
  }
  func.func @transform_11(%arg0: i32) -> (i32, i32) {
    %c0_i32 = arith.constant 0 : i32
    %c0_i32_0 = arith.constant 0 : i32
    %c0_i32_1 = arith.constant 0 : i32
    return %c0_i32, %c0_i32_0 : i32, i32
  }
  func.func @transform_12(%arg0: i32) -> (i32, i32) {
    %c0_i32 = arith.constant 0 : i32
    %c0_i32_0 = arith.constant 0 : i32
    %c0_i32_1 = arith.constant 0 : i32
    return %c0_i32, %c0_i32_0 : i32, i32
  }
  func.func @transform_13(%arg0: i32) -> (i32, i32) {
    %c0_i32 = arith.constant 0 : i32
    %c0_i32_0 = arith.constant 0 : i32
    return %c0_i32, %arg0 : i32, i32
  }
}

</mosaic_0001>

<bundles_post_ra>
// kernel: _frequency_flow_jit.1
= control target key start
LH: loop header
LB: loop body
LE: loop exit
PB: predicated region body
PF: predicated region fallthrough
CT: control target
= control target key end

     0   :  { %s13400_s0 = inlined_call_operand.vmem [shape: f32[64,256], index: 0, kind: input, shape index: {}]   ;;  %s13401_s1 = inlined_call_operand.vmem [shape: f32[64,64], index: 1, kind: input, shape index: {}]   ;;  %s13402_s2 = inlined_call_operand.vmem [shape: f32[64,64], index: 2, kind: input, shape index: {}]   ;;  %s13403_s3 = inlined_call_operand.vmem [shape: f32[128,64], index: 3, kind: input, shape index: {}]   ;;  %s13404_s4 = inlined_call_operand.vmem [shape: f32[128,1], index: 4, kind: input, shape index: {}]   ;;  %s13405_s5 = inlined_call_operand.vmem [shape: f32[128,64], index: 5, kind: input, shape index: {}]   ;;  %s13406_s6 = inlined_call_operand.vmem [shape: f32[128,1], index: 6, kind: input, shape index: {}]   ;;  %s13407_s7 = inlined_call_operand.vmem [shape: f32[64,128], index: 7, kind: input, shape index: {}]   ;;  %s13408_s8 = inlined_call_operand.vmem [shape: f32[64,1], index: 8, kind: input, shape index: {}]   ;;  %s13409_s9 = inlined_call_operand.vmem [shape: f32[64,128], index: 9, kind: input, shape index: {}]   ;;  %s13410_s10 = inlined_call_operand.vmem [shape: f32[64,1], index: 10, kind: input, shape index: {}]   ;;  %s13411_s11 = inlined_call_operand.vmem [shape: f32[64,64], index: 11, kind: input, shape index: {}]   ;;  %s13412_s12 = inlined_call_operand.vmem [shape: f32[64,64], index: 12, kind: input, shape index: {}]   ;;  %s13413_s13 = inlined_call_operand.hbm [shape: f32[64,256], index: 13, kind: output, shape index: {}]  }
   0x1   :  { %v59_v0 = vld [vmem:[%s13400_s0 + $0x70] sm:$0xff]  ;;  %v60_v1 = vld [vmem:[%s13400_s0 + $0x78] sm:$0xff]  ;;  %v57_v2 = vld [vmem:[%s13400_s0 + $0x60] sm:$0xff] }
   0x2   :  { %216 = vmatpush.msra.mxu2 %v59_v0  ;;  %257 = vmatpush.msra.mxu3 %v60_v1  ;;  %v58_v3 = vld [vmem:[%s13400_s0 + $0x68] sm:$0xff]  ;;  %v55_v4 = vld [vmem:[%s13400_s0 + $0x50] sm:$0xff]  ;;  %v56_v5 = vld [vmem:[%s13400_s0 + $0x58] sm:$0xff] }
   0x3   :  { %102 = vmatpush.msra.mxu0 %v59_v0  ;;  %143 = vmatpush.msra.mxu1 %v60_v1  ;;  %v53_v6 = vld [vmem:[%s13400_s0 + $0x40] sm:$0xff]  ;;  %v54_v7 = vld [vmem:[%s13400_s0 + $0x48] sm:$0xff]  ;;  %v51_v8 = vld [vmem:[%s13400_s0 + $0x30] sm:$0xff] }
   0x4   :  { %217 = vmatpush.msra.mxu2 %v57_v2  ;;  %258 = vmatpush.msra.mxu3 %v58_v3  ;;  %v52_v9 = vld [vmem:[%s13400_s0 + $0x38] sm:$0xff] }
   0x5   :  { %103 = vmatpush.msra.mxu0 %v57_v2  ;;  %144 = vmatpush.msra.mxu1 %v58_v3 }
   0x6   :  { %218 = vmatpush.msra.mxu2 %v55_v4  ;;  %259 = vmatpush.msra.mxu3 %v56_v5 }
   0x7   :  { %104 = vmatpush.msra.mxu0 %v55_v4  ;;  %145 = vmatpush.msra.mxu1 %v56_v5 }
   0x8   :  { %219 = vmatpush.msra.mxu2 %v53_v6  ;;  %260 = vmatpush.msra.mxu3 %v54_v7 }
   0x9   :  { %18 = vsyncpa [#allocation3], 0  ;;  %v49_v10 = vld [vmem:[%s13400_s0 + $0x20] sm:$0xff]  ;;  %v50_v11 = vld [vmem:[%s13400_s0 + $0x28] sm:$0xff]  ;;  %105 = vmatpush.msra.mxu0 %v53_v6  ;;  %146 = vmatpush.msra.mxu1 %v54_v7  ;;  %vm13527_vm0 = vcmask 523264   ;;  %s7848_s17 = sshll.u32 %s13413_s13, 4  ;;  %s7849_s17 = int_to_ptr.hbm [resolvable:$true] %s7848_s17 }
   0xa   :  { %220 = vmatpush.msra.mxu2 %v51_v8  ;;  %261 = vmatpush.msra.mxu3 %v52_v9  ;;  %v47_v12 = vld [vmem:[%s13400_s0 + $0x10] sm:$0xff]  ;;  %v48_v13 = vld [vmem:[%s13400_s0 + $0x18] sm:$0xff]  ;;  %v45_v14 = vld [vmem:[%s13400_s0] sm:$0xff]  ;;  %s8262_s18 = smov 16  }
   0xb   :  { %106 = vmatpush.msra.mxu0 %v51_v8  ;;  %147 = vmatpush.msra.mxu1 %v52_v9  ;;  %v46_v15 = vld [vmem:[%s13400_s0 + $0x8] sm:$0xff]  ;;  %v176_v16 = vld [vmem:[%s13402_s2] sm:$0xff]  ;;  %v178_v20 = vld [vmem:[%s13402_s2 + $0x10] sm:$0xff] }
   0xc   :  { %221 = vmatpush.msra.mxu2 %v49_v10  ;;  %262 = vmatpush.msra.mxu3 %v50_v11  ;;  %v61_v17 = vld [vmem:[%s13401_s1] sm:$0xff]  ;;  %v177_v18 = vld [vmem:[%s13402_s2 + $0x8] sm:$0xff]  ;;  %v63_v21 = vld [vmem:[%s13401_s1 + $0x10] sm:$0xff] }
   0xd   :  { %107 = vmatpush.msra.mxu0 %v49_v10  ;;  %148 = vmatpush.msra.mxu1 %v50_v11  ;;  %v62_v19 = vld [vmem:[%s13401_s1 + $0x8] sm:$0xff]  ;;  %v179_v22 = vld [vmem:[%s13402_s2 + $0x18] sm:$0xff]  ;;  %v180_v24 = vld [vmem:[%s13402_s2 + $0x20] sm:$0xff] }
   0xe   :  { %222 = vmatpush.msra.mxu2 %v47_v12  ;;  %263 = vmatpush.msra.mxu3 %v48_v13  ;;  %v64_v23 = vld [vmem:[%s13401_s1 + $0x18] sm:$0xff]  ;;  %v65_v25 = vld [vmem:[%s13401_s1 + $0x20] sm:$0xff]  ;;  %v181_v26 = vld [vmem:[%s13402_s2 + $0x28] sm:$0xff] }
   0xf   :  { %108 = vmatpush.msra.mxu0 %v47_v12  ;;  %149 = vmatpush.msra.mxu1 %v48_v13  ;;  %v66_v27 = vld [vmem:[%s13401_s1 + $0x28] sm:$0xff]  ;;  %v182_v28 = vld [vmem:[%s13402_s2 + $0x30] sm:$0xff]  ;;  %v183_v30 = vld [vmem:[%s13402_s2 + $0x38] sm:$0xff] }
  0x10   :  { %223 = vmatpush.msra.mxu2 %v45_v14  ;;  %264 = vmatpush.msra.mxu3 %v46_v15  ;;  %v67_v29 = vld [vmem:[%s13401_s1 + $0x30] sm:$0xff]  ;;  %v68_v31 = vld [vmem:[%s13401_s1 + $0x38] sm:$0xff] }
  0x11   :  { %7876 = vmatmul.msk.f32.vlgmr.msra.gmra.mxu2 %vm13527_vm0, %v176_v16  ;;  %7884 = vmatmul.msk.f32.vlgmr.msra.gmra.mxu3 %vm13527_vm0, %v176_v16 }
  0x12   :  { %109 = vmatpush.msra.mxu0 %v45_v14  ;;  %150 = vmatpush.msra.mxu1 %v46_v15 }
  0x13   :  { %7860 = vmatmul.msk.f32.vlgmr.msra.gmra.mxu0 %vm13527_vm0, %v61_v17  ;;  %7868 = vmatmul.msk.f32.vlgmr.msra.gmra.mxu1 %vm13527_vm0, %v61_v17 }
  0x19   :  { %7877 = vmatmul.msk.f32.gmra.mxu2 %vm13527_vm0, %v177_v18  ;;  %7885 = vmatmul.msk.f32.gmra.mxu3 %vm13527_vm0, %v177_v18 }
  0x1b   :  { %7861 = vmatmul.msk.f32.gmra.mxu0 %vm13527_vm0, %v62_v19  ;;  %7869 = vmatmul.msk.f32.gmra.mxu1 %vm13527_vm0, %v62_v19 }
  0x21   :  { %7878 = vmatmul.msk.f32.gmra.mxu2 %vm13527_vm0, %v178_v20  ;;  %7886 = vmatmul.msk.f32.gmra.mxu3 %vm13527_vm0, %v178_v20 }
  0x23   :  { %7862 = vmatmul.msk.f32.gmra.mxu0 %vm13527_vm0, %v63_v21  ;;  %7870 = vmatmul.msk.f32.gmra.mxu1 %vm13527_vm0, %v63_v21 }
  0x29   :  { %7879 = vmatmul.msk.f32.gmra.mxu2 %vm13527_vm0, %v179_v22  ;;  %7887 = vmatmul.msk.f32.gmra.mxu3 %vm13527_vm0, %v179_v22 }
  0x2b   :  { %7863 = vmatmul.msk.f32.gmra.mxu0 %vm13527_vm0, %v64_v23  ;;  %7871 = vmatmul.msk.f32.gmra.mxu1 %vm13527_vm0, %v64_v23 }
  0x31   :  { %7880 = vmatmul.msk.f32.gmra.mxu2 %vm13527_vm0, %v180_v24  ;;  %7888 = vmatmul.msk.f32.gmra.mxu3 %vm13527_vm0, %v180_v24 }
  0x33   :  { %7864 = vmatmul.msk.f32.gmra.mxu0 %vm13527_vm0, %v65_v25  ;;  %7872 = vmatmul.msk.f32.gmra.mxu1 %vm13527_vm0, %v65_v25 }
  0x39   :  { %7881 = vmatmul.msk.f32.gmra.mxu2 %vm13527_vm0, %v181_v26  ;;  %7889 = vmatmul.msk.f32.gmra.mxu3 %vm13527_vm0, %v181_v26 }
  0x3b   :  { %7865 = vmatmul.msk.f32.gmra.mxu0 %vm13527_vm0, %v66_v27  ;;  %7873 = vmatmul.msk.f32.gmra.mxu1 %vm13527_vm0, %v66_v27 }
  0x41   :  { %7882 = vmatmul.msk.f32.gmra.mxu2 %vm13527_vm0, %v182_v28  ;;  %7890 = vmatmul.msk.f32.gmra.mxu3 %vm13527_vm0, %v182_v28 }
  0x43   :  { %7866 = vmatmul.msk.f32.gmra.mxu0 %vm13527_vm0, %v67_v29  ;;  %7874 = vmatmul.msk.f32.gmra.mxu1 %vm13527_vm0, %v67_v29 }
  0x49   :  { %7883 = vmatmul.msk.f32.gmra.mxu2 %vm13527_vm0, %v183_v30  ;;  %7891 = vmatmul.msk.f32.gmra.mxu3 %vm13527_vm0, %v183_v30 }
  0x4b   :  { %7867 = vmatmul.msk.f32.gmra.mxu0 %vm13527_vm0, %v68_v31  ;;  %7875 = vmatmul.msk.f32.gmra.mxu1 %vm13527_vm0, %v68_v31 }
  0x90   :  { %v8461_v32 = vpop.f32.mrf.mxu0  ;;  %v8463_v33 = vpop.f32.mrf.mxu1 }
  0x91   :  { %13638 = vst [vmem:[#allocation5_spill] sm:$0xff] %v8461_v32  ;;  %v8494_v48 = vand.u32 2147483647, %v8461_v32  ;;  %v1042_v50 = vmul.f32 %v8461_v32, %v8461_v32  ;;  %v8502_v51 = vand.u32 2147483647, %v8463_v33  ;;  %v1043_v54 = vmul.f32 %v8463_v33, %v8463_v33 }
  0x92   :  { %13639 = vst [vmem:[#allocation6_spill] sm:$0xff] %v8463_v33 }
  0x93   :  { %13654 = vst [vmem:[#allocation21_spill] sm:$0xff] %v8494_v48 }
  0x94   :  { %v8465_v34 = vpop.f32.mrf.mxu2  ;;  %v8467_v35 = vpop.f32.mrf.mxu3  ;;  %13656 = vst [vmem:[#allocation23_spill] sm:$0xff] %v8502_v51 }
  0x95   :  { %13640 = vst [vmem:[#allocation7_spill] sm:$0xff] %v8465_v34  ;;  %v8497_v49 = vand.u32 2147483647, %v8465_v34  ;;  %v1058_v55 = vmul.f32 %v8465_v34, %v8465_v34  ;;  %v8515_v56 = vand.u32 2147483647, %v8467_v35  ;;  %v1059_v57 = vmul.f32 %v8467_v35, %v8467_v35 }
  0x96   :  { %13641 = vst [vmem:[#allocation8_spill] sm:$0xff] %v8467_v35 }
  0x97   :  { %13655 = vst [vmem:[#allocation22_spill] sm:$0xff] %v8497_v49  ;;  %v8525_v60 = vmax.f32 %v8494_v48, %v8497_v49  ;;  %v8529_v61 = vmin.f32 %v8494_v48, %v8497_v49  ;;  %v8561_v10 = vadd.f32 %v1058_v55, %v1042_v50  ;;  %v8565_v11 = vmax.f32 %v8502_v51, %v8515_v56 }
  0x98   :  { %v8469_v36 = vpop.f32.mrf.mxu0  ;;  %v8471_v37 = vpop.f32.mrf.mxu1  ;;  %13659 = vst [vmem:[#allocation26_spill] sm:$0xff] %v8515_v56  ;;  %v8569_v12 = vmin.f32 %v8502_v51, %v8515_v56  ;;  %v8575_v14 = vadd.f32 %v1059_v57, %v1043_v54 }
  0x99   :  { %13642 = vst [vmem:[#allocation9_spill] sm:$0xff] %v8469_v36  ;;  %v8505_v52 = vand.u32 2147483647, %v8469_v36  ;;  %v1044_v62 = vmul.f32 %v8469_v36, %v8469_v36  ;;  %v8534_v63 = vand.u32 2147483647, %v8471_v37  ;;  %v1045_v0 = vmul.f32 %v8471_v37, %v8471_v37 }
  0x9a   :  { %13643 = vst [vmem:[#allocation10_spill] sm:$0xff] %v8471_v37  ;;  %v8573_v13 = vadd.f32 %v8529_v61, %v8525_v60 }
  0x9b   :  { %13657 = vst [vmem:[#allocation24_spill] sm:$0xff] %v8505_v52 }
  0x9c   :  { %v8473_v38 = vpop.f32.mrf.mxu2  ;;  %v8475_v39 = vpop.f32.mrf.mxu3  ;;  %13662 = vst [vmem:[#allocation29_spill] sm:$0xff] %v8525_v60 }
  0x9d   :  { %13644 = vst [vmem:[#allocation11_spill] sm:$0xff] %v8473_v38  ;;  %v8508_v53 = vand.u32 2147483647, %v8473_v38  ;;  %v1060_v1 = vmul.f32 %v8473_v38, %v8473_v38  ;;  %v8541_v2 = vand.u32 2147483647, %v8475_v39  ;;  %v1061_v3 = vmul.f32 %v8475_v39, %v8475_v39 }
  0x9e   :  { %13645 = vst [vmem:[#allocation12_spill] sm:$0xff] %v8475_v39 }
  0x9f   :  { %13658 = vst [vmem:[#allocation25_spill] sm:$0xff] %v8508_v53  ;;  %v8547_v4 = vmax.f32 %v8505_v52, %v8508_v53  ;;  %v8551_v5 = vmin.f32 %v8505_v52, %v8508_v53  ;;  %v8577_v15 = vadd.f32 %v1060_v1, %v1044_v62  ;;  %v8581_v16 = vmax.f32 %v8534_v63, %v8541_v2 }
  0xa0   :  { %v8477_v40 = vpop.f32.mrf.mxu0  ;;  %v8479_v41 = vpop.f32.mrf.mxu1  ;;  %13663 = vst [vmem:[#allocation30_spill] sm:$0xff] %v8529_v61  ;;  %v8587_v18 = vmin.f32 %v8534_v63, %v8541_v2  ;;  %v8589_v19 = vadd.f32 %v1061_v3, %v1045_v0 }
  0xa1   :  { %13646 = vst [vmem:[#allocation13_spill] sm:$0xff] %v8477_v40  ;;  %v1046_v6 = vmul.f32 %v8477_v40, %v8477_v40  ;;  %v8594_v21 = vand.u32 2147483647, %v8477_v40  ;;  %v8609_v27 = vadd.f32 %v8551_v5, %v8547_v4  ;;  %v8612_v28 = vand.u32 2147483647, %v8479_v41 }
  0xa2   :  { %13647 = vst [vmem:[#allocation14_spill] sm:$0xff] %v8479_v41  ;;  %v1047_v31 = vmul.f32 %v8479_v41, %v8479_v41 }
  0xa3   :  { %13664 = vst [vmem:[#allocation31_spill] sm:$0xff] %v8534_v63 }
  0xa4   :  { %v8481_v42 = vpop.f32.mrf.mxu2  ;;  %v8483_v43 = vpop.f32.mrf.mxu3  ;;  %13665 = vst [vmem:[#allocation32_spill] sm:$0xff] %v8541_v2 }
  0xa5   :  { %13648 = vst [vmem:[#allocation15_spill] sm:$0xff] %v8481_v42  ;;  %v1062_v7 = vmul.f32 %v8481_v42, %v8481_v42  ;;  %v8597_v22 = vand.u32 2147483647, %v8481_v42  ;;  %v8621_v50 = vand.u32 2147483647, %v8483_v43  ;;  %v1063_v57 = vmul.f32 %v8483_v43, %v8483_v43 }
  0xa6   :  { %13649 = vst [vmem:[#allocation16_spill] sm:$0xff] %v8483_v43 }
  0xa7   :  { %13666 = vst [vmem:[#allocation33_spill] sm:$0xff] %v8547_v4  ;;  %v8591_v20 = vadd.f32 %v1062_v7, %v1046_v6  ;;  %v8636_v1 = vmax.f32 %v8594_v21, %v8597_v22  ;;  %v8640_v3 = vmin.f32 %v8594_v21, %v8597_v22  ;;  %v8670_v32 = vadd.f32 %v1063_v57, %v1047_v31 }
  0xa8   :  { %v8485_v44 = vpop.f32.mrf.mxu0  ;;  %v8487_v45 = vpop.f32.mrf.mxu1  ;;  %13667 = vst [vmem:[#allocation34_spill] sm:$0xff] %v8551_v5 }
  0xa9   :  { %13650 = vst [vmem:[#allocation17_spill] sm:$0xff] %v8485_v44  ;;  %v1048_v23 = vmul.f32 %v8485_v44, %v8485_v44  ;;  %v1049_v29 = vmul.f32 %v8487_v45, %v8487_v45  ;;  %8130 = vrsqrt.f32 %v8591_v20  ;;  %v8673_v49 = vand.u32 2147483647, %v8485_v44 }
  0xaa   :  { %13651 = vst [vmem:[#allocation18_spill] sm:$0xff] %v8487_v45  ;;  %v8697_v57 = vadd.f32 %v8640_v3, %v8636_v1  ;;  %vm1145_vm14 = vcmp.eq.f32.partialorder %v8591_v20, inf  ;;  %vm1147_vm15 = vcmp.eq.f32.partialorder %v8591_v20, 0.0 }
  0xab   :  { %13670 = vst [vmem:[#allocation37_spill] sm:$0xff] %v8565_v11 }
  0xac   :  { %v8489_v46 = vpop.f32.mrf.mxu2  ;;  %v8491_v47 = vpop.f32.mrf.mxu3  ;;  %13671 = vst [vmem:[#allocation38_spill] sm:$0xff] %v8569_v12 }
  0xad   :  { %13652 = vst [vmem:[#allocation19_spill] sm:$0xff] %v8489_v46  ;;  %v1064_v24 = vmul.f32 %v8489_v46, %v8489_v46  ;;  %v1065_v30 = vmul.f32 %v8491_v47, %v8491_v47  ;;  %v8676_v48 = vand.u32 2147483647, %v8489_v46 }
  0xae   :  { %13653 = vst [vmem:[#allocation20_spill] sm:$0xff] %v8491_v47 }
  0xaf   :  { %13672 = vst [vmem:[#allocation39_spill] sm:$0xff] %v8573_v13  ;;  %v8642_v6 = vadd.f32 %v1064_v24, %v1048_v23  ;;  %v8650_v33 = vadd.f32 %v1065_v30, %v1049_v29  ;;  %v8662_v24 = vadd.f32 %v8587_v18, %v8581_v16  ;;  %v8666_v29 = vmax.f32 %v8612_v28, %v8621_v50 }
  0xb0   :  { %v8519_v58 = vpop.f32.mrf.mxu0  ;;  %v8521_v59 = vpop.f32.mrf.mxu1  ;;  %13673 = vst [vmem:[#allocation40_spill] sm:$0xff] %v8581_v16  ;;  %v8717_v38 = vmax.f32 %v8673_v49, %v8676_v48 }
  0xb1   :  { %13660 = vst [vmem:[#allocation27_spill] sm:$0xff] %v8519_v58  ;;  %v1050_v54 = vmul.f32 %v8519_v58, %v8519_v58  ;;  %v1051_v62 = vmul.f32 %v8521_v59, %v8521_v59  ;;  %v8681_v23 = vand.u32 2147483647, %v8519_v58  ;;  %8132 = vrsqrt.f32 %v8642_v6 }
  0xb2   :  { %13661 = vst [vmem:[#allocation28_spill] sm:$0xff] %v8521_v59  ;;  %8134 = vrsqrt.f32 %v8650_v33  ;;  %vm1169_vm0 = vcmp.eq.f32.partialorder %v8642_v6, inf  ;;  %vm1181_vm13 = vcmp.eq.f32.partialorder %v8650_v33, inf }
  0xb3   :  { %13674 = vst [vmem:[#allocation41_spill] sm:$0xff] %v8587_v18 }
  0xb4   :  { %v8557_v8 = vpop.f32.mrf.mxu2  ;;  %v8559_v9 = vpop.f32.mrf.mxu3  ;;  %13675 = vst [vmem:[#allocation42_spill] sm:$0xff] %v8594_v21 }
  0xb5   :  { %13668 = vst [vmem:[#allocation35_spill] sm:$0xff] %v8557_v8  ;;  %v1066_v55 = vmul.f32 %v8557_v8, %v8557_v8  ;;  %v1067_v0 = vmul.f32 %v8559_v9, %v8559_v9  ;;  %v8684_v37 = vand.u32 2147483647, %v8557_v8  ;;  %v8712_v63 = vand.u32 2147483647, %v8559_v9 }
  0xb6   :  { %13669 = vst [vmem:[#allocation36_spill] sm:$0xff] %v8559_v9 }
  0xb7   :  { %13676 = vst [vmem:[#allocation43_spill] sm:$0xff] %v8597_v22  ;;  %v8668_v30 = vadd.f32 %v1066_v55, %v1050_v54  ;;  %v8678_v39 = vadd.f32 %v1067_v0, %v1051_v62  ;;  %v8693_v55 = vpop.eup %8130  ;;  %v8700_v62 = vand.u32 2147483647, %v8487_v45  ;;  %v8728_v36 = vmax.f32 %v8681_v23, %v8684_v37 }
  0xb8   :  { %v8603_v25 = vpop.f32.mrf.mxu0  ;;  %v8605_v26 = vpop.f32.mrf.mxu1  ;;  %13679 = vst [vmem:[#allocation46_spill] sm:$0xff] %v8609_v27  ;;  %v1139_v41 = vmul.f32 %v8693_v55, %v8591_v20  ;;  %v8741_v12 = vmin.f32 %v8681_v23, %v8684_v37 }
  0xb9   :  { %13677 = vst [vmem:[#allocation44_spill] sm:$0xff] %v8603_v25  ;;  %v1052_v7 = vmul.f32 %v8603_v25, %v8603_v25  ;;  %v1053_v56 = vmul.f32 %v8605_v26, %v8605_v26  ;;  %8136 = vrsqrt.f32 %v8668_v30  ;;  %v8748_v13 = vpop.eup %8132  ;;  %v8759_v60 = vand.u32 2147483647, %v8603_v25 }
  0xba   :  { %13678 = vst [vmem:[#allocation45_spill] sm:$0xff] %v8605_v26  ;;  %8138 = vrsqrt.f32 %v8678_v39  ;;  %v8764_v22 = vpop.eup %8134  ;;  %vm1193_vm1 = vcmp.eq.f32.partialorder %v8668_v30, inf  ;;  %vm1195_vm11 = vcmp.eq.f32.partialorder %v8668_v30, 0.0  ;;  %vm1205_vm12 = vcmp.eq.f32.partialorder %v8678_v39, inf }
  0xbb   :  { %13680 = vst [vmem:[#allocation47_spill] sm:$0xff] %v8612_v28 }
  0xbc   :  { %13681 = vst [vmem:[#allocation48_spill] sm:$0xff] %v8621_v50  ;;  %v8646_v17 = vpop.f32.mrf.mxu2  ;;  %v8648_v35 = vpop.f32.mrf.mxu3 }
  0xbd   :  { %13682 = vst [vmem:[#allocation49_spill] sm:$0xff] %v8636_v1  ;;  %v1068_v51 = vmul.f32 %v8646_v17, %v8646_v17  ;;  %v1069_v34 = vmul.f32 %v8648_v35, %v8648_v35 }
  0xbe   :  { %13683 = vst [vmem:[#allocation50_spill] sm:$0xff] %v8640_v3 }
  0xbf   :  { %13684 = vst [vmem:[#allocation51_spill] sm:$0xff] %v8646_v17  ;;  %v8686_v2 = vadd.f32 %v1068_v51, %v1052_v7  ;;  %v8702_v0 = vadd.f32 %v1069_v34, %v1053_v56  ;;  %v8706_v51 = vand.u32 2147483647, %v8491_v47  ;;  %v8709_v7 = vand.u32 2147483647, %v8521_v59  ;;  %v8777_v18 = vpop.eup %8136 }
  0xc0   :  { %13685 = vst [vmem:[#allocation52_spill] sm:$0xff] %v8648_v35  ;;  %v8688_v54 = vpop.f32.mrf.mxu0  ;;  %v8690_v31 = vpop.f32.mrf.mxu1  ;;  %v8721_v34 = vmin.f32 %v8673_v49, %v8676_v48  ;;  %v8762_v47 = vand.u32 2147483647, %v8646_v17  ;;  %v1187_v4 = vmul.f32 %v8777_v18, %v8668_v30 }
  0xc1   :  { %13686 = vst [vmem:[#allocation53_spill] sm:$0xff] %v8662_v24  ;;  %v1054_v56 = vmul.f32 %v8688_v54, %v8688_v54  ;;  %v1055_v53 = vmul.f32 %v8690_v31, %v8690_v31  ;;  %8140 = vrsqrt.f32 %v8686_v2  ;;  %v8752_v61 = vmax.f32 %v8709_v7, %v8712_v63  ;;  %v8786_v9 = vpop.eup %8138 }
  0xc2   :  { %13687 = vst [vmem:[#allocation54_spill] sm:$0xff] %v8666_v29  ;;  %8142 = vrsqrt.f32 %v8702_v0  ;;  %v8756_v40 = vmin.f32 %v8709_v7, %v8712_v63  ;;  %v8768_v21 = vmax.f32 %v8700_v62, %v8706_v51  ;;  %v8772_v45 = vmin.f32 %v8700_v62, %v8706_v51 }
  0xc3   :  { %13688 = vst [vmem:[#allocation55_spill] sm:$0xff] %v8673_v49  ;;  %v1140_v49 = vmul.f32 %v8693_v55, %v1139_v41  ;;  %8144 = vrsqrt.f32 %v8670_v32  ;;  %v8820_v59 = vmin.f32 %v8759_v60, %v8762_v47  ;;  %v1199_v3 = vmul.f32 %v8786_v9, %v8678_v39 }
  0xc4   :  { %13689 = vst [vmem:[#allocation56_spill] sm:$0xff] %v8676_v48  ;;  %v8732_v52 = vpop.f32.mrf.mxu2  ;;  %v8734_v43 = vpop.f32.mrf.mxu3  ;;  %v8806_v46 = vadd.f32 %v8756_v40, %v8752_v61  ;;  %v1188_v17 = vmul.f32 %v8777_v18, %v1187_v4  ;;  %vm1217_vm5 = vcmp.eq.f32.partialorder %v8686_v2, inf  ;;  %vm1229_vm6 = vcmp.eq.f32.partialorder %v8702_v0, inf }
  0xc5   :  { %13690 = vst [vmem:[#allocation57_spill] sm:$0xff] %v8681_v23  ;;  %v1070_v11 = vmul.f32 %v8732_v52, %v8732_v52  ;;  %v1071_v42 = vmul.f32 %v8734_v43, %v8734_v43  ;;  %v8835_v58 = vmul.f32 0.5, %v1140_v49 }
  0xc6   :  { %13691 = vst [vmem:[#allocation58_spill] sm:$0xff] %v8684_v37 }
  0xc7   :  { %13692 = vst [vmem:[#allocation59_spill] sm:$0xff] %v8688_v54  ;;  %v8774_v24 = vadd.f32 %v1070_v11, %v1054_v56  ;;  %v8779_v16 = vadd.f32 %v1071_v42, %v1055_v53  ;;  %v8792_v56 = vadd.f32 %v8741_v12, %v8728_v36  ;;  %v8795_v42 = vand.u32 2147483647, %v8605_v26  ;;  %v8802_v41 = vpop.eup %8140 }
  0xc8   :  { %13693 = vst [vmem:[#allocation60_spill] sm:$0xff] %v8690_v31  ;;  %v8781_v44 = vpop.f32.mrf.mxu0  ;;  %v8798_v53 = vand.u32 2147483647, %v8648_v35  ;;  %v8800_v48 = vpop.f32.mrf.mxu1  ;;  %v8810_v11 = vmax.f32 %v8759_v60, %v8762_v47  ;;  %v1211_v49 = vmul.f32 %v8802_v41, %v8686_v2 }
  0xc9   :  { %13694 = vst [vmem:[#allocation61_spill] sm:$0xff] %v8697_v57  ;;  %v8816_v27 = vpop.eup %8142  ;;  %v1056_v5 = vmul.f32 %v8781_v44, %v8781_v44  ;;  %8146 = vrsqrt.f32 %v8774_v24  ;;  %vm1241_vm3 = vcmp.eq.f32.partialorder %v8774_v24, inf  ;;  %vm1253_vm7 = vcmp.eq.f32.partialorder %v8779_v16, inf }
  0xca   :  { %13695 = vst [vmem:[#allocation62_spill] sm:$0xff] %v8700_v62  ;;  %v1175_v62 = vmul.f32 %v8764_v22, %v8650_v33  ;;  %8148 = vrsqrt.f32 %v8779_v16  ;;  %v8839_v57 = vmax.f32 %v8795_v42, %v8798_v53  ;;  %v8847_v37 = vpop.eup %8144  ;;  %v8851_v29 = vmin.f32 %v8795_v42, %v8798_v53 }
  0xcb   :  { %13696 = vst [vmem:[#allocation63_spill] sm:$0xff] %v8706_v51  ;;  %v1163_v51 = vmul.f32 %v8748_v13, %v8642_v6  ;;  %v1223_v23 = vmul.f32 %v8816_v27, %v8702_v0  ;;  %vm1243_vm8 = vcmp.eq.f32.partialorder %v8774_v24, 0.0 }
  0xcc   :  { %13697 = vst [vmem:[#allocation64_spill] sm:$0xff] %v8709_v7  ;;  %v8829_v7 = vpop.f32.mrf.mxu2  ;;  %v8831_v8 = vpop.f32.mrf.mxu3  ;;  %v1176_v25 = vmul.f32 %v8764_v22, %v1175_v62 }
  0xcd   :  { %13698 = vst [vmem:[#allocation65_spill] sm:$0xff] %v8712_v63  ;;  %v1057_v63 = vmul.f32 %v8800_v48, %v8800_v48  ;;  %v1072_v28 = vmul.f32 %v8829_v7, %v8829_v7  ;;  %v1073_v50 = vmul.f32 %v8831_v8, %v8831_v8  ;;  %v1164_v1 = vmul.f32 %v8748_v13, %v1163_v51 }
  0xce   :  { %13699 = vst [vmem:[#allocation66_spill] sm:$0xff] %v8717_v38  ;;  %v1224_v4 = vmul.f32 %v8816_v27, %v1223_v23  ;;  %v8897_v38 = vmul.f32 0.5, %v1176_v25 }
  0xcf   :  { %13700 = vst [vmem:[#allocation67_spill] sm:$0xff] %v8721_v34  ;;  %v8860_v26 = vadd.f32 %v1072_v28, %v1056_v5  ;;  %v8874_v51 = vadd.f32 %v1073_v50, %v1057_v63  ;;  %v1212_v5 = vmul.f32 %v8802_v41, %v1211_v49  ;;  %v1200_v28 = vmul.f32 %v8786_v9, %v1199_v3 }
  0xd0   :  { %13701 = vst [vmem:[#allocation68_spill] sm:$0xff] %v8732_v52  ;;  %v8887_v63 = vand.u32 2147483647, %v8690_v31  ;;  %v8890_v50 = vand.u32 2147483647, %v8734_v43  ;;  %v1189_v49 = vmul.f32 0.5, %v1188_v17 }
  0xd1   :  { %13702 = vst [vmem:[#allocation69_spill] sm:$0xff] %v8734_v43  ;;  %8150 = vrsqrt.f32 %v8860_v26  ;;  %v1165_v34 = vmul.f32 0.5, %v1164_v1  ;;  %v1213_v43 = vmul.f32 0.5, %v1212_v5  ;;  %v1201_v31 = vmul.f32 0.5, %v1200_v28 }
  0xd2   :  { %13703 = vst [vmem:[#allocation70_spill] sm:$0xff] %v8741_v12  ;;  %8152 = vrsqrt.f32 %v8874_v51  ;;  %v8909_v17 = vmax.f32 %v8887_v63, %v8890_v50  ;;  %v8913_v25 = vmin.f32 %v8887_v63, %v8890_v50  ;;  %v8919_v5 = vand.u32 2147483647, %v8829_v7 }
  0xd3   :  { %13704 = vst [vmem:[#allocation71_spill] sm:$0xff] %v8752_v61  ;;  %v8916_v61 = vand.u32 2147483647, %v8781_v44  ;;  %vm1265_vm2 = vcmp.eq.f32.partialorder %v8860_v26, inf  ;;  %vm1267_vm4 = vcmp.eq.f32.partialorder %v8860_v26, 0.0  ;;  %vm1277_vm9 = vcmp.eq.f32.partialorder %v8874_v51, inf }
  0xd4   :  { %13705 = vst [vmem:[#allocation72_spill] sm:$0xff] %v8756_v40  ;;  %v1225_v40 = vmul.f32 0.5, %v1224_v4  ;;  %v1190_v4 = vsub.f32 1.5, %v1189_v49  ;;  %vm1279_vm10 = vcmp.eq.f32.partialorder %v8874_v51, 0.0  ;;  %8154 = vrsqrt.f32 %v8577_v15 }
  0xd5   :  { %13706 = vst [vmem:[#allocation73_spill] sm:$0xff] %v8759_v60  ;;  %v8928_v49 = vmax.f32 %v8916_v61, %v8919_v5  ;;  %8156 = vrsqrt.f32 %v8589_v19 }
  0xd6   :  { %13707 = vst [vmem:[#allocation74_spill] sm:$0xff] %v8762_v47  ;;  %v8884_v47 = vadd.f32 %v8851_v29, %v8839_v57  ;;  %8158 = vrsqrt.f32 %v8561_v10 }
  0xd7   :  { %13708 = vst [vmem:[#allocation75_spill] sm:$0xff] %v8768_v21  ;;  %v8147_v21 = vpop.eup %8146  ;;  %8160 = vrsqrt.f32 %v8575_v14 }
  0xd8   :  { %13709 = vst [vmem:[#allocation76_spill] sm:$0xff] %v8772_v45  ;;  %v8872_v45 = vand.u32 2147483647, %v8732_v52  ;;  %v8149_v62 = vpop.eup %8148  ;;  %v1235_v60 = vmul.f32 %v8147_v21, %v8774_v24 }
  0xd9   :  { %13710 = vst [vmem:[#allocation77_spill] sm:$0xff] %v8781_v44  ;;  %v1247_v35 = vmul.f32 %v8149_v62, %v8779_v16  ;;  %v8151_v1 = vpop.eup %8150 }
  0xda   :  { %13711 = vst [vmem:[#allocation78_spill] sm:$0xff] %v8792_v56  ;;  %v1236_v3 = vmul.f32 %v8147_v21, %v1235_v60  ;;  %v1259_v28 = vmul.f32 %v8151_v1, %v8860_v26  ;;  %v8153_v60 = vpop.eup %8152  ;;  %v1214_v56 = vsub.f32 1.5, %v1213_v43  ;;  %v1166_v43 = vsub.f32 1.5, %v1165_v34 }
  0xdb   :  { %13712 = vst [vmem:[#allocation79_spill] sm:$0xff] %v8795_v42  ;;  %v8869_v42 = vand.u32 2147483647, %v8688_v54  ;;  %v1248_v52 = vmul.f32 %v8149_v62, %v1247_v35  ;;  %v1256_v35 = vand.u32 2147483648, %v8779_v16  ;;  %v1271_v44 = vmul.f32 %v8153_v60, %v8874_v51 }
  0xdc   :  { %13713 = vst [vmem:[#allocation80_spill] sm:$0xff] %v8798_v53  ;;  %v8866_v53 = vadd.f32 %v8820_v59, %v8810_v11  ;;  %v1237_v54 = vmul.f32 0.5, %v1236_v3 }
  0xdd   :  { %13714 = vst [vmem:[#allocation81_spill] sm:$0xff] %v8806_v46  ;;  %v8901_v46 = vmax.f32 %v8869_v42, %v8872_v45  ;;  %v8905_v23 = vmin.f32 %v8869_v42, %v8872_v45 }
  0xde   :  { %13715 = vst [vmem:[#allocation82_spill] sm:$0xff] %v8851_v29  ;;  %v1238_v12 = vsub.f32 1.5, %v1237_v54  ;;  %v1215_v54 = vmul.f32 %v8802_v41, %v1214_v56 }
  0xdf   :  { %13716 = vst [vmem:[#allocation83_spill] sm:$0xff] %v8869_v42  ;;  %v1249_v42 = vmul.f32 0.5, %v1248_v52  ;;  %v1191_v52 = vmul.f32 %v8777_v18, %v1190_v4  ;;  %v1178_v18 = vsub.f32 1.5, %v8897_v38 }
  0xe0   :  { %13717 = vst [vmem:[#allocation84_spill] sm:$0xff] %v8872_v45  ;;  %v1244_v45 = vand.u32 2147483648, %v8774_v24  ;;  %v1239_v3 = vmul.f32 %v8147_v21, %v1238_v12  ;;  %v1280_v21 = vand.u32 2147483648, %v8874_v51 }
  0xe1   :  { %13718 = vst [vmem:[#allocation85_spill] sm:$0xff] %v8884_v47  ;;  %v1226_v47 = vsub.f32 1.5, %v1225_v40  ;;  %v1250_v29 = vsub.f32 1.5, %v1249_v42  ;;  %v1192_v12 = vmul.f32 %v1191_v52, %v8668_v30  ;;  %v1142_v52 = vsub.f32 1.5, %v8835_v58 }
  0xe2   :  { %13719 = vst [vmem:[#allocation86_spill] sm:$0xff] %v8887_v63  ;;  %v1260_v63 = vmul.f32 %v8151_v1, %v1259_v28 }
  0xe3   :  { %13720 = vst [vmem:[#allocation87_spill] sm:$0xff] %v8890_v50  ;;  %v1202_v50 = vsub.f32 1.5, %v1201_v31  ;;  %v1272_v31 = vmul.f32 %v8153_v60, %v1271_v44  ;;  %v1227_v42 = vmul.f32 %v8816_v27, %v1226_v47  ;;  %v1251_v44 = vmul.f32 %v8149_v62, %v1250_v29 }
  0xe4   :  { %v1261_v40 = vmul.f32 0.5, %v1260_v63  ;;  %v1268_v63 = vand.u32 2147483648, %v8860_v26  ;;  %v1167_v47 = vmul.f32 %v8748_v13, %v1166_v43  ;;  %v1240_v27 = vmul.f32 %v1239_v3, %v8774_v24 }
  0xe5   :  { %v1203_v28 = vmul.f32 %v8786_v9, %v1202_v50  ;;  %v1273_v4 = vmul.f32 0.5, %v1272_v31  ;;  %v1216_v29 = vmul.f32 %v1215_v54, %v8686_v2  ;;  %v1228_v56 = vmul.f32 %v1227_v42, %v8702_v0 }
  0xe6   :  { %v1262_v34 = vsub.f32 1.5, %v1261_v40  ;;  %v1179_v13 = vmul.f32 %v8764_v22, %v1178_v18  ;;  %v1194_v43 = vsel %vm1193_vm1, %v8668_v30, %v1192_v12  ;;  %v1168_v40 = vmul.f32 %v1167_v47, %v8642_v6 }
  0xe7   :  { %v1274_v9 = vsub.f32 1.5, %v1273_v4  ;;  %v1204_v41 = vmul.f32 %v1203_v28, %v8678_v39  ;;  %v1151_v22 = vmul.f32 %v8847_v37, %v8670_v32  ;;  %v1242_v31 = vsel %vm1241_vm3, %v8774_v24, %v1240_v27 }
  0xe8   :  { %v1263_v38 = vmul.f32 %v8151_v1, %v1262_v34  ;;  %v1252_v1 = vmul.f32 %v1251_v44, %v8779_v16  ;;  %vm1171_vm1 = vcmp.eq.f32.partialorder %v8642_v6, 0.0  ;;  %v1143_v3 = vmul.f32 %v8693_v55, %v1142_v52 }
  0xe9   :  { %v1275_v50 = vmul.f32 %v8153_v60, %v1274_v9  ;;  %v1218_v42 = vsel %vm1217_vm5, %v8686_v2, %v1216_v29  ;;  %v1230_v28 = vsel %vm1229_vm6, %v8702_v0, %v1228_v56  ;;  %v1152_v18 = vmul.f32 %v8847_v37, %v1151_v22 }
  0xea   :  { %v1264_v62 = vmul.f32 %v1263_v38, %v8860_v26  ;;  %v1254_v55 = vsel %vm1253_vm7, %v8779_v16, %v1252_v1  ;;  %v1180_v34 = vmul.f32 %v1179_v13, %v8650_v33  ;;  %v1245_v4 = vsel %vm1243_vm8, %v1244_v45, %v1242_v31  ;;  %v8155_v45 = vpop.eup %8154 }
  0xeb   :  { %v1276_v58 = vmul.f32 %v1275_v50, %v8874_v51  ;;  %v1144_v44 = vmul.f32 %v1143_v3, %v8591_v20  ;;  %v1153_v12 = vmul.f32 0.5, %v1152_v18  ;;  %v9009_v47 = vmin.f32 %v8916_v61, %v8919_v5 }
  0xec   :  { %v1266_v60 = vsel %vm1265_vm2, %v8860_v26, %v1264_v62  ;;  %vm1183_vm2 = vcmp.eq.f32.partialorder %v8650_v33, 0.0  ;;  %v13721_v38 = vand.u32 2147483648, %v8668_v30  ;;  %v1206_v9 = vsel %vm1205_vm12, %v8678_v39, %v1204_v41 }
  0xed   :  { %v1269_v54 = vsel %vm1267_vm4, %v1268_v63, %v1266_v60  ;;  %v1278_v26 = vsel %vm1277_vm9, %v8874_v51, %v1276_v58  ;;  %vm13722_vm3 = vcmp.eq.f32.partialorder %v8779_v16, 0.0  ;;  %vm13724_vm4 = vcmp.eq.f32.partialorder %v8686_v2, 0.0 }
  0xee   :  { %1772 = vmatpush.msrb.mxu2 %v1269_v54  ;;  %v1281_v63 = vsel %vm1279_vm10, %v1280_v21, %v1278_v26  ;;  %v1197_v51 = vsel %vm1195_vm11, %v13721_v38, %v1194_v43  ;;  %v1257_v24 = vsel %vm13722_vm3, %v1256_v35, %v1254_v55  ;;  %v13723_v21 = vand.u32 2147483648, %v8686_v2 }
  0xef   :  { %1837 = vmatpush.msrb.mxu3 %v1281_v63  ;;  %v1154_v29 = vsub.f32 1.5, %v1153_v12  ;;  %v13725_v30 = vand.u32 2147483648, %v8702_v0  ;;  %vm13726_vm5 = vcmp.eq.f32.partialorder %v8702_v0, 0.0  ;;  %v1208_v41 = vand.u32 2147483648, %v8678_v39  ;;  %v8157_v0 = vpop.eup %8156 }
  0xf0   :  { %1773 = vmatpush.msrb.mxu2 %v1245_v4  ;;  %v1221_v27 = vsel %vm13724_vm4, %v13723_v21, %v1218_v42  ;;  %v1170_v16 = vsel %vm1169_vm0, %v8642_v6, %v1168_v40  ;;  %v1115_v35 = vmul.f32 %v8155_v45, %v8577_v15  ;;  %v1182_v2 = vsel %vm1181_vm13, %v8650_v33, %v1180_v34  ;;  %v1313_v40 = vld [vmem:[%s13404_s4 + $0x78] sm:$0xff]  ;;  %v8159_v31 = vpop.eup %8158 }
  0xf1   :  { %1838 = vmatpush.msrb.mxu3 %v1257_v24  ;;  %v1233_v56 = vsel %vm13726_vm5, %v13725_v30, %v1230_v28  ;;  %v1146_v13 = vsel %vm1145_vm14, %v8591_v20, %v1144_v44  ;;  %v1155_v62 = vmul.f32 %v8847_v37, %v1154_v29  ;;  %v432_v50 = vadd.f32 %v9009_v47, %v8928_v49  ;;  %v8161_v18 = vpop.eup %8160 }
  0xf2   :  { %1774 = vmatpush.msrb.mxu2 %v1221_v27  ;;  %vm13727_vm0 = vcmp.eq.f32.partialorder %v8678_v39, 0.0  ;;  %v1148_v52 = vand.u32 2147483648, %v8591_v20  ;;  %v1116_v43 = vmul.f32 %v8155_v45, %v1115_v35  ;;  %v13728_v22 = vand.u32 2147483648, %v8642_v6 }
  0xf3   :  { %1839 = vmatpush.msrb.mxu3 %v1233_v56  ;;  %v1209_v1 = vsel %vm13727_vm0, %v1208_v41, %v1206_v9  ;;  %v1156_v60 = vmul.f32 %v1155_v62, %v8670_v32  ;;  %vm1157_vm6 = vcmp.eq.f32.partialorder %v8670_v32, inf  ;;  %v1127_v58 = vmul.f32 %v8157_v0, %v8589_v19 }
  0xf4   :  { %1775 = vmatpush.msrb.mxu2 %v1197_v51  ;;  %v1173_v37 = vsel %vm1171_vm1, %v13728_v22, %v1170_v16  ;;  %v13528_v39 = vmov 0   ;;  %v13729_v3 = vand.u32 2147483648, %v8650_v33  ;;  %v1149_v54 = vsel %vm1147_vm15, %v1148_v52, %v1146_v13  ;;  %v1312_v16 = vld [vmem:[%s13404_s4 + $0x70] sm:$0xff] }
  0xf5   :  { %8127 = vset.pattern.permute.xlu0 %v13528_v39  ;;  %8128 = vset.pattern.permute.xlu1 %v13528_v39  ;;  %v1160_v42 = vand.u32 2147483648, %v8670_v32  ;;  %v1117_v28 = vmul.f32 0.5, %v1116_v43  ;;  %v1158_v26 = vsel %vm1157_vm6, %v8670_v32, %v1156_v60  ;;  %v1128_v55 = vmul.f32 %v8157_v0, %v1127_v58 }
  0xf6   :  { %1840 = vmatpush.msrb.mxu3 %v1209_v1  ;;  %1776 = vmatpush.msrb.mxu2 %v1173_v37  ;;  %v1185_v6 = vsel %vm1183_vm2, %v13729_v3, %v1182_v2  ;;  %v1091_v34 = vmul.f32 %v8159_v31, %v8561_v10  ;;  %v9071_v63 = vmul.f32 0.41421357, %v8928_v49  ;;  %v9075_v33 = vand.u32 2147483647, %v8800_v48 }
  0xf7   :  { %1391 = vperm.xlu0 %8127, %v1313_v40   ;;  %8129 = vset.pattern.permute.xlu2 %v13528_v39  ;;  %vm1159_vm7 = vcmp.eq.f32.partialorder %v8670_v32, 0.0  ;;  %v1118_v20 = vsub.f32 1.5, %v1117_v28  ;;  %v1103_v4 = vmul.f32 %v8161_v18, %v8575_v14  ;;  %v1129_v12 = vmul.f32 0.5, %v1128_v55  ;;  %v1604_v28 = vld [vmem:[%s13405_s5] sm:$0xff] }
  0xf8   :  { %1841 = vmatpush.msrb.mxu3 %v1185_v6  ;;  %1777 = vmatpush.msrb.mxu2 %v1149_v54  ;;  %v1161_v44 = vsel %vm1159_vm7, %v1160_v42, %v1158_v26  ;;  %v1092_v38 = vmul.f32 %v8159_v31, %v1091_v34  ;;  %vm384_vm8 = vcmp.gt.f32.partialorder %v9009_v47, %v9071_v63  ;;  %v9082_v51 = vand.u32 2147483647, %v8831_v8 }
  0xf9   :  { %v1119_v9 = vmul.f32 %v8155_v45, %v1118_v20  ;;  %v1104_v24 = vmul.f32 %v8161_v18, %v1103_v4  ;;  %v448_v32 = vsel %vm384_vm8, %v432_v50, %v8928_v49  ;;  %v398_v21 = vsub.f32 %v8905_v23, %v8901_v46 }
  0xfa   :  { %1842 = vmatpush.msrb.mxu3 %v1161_v44  ;;  %v1130_v27 = vsub.f32 1.5, %v1129_v12  ;;  %v1093_v29 = vmul.f32 0.5, %v1092_v38  ;;  %v9090_v30 = vmax.f32 %v448_v32, 1e-30  ;;  %v430_v56 = vadd.f32 %v8905_v23, %v8901_v46 }
  0xfb   :  { %v1120_v41 = vmul.f32 %v1119_v9, %v8577_v15  ;;  %vm1121_vm9 = vcmp.eq.f32.partialorder %v8577_v15, inf  ;;  %v1105_v45 = vmul.f32 0.5, %v1104_v24  ;;  %v1124_v35 = vand.u32 2147483648, %v8577_v15 }
  0xfc   :  { %v1131_v2 = vmul.f32 %v8157_v0, %v1130_v27  ;;  %v1094_v13 = vsub.f32 1.5, %v1093_v29  ;;  %8162 = vrcp.f32 %v9090_v30  ;;  %v9103_v62 = vmax.f32 %v9075_v33, %v9082_v51 }
  0xfd   :  { %v1122_v50 = vsel %vm1121_vm9, %v8577_v15, %v1120_v41  ;;  %vm1123_vm10 = vcmp.eq.f32.partialorder %v8577_v15, 0.0  ;;  %v1106_v1 = vsub.f32 1.5, %v1105_v45  ;;  %v9109_v52 = vmin.f32 %v9075_v33, %v9082_v51 }
  0xfe   :  { %v1125_v43 = vsel %vm1123_vm10, %v1124_v35, %v1122_v50  ;;  %v1132_v40 = vmul.f32 %v1131_v2, %v8589_v19  ;;  %v1095_v0 = vmul.f32 %v8159_v31, %v1094_v13  ;;  %vm1133_vm11 = vcmp.eq.f32.partialorder %v8589_v19, inf }
  0xff   :  { %1386 = vperm.xlu0 %8127, %v1312_v16   ;;  %1778 = vmatpush.msrb.mxu2 %v1125_v43  ;;  %vm1135_vm12 = vcmp.eq.f32.partialorder %v8589_v19, 0.0  ;;  %v1136_v22 = vand.u32 2147483648, %v8589_v19  ;;  %v1107_v37 = vmul.f32 %v8161_v18, %v1106_v1  ;;  %vm1097_vm13 = vcmp.eq.f32.partialorder %v8561_v10, inf }
 0x100   :  { %v1134_v15 = vsel %vm1133_vm11, %v8589_v19, %v1132_v40  ;;  %v1096_v60 = vmul.f32 %v1095_v0, %v8561_v10  ;;  %vm1099_vm14 = vcmp.eq.f32.partialorder %v8561_v10, 0.0  ;;  %v1100_v31 = vand.u32 2147483648, %v8561_v10 }
 0x101   :  { %v1137_v58 = vsel %vm1135_vm12, %v1136_v22, %v1134_v15  ;;  %v1108_v3 = vmul.f32 %v1107_v37, %v8575_v14  ;;  %v366_v6 = vmul.f32 0.41421357, %v8901_v46  ;;  %vm1109_vm15 = vcmp.eq.f32.partialorder %v8575_v14, inf  ;;  %v13734_v15 = vld [vmem:[#allocation82_spill] sm:$0xff] }
 0x102   :  { %v8163_v54 = vpop.eup %8162  ;;  %1843 = vmatpush.msrb.mxu3 %v1137_v58  ;;  %v1098_v42 = vsel %vm1097_vm13, %v8561_v10, %v1096_v60  ;;  %v1112_v19 = vand.u32 2147483648, %v8575_v14  ;;  %v367_v18 = vmul.f32 0.41421357, %v8909_v17  ;;  %vm1111_vm1 = vcmp.eq.f32.partialorder %v8575_v14, 0.0 }
 0x103   :  { %v1101_v26 = vsel %vm1099_vm14, %v1100_v31, %v1098_v42  ;;  %v1110_v55 = vsel %vm1109_vm15, %v8575_v14, %v1108_v3  ;;  %v677_v34 = vmul.f32 %v8163_v54, %v9090_v30  ;;  %v431_v10 = vadd.f32 %v8913_v25, %v8909_v17 }
 0x104   :  { %v400_v20 = vsub.f32 %v9009_v47, %v8928_v49  ;;  %1779 = vmatpush.msrb.mxu2 %v1101_v26  ;;  %v1113_v4 = vsel %vm1111_vm1, %v1112_v19, %v1110_v55  ;;  %vm382_vm2 = vcmp.gt.f32.partialorder %v8905_v23, %v366_v6  ;;  %v399_v44 = vsub.f32 %v8913_v25, %v8909_v17  ;;  %v13738_v26 = vld [vmem:[#allocation70_spill] sm:$0xff] }
 0x105   :  { %v401_v12 = vsub.f32 %v9109_v52, %v9103_v62  ;;  %1844 = vmatpush.msrb.mxu3 %v1113_v4  ;;  %vm13730_vm3 = vcmask 523264   ;;  %v678_v14 = vsub.f32 1.0, %v677_v34  ;;  %vm383_vm4 = vcmp.gt.f32.partialorder %v8913_v25, %v367_v18 }
 0x106   :  { %7924 = vmatmul.msk.f32.vlgmr.msrb.gmra.mxu2 %vm13730_vm3, %v1604_v28  ;;  %v433_v38 = vadd.f32 %v9109_v52, %v9103_v62  ;;  %vm13731_vm5 = vmmov %vm13730_vm3  ;;  %v685_v49 = vand.u32 2147483647, %v9090_v30  ;;  %v687_v9 = vand.u32 2147483648, %v9090_v30  ;;  %v446_v24 = vsel %vm382_vm2, %v430_v56, %v8901_v46  ;;  %v1605_v56 = vld [vmem:[%s13405_s5 + $0x8] sm:$0xff] }
 0x107   :  { %7940 = vmatmul.msk.f32.vlgmr.msrb.gmra.mxu3 %vm13731_vm5, %v1604_v28  ;;  %v679_v32 = vmul.f32 %v8163_v54, %v678_v14  ;;  %vm682_vm0 = vweird.f32 %v8163_v54  ;;  %v9151_v27 = vmax.f32 %v446_v24, 1e-30  ;;  %v9154_v29 = vmul.f32 0.41421357, %v8810_v11  ;;  %vm13733_vm12 = vmmov %vm13730_vm3 }
 0x108   :  { %v416_v41 = vsel %vm384_vm8, %v400_v20, %v9009_v47  ;;  %v447_v45 = vsel %vm383_vm4, %v431_v10, %v8909_v17  ;;  %v9164_v16 = vmul.f32 0.41421357, %v8728_v36  ;;  %vm681_vm6 = vweird.f32 %v9090_v30  ;;  %v13739_v20 = vld [vmem:[#allocation85_spill] sm:$0xff] }
 0x109   :  { %v680_v35 = vadd.f32 %v8163_v54, %v679_v32  ;;  %v9171_v2 = vmul.f32 0.41421357, %v9103_v62  ;;  %8164 = vrcp.f32 %v9151_v27  ;;  %vm683_vm7 = vmor %vm681_vm6, %vm682_vm0  ;;  %vm686_vm9 = vcmp.eq.f32.partialorder %v685_v49, 8.507059e+37 }
 0x10a   :  { %v688_v13 = vor.u32 1.1754944e-38, %v687_v9  ;;  %v9174_v50 = vmax.f32 %v447_v45, 1e-30  ;;  %v9177_v17 = vmul.f32 0.41421357, %v8839_v57  ;;  %v8253_v43 = vmov 0.0   ;;  %vm13742_vm6 = vmmov %vm13731_vm5 }
 0x10b   :  { %v684_v1 = vsel %vm683_vm7, %v8163_v54, %v680_v35  ;;  %v9183_v30 = vsel %vm384_vm8, 0.7853982, %v8253_v43  ;;  %vm385_vm10 = vcmp.gt.f32.partialorder %v9109_v52, %v9171_v2  ;;  %vm380_vm11 = vcmp.gt.f32.partialorder %v8820_v59, %v9154_v29  ;;  %vm13732_vm8 = vmmov %vm13730_vm3  ;;  %v1307_v35 = vld [vmem:[%s13404_s4 + $0x48] sm:$0xff]  ;;  %v13764_v2 = vld [vmem:[#allocation81_spill] sm:$0xff] }
 0x10c   :  { %v689_v40 = vsel %vm686_vm9, %v688_v13, %v684_v1  ;;  %v449_v0 = vsel %vm385_vm10, %v433_v38, %v9103_v62  ;;  %v9199_v47 = vsel %vm382_vm2, %v398_v21, %v8905_v23  ;;  %v9204_v63 = vsel %vm382_vm2, 0.7853982, %v8253_v43  ;;  %1361 = vperm.xlu0 %8127, %v1307_v35  }
 0x10d   :  { %v9207_v22 = vmul.f32 %v689_v40, %v416_v41  ;;  %v9209_v37 = vmax.f32 %v449_v0, 1e-30  ;;  %v655_v62 = vand.u32 2147483647, %v9151_v27  ;;  %v9215_v46 = vsel %vm383_vm4, %v399_v44, %v8913_v25 }
 0x10e   :  { %7925 = vmatmul.msk.f32.gmra.mxu2 %vm13732_vm8, %v1605_v56  ;;  %8166 = vrcp.f32 %v9174_v50  ;;  %v9222_v23 = vsel %vm383_vm4, 0.7853982, %v8253_v43  ;;  %v444_v21 = vsel %vm380_vm11, %v8866_v53, %v8810_v11  ;;  %vm381_vm13 = vcmp.gt.f32.partialorder %v13734_v15, %v9177_v17  ;;  %v13773_v17 = vld [vmem:[#allocation51_spill] sm:$0xff] }
 0x10f   :  { %7941 = vmatmul.msk.f32.gmra.mxu3 %vm13733_vm12, %v1605_v56  ;;  %v8165_v60 = vpop.eup %8164  ;;  %v9233_v58 = vmul.f32 %v9207_v22, %v9207_v22  ;;  %8168 = vrcp.f32 %v9209_v37  ;;  %vm651_vm14 = vweird.f32 %v9151_v27  ;;  %v657_v25 = vand.u32 2147483648, %v9151_v27 }
 0x110   :  { %v9242_v31 = vsel %vm385_vm10, %v401_v12, %v9109_v52  ;;  %v647_v53 = vmul.f32 %v8165_v60, %v9151_v27  ;;  %v670_v3 = vand.u32 2147483647, %v9174_v50  ;;  %v13735_v6 = vsub.f32 %v8820_v59, %v8810_v11  ;;  %v1606_v11 = vld [vmem:[%s13405_s5 + $0x10] sm:$0xff] }
 0x111   :  { %v736_v42 = vmul.f32 0.080537446, %v9233_v58  ;;  %vm9256_vm15 = vcmp.eq.f32.partialorder %v655_v62, 8.507059e+37  ;;  %v672_v28 = vand.u32 2147483648, %v9174_v50  ;;  %v9261_v18 = vmax.f32 %v444_v21, 1e-30 }
 0x112   :  { %v9253_v54 = vsel %vm380_vm11, %v13735_v6, %v8820_v59  ;;  %vm378_vm1 = vcmp.gt.f32.partialorder %v13738_v26, %v9164_v16  ;;  %v700_v55 = vand.u32 2147483647, %v9209_v37  ;;  %v702_v34 = vand.u32 2147483648, %v9209_v37 }
 0x113   :  { %v648_v10 = vsub.f32 1.0, %v647_v53  ;;  %v445_v4 = vsel %vm381_vm13, %v13739_v20, %v8839_v57  ;;  %v752_v44 = vadd.f32 -0.13877685, %v736_v42  ;;  %v658_v12 = vor.u32 1.1754944e-38, %v657_v25 }
 0x114   :  { %vm666_vm2 = vweird.f32 %v9174_v50  ;;  %8170 = vrcp.f32 %v9261_v18  ;;  %v8167_v14 = vpop.eup %8166  ;;  %vm696_vm3 = vweird.f32 %v9209_v37  ;;  %vm652_vm4 = vweird.f32 %v8165_v60 }
 0x115   :  { %v649_v38 = vmul.f32 %v8165_v60, %v648_v10  ;;  %v9278_v49 = vmax.f32 %v445_v4, 1e-30  ;;  %v8169_v9 = vpop.eup %8168  ;;  %v768_v24 = vmul.f32 %v752_v44, %v9233_v58  ;;  %v662_v32 = vmul.f32 %v8167_v14, %v9174_v50  ;;  %vm653_vm9 = vmor %vm651_vm14, %vm652_vm4 }
 0x116   :  { %7926 = vmatmul.msk.f32.gmra.mxu2 %vm13731_vm5, %v1606_v11  ;;  %vm9283_vm0 = vcmp.eq.f32.partialorder %v670_v3, 8.507059e+37  ;;  %v673_v45 = vor.u32 1.1754944e-38, %v672_v28  ;;  %v692_v56 = vmul.f32 %v8169_v9, %v9209_v37  ;;  %vm9289_vm7 = vcmp.eq.f32.partialorder %v700_v55, 8.507059e+37 }
 0x117   :  { %7942 = vmatmul.msk.f32.gmra.mxu3 %vm13742_vm6, %v1606_v11  ;;  %v703_v13 = vor.u32 1.1754944e-38, %v702_v34  ;;  %v650_v1 = vadd.f32 %v8165_v60, %v649_v38  ;;  %v625_v40 = vand.u32 2147483647, %v9261_v18  ;;  %v784_v0 = vadd.f32 0.19977711, %v768_v24  ;;  %v13748_v38 = vld [vmem:[#allocation78_spill] sm:$0xff] }
 0x118   :  { %v663_v62 = vsub.f32 1.0, %v662_v32  ;;  %v627_v21 = vand.u32 2147483648, %v9261_v18  ;;  %8172 = vrcp.f32 %v9278_v49  ;;  %v693_v25 = vsub.f32 1.0, %v692_v56 }
 0x119   :  { %v654_v53 = vsel %vm653_vm9, %v8165_v60, %v650_v1  ;;  %vm621_vm8 = vweird.f32 %v9261_v18  ;;  %v13745_v3 = vsub.f32 %v13734_v15, %v8839_v57  ;;  %v800_v42 = vmul.f32 %v784_v0, %v9233_v58 }
 0x11a   :  { %v8171_v27 = vpop.eup %8170  ;;  %v659_v28 = vsel %vm9256_vm15, %v658_v12, %v654_v53  ;;  %v664_v11 = vmul.f32 %v8167_v14, %v663_v62  ;;  %vm667_vm12 = vweird.f32 %v8167_v14  ;;  %v694_v60 = vmul.f32 %v8169_v9, %v693_v25 }
 0x11b   :  { %v9307_v6 = vsel %vm381_vm13, %v13745_v3, %v13734_v15  ;;  %vm697_vm14 = vweird.f32 %v8169_v9  ;;  %v9313_v55 = vmul.f32 %v659_v28, %v9199_v47  ;;  %v617_v57 = vmul.f32 %v8171_v27, %v9261_v18  ;;  %vm668_vm15 = vmor %vm666_vm2, %vm667_vm12 }
 0x11c   :  { %vm9316_vm4 = vcmp.eq.f32.partialorder %v625_v40, 8.507059e+37  ;;  %v816_v10 = vadd.f32 -0.3333295, %v800_v42  ;;  %v665_v20 = vadd.f32 %v8167_v14, %v664_v11  ;;  %v628_v4 = vor.u32 1.1754944e-38, %v627_v21  ;;  %vm698_vm5 = vmor %vm696_vm3, %vm697_vm14 }
 0x11d   :  { %v640_v44 = vand.u32 2147483647, %v9278_v49  ;;  %v695_v19 = vadd.f32 %v8169_v9, %v694_v60  ;;  %v9323_v12 = vmul.f32 %v9313_v55, %v9313_v55  ;;  %v618_v47 = vsub.f32 1.0, %v617_v57 }
 0x11e   :  { %v442_v24 = vsel %vm378_vm1, %v13748_v38, %v8728_v36  ;;  %v8173_v32 = vpop.eup %8172  ;;  %v832_v56 = vmul.f32 %v816_v10, %v9233_v58  ;;  %v669_v1 = vsel %vm668_vm15, %v8167_v14, %v665_v20  ;;  %vm622_vm6 = vweird.f32 %v8171_v27 }
 0x11f   :  { %vm636_vm9 = vweird.f32 %v9278_v49  ;;  %v9337_v50 = vmax.f32 %v442_v24, 1e-30  ;;  %vm912_vm2 = vcmp.gt.f32.partialorder %v8919_v5, %v8916_v61  ;;  %v699_v40 = vsel %vm698_vm5, %v8169_v9, %v695_v19 }
 0x120   :  { %v734_v0 = vmul.f32 0.080537446, %v9323_v12  ;;  %v674_v62 = vsel %vm9283_vm0, %v673_v45, %v669_v1  ;;  %v619_v58 = vmul.f32 %v8171_v27, %v618_v47  ;;  %v848_v21 = vmul.f32 %v832_v56, %v9207_v22  ;;  %v13749_v45 = vld [vmem:[#allocation77_spill] sm:$0xff]  ;;  %vm623_vm0 = vmor %vm621_vm8, %vm622_vm6 }
 0x121   :  { %v704_v37 = vsel %vm9289_vm7, %v703_v13, %v699_v40  ;;  %v9348_v14 = vmul.f32 %v674_v62, %v9215_v46  ;;  %v632_v25 = vmul.f32 %v8173_v32, %v9278_v49  ;;  %v642_v42 = vand.u32 2147483648, %v9278_v49 }
 0x122   :  { %v9352_v53 = vmul.f32 %v704_v37, %v9242_v31  ;;  %v750_v9 = vadd.f32 -0.13877685, %v734_v0  ;;  %v620_v3 = vadd.f32 %v8171_v27, %v619_v58  ;;  %v864_v41 = vadd.f32 %v848_v21, %v9207_v22 }
 0x123   :  { %vm960_vm3 = vcmp.lt.f32.partialorder %v13749_v45, 0.0  ;;  %v9362_v46 = vmul.f32 %v9348_v14, %v9348_v14  ;;  %v633_v31 = vsub.f32 1.0, %v632_v25  ;;  %8174 = vrcp.f32 %v9337_v50 }
 0x124   :  { %v9370_v22 = vmul.f32 %v9352_v53, %v9352_v53  ;;  %v766_v13 = vmul.f32 %v750_v9, %v9323_v12  ;;  %v624_v28 = vsel %vm623_vm0, %v8171_v27, %v620_v3  ;;  %vm637_vm7 = vweird.f32 %v8173_v32 }
 0x125   :  { %v896_v11 = vadd.f32 %v9183_v30, %v864_v41  ;;  %v735_v60 = vmul.f32 0.080537446, %v9362_v46  ;;  %v629_v18 = vsel %vm9316_vm4, %v628_v4, %v624_v28  ;;  %v634_v57 = vmul.f32 %v8173_v32, %v633_v31  ;;  %vm638_vm14 = vmor %vm636_vm9, %vm637_vm7  ;;  %v13753_v31 = vld [vmem:[#allocation83_spill] sm:$0xff] }
 0x126   :  { %vm1008_vm8 = vcmp.lt.f32.partialorder %v8829_v7, 0.0  ;;  %v737_v10 = vmul.f32 0.080537446, %v9370_v22  ;;  %v782_v20 = vadd.f32 0.19977711, %v766_v13  ;;  %v9380_v19 = vmul.f32 %v629_v18, %v9253_v54  ;;  %v13754_v13 = vld [vmem:[#allocation84_spill] sm:$0xff] }
 0x127   :  { %v13750_v27 = vsub.f32 %v13738_v26, %v8728_v36  ;;  %v928_v34 = vsub.f32 1.5707964, %v896_v11  ;;  %v751_v4 = vadd.f32 -0.13877685, %v735_v60  ;;  %v635_v47 = vadd.f32 %v8173_v32, %v634_v57 }
 0x128   :  { %vm9391_vm12 = vcmp.eq.f32.partialorder %v640_v44, 8.507059e+37  ;;  %v753_v24 = vadd.f32 -0.13877685, %v737_v10  ;;  %v798_v54 = vmul.f32 %v782_v20, %v9323_v12  ;;  %v9398_v56 = vmul.f32 %v9380_v19, %v9380_v19 }
 0x129   :  { %v9389_v30 = vsel %vm378_vm1, %v13750_v27, %v13738_v26  ;;  %v643_v36 = vor.u32 1.1754944e-38, %v642_v42  ;;  %v8175_v1 = vpop.eup %8174  ;;  %v944_v44 = vsel %vm912_vm2, %v928_v34, %v896_v11  ;;  %v767_v40 = vmul.f32 %v751_v4, %v9362_v46 }
 0x12a   :  { %v639_v0 = vsel %vm638_vm14, %v8173_v32, %v635_v47  ;;  %v595_v62 = vand.u32 2147483647, %v9337_v50  ;;  %v976_v58 = vsub.f32 3.1415927, %v944_v44  ;;  %v769_v21 = vmul.f32 %v753_v24, %v9370_v22  ;;  %v13757_v47 = vld [vmem:[#allocation59_spill] sm:$0xff] }
 0x12b   :  { %v814_v37 = vadd.f32 -0.3333295, %v798_v54  ;;  %v732_v25 = vmul.f32 0.080537446, %v9398_v56  ;;  %v783_v9 = vadd.f32 0.19977711, %v767_v40  ;;  %v644_v49 = vsel %vm9391_vm12, %v643_v36, %v639_v0 }
 0x12c   :  { %v587_v3 = vmul.f32 %v8175_v1, %v9337_v50  ;;  %v597_v61 = vand.u32 2147483648, %v9337_v50  ;;  %v992_v5 = vsel %vm960_vm3, %v976_v58, %v944_v44  ;;  %v785_v32 = vadd.f32 0.19977711, %v769_v21  ;;  %v13758_v0 = vld [vmem:[#allocation86_spill] sm:$0xff]  ;;  %v13759_v58 = vld [vmem:[#allocation87_spill] sm:$0xff] }
 0x12d   :  { %v830_v42 = vmul.f32 %v814_v37, %v9323_v12  ;;  %v748_v41 = vadd.f32 -0.13877685, %v732_v25  ;;  %v1024_v35 = vsub.f32 0.0, %v992_v5  ;;  %vm910_vm4 = vcmp.gt.f32.partialorder %v13754_v13, %v13753_v31  ;;  %v1607_v12 = vld [vmem:[%s13405_s5 + $0x18] sm:$0xff]  ;;  %v13760_v21 = vld [vmem:[#allocation71_spill] sm:$0xff] }
 0x12e   :  { %v799_v28 = vmul.f32 %v783_v9, %v9362_v46  ;;  %v9421_v11 = vmul.f32 %v644_v49, %v9307_v6  ;;  %v588_v60 = vsub.f32 1.0, %v587_v3  ;;  %v801_v18 = vmul.f32 %v785_v32, %v9370_v22 }
 0x12f   :  { %v846_v57 = vmul.f32 %v830_v42, %v9313_v55  ;;  %v764_v45 = vmul.f32 %v748_v41, %v9398_v56  ;;  %vm592_vm15 = vweird.f32 %v8175_v1  ;;  %v1040_v10 = vsel %vm1008_vm8, %v1024_v35, %v992_v5  ;;  %v13762_v5 = vld [vmem:[#allocation60_spill] sm:$0xff] }
 0x130   :  { %v815_v20 = vadd.f32 -0.3333295, %v799_v28  ;;  %v9433_v6 = vmul.f32 %v9421_v11, %v9421_v11  ;;  %vm13755_vm5 = vcmask 523264   ;;  %v589_v27 = vmul.f32 %v8175_v1, %v588_v60  ;;  %1450 = vmatpush.msrb.mxu0 %v1040_v10  ;;  %v13763_v41 = vld [vmem:[#allocation72_spill] sm:$0xff] }
 0x131   :  { %7927 = vmatmul.msk.f32.gmra.mxu2 %vm13755_vm5, %v1607_v12  ;;  %vm13756_vm6 = vmmov %vm13755_vm5  ;;  %v817_v34 = vadd.f32 -0.3333295, %v801_v18  ;;  %v862_v4 = vadd.f32 %v846_v57, %v9313_v55  ;;  %vm958_vm9 = vcmp.lt.f32.partialorder %v13757_v47, 0.0  ;;  %v780_v38 = vadd.f32 0.19977711, %v764_v45 }
 0x132   :  { %7943 = vmatmul.msk.f32.gmra.mxu3 %vm13756_vm6, %v1607_v12  ;;  %vm591_vm2 = vweird.f32 %v9337_v50  ;;  %v831_v7 = vmul.f32 %v815_v20, %v9362_v46  ;;  %v733_v24 = vmul.f32 0.080537446, %v9433_v6  ;;  %v590_v54 = vadd.f32 %v8175_v1, %v589_v27  ;;  %v13761_v50 = vld [vmem:[#allocation68_spill] sm:$0xff] }
 0x133   :  { %v598_v36 = vor.u32 1.1754944e-38, %v597_v61  ;;  %v833_v44 = vmul.f32 %v817_v34, %v9370_v22  ;;  %v894_v40 = vadd.f32 %v9204_v63, %v862_v4  ;;  %vm911_vm3 = vcmp.gt.f32.partialorder %v13759_v58, %v13758_v0  ;;  %vm593_vm0 = vmor %vm591_vm2, %vm592_vm15  ;;  %v13767_v58 = vld [vmem:[#allocation73_spill] sm:$0xff] }
 0x134   :  { %v796_v55 = vmul.f32 %v780_v38, %v9398_v56  ;;  %v9449_v37 = vmul.f32 0.41421357, %v13760_v21  ;;  %vm1006_vm7 = vcmp.lt.f32.partialorder %v13761_v50, 0.0  ;;  %v847_v46 = vmul.f32 %v831_v7, %v9348_v14 }
 0x135   :  { %v749_v25 = vadd.f32 -0.13877685, %v733_v24  ;;  %v594_v9 = vsel %vm593_vm0, %v8175_v1, %v590_v54  ;;  %vm596_vm8 = vcmp.eq.f32.partialorder %v595_v62, 8.507059e+37  ;;  %v849_v22 = vmul.f32 %v833_v44, %v9352_v53  ;;  %v13766_v44 = vld [vmem:[#allocation67_spill] sm:$0xff] }
 0x136   :  { %v926_v63 = vsub.f32 1.5707964, %v894_v40  ;;  %v812_v49 = vadd.f32 -0.3333295, %v796_v55  ;;  %v599_v3 = vsel %vm596_vm8, %v598_v36, %v594_v9  ;;  %v863_v61 = vadd.f32 %v847_v46, %v9348_v14  ;;  %v13765_v36 = vld [vmem:[#allocation66_spill] sm:$0xff] }
 0x137   :  { %vm959_vm12 = vcmp.lt.f32.partialorder %v13762_v5, 0.0  ;;  %v765_v32 = vmul.f32 %v749_v25, %v9433_v6  ;;  %v9458_v42 = vmul.f32 %v599_v3, %v9389_v30  ;;  %vm379_vm14 = vcmp.gt.f32.partialorder %v13763_v41, %v9449_v37  ;;  %v13768_v55 = vld [vmem:[#allocation74_spill] sm:$0xff]  ;;  %v13770_v25 = vld [vmem:[#allocation76_spill] sm:$0xff] }
 0x138   :  { %v865_v1 = vadd.f32 %v849_v22, %v9352_v53  ;;  %v881_v62 = vsel %vm385_vm10, 0.7853982, %v8253_v43  ;;  %v942_v14 = vsel %vm910_vm4, %v926_v63, %v894_v40  ;;  %v828_v35 = vmul.f32 %v812_v49, %v9398_v56 }
 0x139   :  { %v974_v28 = vsub.f32 3.1415927, %v942_v14  ;;  %v895_v30 = vadd.f32 %v9222_v23, %v863_v61  ;;  %v781_v60 = vadd.f32 0.19977711, %v765_v32  ;;  %v714_v18 = vmul.f32 %v9458_v42, %v9458_v42  ;;  %v13771_v32 = vld [vmem:[#allocation44_spill] sm:$0xff] }
 0x13a   :  { %v897_v57 = vadd.f32 %v881_v62, %v865_v1  ;;  %vm913_vm15 = vcmp.gt.f32.partialorder %v9082_v51, %v9075_v33  ;;  %v844_v52 = vmul.f32 %v828_v35, %v9380_v19  ;;  %v443_v53 = vsel %vm379_vm14, %v13764_v2, %v13760_v21  ;;  %v13772_v35 = vld [vmem:[#allocation69_spill] sm:$0xff] }
 0x13b   :  { %v990_v56 = vsel %vm958_vm9, %v974_v28, %v942_v14  ;;  %v927_v23 = vsub.f32 1.5707964, %v895_v30  ;;  %v797_v31 = vmul.f32 %v781_v60, %v9433_v6  ;;  %v730_v13 = vmul.f32 0.080537446, %v714_v18 }
 0x13c   :  { %v929_v45 = vsub.f32 1.5707964, %v897_v57  ;;  %v1022_v12 = vsub.f32 0.0, %v990_v56  ;;  %v860_v10 = vadd.f32 %v844_v52, %v9380_v19  ;;  %v9486_v33 = vmax.f32 %v443_v53, 1e-30 }
 0x13d   :  { %v943_v51 = vsel %vm911_vm3, %v927_v23, %v895_v30  ;;  %v876_v20 = vsel %vm380_vm11, 0.7853982, %v8253_v43  ;;  %v813_v27 = vadd.f32 -0.3333295, %v797_v31  ;;  %v746_v34 = vadd.f32 -0.13877685, %v730_v13 }
 0x13e   :  { %v945_v4 = vsel %vm913_vm15, %v929_v45, %v897_v57  ;;  %v1038_v47 = vsel %vm1006_vm7, %v1022_v12, %v990_v56  ;;  %v975_v38 = vsub.f32 3.1415927, %v943_v51  ;;  %v892_v7 = vadd.f32 %v876_v20, %v860_v10  ;;  %v13774_v56 = vld [vmem:[#allocation79_spill] sm:$0xff]  ;;  %v13775_v23 = vld [vmem:[#allocation80_spill] sm:$0xff] }
 0x13f   :  { %v977_v19 = vsub.f32 3.1415927, %v945_v4  ;;  %1451 = vmatpush.msrb.mxu0 %v1038_v47  ;;  %v829_v24 = vmul.f32 %v813_v27, %v9433_v6  ;;  %v762_v54 = vmul.f32 %v746_v34, %v714_v18  ;;  %8176 = vrcp.f32 %v9486_v33  ;;  %v13769_v6 = vld [vmem:[#allocation75_spill] sm:$0xff]  ;;  %v13776_v34 = vld [vmem:[#allocation45_spill] sm:$0xff] }
 0x140   :  { %v424_v40 = vadd.f32 %v13766_v44, %v13765_v36  ;;  %vm961_vm10 = vcmp.lt.f32.partialorder %v8800_v48, 0.0  ;;  %v991_v59 = vsel %vm959_vm12, %v975_v38, %v943_v51  ;;  %v924_v29 = vsub.f32 1.5707964, %v892_v7 }
 0x141   :  { %v993_v0 = vsel %vm961_vm10, %v977_v19, %v945_v4  ;;  %vm908_vm11 = vcmp.gt.f32.partialorder %v13768_v55, %v13767_v58  ;;  %v845_v50 = vmul.f32 %v829_v24, %v9421_v11  ;;  %v778_v46 = vadd.f32 0.19977711, %v762_v54  ;;  %v13777_v24 = vld [vmem:[#allocation52_spill] sm:$0xff]  ;;  %v13779_v55 = vld [vmem:[#allocation57_spill] sm:$0xff] }
 0x142   :  { %v9509_v9 = vadd.f32 %v13770_v25, %v13769_v6  ;;  %v1025_v22 = vsub.f32 0.0, %v993_v0  ;;  %v1023_v63 = vsub.f32 0.0, %v991_v59  ;;  %v940_v49 = vsel %vm908_vm11, %v924_v29, %v892_v7 }
 0x143   :  { %vm1009_vm4 = vcmp.lt.f32.partialorder %v8831_v8, 0.0  ;;  %v972_v48 = vsub.f32 3.1415927, %v940_v49  ;;  %v861_v3 = vadd.f32 %v845_v50, %v9421_v11  ;;  %v794_v61 = vmul.f32 %v778_v46, %v714_v18  ;;  %v13780_v50 = vld [vmem:[#allocation58_spill] sm:$0xff] }
 0x144   :  { %v1041_v5 = vsel %vm1009_vm4, %v1025_v22, %v993_v0  ;;  %vm956_vm5 = vcmp.lt.f32.partialorder %v13771_v32, 0.0  ;;  %v877_v1 = vsel %vm381_vm13, 0.7853982, %v8253_v43  ;;  %v9519_v62 = vmul.f32 0.41421357, %v13765_v36 }
 0x145   :  { %v8177_v14 = vpop.eup %8176  ;;  %1515 = vmatpush.msrb.mxu1 %v1041_v5  ;;  %vm1007_vm6 = vcmp.lt.f32.partialorder %v13772_v35, 0.0  ;;  %v988_v8 = vsel %vm956_vm5, %v972_v48, %v940_v49  ;;  %v893_v28 = vadd.f32 %v877_v1, %v861_v3  ;;  %v810_v30 = vadd.f32 -0.3333295, %v794_v61  ;;  %v13782_v49 = vld [vmem:[#allocation48_spill] sm:$0xff]  ;;  %v13783_v48 = vld [vmem:[#allocation47_spill] sm:$0xff] }
 0x146   :  { %v1039_v11 = vsel %vm1007_vm6, %v1023_v63, %v991_v59  ;;  %v1020_v60 = vsub.f32 0.0, %v988_v8  ;;  %v602_v57 = vmul.f32 %v8177_v14, %v9486_v33  ;;  %vm376_vm9 = vcmp.gt.f32.partialorder %v13766_v44, %v9519_v62  ;;  %v13781_v63 = vld [vmem:[#allocation50_spill] sm:$0xff] }
 0x147   :  { %1516 = vmatpush.msrb.mxu1 %v1039_v11  ;;  %vm1004_vm13 = vcmp.lt.f32.partialorder %v13773_v17, 0.0  ;;  %v925_v15 = vsub.f32 1.5707964, %v893_v28  ;;  %v826_v52 = vmul.f32 %v810_v30, %v714_v18  ;;  %v440_v2 = vsel %vm376_vm9, %v424_v40, %v13765_v36  ;;  %v13785_v30 = vld [vmem:[#allocation27_spill] sm:$0xff] }
 0x148   :  { %v1036_v53 = vsel %vm1004_vm13, %v1020_v60, %v988_v8  ;;  %vm909_vm2 = vcmp.gt.f32.partialorder %v13775_v23, %v13774_v56  ;;  %v603_v31 = vsub.f32 1.0, %v602_v57  ;;  %v9532_v13 = vmax.f32 %v440_v2, 1e-30  ;;  %v13786_v56 = vld [vmem:[#allocation54_spill] sm:$0xff] }
 0x149   :  { %1452 = vmatpush.msrb.mxu0 %v1036_v53  ;;  %v941_v45 = vsel %vm909_vm2, %v925_v15, %v893_v28  ;;  %v842_v12 = vmul.f32 %v826_v52, %v9458_v42  ;;  %v610_v10 = vand.u32 2147483647, %v9486_v33  ;;  %v612_v18 = vand.u32 2147483648, %v9486_v33 }
 0x14a   :  { %v973_v51 = vsub.f32 3.1415927, %v941_v45  ;;  %v604_v20 = vmul.f32 %v8177_v14, %v603_v31  ;;  %vm607_vm3 = vweird.f32 %v8177_v14  ;;  %8178 = vrcp.f32 %v9532_v13 }
 0x14b   :  { %v395_v27 = vsub.f32 %v13763_v41, %v13760_v21  ;;  %vm957_vm0 = vcmp.lt.f32.partialorder %v13776_v34, 0.0  ;;  %v858_v4 = vadd.f32 %v842_v12, %v9458_v42  ;;  %v9543_v47 = vmul.f32 0.41421357, %v13769_v6  ;;  %v13778_v42 = vld [vmem:[#allocation49_spill] sm:$0xff] }
 0x14c   :  { %v989_v38 = vsel %vm957_vm0, %v973_v51, %v941_v45  ;;  %v874_v7 = vsel %vm378_vm1, 0.7853982, %v8253_v43  ;;  %v605_v19 = vadd.f32 %v8177_v14, %v604_v20  ;;  %vm606_vm7 = vweird.f32 %v9486_v33 }
 0x14d   :  { %vm1005_vm8 = vcmp.lt.f32.partialorder %v13777_v24, 0.0  ;;  %v1021_v54 = vsub.f32 0.0, %v989_v38  ;;  %v890_v21 = vadd.f32 %v874_v7, %v858_v4  ;;  %vm608_vm12 = vmor %vm606_vm7, %vm607_vm3  ;;  %v613_v40 = vor.u32 1.1754944e-38, %v612_v18 }
 0x14e   :  { %v609_v59 = vsel %vm608_vm12, %v8177_v14, %v605_v19  ;;  %vm611_vm15 = vcmp.eq.f32.partialorder %v610_v10, 8.507059e+37  ;;  %vm377_vm10 = vcmp.gt.f32.partialorder %v13770_v25, %v9543_v47  ;;  %v9554_v29 = vmul.f32 0.41421357, %v13778_v42  ;;  %v13814_v47 = vld [vmem:[#allocation20_spill] sm:$0xff] }
 0x14f   :  { %v1037_v0 = vsel %vm1005_vm8, %v1021_v54, %v989_v38  ;;  %v922_v16 = vsub.f32 1.5707964, %v890_v21  ;;  %v411_v26 = vsel %vm379_vm14, %v395_v27, %v13763_v41  ;;  %v614_v33 = vsel %vm611_vm15, %v613_v40, %v609_v59 }
 0x150   :  { %v8179_v58 = vpop.eup %8178  ;;  %1517 = vmatpush.msrb.mxu1 %v1037_v0  ;;  %vm906_vm1 = vcmp.gt.f32.partialorder %v13780_v50, %v13779_v55  ;;  %v9562_v46 = vmul.f32 %v614_v33, %v411_v26  ;;  %v441_v22 = vsel %vm377_vm10, %v9509_v9, %v13769_v6  ;;  %vm374_vm11 = vcmp.gt.f32.partialorder %v13781_v63, %v9554_v29  ;;  %v13784_v9 = vld [vmem:[#allocation61_spill] sm:$0xff] }
 0x151   :  { %v9573_v3 = vmin.f32 %v13783_v48, %v13782_v49  ;;  %v938_v61 = vsel %vm906_vm1, %v922_v16, %v890_v21  ;;  %v557_v5 = vmul.f32 %v8179_v58, %v9532_v13  ;;  %v9576_v32 = vmax.f32 %v441_v22, 1e-30 }
 0x152   :  { %v390_v1 = vsub.f32 %v13781_v63, %v13778_v42  ;;  %v970_v14 = vsub.f32 3.1415927, %v938_v61  ;;  %v715_v35 = vmul.f32 %v9562_v46, %v9562_v46  ;;  %v438_v8 = vsel %vm374_vm11, %v13784_v9, %v13778_v42 }
 0x153   :  { %v392_v28 = vsub.f32 %v13766_v44, %v13765_v36  ;;  %vm954_vm4 = vcmp.lt.f32.partialorder %v13785_v30, 0.0  ;;  %v558_v11 = vsub.f32 1.0, %v557_v5  ;;  %8180 = vrcp.f32 %v9576_v32  ;;  %v13787_v36 = vld [vmem:[#allocation35_spill] sm:$0xff]  ;;  %v13791_v30 = vld [vmem:[#allocation65_spill] sm:$0xff] }
 0x154   :  { %v986_v60 = vsel %vm954_vm4, %v970_v14, %v938_v61  ;;  %v731_v57 = vmul.f32 0.080537446, %v715_v35  ;;  %v567_v17 = vand.u32 2147483648, %v9532_v13  ;;  %v9592_v15 = vmax.f32 %v438_v8, 1e-30 }
 0x155   :  { %v1018_v52 = vsub.f32 0.0, %v986_v60  ;;  %v559_v2 = vmul.f32 %v8179_v58, %v558_v11  ;;  %vm562_vm5 = vweird.f32 %v8179_v58  ;;  %v565_v53 = vand.u32 2147483647, %v9532_v13 }
 0x156   :  { %v391_v23 = vsub.f32 %v9573_v3, %v13786_v56  ;;  %vm1002_vm6 = vcmp.lt.f32.partialorder %v13787_v36, 0.0  ;;  %v747_v31 = vadd.f32 -0.13877685, %v731_v57  ;;  %8182 = vrcp.f32 %v9592_v15  ;;  %v13792_v57 = vld [vmem:[#allocation33_spill] sm:$0xff] }
 0x157   :  { %v393_v45 = vsub.f32 %v13770_v25, %v13769_v6  ;;  %v1034_v12 = vsel %vm1002_vm6, %v1018_v52, %v986_v60  ;;  %v560_v10 = vadd.f32 %v8179_v58, %v559_v2  ;;  %vm561_vm13 = vweird.f32 %v9532_v13 }
 0x158   :  { %v423_v18 = vadd.f32 %v9573_v3, %v13786_v56  ;;  %1453 = vmatpush.msrb.mxu0 %v1034_v12  ;;  %v763_v51 = vmul.f32 %v747_v31, %v715_v35  ;;  %v9608_v20 = vsel %vm379_vm14, 0.7853982, %v8253_v43  ;;  %vm563_vm2 = vmor %vm561_vm13, %vm562_vm5  ;;  %v568_v27 = vor.u32 1.1754944e-38, %v567_v17  ;;  %v13795_v31 = vld [vmem:[#allocation34_spill] sm:$0xff]  ;;  %v13796_v12 = vld [vmem:[#allocation28_spill] sm:$0xff] }
 0x159   :  { %v8181_v34 = vpop.eup %8180  ;;  %v408_v6 = vsel %vm376_vm9, %v392_v28, %v13766_v44  ;;  %v564_v13 = vsel %vm563_vm2, %v8179_v58, %v560_v10  ;;  %vm566_vm3 = vcmp.eq.f32.partialorder %v565_v53, 8.507059e+37  ;;  %v9615_v4 = vmul.f32 0.41421357, %v13786_v56  ;;  %v13790_v28 = vld [vmem:[#allocation64_spill] sm:$0xff] }
 0x15a   :  { %v779_v38 = vadd.f32 0.19977711, %v763_v51  ;;  %v569_v7 = vsel %vm566_vm3, %v568_v27, %v564_v13  ;;  %v9621_v37 = vsel %vm376_vm9, 0.7853982, %v8253_v43  ;;  %v572_v41 = vmul.f32 %v8181_v34, %v9576_v32 }
 0x15b   :  { %v9624_v19 = vmul.f32 %v569_v7, %v408_v6  ;;  %v409_v24 = vsel %vm377_vm10, %v393_v45, %v13770_v25  ;;  %v580_v54 = vand.u32 2147483647, %v9576_v32  ;;  %vm375_vm14 = vcmp.gt.f32.partialorder %v9573_v3, %v9615_v4  ;;  %v1311_v6 = vld [vmem:[%s13404_s4 + $0x68] sm:$0xff] }
 0x15c   :  { %v8183_v21 = vpop.eup %8182  ;;  %v795_v40 = vmul.f32 %v779_v38, %v715_v35  ;;  %v573_v59 = vsub.f32 1.0, %v572_v41  ;;  %v582_v44 = vand.u32 2147483648, %v9576_v32  ;;  %v439_v62 = vsel %vm375_vm14, %v423_v18, %v13786_v56  ;;  %v13797_v18 = vld [vmem:[#allocation46_spill] sm:$0xff]  ;;  %1381 = vperm.xlu1 %8128, %v1311_v6   ;;  %v13799_v56 = vld [vmem:[#allocation55_spill] sm:$0xff] }
 0x15d   :  { %v9640_v0 = vmul.f32 %v9624_v19, %v9624_v19  ;;  %vm576_vm9 = vweird.f32 %v9576_v32  ;;  %v527_v16 = vmul.f32 %v8183_v21, %v9592_v15  ;;  %v9644_v26 = vmax.f32 %v439_v62, 1e-30 }
 0x15e   :  { %v811_v33 = vadd.f32 -0.3333295, %v795_v40  ;;  %v574_v58 = vmul.f32 %v8181_v34, %v573_v59  ;;  %vm577_vm0 = vweird.f32 %v8181_v34  ;;  %v535_v55 = vand.u32 2147483647, %v9592_v15 }
 0x15f   :  { %v728_v50 = vmul.f32 0.080537446, %v9640_v0  ;;  %vm9648_vm7 = vcmp.eq.f32.partialorder %v580_v54, 8.507059e+37  ;;  %v528_v61 = vsub.f32 1.0, %v527_v16  ;;  %8184 = vrcp.f32 %v9644_v26  ;;  %vm578_vm12 = vmor %vm576_vm9, %vm577_vm0 }
 0x160   :  { %v827_v5 = vmul.f32 %v811_v33, %v715_v35  ;;  %v575_v14 = vadd.f32 %v8181_v34, %v574_v58  ;;  %v583_v9 = vor.u32 1.1754944e-38, %v582_v44  ;;  %v537_v8 = vand.u32 2147483648, %v9592_v15 }
 0x161   :  { %vm907_vm8 = vcmp.gt.f32.partialorder %v13791_v30, %v13790_v28  ;;  %v744_v11 = vadd.f32 -0.13877685, %v728_v50  ;;  %v529_v60 = vmul.f32 %v8183_v21, %v528_v61  ;;  %vm532_vm15 = vweird.f32 %v8183_v21 }
 0x162   :  { %v9659_v17 = vmul.f32 0.41421357, %v13792_v57  ;;  %v843_v52 = vmul.f32 %v827_v5, %v9562_v46  ;;  %v579_v2 = vsel %vm578_vm12, %v8181_v34, %v575_v14  ;;  %vm531_vm1 = vweird.f32 %v9592_v15 }
 0x163   :  { %vm9663_vm4 = vcmp.eq.f32.partialorder %v535_v55, 8.507059e+37  ;;  %v760_v53 = vmul.f32 %v744_v11, %v9640_v0  ;;  %v584_v32 = vsel %vm9648_vm7, %v583_v9, %v579_v2  ;;  %v530_v36 = vadd.f32 %v8183_v21, %v529_v60  ;;  %vm533_vm13 = vmor %vm531_vm1, %vm532_vm15 }
 0x164   :  { %vm372_vm5 = vcmp.gt.f32.partialorder %v13795_v31, %v9659_v17  ;;  %v859_v45 = vadd.f32 %v843_v52, %v9562_v46  ;;  %vm955_vm6 = vcmp.lt.f32.partialorder %v13796_v12, 0.0  ;;  %v9674_v10 = vmul.f32 %v584_v32, %v409_v24  ;;  %v1304_v46 = vld [vmem:[%s13404_s4 + $0x30] sm:$0xff] }
 0x165   :  { %v538_v15 = vor.u32 1.1754944e-38, %v537_v8  ;;  %v436_v51 = vsel %vm372_vm5, %v13797_v18, %v13792_v57  ;;  %v8185_v27 = vpop.eup %8184  ;;  %v776_v34 = vadd.f32 0.19977711, %v760_v53  ;;  %v406_v13 = vsel %vm374_vm11, %v390_v1, %v13781_v63  ;;  %1346 = vperm.xlu0 %8127, %v1304_v46   ;;  %v13800_v8 = vld [vmem:[#allocation56_spill] sm:$0xff]  ;;  %v13803_v18 = vld [vmem:[#allocation17_spill] sm:$0xff] }
 0x166   :  { %v534_v38 = vsel %vm533_vm13, %v8183_v21, %v530_v36  ;;  %v9694_v7 = vmax.f32 %v436_v51, 1e-30  ;;  %v891_v41 = vadd.f32 %v9608_v20, %v859_v45  ;;  %v9699_v24 = vmul.f32 %v9674_v10, %v9674_v10  ;;  %v13798_v21 = vld [vmem:[#allocation36_spill] sm:$0xff]  ;;  %v13816_v63 = vld [vmem:[#allocation13_spill] sm:$0xff] }
 0x167   :  { %v539_v54 = vsel %vm9663_vm4, %v538_v15, %v534_v38  ;;  %v550_v42 = vand.u32 2147483647, %v9644_v26  ;;  %v792_v40 = vmul.f32 %v776_v34, %v9640_v0  ;;  %v542_v1 = vmul.f32 %v8185_v27, %v9644_v26  ;;  %v13804_v34 = vld [vmem:[#allocation40_spill] sm:$0xff] }
 0x168   :  { %v9705_v59 = vmul.f32 %v539_v54, %v406_v13  ;;  %8186 = vrcp.f32 %v9694_v7  ;;  %v923_v20 = vsub.f32 1.5707964, %v891_v41  ;;  %vm1003_vm2 = vcmp.lt.f32.partialorder %v13798_v21, 0.0 }
 0x169   :  { %v729_v44 = vmul.f32 0.080537446, %v9699_v24  ;;  %v552_v62 = vand.u32 2147483648, %v9644_v26  ;;  %v808_v16 = vadd.f32 -0.3333295, %v792_v40  ;;  %v407_v58 = vsel %vm375_vm14, %v391_v23, %v9573_v3 }
 0x16a   :  { %v9714_v33 = vmul.f32 %v9705_v59, %v9705_v59  ;;  %v543_v55 = vsub.f32 1.0, %v542_v1  ;;  %v939_v50 = vsel %vm907_vm8, %v923_v20, %v891_v41  ;;  %vm546_vm3 = vweird.f32 %v9644_v26  ;;  %v13807_v20 = vld [vmem:[#allocation53_spill] sm:$0xff] }
 0x16b   :  { %v745_v22 = vadd.f32 -0.13877685, %v729_v44  ;;  %vm547_vm9 = vweird.f32 %v8185_v27  ;;  %v971_v61 = vsub.f32 3.1415927, %v939_v50  ;;  %v824_v5 = vmul.f32 %v808_v16, %v9640_v0 }
 0x16c   :  { %v726_v14 = vmul.f32 0.080537446, %v9714_v33  ;;  %v544_v9 = vmul.f32 %v8185_v27, %v543_v55  ;;  %vm904_vm0 = vcmp.gt.f32.partialorder %v13800_v8, %v13799_v56  ;;  %vm9732_vm7 = vcmp.eq.f32.partialorder %v550_v42, 8.507059e+37  ;;  %vm548_vm8 = vmor %vm546_vm3, %vm547_vm9  ;;  %v13806_v42 = vld [vmem:[#allocation19_spill] sm:$0xff] }
 0x16d   :  { %v761_v23 = vmul.f32 %v745_v22, %v9699_v24  ;;  %v553_v28 = vor.u32 1.1754944e-38, %v552_v62  ;;  %v505_v30 = vand.u32 2147483647, %v9694_v7  ;;  %v987_v52 = vsel %vm955_vm6, %v971_v61, %v939_v50  ;;  %v13808_v61 = vld [vmem:[#allocation62_spill] sm:$0xff] }
 0x16e   :  { %v8187_v60 = vpop.eup %8186  ;;  %v840_v0 = vmul.f32 %v824_v5, %v9624_v19  ;;  %v742_v2 = vadd.f32 -0.13877685, %v726_v14  ;;  %v545_v35 = vadd.f32 %v8185_v27, %v544_v9  ;;  %v1019_v53 = vsub.f32 0.0, %v987_v52  ;;  %v13809_v5 = vld [vmem:[#allocation63_spill] sm:$0xff] }
 0x16f   :  { %v777_v32 = vadd.f32 0.19977711, %v761_v23  ;;  %v497_v36 = vmul.f32 %v8187_v60, %v9694_v7  ;;  %v507_v45 = vand.u32 2147483648, %v9694_v7  ;;  %vm952_vm12 = vcmp.lt.f32.partialorder %v13803_v18, 0.0 }
 0x170   :  { %v856_v15 = vadd.f32 %v840_v0, %v9624_v19  ;;  %v758_v12 = vmul.f32 %v742_v2, %v9714_v33  ;;  %v549_v51 = vsel %vm548_vm8, %v8185_v27, %v545_v35  ;;  %v9749_v6 = vmul.f32 0.41421357, %v13804_v34  ;;  %v13805_v27 = vld [vmem:[#allocation41_spill] sm:$0xff]  ;;  %v13811_v35 = vld [vmem:[#allocation18_spill] sm:$0xff] }
 0x171   :  { %v1035_v46 = vsel %vm1003_vm2, %v1019_v53, %v987_v52  ;;  %v793_v26 = vmul.f32 %v777_v32, %v9699_v24  ;;  %v554_v13 = vsel %vm9732_vm7, %v553_v28, %v549_v51  ;;  %v498_v38 = vsub.f32 1.0, %v497_v36 }
 0x172   :  { %1518 = vmatpush.msrb.mxu1 %v1035_v46  ;;  %v888_v19 = vadd.f32 %v9621_v37, %v856_v15  ;;  %v774_v41 = vadd.f32 0.19977711, %v758_v12  ;;  %v9757_v54 = vmul.f32 %v554_v13, %v407_v58  ;;  %vm373_vm15 = vcmp.gt.f32.partialorder %v13805_v27, %v9749_v6  ;;  %v13815_v46 = vld [vmem:[#allocation29_spill] sm:$0xff] }
 0x173   :  { %vm1000_vm1 = vcmp.lt.f32.partialorder %v13806_v42, 0.0  ;;  %v809_v40 = vadd.f32 -0.3333295, %v793_v26  ;;  %v499_v1 = vmul.f32 %v8187_v60, %v498_v38  ;;  %vm502_vm4 = vweird.f32 %v8187_v60 }
 0x174   :  { %v437_v21 = vsel %vm373_vm15, %v13807_v20, %v13804_v34  ;;  %v920_v44 = vsub.f32 1.5707964, %v888_v19  ;;  %v790_v37 = vmul.f32 %v774_v41, %v9714_v33  ;;  %v711_v62 = vmul.f32 %v9757_v54, %v9757_v54 }
 0x175   :  { %v9770_v16 = vmax.f32 %v437_v21, 1e-30  ;;  %v825_v58 = vmul.f32 %v809_v40, %v9699_v24  ;;  %v500_v55 = vadd.f32 %v8187_v60, %v499_v1  ;;  %vm501_vm6 = vweird.f32 %v9694_v7  ;;  %v13817_v40 = vld [vmem:[#allocation30_spill] sm:$0xff] }
 0x176   :  { %v508_v50 = vor.u32 1.1754944e-38, %v507_v45  ;;  %v936_v22 = vsel %vm904_vm0, %v920_v44, %v888_v19  ;;  %vm905_vm13 = vcmp.gt.f32.partialorder %v13809_v5, %v13808_v61  ;;  %v806_v14 = vadd.f32 -0.3333295, %v790_v37  ;;  %vm503_vm2 = vmor %vm501_vm6, %vm502_vm4  ;;  %v13813_v45 = vld [vmem:[#allocation43_spill] sm:$0xff] }
 0x177   :  { %v727_v9 = vmul.f32 0.080537446, %v711_v62  ;;  %8188 = vrcp.f32 %v9770_v16  ;;  %v968_v23 = vsub.f32 3.1415927, %v936_v22  ;;  %v841_v11 = vmul.f32 %v825_v58, %v9674_v10 }
 0x178   :  { %v504_v24 = vsel %vm503_vm2, %v8187_v60, %v500_v55  ;;  %vm506_vm3 = vcmp.eq.f32.partialorder %v505_v30, 8.507059e+37  ;;  %v822_v7 = vmul.f32 %v806_v14, %v9714_v33  ;;  %v13810_v56 = vsub.f32 %v13795_v31, %v13792_v57  ;;  %v13818_v55 = vld [vmem:[#allocation39_spill] sm:$0xff] }
 0x179   :  { %v743_v28 = vadd.f32 -0.13877685, %v727_v9  ;;  %v509_v52 = vsel %vm506_vm3, %v508_v50, %v504_v24  ;;  %v984_v0 = vsel %vm952_vm12, %v968_v23, %v936_v22  ;;  %v857_v2 = vadd.f32 %v841_v11, %v9674_v10  ;;  %v13812_v10 = vld [vmem:[#allocation42_spill] sm:$0xff] }
 0x17a   :  { %v404_v8 = vsel %vm372_vm5, %v13810_v56, %v13795_v31  ;;  %vm953_vm9 = vcmp.lt.f32.partialorder %v13811_v35, 0.0  ;;  %v1016_v33 = vsub.f32 0.0, %v984_v0  ;;  %v873_v57 = vsel %vm377_vm10, 0.7853982, %v8253_v43 }
 0x17b   :  { %v9793_v30 = vmul.f32 %v509_v52, %v404_v8  ;;  %v838_v60 = vmul.f32 %v822_v7, %v9705_v59  ;;  %v759_v53 = vmul.f32 %v743_v28, %v711_v62  ;;  %v889_v32 = vadd.f32 %v873_v57, %v857_v2 }
 0x17c   :  { %v870_v36 = vsel %vm374_vm11, 0.7853982, %v8253_v43  ;;  %vm902_vm0 = vcmp.gt.f32.partialorder %v13813_v45, %v13812_v10  ;;  %v1032_v25 = vsel %vm1000_vm1, %v1016_v33, %v984_v0  ;;  %vm1001_vm10 = vcmp.lt.f32.partialorder %v13814_v47, 0.0  ;;  %v13822_v45 = vld [vmem:[#allocation38_spill] sm:$0xff]  ;;  %v1608_v47 = vld [vmem:[%s13405_s5 + $0x20] sm:$0xff] }
 0x17d   :  { %v708_v15 = vmul.f32 %v9793_v30, %v9793_v30  ;;  %v8189_v18 = vpop.eup %8188  ;;  %v854_v12 = vadd.f32 %v838_v60, %v9705_v59  ;;  %v775_v51 = vadd.f32 0.19977711, %v759_v53  ;;  %v9813_v26 = vmul.f32 0.41421357, %v13815_v46  ;;  %1454 = vmatpush.msrb.mxu0 %v1032_v25  ;;  %v13820_v53 = vld [vmem:[#allocation15_spill] sm:$0xff] }
 0x17e   :  { %v921_v29 = vsub.f32 1.5707964, %v889_v32  ;;  %vm950_vm11 = vcmp.lt.f32.partialorder %v13816_v63, 0.0  ;;  %v512_v38 = vmul.f32 %v8189_v18, %v9770_v16  ;;  %v520_v42 = vand.u32 2147483647, %v9770_v16 }
 0x17f   :  { %v724_v13 = vmul.f32 0.080537446, %v708_v15  ;;  %v886_v19 = vadd.f32 %v870_v36, %v854_v12  ;;  %v791_v41 = vmul.f32 %v775_v51, %v711_v62  ;;  %vm370_vm7 = vcmp.gt.f32.partialorder %v13817_v40, %v9813_v26  ;;  %v1610_v26 = vld [vmem:[%s13405_s5 + $0x30] sm:$0xff] }
 0x180   :  { %v937_v59 = vsel %vm905_vm13, %v921_v29, %v889_v32  ;;  %v513_v20 = vsub.f32 1.0, %v512_v38  ;;  %v522_v21 = vand.u32 2147483648, %v9770_v16  ;;  %v434_v50 = vsel %vm370_vm7, %v13818_v55, %v13815_v46 }
 0x181   :  { %v740_v1 = vadd.f32 -0.13877685, %v724_v13  ;;  %v969_v44 = vsub.f32 3.1415927, %v937_v59  ;;  %v918_v37 = vsub.f32 1.5707964, %v886_v19  ;;  %vm517_vm8 = vweird.f32 %v8189_v18 }
 0x182   :  { %v807_v58 = vadd.f32 -0.3333295, %v791_v41  ;;  %v514_v14 = vmul.f32 %v8189_v18, %v513_v20  ;;  %v9829_v9 = vmax.f32 %v434_v50, 1e-30  ;;  %vm516_vm12 = vweird.f32 %v9770_v16  ;;  %v13826_v50 = vld [vmem:[#allocation16_spill] sm:$0xff] }
 0x183   :  { %v756_v22 = vmul.f32 %v740_v1, %v708_v15  ;;  %v985_v61 = vsel %vm953_vm9, %v969_v44, %v937_v59  ;;  %v934_v5 = vsel %vm902_vm0, %v918_v37, %v886_v19  ;;  %vm518_vm1 = vmor %vm516_vm12, %vm517_vm8  ;;  %vm521_vm4 = vcmp.eq.f32.partialorder %v520_v42, 8.507059e+37  ;;  %v13825_v19 = vld [vmem:[#allocation14_spill] sm:$0xff] }
 0x184   :  { %v823_v23 = vmul.f32 %v807_v58, %v711_v62  ;;  %v1017_v11 = vsub.f32 0.0, %v985_v61  ;;  %v966_v24 = vsub.f32 3.1415927, %v934_v5  ;;  %v515_v28 = vadd.f32 %v8189_v18, %v514_v14 }
 0x185   :  { %v772_v7 = vadd.f32 0.19977711, %v756_v22  ;;  %v523_v8 = vor.u32 1.1754944e-38, %v522_v21  ;;  %8190 = vrcp.f32 %v9829_v9  ;;  %v13819_v33 = vsub.f32 %v13805_v27, %v13804_v34 }
 0x186   :  { %v839_v56 = vmul.f32 %v823_v23, %v9757_v54  ;;  %v1033_v52 = vsel %vm1001_vm10, %v1017_v11, %v985_v61  ;;  %v982_v0 = vsel %vm950_vm11, %v966_v24, %v934_v5  ;;  %v519_v2 = vsel %vm518_vm1, %v8189_v18, %v515_v28  ;;  %v13827_v23 = vld [vmem:[#allocation24_spill] sm:$0xff]  ;;  %v13828_v11 = vld [vmem:[#allocation25_spill] sm:$0xff] }
 0x187   :  { %v788_v62 = vmul.f32 %v772_v7, %v708_v15  ;;  %1519 = vmatpush.msrb.mxu1 %v1033_v52  ;;  %v1014_v16 = vsub.f32 0.0, %v982_v0  ;;  %v405_v57 = vsel %vm373_vm15, %v13819_v33, %v13805_v27  ;;  %v524_v60 = vsel %vm521_vm4, %v523_v8, %v519_v2 }
 0x188   :  { %v855_v35 = vadd.f32 %v839_v56, %v9757_v54  ;;  %vm998_vm6 = vcmp.lt.f32.partialorder %v13820_v53, 0.0  ;;  %v871_v32 = vsel %vm375_vm14, 0.7853982, %v8253_v43  ;;  %v9856_v10 = vmul.f32 %v524_v60, %v405_v57  ;;  %v13821_v54 = vld [vmem:[#allocation37_spill] sm:$0xff]  ;;  %v13830_v53 = vld [vmem:[#allocation11_spill] sm:$0xff] }
 0x189   :  { %v804_v36 = vadd.f32 -0.3333295, %v788_v62  ;;  %v419_v18 = vadd.f32 %v13822_v45, %v13821_v54  ;;  %v1030_v25 = vsel %vm998_vm6, %v1014_v16, %v982_v0  ;;  %v9864_v12 = vmul.f32 0.41421357, %v13821_v54 }
 0x18a   :  { %v887_v34 = vadd.f32 %v871_v32, %v855_v35  ;;  %1455 = vmatpush.msrb.mxu0 %v1030_v25  ;;  %v709_v3 = vmul.f32 %v9856_v10, %v9856_v10  ;;  %vm13823_vm14 = vcmask 523264   ;;  %vm903_vm3 = vcmp.gt.f32.partialorder %v13782_v49, %v13783_v48 }
 0x18b   :  { %v820_v51 = vmul.f32 %v804_v36, %v708_v15  ;;  %7928 = vmatmul.msk.f32.gmra.mxu2 %vm13823_vm14, %v1608_v47  ;;  %v8191_v4 = vpop.eup %8190  ;;  %vm13824_vm13 = vmmov %vm13823_vm14  ;;  %vm371_vm2 = vcmp.gt.f32.partialorder %v13822_v45, %v9864_v12  ;;  %vm951_vm9 = vcmp.lt.f32.partialorder %v13825_v19, 0.0  ;;  %v868_v41 = vsel %vm372_vm5, 0.7853982, %v8253_v43  ;;  %v1283_v12 = vld [vmem:[%s13403_s3 + $0x8] sm:$0xff] }
 0x18c   :  { %v919_v29 = vsub.f32 1.5707964, %v887_v34  ;;  %7944 = vmatmul.msk.f32.gmra.mxu3 %vm13824_vm13, %v1608_v47  ;;  %v725_v13 = vmul.f32 0.080537446, %v709_v3  ;;  %v467_v15 = vmul.f32 %v8191_v4, %v9829_v9  ;;  %v435_v42 = vsel %vm371_vm2, %v419_v18, %v13821_v54 }
 0x18d   :  { %v836_v63 = vmul.f32 %v820_v51, %v9793_v30  ;;  %vm472_vm0 = vweird.f32 %v8191_v4  ;;  %v475_v20 = vand.u32 2147483647, %v9829_v9  ;;  %v477_v21 = vand.u32 2147483648, %v9829_v9 }
 0x18e   :  { %v935_v38 = vsel %vm903_vm3, %v919_v29, %v887_v34  ;;  %v741_v48 = vadd.f32 -0.13877685, %v725_v13  ;;  %v468_v1 = vsub.f32 1.0, %v467_v15  ;;  %v451_v44 = vmax.f32 %v435_v42, 1e-30 }
 0x18f   :  { %v967_v59 = vsub.f32 3.1415927, %v935_v38  ;;  %v852_v49 = vadd.f32 %v836_v63, %v9793_v30  ;;  %v386_v55 = vsub.f32 %v13817_v40, %v13815_v46  ;;  %vm999_vm5 = vcmp.lt.f32.partialorder %v13826_v50, 0.0 }
 0x190   :  { %v757_v17 = vmul.f32 %v741_v48, %v709_v3  ;;  %v469_v31 = vmul.f32 %v8191_v4, %v468_v1  ;;  %8192 = vrcp.f32 %v451_v44  ;;  %vm471_vm10 = vweird.f32 %v9829_v9  ;;  %v13829_v9 = vld [vmem:[#allocation9_spill] sm:$0xff] }
 0x191   :  { %v983_v37 = vsel %vm951_vm9, %v967_v59, %v935_v38  ;;  %v884_v58 = vadd.f32 %v868_v41, %v852_v49  ;;  %vm900_vm11 = vcmp.gt.f32.partialorder %v13828_v11, %v13827_v23  ;;  %vm473_vm8 = vmor %vm471_vm10, %vm472_vm0  ;;  %v478_v24 = vor.u32 1.1754944e-38, %v477_v21  ;;  %v13831_v59 = vld [vmem:[#allocation31_spill] sm:$0xff]  ;;  %v13832_v49 = vld [vmem:[#allocation32_spill] sm:$0xff] }
 0x192   :  { %v1015_v22 = vsub.f32 0.0, %v983_v37  ;;  %v773_v14 = vadd.f32 0.19977711, %v757_v17  ;;  %v470_v61 = vadd.f32 %v8191_v4, %v469_v31  ;;  %vm476_vm12 = vcmp.eq.f32.partialorder %v475_v20, 8.507059e+37  ;;  %v13833_v21 = vld [vmem:[#allocation10_spill] sm:$0xff]  ;;  %v1301_v17 = vld [vmem:[%s13404_s4 + $0x18] sm:$0xff] }
 0x193   :  { %v916_v30 = vsub.f32 1.5707964, %v884_v58  ;;  %v402_v8 = vsel %vm370_vm7, %v386_v55, %v13817_v40  ;;  %vm948_vm1 = vcmp.lt.f32.partialorder %v13829_v9, 0.0  ;;  %vm996_vm4 = vcmp.lt.f32.partialorder %v13830_v53, 0.0  ;;  %v1609_v31 = vld [vmem:[%s13405_s5 + $0x28] sm:$0xff]  ;;  %1331 = vperm.xlu0 %8127, %v1301_v17   ;;  %v1635_v17 = vld [vmem:[%s13406_s6 + $0x78] sm:$0xff] }
 0x194   :  { %v1031_v5 = vsel %vm999_vm5, %v1015_v22, %v983_v37  ;;  %v789_v28 = vmul.f32 %v773_v14, %v709_v3  ;;  %v474_v46 = vsel %vm473_vm8, %v8191_v4, %v470_v61  ;;  %v490_v34 = vand.u32 2147483647, %v451_v44  ;;  %v13836_v14 = vld [vmem:[#allocation12_spill] sm:$0xff] }
 0x195   :  { %1520 = vmatpush.msrb.mxu1 %v1031_v5  ;;  %v932_v7 = vsel %vm900_vm11, %v916_v30, %v884_v58  ;;  %v479_v52 = vsel %vm476_vm12, %v478_v24, %v474_v46  ;;  %v492_v47 = vand.u32 2147483648, %v451_v44  ;;  %v869_v63 = vsel %vm373_vm15, 0.7853982, %v8253_v43  ;;  %v1310_v58 = vld [vmem:[%s13404_s4 + $0x60] sm:$0xff] }
 0x196   :  { %v964_v56 = vsub.f32 3.1415927, %v932_v7  ;;  %v805_v0 = vadd.f32 -0.3333295, %v789_v28  ;;  %v480_v62 = vmul.f32 %v479_v52, %v402_v8  ;;  %v8193_v2 = vpop.eup %8192  ;;  %vm486_vm14 = vweird.f32 %v451_v44  ;;  %1376 = vperm.xlu1 %8128, %v1310_v58   ;;  %v1306_v8 = vld [vmem:[%s13404_s4 + $0x40] sm:$0xff]  ;;  %v1633_v58 = vld [vmem:[%s13406_s6 + $0x68] sm:$0xff] }
 0x197   :  { %v482_v60 = vmul.f32 %v8193_v2, %v451_v44  ;;  %vm487_vm6 = vweird.f32 %v8193_v2  ;;  %v493_v19 = vor.u32 1.1754944e-38, %v492_v47  ;;  %vm491_vm3 = vcmp.eq.f32.partialorder %v490_v34, 8.507059e+37  ;;  %v1298_v52 = vld [vmem:[%s13404_s4] sm:$0xff]  ;;  %v13842_v34 = vld [vmem:[#allocation7_spill] sm:$0xff] }
 0x198   :  { %v980_v16 = vsel %vm948_vm1, %v964_v56, %v932_v7  ;;  %v821_v33 = vmul.f32 %v805_v0, %v709_v3  ;;  %v706_v57 = vmul.f32 %v480_v62, %v480_v62  ;;  %v387_v3 = vsub.f32 %v13822_v45, %v13821_v54  ;;  %vm488_vm13 = vmor %vm486_vm14, %vm487_vm6  ;;  %v1309_v56 = vld [vmem:[%s13404_s4 + $0x58] sm:$0xff]  ;;  %v13838_v0 = vld [vmem:[#allocation21_spill] sm:$0xff] }
 0x199   :  { %v1012_v35 = vsub.f32 0.0, %v980_v16  ;;  %v483_v25 = vsub.f32 1.0, %v482_v60  ;;  %vm901_vm9 = vcmp.gt.f32.partialorder %v13832_v49, %v13831_v59  ;;  %vm949_vm15 = vcmp.lt.f32.partialorder %v13833_v21, 0.0  ;;  %1371 = vperm.xlu2 %8129, %v1309_v56   ;;  %v1282_v47 = vld [vmem:[%s13403_s3] sm:$0xff]  ;;  %v13852_v49 = vld [vmem:[#allocation8_spill] sm:$0xff]  ;;  %v1621_v56 = vld [vmem:[%s13406_s6 + $0x8] sm:$0xff] }
 0x19a   :  { %v837_v36 = vmul.f32 %v821_v33, %v9856_v10  ;;  %v722_v18 = vmul.f32 0.080537446, %v706_v57  ;;  %v403_v54 = vsel %vm371_vm2, %v387_v3, %v13822_v45  ;;  %vm13834_vm0 = vcmask 523264   ;;  %v13841_v33 = vld [vmem:[#allocation5_spill] sm:$0xff]  ;;  %v1285_v21 = vld [vmem:[%s13403_s3 + $0x18] sm:$0xff] }
 0x19b   :  { %v1028_v32 = vsel %vm996_vm4, %v1012_v35, %v980_v16  ;;  %v484_v29 = vmul.f32 %v8193_v2, %v483_v25  ;;  %7929 = vmatmul.msk.f32.gmra.mxu2 %vm13834_vm0, %v1609_v31  ;;  %vm13835_vm5 = vmmov %vm13834_vm0  ;;  %vm997_vm10 = vcmp.lt.f32.partialorder %v13836_v14, 0.0  ;;  %v866_v7 = vsel %vm370_vm7, 0.7853982, %v8253_v43  ;;  %1316 = vperm.xlu0 %8127, %v1298_v52   ;;  %v1611_v25 = vld [vmem:[%s13405_s5 + $0x38] sm:$0xff]  ;;  %v1288_v14 = vld [vmem:[%s13403_s3 + $0x30] sm:$0xff] }
 0x19c   :  { %1456 = vmatpush.msrb.mxu0 %v1028_v32  ;;  %v853_v51 = vadd.f32 %v837_v36, %v9856_v10  ;;  %v738_v4 = vadd.f32 -0.13877685, %v722_v18  ;;  %7945 = vmatmul.msk.f32.gmra.mxu3 %vm13835_vm5, %v1609_v31  ;;  %vm13837_vm7 = vmmov %vm13834_vm0  ;;  %vm946_vm12 = vcmp.lt.f32.partialorder %v13841_v33, 0.0  ;;  %v1308_v36 = vld [vmem:[%s13404_s4 + $0x50] sm:$0xff]  ;;  %v1303_v18 = vld [vmem:[%s13404_s4 + $0x28] sm:$0xff]  ;;  %vm994_vm1 = vcmp.lt.f32.partialorder %v13842_v34, 0.0 }
 0x19d   :  { %v485_v38 = vadd.f32 %v8193_v2, %v484_v29  ;;  %vm13840_vm8 = vmmov %vm13834_vm0  ;;  %v867_v29 = vsel %vm371_vm2, 0.7853982, %v8253_v43  ;;  %v1612_v43 = vld [vmem:[%s13405_s5 + $0x40] sm:$0xff]  ;;  %v1291_v52 = vld [vmem:[%s13403_s3 + $0x48] sm:$0xff] }
 0x19e   :  { %v885_v13 = vadd.f32 %v869_v63, %v853_v51  ;;  %v754_v15 = vmul.f32 %v738_v4, %v706_v57  ;;  %1356 = vperm.xlu1 %8128, %v1306_v8   ;;  %vm13843_vm4 = vmmov %vm13834_vm0  ;;  %v1616_v31 = vld [vmem:[%s13405_s5 + $0x60] sm:$0xff]  ;;  %v1623_v8 = vld [vmem:[%s13406_s6 + $0x18] sm:$0xff] }
 0x19f   :  { %v489_v10 = vsel %vm488_vm13, %v8193_v2, %v485_v38  ;;  %vm13844_vm6 = vmmov %vm13834_vm0  ;;  %v1937_v33 = vld [vmem:[%s13408_s8 + $0x18] sm:$0xff] }
 0x1a0   :  { %v917_v41 = vsub.f32 1.5707964, %v885_v13  ;;  %v770_v42 = vadd.f32 0.19977711, %v754_v15  ;;  %v494_v6 = vsel %vm491_vm3, %v493_v19, %v489_v10  ;;  %vm13845_vm14 = vmmov %vm13834_vm0  ;;  %v13847_v15 = vld [vmem:[#allocation26_spill] sm:$0xff]  ;;  %v1305_v19 = vld [vmem:[%s13404_s4 + $0x38] sm:$0xff] }
 0x1a1   :  { %v495_v1 = vmul.f32 %v494_v6, %v403_v54  ;;  %1366 = vperm.xlu2 %8129, %v1308_v36   ;;  %vm13849_vm3 = vmmov %vm13834_vm0  ;;  %v1302_v6 = vld [vmem:[%s13404_s4 + $0x20] sm:$0xff]  ;;  %v1631_v36 = vld [vmem:[%s13406_s6 + $0x58] sm:$0xff] }
 0x1a2   :  { %v933_v27 = vsel %vm901_vm9, %v917_v41, %v885_v13  ;;  %v786_v48 = vmul.f32 %v770_v42, %v706_v57  ;;  %v13846_v13 = vld [vmem:[#allocation23_spill] sm:$0xff]  ;;  %v13848_v42 = vld [vmem:[#allocation6_spill] sm:$0xff]  ;;  %vm13850_vm9 = vmmov %vm13834_vm0 }
 0x1a3   :  { %v965_v20 = vsub.f32 3.1415927, %v933_v27  ;;  %v707_v37 = vmul.f32 %v495_v1, %v495_v1  ;;  %7930 = vmatmul.msk.f32.gmra.mxu2 %vm13837_vm7, %v1610_v26  ;;  %vm899_vm13 = vcmp.gt.f32.partialorder %v13847_v15, %v13846_v13  ;;  %v1300_v41 = vld [vmem:[%s13404_s4 + $0x10] sm:$0xff]  ;;  %vm947_vm2 = vcmp.lt.f32.partialorder %v13848_v42, 0.0  ;;  %vm13853_vm5 = vmmov %vm13849_vm3  ;;  %1703 = vperm.xlu0 %8127, %v1633_v58   ;;  %v2079_v15 = vld [vmem:[%s13410_s10 + $0x38] sm:$0xff] }
 0x1a4   :  { %v802_v44 = vadd.f32 -0.3333295, %v786_v48  ;;  %7946 = vmatmul.msk.f32.gmra.mxu3 %vm13840_vm8, %v1610_v26  ;;  %v1284_v48 = vld [vmem:[%s13403_s3 + $0x10] sm:$0xff]  ;;  %vm13855_vm7 = vmmov %vm13849_vm3  ;;  %v10100_v26 = vpop.f32.mrf.mxu2 }
 0x1a5   :  { %v981_v55 = vsel %vm949_vm15, %v965_v20, %v933_v27  ;;  %v723_v30 = vmul.f32 0.080537446, %v707_v37  ;;  %vm13851_vm15 = vmmov %vm13834_vm0  ;;  %vm995_vm0 = vcmp.lt.f32.partialorder %v13852_v49, 0.0  ;;  %v1613_v27 = vld [vmem:[%s13405_s5 + $0x48] sm:$0xff]  ;;  %v1614_v20 = vld [vmem:[%s13405_s5 + $0x50] sm:$0xff] }
 0x1a6   :  { %v1013_v50 = vsub.f32 0.0, %v981_v55  ;;  %v818_v22 = vmul.f32 %v802_v44, %v706_v57  ;;  %1341 = vperm.xlu1 %8128, %v1303_v18   ;;  %vm13857_vm8 = vmmov %vm13849_vm3  ;;  %v1615_v44 = vld [vmem:[%s13405_s5 + $0x58] sm:$0xff]  ;;  %v1934_v18 = vld [vmem:[%s13408_s8] sm:$0xff] }
 0x1a7   :  { %v739_v23 = vadd.f32 -0.13877685, %v723_v30  ;;  %v1617_v30 = vld [vmem:[%s13405_s5 + $0x68] sm:$0xff]  ;;  %v1622_v42 = vld [vmem:[%s13406_s6 + $0x10] sm:$0xff] }
 0x1a8   :  { %v1029_v61 = vsel %vm997_vm10, %v1013_v50, %v981_v55  ;;  %v834_v5 = vmul.f32 %v818_v22, %v480_v62  ;;  %vm13854_vm10 = vmmov %vm13849_vm3  ;;  %v1287_v55 = vld [vmem:[%s13403_s3 + $0x28] sm:$0xff]  ;;  %v1630_v50 = vld [vmem:[%s13406_s6 + $0x50] sm:$0xff] }
 0x1a9   :  { %1521 = vmatpush.msrb.mxu1 %v1029_v61  ;;  %v755_v24 = vmul.f32 %v739_v23, %v707_v37  ;;  %1351 = vperm.xlu2 %8129, %v1305_v19   ;;  %v1632_v22 = vld [vmem:[%s13406_s6 + $0x60] sm:$0xff]  ;;  %v1627_v61 = vld [vmem:[%s13406_s6 + $0x38] sm:$0xff]  ;;  %v1618_v23 = vld [vmem:[%s13405_s5 + $0x70] sm:$0xff] }
 0x1aa   :  { %v850_v11 = vadd.f32 %v834_v5, %v480_v62  ;;  %v13839_v62 = vld [vmem:[#allocation22_spill] sm:$0xff]  ;;  %v2074_v19 = vld [vmem:[%s13410_s10 + $0x10] sm:$0xff] }
 0x1ab   :  { %v771_v46 = vadd.f32 0.19977711, %v755_v24  ;;  %vm898_vm11 = vcmp.gt.f32.partialorder %v13839_v62, %v13838_v0  ;;  %7931 = vmatmul.msk.f32.gmra.mxu2 %vm13843_vm4, %v1611_v25  ;;  %1688 = vperm.xlu0 %8127, %v1630_v50   ;;  %v1629_v5 = vld [vmem:[%s13406_s6 + $0x48] sm:$0xff]  ;;  %v1624_v24 = vld [vmem:[%s13406_s6 + $0x20] sm:$0xff]  ;;  %v1292_v62 = vld [vmem:[%s13403_s3 + $0x50] sm:$0xff] }
 0x1ac   :  { %v882_v28 = vadd.f32 %v866_v7, %v850_v11  ;;  %7947 = vmatmul.msk.f32.gmra.mxu3 %vm13844_vm6, %v1611_v25  ;;  %v1289_v11 = vld [vmem:[%s13403_s3 + $0x38] sm:$0xff]  ;;  %v1626_v7 = vld [vmem:[%s13406_s6 + $0x30] sm:$0xff]  ;;  %v1620_v0 = vld [vmem:[%s13406_s6] sm:$0xff] }
 0x1ad   :  { %v787_v9 = vmul.f32 %v771_v46, %v707_v37  ;;  %v1290_v46 = vld [vmem:[%s13403_s3 + $0x40] sm:$0xff] }
 0x1ae   :  { %v914_v40 = vsub.f32 1.5707964, %v882_v28  ;;  %1326 = vperm.xlu1 %8128, %v1300_v41   ;;  %v1294_v25 = vld [vmem:[%s13403_s3 + $0x60] sm:$0xff]  ;;  %v1296_v41 = vld [vmem:[%s13403_s3 + $0x70] sm:$0xff] }
 0x1af   :  { %v803_v16 = vadd.f32 -0.3333295, %v787_v9  ;;  %v1940_v9 = vld [vmem:[%s13408_s8 + $0x30] sm:$0xff] }
 0x1b0   :  { %v930_v2 = vsel %vm898_vm11, %v914_v40, %v882_v28  ;;  %vm13856_vm11 = vmmov %vm13849_vm3  ;;  %v1619_v28 = vld [vmem:[%s13405_s5 + $0x78] sm:$0xff]  ;;  %v10102_v40 = vpop.f32.mrf.mxu3  ;;  %s8261_s5 = smov 256  }
 0x1b1   :  { %v962_v35 = vsub.f32 3.1415927, %v930_v2  ;;  %v819_v57 = vmul.f32 %v803_v16, %v707_v37  ;;  %1336 = vperm.xlu2 %8129, %v1302_v6   ;;  %v1286_v37 = vld [vmem:[%s13403_s3 + $0x20] sm:$0xff]  ;;  %v2073_v6 = vld [vmem:[%s13410_s10 + $0x8] sm:$0xff] }
 0x1b3   :  { %v978_v60 = vsel %vm946_vm12, %v962_v35, %v930_v2  ;;  %v835_v32 = vmul.f32 %v819_v57, %v495_v1  ;;  %7932 = vmatmul.msk.f32.gmra.mxu2 %vm13849_vm3, %v1612_v43  ;;  %vm13858_vm12 = vmmov %vm13849_vm3  ;;  %1673 = vperm.xlu0 %8127, %v1627_v61   ;;  %v10115_v2 = vpop.f32.mrf.mxu2  ;;  %v1634_v35 = vld [vmem:[%s13406_s6 + $0x70] sm:$0xff]  ;;  %v1293_v57 = vld [vmem:[%s13403_s3 + $0x58] sm:$0xff] }
 0x1b4   :  { %v1010_v53 = vsub.f32 0.0, %v978_v60  ;;  %7948 = vmatmul.msk.f32.gmra.mxu3 %vm13850_vm9, %v1612_v43 }
 0x1b5   :  { %v851_v4 = vadd.f32 %v835_v32, %v495_v1  ;;  %v1299_v1 = vld [vmem:[%s13404_s4 + $0x8] sm:$0xff] }
 0x1b6   :  { %v1026_v51 = vsel %vm994_vm1, %v1010_v53, %v978_v60  ;;  %vm13859_vm1 = vmmov %vm13849_vm3  ;;  %1713 = vperm.xlu1 %8128, %v1635_v17   ;;  %v1939_v32 = vld [vmem:[%s13408_s8 + $0x28] sm:$0xff] }
 0x1b7   :  { %1457 = vmatpush.msrb.mxu0 %v1026_v51  ;;  %v883_v3 = vadd.f32 %v867_v29, %v851_v4  ;;  %vm13860_vm4 = vmmov %vm13859_vm1  ;;  %v1936_v51 = vld [vmem:[%s13408_s8 + $0x10] sm:$0xff]  ;;  %v1628_v4 = vld [vmem:[%s13406_s6 + $0x40] sm:$0xff] }
 0x1b8   :  { %7892 = vmatmul.msk.f32.vlgmr.msrb.gmra.mxu0 %vm13845_vm14, %v1282_v47  ;;  %vm13861_vm6 = vmmov %vm13859_vm1  ;;  %v10117_v16 = vpop.f32.mrf.mxu3  ;;  %v2077_v29 = vld [vmem:[%s13410_s10 + $0x28] sm:$0xff] }
 0x1b9   :  { %v915_v63 = vsub.f32 1.5707964, %v883_v3  ;;  %1321 = vperm.xlu2 %8129, %v1299_v1   ;;  %vm13862_vm14 = vmmov %vm13859_vm1 }
 0x1ba   :  { %vm13865_vm3 = vmmov %vm13859_vm1 }
 0x1bb   :  { %v931_v38 = vsel %vm899_vm13, %v915_v63, %v883_v3  ;;  %7933 = vmatmul.msk.f32.gmra.mxu2 %vm13854_vm10, %v1613_v27  ;;  %vm13863_vm13 = vmmov %vm13859_vm1  ;;  %1658 = vperm.xlu0 %8127, %v1624_v24   ;;  %v10130_v60 = vpop.f32.mrf.mxu2  ;;  %v1295_v3 = vld [vmem:[%s13403_s3 + $0x68] sm:$0xff] }
 0x1bc   :  { %v963_v45 = vsub.f32 3.1415927, %v931_v38  ;;  %7949 = vmatmul.msk.f32.gmra.mxu3 %vm13855_vm7, %v1613_v27  ;;  %vm13866_vm9 = vmmov %vm13859_vm1  ;;  %v1941_v27 = vld [vmem:[%s13408_s8 + $0x38] sm:$0xff] }
 0x1be   :  { %v979_v10 = vsel %vm947_vm2, %v963_v45, %v931_v38  ;;  %vm13864_vm2 = vmmov %vm13859_vm1  ;;  %1698 = vperm.xlu1 %8128, %v1632_v22   ;;  %v1625_v38 = vld [vmem:[%s13406_s6 + $0x28] sm:$0xff] }
 0x1bf   :  { %v1011_v59 = vsub.f32 0.0, %v979_v10 }
 0x1c0   :  { %7893 = vmatmul.msk.f32.gmra.mxu0 %vm13851_vm15, %v1283_v12  ;;  %vm13867_vm15 = vmmov %vm13859_vm1  ;;  %v10132_v53 = vpop.f32.mrf.mxu3 }
 0x1c1   :  { %v1027_v54 = vsel %vm995_vm0, %v1011_v59, %v979_v10  ;;  %vm13868_vm0 = vmmov %vm13859_vm1  ;;  %1708 = vperm.xlu2 %8129, %v1634_v35   ;;  %v1297_v10 = vld [vmem:[%s13403_s3 + $0x78] sm:$0xff]  ;;  %v10198_v59 = vpop.permute.xlu0 %1391 }
 0x1c2   :  { %1522 = vmatpush.msrb.mxu1 %v1027_v54  ;;  %vm13870_vm10 = vmmov %vm13868_vm0 }
 0x1c3   :  { %7908 = vmatmul.msk.f32.vlgmr.msrb.gmra.mxu1 %vm13853_vm5, %v1282_v47  ;;  %7934 = vmatmul.msk.f32.gmra.mxu2 %vm13858_vm12, %v1614_v20  ;;  %vm13869_vm5 = vmmov %vm13868_vm0  ;;  %v10148_v34 = vpop.f32.mrf.mxu2 }
 0x1c4   :  { %7950 = vmatmul.msk.f32.gmra.mxu3 %vm13859_vm1, %v1614_v20  ;;  %vm13871_vm7 = vmmov %vm13868_vm0  ;;  %1643 = vperm.xlu0 %8127, %v1621_v56  }
 0x1c5   :  { %vm13874_vm12 = vmmov %vm13868_vm0 }
 0x1c6   :  { %1683 = vperm.xlu1 %8128, %v1629_v5   ;;  %vm13875_vm1 = vmmov %vm13868_vm0 }
 0x1c8   :  { %7894 = vmatmul.msk.f32.gmra.mxu0 %vm13856_vm11, %v1284_v48  ;;  %vm13872_vm11 = vmmov %vm13868_vm0  ;;  %v10150_v47 = vpop.f32.mrf.mxu3 }
 0x1c9   :  { %1693 = vperm.xlu2 %8129, %v1631_v36   ;;  %v10227_v17 = vpop.permute.xlu0 %1386 }
 0x1cb   :  { %7909 = vmatmul.msk.f32.gmra.mxu1 %vm13857_vm8, %v1283_v12  ;;  %7935 = vmatmul.msk.f32.gmra.mxu2 %vm13862_vm14, %v1615_v44  ;;  %vm13873_vm8 = vmmov %vm13868_vm0  ;;  %v2076_v12 = vld [vmem:[%s13410_s10 + $0x20] sm:$0xff] }
 0x1cc   :  { %7951 = vmatmul.msk.f32.gmra.mxu3 %vm13863_vm13, %v1615_v44  ;;  %vm13878_vm14 = vmmov %vm13868_vm0  ;;  %1974 = vperm.xlu0 %8127, %v1940_v9  }
 0x1cd   :  { %vm13879_vm13 = vmmov %vm13868_vm0 }
 0x1ce   :  { %1668 = vperm.xlu1 %8128, %v1626_v7   ;;  %v10213_v1 = vpop.permute.xlu1 %1381 }
 0x1d0   :  { %7895 = vmatmul.msk.f32.gmra.mxu0 %vm13860_vm4, %v1285_v21  ;;  %vm13876_vm4 = vmmov %vm13868_vm0 }
 0x1d1   :  { %1678 = vperm.xlu2 %8129, %v1628_v4   ;;  %v10244_v5 = vpop.permute.xlu0 %1361 }
 0x1d3   :  { %7910 = vmatmul.msk.f32.gmra.mxu1 %vm13861_vm6, %v1284_v48  ;;  %7936 = vmatmul.msk.f32.gmra.mxu2 %vm13866_vm9, %v1616_v31  ;;  %vm13877_vm6 = vmmov %vm13868_vm0 }
 0x1d4   :  { %7952 = vmatmul.msk.f32.gmra.mxu3 %vm13867_vm15, %v1616_v31  ;;  %vm13882_vm9 = vmmov %vm13868_vm0  ;;  %1959 = vperm.xlu0 %8127, %v1937_v33  }
 0x1d5   :  { %vm13883_vm15 = vmmov %vm13868_vm0 }
 0x1d6   :  { %1653 = vperm.xlu1 %8128, %v1623_v8  }
 0x1d8   :  { %7896 = vmatmul.msk.f32.gmra.mxu0 %vm13864_vm2, %v1286_v37  ;;  %vm13880_vm2 = vmmov %vm13868_vm0 }
 0x1d9   :  { %1663 = vperm.xlu2 %8129, %v1625_v38  }
 0x1db   :  { %7911 = vmatmul.msk.f32.gmra.mxu1 %vm13865_vm3, %v1285_v21  ;;  %7937 = vmatmul.msk.f32.gmra.mxu2 %vm13870_vm10, %v1617_v30  ;;  %vm13881_vm3 = vmmov %vm13868_vm0 }
 0x1dc   :  { %7953 = vmatmul.msk.f32.gmra.mxu3 %vm13871_vm7, %v1617_v30  ;;  %vm13885_vm10 = vmmov %vm13868_vm0  ;;  %1944 = vperm.xlu0 %8127, %v1934_v18   ;;  %v1935_v30 = vld [vmem:[%s13408_s8 + $0x8] sm:$0xff] }
 0x1dd   :  { %vm13886_vm7 = vmmov %vm13868_vm0 }
 0x1de   :  { %1638 = vperm.xlu1 %8128, %v1620_v0  }
 0x1e0   :  { %7897 = vmatmul.msk.f32.gmra.mxu0 %vm13868_vm0, %v1287_v55 }
 0x1e1   :  { %1648 = vperm.xlu2 %8129, %v1622_v42  }
 0x1e3   :  { %7912 = vmatmul.msk.f32.gmra.mxu1 %vm13869_vm5, %v1286_v37  ;;  %7938 = vmatmul.msk.f32.gmra.mxu2 %vm13874_vm12, %v1618_v23  ;;  %vm13884_vm5 = vmmov %vm13868_vm0  ;;  %v1938_v37 = vld [vmem:[%s13408_s8 + $0x20] sm:$0xff] }
 0x1e4   :  { %7954 = vmatmul.msk.f32.gmra.mxu3 %vm13875_vm1, %v1618_v23  ;;  %2107 = vperm.xlu0 %8127, %v2077_v29   ;;  %vm13889_vm12 = vmmov %vm13868_vm0 }
 0x1e5   :  { %vm13890_vm1 = vmmov %vm13868_vm0 }
 0x1e6   :  { %1969 = vperm.xlu1 %8128, %v1939_v32  }
 0x1e8   :  { %7898 = vmatmul.msk.f32.gmra.mxu0 %vm13872_vm11, %v1288_v14  ;;  %vm13887_vm11 = vmmov %vm13868_vm0 }
 0x1e9   :  { %1979 = vperm.xlu2 %8129, %v1941_v27  }
 0x1eb   :  { %7913 = vmatmul.msk.f32.gmra.mxu1 %vm13873_vm8, %v1287_v55  ;;  %7939 = vmatmul.msk.f32.gmra.mxu2 %vm13878_vm14, %v1619_v28  ;;  %vm13888_vm8 = vmmov %vm13868_vm0 }
 0x1ec   :  { %7955 = vmatmul.msk.f32.gmra.mxu3 %vm13879_vm13, %v1619_v28  ;;  %2092 = vperm.xlu0 %8127, %v2074_v19   ;;  %vm13893_vm14 = vmmov %vm13868_vm0  ;;  %v2078_v28 = vld [vmem:[%s13410_s10 + $0x30] sm:$0xff] }
 0x1ed   :  { %vm13894_vm13 = vmmov %vm13868_vm0 }
 0x1ee   :  { %1954 = vperm.xlu1 %8128, %v1936_v51  }
 0x1f0   :  { %7899 = vmatmul.msk.f32.gmra.mxu0 %vm13876_vm4, %v1289_v11  ;;  %vm13891_vm4 = vmmov %vm13868_vm0 }
 0x1f1   :  { %1964 = vperm.xlu2 %8129, %v1938_v37  }
 0x1f3   :  { %7914 = vmatmul.msk.f32.gmra.mxu1 %vm13877_vm6, %v1288_v14  ;;  %vm13892_vm6 = vmmov %vm13868_vm0  ;;  %v10215_v20 = vpop.permute.xlu2 %1371 }
 0x1f6   :  { %2117 = vperm.xlu1 %8128, %v2079_v15  }
 0x1f8   :  { %7900 = vmatmul.msk.f32.gmra.mxu0 %vm13880_vm2, %v1290_v46  ;;  %vm13896_vm2 = vmmov %vm13868_vm0 }
 0x1f9   :  { %1949 = vperm.xlu2 %8129, %v1935_v30  }
 0x1fb   :  { %7915 = vmatmul.msk.f32.gmra.mxu1 %vm13881_vm3, %v1289_v11  ;;  %v10242_v61 = vpop.permute.xlu2 %1366 }
 0x1fe   :  { %2102 = vperm.xlu1 %8128, %v2076_v12  }
 0x200   :  { %7901 = vmatmul.msk.f32.gmra.mxu0 %vm13882_vm9, %v1291_v52 }
 0x201   :  { %2112 = vperm.xlu2 %8129, %v2078_v28  }
 0x203   :  { %7916 = vmatmul.msk.f32.gmra.mxu1 %vm13883_vm15, %v1290_v46  ;;  %v10259_v56 = vpop.permute.xlu2 %1351 }
 0x204   :  { %13902 = vst [vmem:[#allocation84_spill] sm:$0xff] %v10259_v56 }
 0x206   :  { %2087 = vperm.xlu1 %8128, %v2073_v6  }
 0x208   :  { %7902 = vmatmul.msk.f32.gmra.mxu0 %vm13868_vm0, %v1292_v62  ;;  %v10229_v31 = vpop.permute.xlu1 %1376 }
 0x20b   :  { %7917 = vmatmul.msk.f32.gmra.mxu1 %vm13884_vm5, %v1291_v52  ;;  %v10263_v52 = vpop.permute.xlu0 %1346  ;;  %v10274_v32 = vpop.permute.xlu2 %1336 }
 0x20c   :  { %13904 = vst [vmem:[#allocation86_spill] sm:$0xff] %v10263_v52 }
 0x20d   :  { %13908 = vst [vmem:[#allocation60_spill] sm:$0xff] %v10274_v32 }
 0x20e   :  { %v10166_v63 = vpop.f32.mrf.mxu2 }
 0x20f   :  { %v10168_v13 = vpop.f32.mrf.mxu3 }
 0x210   :  { %7903 = vmatmul.msk.f32.gmra.mxu0 %vm13885_vm10, %v1293_v57  ;;  %v10248_v11 = vpop.permute.xlu1 %1356 }
 0x213   :  { %7918 = vmatmul.msk.f32.gmra.mxu1 %vm13886_vm7, %v1292_v62  ;;  %v2075_v62 = vld [vmem:[%s13410_s10 + $0x18] sm:$0xff]  ;;  %v10276_v36 = vpop.permute.xlu0 %1331  ;;  %v10287_v15 = vpop.permute.xlu2 %1321 }
 0x214   :  { %2097 = vperm.xlu2 %8129, %v2075_v62   ;;  %13909 = vst [vmem:[#allocation72_spill] sm:$0xff] %v10276_v36 }
 0x215   :  { %13913 = vst [vmem:[#allocation73_spill] sm:$0xff] %v10287_v15 }
 0x218   :  { %7904 = vmatmul.msk.f32.gmra.mxu0 %vm13887_vm11, %v1294_v25  ;;  %v10265_v9 = vpop.permute.xlu1 %1341 }
 0x219   :  { %13905 = vst [vmem:[#allocation87_spill] sm:$0xff] %v10265_v9 }
 0x21b   :  { %7919 = vmatmul.msk.f32.gmra.mxu1 %vm13888_vm8, %v1293_v57  ;;  %v10291_v12 = vpop.permute.xlu0 %1316  ;;  %v1709_v6 = vpop.permute.xlu2 %1708 }
 0x21c   :  { %13915 = vst [vmem:[#allocation75_spill] sm:$0xff] %v10291_v12 }
 0x21e   :  { %v10184_v43 = vpop.f32.mrf.mxu2 }
 0x21f   :  { %v10186_v45 = vpop.f32.mrf.mxu3 }
 0x220   :  { %7905 = vmatmul.msk.f32.gmra.mxu0 %vm13889_vm12, %v1295_v3  ;;  %v10283_v29 = vpop.permute.xlu1 %1326 }
 0x221   :  { %13911 = vst [vmem:[#allocation66_spill] sm:$0xff] %v10283_v29 }
 0x223   :  { %7920 = vmatmul.msk.f32.gmra.mxu1 %vm13890_vm1, %v1294_v25  ;;  %v2072_v25 = vld [vmem:[%s13410_s10] sm:$0xff]  ;;  %v1704_v28 = vpop.permute.xlu0 %1703 }
 0x224   :  { %2082 = vperm.xlu2 %8129, %v2072_v25  }
 0x226   :  { %v10201_v49 = vpop.f32.mrf.mxu2 }
 0x227   :  { %v10203_v54 = vpop.f32.mrf.mxu3 }
 0x228   :  { %7906 = vmatmul.msk.f32.gmra.mxu0 %vm13891_vm4, %v1296_v41  ;;  %v1714_v42 = vpop.permute.xlu1 %1713 }
 0x22b   :  { %7921 = vmatmul.msk.f32.gmra.mxu1 %vm13892_vm6, %v1295_v3 }
 0x22e   :  { %v10218_v21 = vpop.f32.mrf.mxu2 }
 0x22f   :  { %v10220_v44 = vpop.f32.mrf.mxu3 }
 0x230   :  { %7907 = vmatmul.msk.f32.gmra.mxu0 %vm13893_vm14, %v1297_v10  ;;  %v1699_v62 = vpop.permute.xlu1 %1698 }
 0x233   :  { %7922 = vmatmul.msk.f32.gmra.mxu1 %vm13894_vm13, %v1296_v41 }
 0x235   :  { %v10211_v48 = vpop.f32.mrf.mxu0 }
 0x236   :  { %13895 = vst [vmem:[#allocation82_spill] sm:$0xff] %v10211_v48  ;;  %v10233_v50 = vpop.f32.mrf.mxu2 }
 0x237   :  { %v10235_v22 = vpop.f32.mrf.mxu3 }
 0x238   :  { %v1684_v48 = vpop.permute.xlu1 %1683 }
 0x23b   :  { %7923 = vmatmul.msk.f32.gmra.mxu1 %vm13896_vm2, %v1297_v10 }
 0x23d   :  { %v10225_v58 = vpop.f32.mrf.mxu0 }
 0x23e   :  { %13897 = vst [vmem:[#allocation70_spill] sm:$0xff] %v10225_v58  ;;  %v10250_v24 = vpop.f32.mrf.mxu2 }
 0x23f   :  { %v10252_v7 = vpop.f32.mrf.mxu3 }
 0x240   :  { %v10231_v55 = vpop.f32.mrf.mxu1 }
 0x241   :  { %13898 = vst [vmem:[#allocation85_spill] sm:$0xff] %v10231_v55 }
 0x245   :  { %v10240_v14 = vpop.f32.mrf.mxu0 }
 0x246   :  { %13899 = vst [vmem:[#allocation78_spill] sm:$0xff] %v10240_v14  ;;  %v1811_v0 = vpop.f32.mrf.mxu2 }
 0x247   :  { %v1876_v33 = vpop.f32.mrf.mxu3 }
 0x248   :  { %v10246_v23 = vpop.f32.mrf.mxu1 }
 0x249   :  { %13900 = vst [vmem:[#allocation77_spill] sm:$0xff] %v10246_v23 }
 0x24d   :  { %v10257_v46 = vpop.f32.mrf.mxu0 }
 0x24e   :  { %13901 = vst [vmem:[#allocation83_spill] sm:$0xff] %v10257_v46  ;;  %v1814_v18 = vpop.f32.mrf.mxu2 }
 0x24f   :  { %v1879_v4 = vpop.f32.mrf.mxu3 }
 0x250   :  { %v10261_v8 = vpop.f32.mrf.mxu1 }
 0x251   :  { %13903 = vst [vmem:[#allocation59_spill] sm:$0xff] %v10261_v8  ;;  %v1694_v8 = vpop.permute.xlu2 %1693 }
 0x255   :  { %v10270_v35 = vpop.f32.mrf.mxu0 }
 0x256   :  { %13906 = vst [vmem:[#allocation71_spill] sm:$0xff] %v10270_v35  ;;  %v1817_v38 = vpop.f32.mrf.mxu2 }
 0x257   :  { %v1882_v41 = vpop.f32.mrf.mxu3 }
 0x258   :  { %v10272_v57 = vpop.f32.mrf.mxu1  ;;  %v1883_v9 = vadd.f32 %v1882_v41, %v1699_v62 }
 0x259   :  { %13907 = vst [vmem:[#allocation68_spill] sm:$0xff] %v10272_v57  ;;  %v1689_v57 = vpop.permute.xlu0 %1688  ;;  %v1679_v52 = vpop.permute.xlu2 %1678 }
 0x25d   :  { %v10281_v51 = vpop.f32.mrf.mxu0 }
 0x25e   :  { %13910 = vst [vmem:[#allocation81_spill] sm:$0xff] %v10281_v51  ;;  %v1820_v27 = vpop.f32.mrf.mxu2 }
 0x25f   :  { %v1885_v30 = vpop.f32.mrf.mxu3  ;;  %v1821_v14 = vadd.f32 %v1820_v27, %v1704_v28 }
 0x260   :  { %v10285_v3 = vpop.f32.mrf.mxu1  ;;  %v1886_v36 = vadd.f32 %v1885_v30, %v1704_v28 }
 0x261   :  { %13912 = vst [vmem:[#allocation67_spill] sm:$0xff] %v10285_v3 }
 0x265   :  { %v10289_v19 = vpop.f32.mrf.mxu0 }
 0x266   :  { %13914 = vst [vmem:[#allocation74_spill] sm:$0xff] %v10289_v19  ;;  %v1823_v39 = vpop.f32.mrf.mxu2 }
 0x267   :  { %v1888_v23 = vpop.f32.mrf.mxu3  ;;  %v1824_v12 = vadd.f32 %v1823_v39, %v1709_v6  ;;  %v1815_v39 = vadd.f32 %v1814_v18, %v1694_v8 }
 0x268   :  { %v10293_v10 = vpop.f32.mrf.mxu1 }
 0x269   :  { %13916 = vst [vmem:[#allocation76_spill] sm:$0xff] %v10293_v10  ;;  %v1889_v10 = vadd.f32 %v1888_v23, %v1709_v6  ;;  %v1922_v32 = vmax.f32 %v1824_v12, 0.0  ;;  %v1674_v23 = vpop.permute.xlu0 %1673  ;;  %v1921_v6 = vmax.f32 %v1886_v36, 0.0  ;;  %v1669_v12 = vpop.permute.xlu1 %1668  ;;  %v1916_v41 = vmax.f32 %v1815_v39, 0.0 }
 0x26b   :  { %v1923_v19 = vmax.f32 %v1889_v10, 0.0 }
 0x26d   :  { %v10295_v37 = vpop.f32.mrf.mxu0 }
 0x26e   :  { %13917 = vst [vmem:[#allocation44_spill] sm:$0xff] %v10295_v37  ;;  %v1826_v58 = vpop.f32.mrf.mxu2 }
 0x26f   :  { %v1827_v29 = vadd.f32 %v1826_v58, %v1714_v42  ;;  %v1891_v46 = vpop.f32.mrf.mxu3  ;;  %v1812_v58 = vadd.f32 %v1811_v0, %v1689_v57 }
 0x270   :  { %v10297_v25 = vpop.f32.mrf.mxu1  ;;  %v1892_v35 = vadd.f32 %v1891_v46, %v1714_v42  ;;  %v1877_v46 = vadd.f32 %v1876_v33, %v1689_v57  ;;  %v1871_v33 = vadd.f32 %v10235_v22, %v1679_v52 }
 0x271   :  { %13918 = vst [vmem:[#allocation69_spill] sm:$0xff] %v10297_v25  ;;  %v1818_v25 = vadd.f32 %v1817_v38, %v1699_v62  ;;  %v1924_v51 = vmax.f32 %v1827_v29, 0.0  ;;  %v1919_v38 = vmax.f32 %v1883_v9, 0.0  ;;  %v1809_v29 = vadd.f32 %v10250_v24, %v1684_v48 }
 0x272   :  { %v1925_v37 = vmax.f32 %v1892_v35, 0.0  ;;  %v1914_v36 = vmax.f32 %v1812_v58, 0.0  ;;  %v1915_v0 = vmax.f32 %v1877_v46, 0.0  ;;  %v1803_v9 = vadd.f32 %v10218_v21, %v1674_v23 }
 0x273   :  { %2120 = vmatpush.msra.mxu2 %v1924_v51  ;;  %v1918_v27 = vmax.f32 %v1818_v25, 0.0  ;;  %v1912_v57 = vmax.f32 %v1809_v29, 0.0  ;;  %v1911_v22 = vmax.f32 %v1871_v33, 0.0 }
 0x274   :  { %2161 = vmatpush.msra.mxu3 %v1925_v37 }
 0x275   :  { %v10299_v55 = vpop.f32.mrf.mxu0  ;;  %2121 = vmatpush.msra.mxu2 %v1922_v32  ;;  %v1868_v32 = vadd.f32 %v10220_v44, %v1674_v23  ;;  %v1654_v44 = vpop.permute.xlu1 %1653 }
 0x276   :  { %13919 = vst [vmem:[#allocation51_spill] sm:$0xff] %v10299_v55  ;;  %v1880_v55 = vadd.f32 %v1879_v4, %v1694_v8  ;;  %2162 = vmatpush.msra.mxu3 %v1923_v19  ;;  %v1806_v8 = vadd.f32 %v10233_v50, %v1679_v52  ;;  %v1659_v50 = vpop.permute.xlu0 %1658  ;;  %v1865_v4 = vadd.f32 %v10203_v54, %v1669_v12  ;;  %v1908_v52 = vmax.f32 %v1803_v9, 0.0 }
 0x277   :  { %v1909_v19 = vmax.f32 %v1868_v32, 0.0  ;;  %v1794_v37 = vadd.f32 %v10166_v63, %v1659_v50  ;;  %v1791_v30 = vadd.f32 %v10148_v34, %v1654_v44  ;;  %v1856_v62 = vadd.f32 %v10150_v47, %v1654_v44 }
 0x278   :  { %v10301_v3 = vpop.f32.mrf.mxu1  ;;  %v1917_v18 = vmax.f32 %v1880_v55, 0.0  ;;  %2163 = vmatpush.msra.mxu3 %v1921_v6  ;;  %v1800_v55 = vadd.f32 %v10201_v49, %v1669_v12  ;;  %v1907_v49 = vmax.f32 %v1865_v4, 0.0 }
 0x279   :  { %13920 = vst [vmem:[#allocation79_spill] sm:$0xff] %v10301_v3  ;;  %v1920_v3 = vmax.f32 %v1821_v14, 0.0  ;;  %v1874_v14 = vadd.f32 %v10252_v7, %v1684_v48  ;;  %v1664_v48 = vpop.permute.xlu2 %1663  ;;  %v1910_v7 = vmax.f32 %v1806_v8, 0.0  ;;  %v1902_v39 = vmax.f32 %v1794_v37, 0.0 }
 0x27a   :  { %2164 = vmatpush.msra.mxu3 %v1919_v38  ;;  %v1862_v42 = vadd.f32 %v10186_v45, %v1664_v48  ;;  %v1906_v10 = vmax.f32 %v1800_v55, 0.0  ;;  %v1900_v23 = vmax.f32 %v1791_v30, 0.0  ;;  %v1901_v34 = vmax.f32 %v1856_v62, 0.0  ;;  %v2066_v55 = vld [vmem:[%s13409_s9 + $0x10] sm:$0xff] }
 0x27b   :  { %2122 = vmatpush.msra.mxu2 %v1920_v3  ;;  %v1913_v51 = vmax.f32 %v1874_v14, 0.0  ;;  %v1797_v3 = vadd.f32 %v10184_v43, %v1664_v48  ;;  %v1859_v43 = vadd.f32 %v10168_v13, %v1659_v50 }
 0x27c   :  { %2165 = vmatpush.msra.mxu3 %v1917_v18  ;;  %v1905_v25 = vmax.f32 %v1862_v42, 0.0 }
 0x27d   :  { %v10303_v15 = vpop.f32.mrf.mxu0  ;;  %2123 = vmatpush.msra.mxu2 %v1918_v27  ;;  %v1904_v28 = vmax.f32 %v1797_v3, 0.0  ;;  %v1903_v58 = vmax.f32 %v1859_v43, 0.0  ;;  %v1639_v38 = vpop.permute.xlu1 %1638  ;;  %v13922_v43 = vld [vmem:[#allocation84_spill] sm:$0xff] }
 0x27e   :  { %2166 = vmatpush.msra.mxu3 %v1915_v0  ;;  %v1644_v27 = vpop.permute.xlu0 %1643  ;;  %v1782_v29 = vadd.f32 %v10100_v26, %v1639_v38  ;;  %v2064_v26 = vld [vmem:[%s13409_s9] sm:$0xff]  ;;  %v2065_v0 = vld [vmem:[%s13409_s9 + $0x8] sm:$0xff]  ;;  %v1487_v44 = vadd.f32 %v10303_v15, %v10244_v5  ;;  %v13923_v15 = vld [vmem:[#allocation44_spill] sm:$0xff] }
 0x27f   :  { %2124 = vmatpush.msra.mxu2 %v1916_v41  ;;  %v1785_v13 = vadd.f32 %v10115_v2, %v1644_v27  ;;  %v1850_v47 = vadd.f32 %v10117_v16, %v1644_v27  ;;  %v1481_v62 = vadd.f32 %v13923_v15, %v13922_v43  ;;  %v13943_v15 = vld [vmem:[#allocation59_spill] sm:$0xff] }
 0x280   :  { %v10305_v56 = vpop.f32.mrf.mxu1  ;;  %2167 = vmatpush.msra.mxu3 %v1913_v51  ;;  %v1894_v2 = vmax.f32 %v1782_v29, 0.0  ;;  %v13929_v29 = vld [vmem:[#allocation71_spill] sm:$0xff] }
 0x281   :  { %2125 = vmatpush.msra.mxu2 %v1914_v36  ;;  %v1649_v45 = vpop.permute.xlu2 %1648  ;;  %v1896_v18 = vmax.f32 %v1785_v13, 0.0 }
 0x282   :  { %2168 = vmatpush.msra.mxu3 %v1911_v22  ;;  %v1788_v63 = vadd.f32 %v10130_v60, %v1649_v45  ;;  %v1853_v46 = vadd.f32 %v10132_v53, %v1649_v45  ;;  %v1847_v60 = vadd.f32 %v10102_v40, %v1639_v38  ;;  %v1897_v53 = vmax.f32 %v1850_v47, 0.0 }
 0x283   :  { %2126 = vmatpush.msra.mxu2 %v1912_v57  ;;  %v1586_v47 = vmax.f32 %v1481_v62, 0.0 }
 0x284   :  { %2169 = vmatpush.msra.mxu3 %v1909_v19  ;;  %v1898_v41 = vmax.f32 %v1788_v63, 0.0  ;;  %v1899_v14 = vmax.f32 %v1853_v46, 0.0  ;;  %v1895_v16 = vmax.f32 %v1847_v60, 0.0  ;;  %v13927_v46 = vld [vmem:[#allocation81_spill] sm:$0xff] }
 0x285   :  { %v10308_v35 = vpop.f32.mrf.mxu0  ;;  %2127 = vmatpush.msra.mxu2 %v1910_v7 }
 0x286   :  { %2170 = vmatpush.msra.mxu3 %v1907_v49  ;;  %v1490_v3 = vadd.f32 %v10308_v35, %v10242_v61 }
 0x287   :  { %2128 = vmatpush.msra.mxu2 %v1908_v52 }
 0x288   :  { %v10314_v24 = vpop.f32.mrf.mxu1  ;;  %2171 = vmatpush.msra.mxu3 %v1905_v25  ;;  %v1592_v30 = vmax.f32 %v1490_v3, 0.0  ;;  %v1590_v25 = vmax.f32 %v1487_v44, 0.0  ;;  %v13940_v3 = vld [vmem:[#allocation76_spill] sm:$0xff] }
 0x289   :  { %2129 = vmatpush.msra.mxu2 %v1906_v10  ;;  %v2067_v10 = vld [vmem:[%s13409_s9 + $0x18] sm:$0xff] }
 0x28a   :  { %2172 = vmatpush.msra.mxu3 %v1903_v58 }
 0x28b   :  { %2130 = vmatpush.msra.mxu2 %v1904_v28 }
 0x28c   :  { %2173 = vmatpush.msra.mxu3 %v1901_v34 }
 0x28d   :  { %v10319_v21 = vpop.f32.mrf.mxu0  ;;  %2131 = vmatpush.msra.mxu2 %v1902_v39 }
 0x28e   :  { %2174 = vmatpush.msra.mxu3 %v1899_v14  ;;  %v1493_v22 = vadd.f32 %v10319_v21, %v10215_v20  ;;  %v13921_v21 = vld [vmem:[#allocation51_spill] sm:$0xff] }
 0x28f   :  { %2132 = vmatpush.msra.mxu2 %v1900_v23  ;;  %v1484_v37 = vadd.f32 %v13921_v21, %v10248_v11  ;;  %v13924_v23 = vld [vmem:[#allocation86_spill] sm:$0xff] }
 0x290   :  { %v10324_v54 = vpop.f32.mrf.mxu1  ;;  %2175 = vmatpush.msra.mxu3 %v1897_v53  ;;  %v1594_v42 = vmax.f32 %v1493_v22, 0.0  ;;  %v13930_v53 = vld [vmem:[#allocation72_spill] sm:$0xff] }
 0x291   :  { %2133 = vmatpush.msra.mxu2 %v1898_v41  ;;  %v1588_v58 = vmax.f32 %v1484_v37, 0.0  ;;  %v1555_v14 = vadd.f32 %v10324_v54, %v10242_v61  ;;  %v1549_v61 = vadd.f32 %v10305_v56, %v10248_v11  ;;  %v13937_v11 = vld [vmem:[#allocation75_spill] sm:$0xff]  ;;  %v13938_v56 = vld [vmem:[#allocation82_spill] sm:$0xff]  ;;  %v1926_v37 = vld [vmem:[%s13407_s7] sm:$0xff] }
 0x292   :  { %2176 = vmatpush.msra.mxu3 %v1895_v16 }
 0x293   :  { %2134 = vmatpush.msra.mxu2 %v1896_v18  ;;  %2177 = vmatmul.f32.vlgmr.msra.gmra.mxu3 %v2064_v26  ;;  %v1593_v54 = vmax.f32 %v1555_v14, 0.0  ;;  %v1589_v22 = vmax.f32 %v1549_v61, 0.0 }
 0x295   :  { %v1495_v6 = vpop.f32.mrf.mxu0  ;;  %2135 = vmatpush.msra.mxu2 %v1894_v2  ;;  %v13931_v2 = vld [vmem:[#allocation83_spill] sm:$0xff] }
 0x296   :  { %2136 = vmatmul.f32.vlgmr.msra.gmra.mxu2 %v2064_v26  ;;  %v1496_v50 = vadd.f32 %v1495_v6, %v10229_v31  ;;  %v13925_v6 = vld [vmem:[#allocation74_spill] sm:$0xff] }
 0x297   :  { %v1478_v63 = vadd.f32 %v13925_v6, %v13924_v23  ;;  %v13932_v26 = vld [vmem:[#allocation66_spill] sm:$0xff]  ;;  %v13945_v6 = vld [vmem:[#allocation85_spill] sm:$0xff] }
 0x298   :  { %v10333_v12 = vpop.f32.mrf.mxu1  ;;  %v1596_v19 = vmax.f32 %v1496_v50, 0.0  ;;  %v13939_v50 = vld [vmem:[#allocation69_spill] sm:$0xff]  ;;  %v1531_v62 = vadd.f32 %v13943_v15, %v13932_v26 }
 0x299   :  { %v1584_v60 = vmax.f32 %v1478_v63, 0.0  ;;  %v1525_v63 = vadd.f32 %v13945_v6, %v13937_v11 }
 0x29b   :  { %2180 = vmatmul.f32.gmra.mxu3 %v2065_v0 }
 0x29d   :  { %v1498_v36 = vpop.f32.mrf.mxu0 }
 0x29e   :  { %2139 = vmatmul.f32.gmra.mxu2 %v2065_v0  ;;  %v1499_v51 = vadd.f32 %v1498_v36, %v10213_v1  ;;  %v1469_v36 = vadd.f32 %v13931_v2, %v13930_v53 }
 0x2a0   :  { %v1560_v8 = vpop.f32.mrf.mxu1  ;;  %v1598_v52 = vmax.f32 %v1499_v51, 0.0 }
 0x2a1   :  { %v1561_v27 = vadd.f32 %v1560_v8, %v10229_v31  ;;  %v13928_v31 = vld [vmem:[#allocation60_spill] sm:$0xff]  ;;  %v13933_v8 = vld [vmem:[#allocation78_spill] sm:$0xff] }
 0x2a2   :  { %v1472_v41 = vadd.f32 %v13929_v29, %v13928_v31  ;;  %v10441_v29 = vpop.permute.xlu0 %1974 }
 0x2a3   :  { %2183 = vmatmul.f32.gmra.mxu3 %v2066_v55  ;;  %v1597_v18 = vmax.f32 %v1561_v27, 0.0  ;;  %v1927_v27 = vld [vmem:[%s13407_s7 + $0x8] sm:$0xff] }
 0x2a4   :  { %v1580_v0 = vmax.f32 %v1472_v41, 0.0 }
 0x2a5   :  { %v1501_v40 = vpop.f32.mrf.mxu0 }
 0x2a6   :  { %v1502_v57 = vadd.f32 %v1501_v40, %v10227_v17  ;;  %2142 = vmatmul.f32.gmra.mxu2 %v2066_v55  ;;  %v1466_v40 = vadd.f32 %v13933_v8, %v13932_v26  ;;  %v1460_v55 = vadd.f32 %v13938_v56, %v13937_v11 }
 0x2a8   :  { %v1563_v33 = vpop.f32.mrf.mxu1  ;;  %v1600_v4 = vmax.f32 %v1502_v57, 0.0  ;;  %v13935_v57 = vld [vmem:[#allocation70_spill] sm:$0xff] }
 0x2a9   :  { %v1564_v45 = vadd.f32 %v1563_v33, %v10213_v1  ;;  %v1558_v1 = vadd.f32 %v10333_v12, %v10215_v20  ;;  %v1552_v20 = vadd.f32 %v10314_v24, %v10244_v5  ;;  %v2069_v33 = vld [vmem:[%s13409_s9 + $0x28] sm:$0xff]  ;;  %v1578_v24 = vmax.f32 %v1469_v36, 0.0 }
 0x2aa   :  { %v10443_v41 = vpop.permute.xlu0 %1959 }
 0x2ab   :  { %2186 = vmatmul.f32.gmra.mxu3 %v2067_v10  ;;  %v1599_v38 = vmax.f32 %v1564_v45, 0.0  ;;  %v1595_v12 = vmax.f32 %v1558_v1, 0.0  ;;  %v13944_v45 = vld [vmem:[#allocation77_spill] sm:$0xff]  ;;  %v1931_v1 = vld [vmem:[%s13407_s7 + $0x28] sm:$0xff] }
 0x2ad   :  { %v1504_v9 = vpop.f32.mrf.mxu0 }
 0x2ae   :  { %v1505_v32 = vadd.f32 %v1504_v9, %v10198_v59  ;;  %2145 = vmatmul.f32.gmra.mxu2 %v2067_v10  ;;  %v13934_v9 = vld [vmem:[#allocation73_spill] sm:$0xff]  ;;  %v13941_v10 = vld [vmem:[#allocation67_spill] sm:$0xff] }
 0x2af   :  { %v1463_v5 = vadd.f32 %v13935_v57, %v13934_v9 }
 0x2b0   :  { %v1602_v48 = vmax.f32 %v1505_v32, 0.0  ;;  %v1566_v7 = vpop.f32.mrf.mxu1  ;;  %v13936_v32 = vld [vmem:[#allocation79_spill] sm:$0xff] }
 0x2b1   :  { %v1567_v35 = vadd.f32 %v1566_v7, %v10227_v17  ;;  %v13926_v17 = vld [vmem:[#allocation87_spill] sm:$0xff]  ;;  %v1546_v51 = vadd.f32 %v13936_v32, %v13922_v43  ;;  %v1576_v7 = vmax.f32 %v1466_v40, 0.0 }
 0x2b2   :  { %1982 = vmatpush.msra.mxu0 %v1602_v48  ;;  %v1475_v13 = vadd.f32 %v13927_v46, %v13926_v17  ;;  %v1591_v48 = vmax.f32 %v1552_v20, 0.0  ;;  %v1928_v46 = vld [vmem:[%s13407_s7 + $0x10] sm:$0xff] }
 0x2b3   :  { %v1601_v34 = vmax.f32 %v1567_v35, 0.0  ;;  %v1587_v44 = vmax.f32 %v1546_v51, 0.0  ;;  %v13942_v35 = vld [vmem:[#allocation68_spill] sm:$0xff] }
 0x2b4   :  { %1983 = vmatpush.msra.mxu0 %v1600_v4  ;;  %v1582_v16 = vmax.f32 %v1475_v13, 0.0  ;;  %v1543_v4 = vadd.f32 %v13939_v50, %v13924_v23  ;;  %v1929_v13 = vld [vmem:[%s13407_s7 + $0x18] sm:$0xff] }
 0x2b6   :  { %1984 = vmatpush.msra.mxu0 %v1598_v52  ;;  %v1574_v52 = vmax.f32 %v1463_v5, 0.0  ;;  %v1585_v21 = vmax.f32 %v1543_v4, 0.0  ;;  %v13551_v4 = vmov 1326507024  }
 0x2b8   :  { %1985 = vmatpush.msra.mxu0 %v1596_v19  ;;  %v1569_v49 = vpop.f32.mrf.mxu1  ;;  %v1540_v19 = vadd.f32 %v13940_v3, %v13926_v17  ;;  %v1573_v17 = vmax.f32 %v1525_v63, 0.0 }
 0x2b9   :  { %v1570_v28 = vadd.f32 %v1569_v49, %v10198_v59  ;;  %v2068_v59 = vld [vmem:[%s13409_s9 + $0x20] sm:$0xff]  ;;  %v1537_v49 = vadd.f32 %v13941_v10, %v13928_v31  ;;  %v1933_v31 = vld [vmem:[%s13407_s7 + $0x38] sm:$0xff] }
 0x2ba   :  { %1986 = vmatpush.msra.mxu0 %v1594_v42  ;;  %2148 = vmatmul.f32.gmra.mxu2 %v2068_v59  ;;  %v1572_v42 = vmax.f32 %v1460_v55, 0.0  ;;  %v1583_v43 = vmax.f32 %v1540_v19, 0.0  ;;  %v13549_v55 = vmov 920167782  }
 0x2bb   :  { %v1603_v39 = vmax.f32 %v1570_v28, 0.0  ;;  %2189 = vmatmul.f32.gmra.mxu3 %v2068_v59  ;;  %v1534_v28 = vadd.f32 %v13942_v35, %v13930_v53 }
 0x2bc   :  { %1987 = vmatpush.msra.mxu0 %v1592_v30  ;;  %v2070_v30 = vld [vmem:[%s13409_s9 + $0x30] sm:$0xff] }
 0x2bd   :  { %2023 = vmatpush.msra.mxu1 %v1603_v39  ;;  %v1528_v39 = vadd.f32 %v13944_v45, %v13934_v9  ;;  %v1579_v23 = vmax.f32 %v1534_v28, 0.0  ;;  %v13547_v9 = vmov 2475754826  }
 0x2be   :  { %1988 = vmatpush.msra.mxu0 %v1590_v25  ;;  %v1581_v25 = vmax.f32 %v1537_v49, 0.0 }
 0x2bf   :  { %2024 = vmatpush.msra.mxu1 %v1601_v34  ;;  %v2071_v34 = vld [vmem:[%s13409_s9 + $0x38] sm:$0xff]  ;;  %v1575_v59 = vmax.f32 %v1528_v39, 0.0 }
 0x2c0   :  { %1989 = vmatpush.msra.mxu0 %v1588_v58  ;;  %v1577_v58 = vmax.f32 %v1531_v62, 0.0 }
 0x2c1   :  { %2025 = vmatpush.msra.mxu1 %v1599_v38  ;;  %v1932_v38 = vld [vmem:[%s13407_s7 + $0x30] sm:$0xff] }
 0x2c2   :  { %1990 = vmatpush.msra.mxu0 %v1586_v47  ;;  %2151 = vmatmul.f32.gmra.mxu2 %v2069_v33  ;;  %v1930_v47 = vld [vmem:[%s13407_s7 + $0x20] sm:$0xff] }
 0x2c3   :  { %2026 = vmatpush.msra.mxu1 %v1597_v18  ;;  %2192 = vmatmul.f32.gmra.mxu3 %v2069_v33 }
 0x2c4   :  { %1991 = vmatpush.msra.mxu0 %v1584_v60  ;;  %v10445_v60 = vpop.permute.xlu0 %1944 }
 0x2c5   :  { %2027 = vmatpush.msra.mxu1 %v1595_v12 }
 0x2c6   :  { %1992 = vmatpush.msra.mxu0 %v1582_v16 }
 0x2c7   :  { %2028 = vmatpush.msra.mxu1 %v1593_v54  ;;  %v13553_v54 = vmov 683565275  }
 0x2c8   :  { %1993 = vmatpush.msra.mxu0 %v1580_v0 }
 0x2c9   :  { %2029 = vmatpush.msra.mxu1 %v1591_v48  ;;  %v13543_v48 = vmov 2102212464  }
 0x2ca   :  { %1994 = vmatpush.msra.mxu0 %v1578_v24  ;;  %2154 = vmatmul.f32.gmra.mxu2 %v2070_v30  ;;  %v13545_v24 = vmov 2131351028  }
 0x2cb   :  { %2030 = vmatpush.msra.mxu1 %v1589_v22  ;;  %2195 = vmatmul.f32.gmra.mxu3 %v2070_v30 }
 0x2cc   :  { %1995 = vmatpush.msra.mxu0 %v1576_v7 }
 0x2cd   :  { %2031 = vmatpush.msra.mxu1 %v1587_v44 }
 0x2ce   :  { %1996 = vmatpush.msra.mxu0 %v1574_v52 }
 0x2cf   :  { %2032 = vmatpush.msra.mxu1 %v1585_v21 }
 0x2d0   :  { %1997 = vmatpush.msra.mxu0 %v1572_v42 }
 0x2d1   :  { %1998 = vmatmul.f32.vlgmr.msra.gmra.mxu0 %v1926_v37  ;;  %2033 = vmatpush.msra.mxu1 %v1583_v43 }
 0x2d2   :  { %2157 = vmatmul.f32.gmra.mxu2 %v2071_v34 }
 0x2d3   :  { %2034 = vmatpush.msra.mxu1 %v1581_v25  ;;  %2198 = vmatmul.f32.gmra.mxu3 %v2071_v34 }
 0x2d5   :  { %2035 = vmatpush.msra.mxu1 %v1579_v23 }
 0x2d7   :  { %2036 = vmatpush.msra.mxu1 %v1577_v58 }
 0x2d9   :  { %2001 = vmatmul.f32.gmra.mxu0 %v1927_v27  ;;  %2037 = vmatpush.msra.mxu1 %v1575_v59 }
 0x2db   :  { %2038 = vmatpush.msra.mxu1 %v1573_v17 }
 0x2dc   :  { %2039 = vmatmul.f32.vlgmr.msra.gmra.mxu1 %v1926_v37 }
 0x2e1   :  { %2004 = vmatmul.f32.gmra.mxu0 %v1928_v46 }
 0x2e4   :  { %2042 = vmatmul.f32.gmra.mxu1 %v1927_v27 }
 0x2e9   :  { %2007 = vmatmul.f32.gmra.mxu0 %v1929_v13 }
 0x2ec   :  { %2045 = vmatmul.f32.gmra.mxu1 %v1928_v46 }
 0x2f1   :  { %2010 = vmatmul.f32.gmra.mxu0 %v1930_v47 }
 0x2f4   :  { %2048 = vmatmul.f32.gmra.mxu1 %v1929_v13 }
 0x2f9   :  { %2013 = vmatmul.f32.gmra.mxu0 %v1931_v1 }
 0x2fc   :  { %2051 = vmatmul.f32.gmra.mxu1 %v1930_v47 }
 0x301   :  { %2016 = vmatmul.f32.gmra.mxu0 %v1932_v38 }
 0x304   :  { %2054 = vmatmul.f32.gmra.mxu1 %v1931_v1 }
 0x309   :  { %2019 = vmatmul.f32.gmra.mxu0 %v1933_v31 }
 0x30c   :  { %2057 = vmatmul.f32.gmra.mxu1 %v1932_v38 }
 0x314   :  { %2060 = vmatmul.f32.gmra.mxu1 %v1933_v31 }
 0x34e   :  { %v1999_v14 = vpop.f32.mrf.mxu0 }
 0x34f   :  { %v10448_v18 = vadd.f32 %v1999_v14, %v10445_v60  ;;  %v13947_v14 = vmov 0  }
 0x351   :  { %13946 = vst [vmem:[#allocation80_spill] sm:$0xff] %v10448_v18  ;;  %v2205_v53 = vand.u32 2139095040, %v10448_v18  ;;  %v13539_v16 = vand.u32 2147483647, %v10448_v18 }
 0x353   :  { %v2206_v2 = vshrl.u32 %v2205_v53, 23  ;;  %v2209_v12 = vand.u32 8388607, %v13539_v16 }
 0x355   :  { %v7956_v36 = vadd.s32 4294967169, %v2206_v2  ;;  %v2210_v0 = vor.u32 8388608, %v2209_v12 }
 0x357   :  { %v2212_v20 = vadd.s32 1, %v7956_v36  ;;  %v10491_v30 = vshll.u32 %v2210_v0, 8 }
 0x359   :  { %vm2213_vm3 = vcmp.gt.s32.totalorder %v2212_v20, 0  ;;  %v2251_v45 = vand.u32 65535, %v10491_v30  ;;  %v2252_v58 = vshrl.u32 %v10491_v30, 16 }
 0x35a   :  { %v2214_v26 = vsel %vm2213_vm3, %v2212_v20, 0 }
 0x35b   :  { %v2216_v8 = vand.u32 31, %v2214_v26  ;;  %v10456_v61 = vshrl.u32 %v2214_v26, 5 }
 0x35d   :  { %v10454_v40 = vsub.s32 32, %v2216_v8  ;;  %v2219_v33 = vshll.u32 %v13553_v54, %v2216_v8  ;;  %v2222_v57 = vshll.u32 %v13547_v9, %v2216_v8  ;;  %v2225_v51 = vshll.u32 %v13545_v24, %v2216_v8 }
 0x35e   :  { %v2228_v56 = vshll.u32 %v13543_v48, %v2216_v8  ;;  %v2231_v50 = vshll.u32 %v13549_v55, %v2216_v8  ;;  %vm2234_vm9 = vcmp.lt.s32.totalorder %v10456_v61, 1  ;;  %vm2237_vm15 = vcmp.lt.s32.totalorder %v10456_v61, 4 }
 0x35f   :  { %v2220_v5 = vshrl.u32 %v13547_v9, %v10454_v40  ;;  %v2223_v32 = vshrl.u32 %v13545_v24, %v10454_v40  ;;  %v2226_v11 = vshrl.u32 %v13543_v48, %v10454_v40  ;;  %v2229_v7 = vshrl.u32 %v13549_v55, %v10454_v40 }
 0x360   :  { %v2232_v22 = vshrl.u32 %v13551_v4, %v10454_v40  ;;  %vm2236_vm0 = vcmp.lt.s32.totalorder %v10456_v61, 3  ;;  %vm2235_vm5 = vcmp.lt.s32.totalorder %v10456_v61, 2 }
 0x361   :  { %v10473_v52 = vor.u32 %v2220_v5, %v2219_v33  ;;  %v10475_v3 = vor.u32 %v2223_v32, %v2222_v57  ;;  %v2227_v19 = vor.u32 %v2226_v11, %v2225_v51  ;;  %v2230_v44 = vor.u32 %v2229_v7, %v2228_v56  ;;  %v2040_v51 = vpop.f32.mrf.mxu1 }
 0x362   :  { %v2233_v42 = vor.u32 %v2232_v22, %v2231_v50  ;;  %v10509_v56 = vadd.f32 %v2040_v51, %v10445_v60 }
 0x363   :  { %v2242_v10 = vsel %vm2234_vm9, %v10473_v52, %v10475_v3  ;;  %v2246_v49 = vsel %vm2234_vm9, %v10475_v3, %v2227_v19  ;;  %v2243_v21 = vsel %vm2237_vm15, %v2230_v44, 920167782 }
 0x364   :  { %v2247_v37 = vsel %vm2237_vm15, %v2233_v42, 1326507024  ;;  %v2244_v35 = vsel %vm2236_vm0, %v2227_v19, %v2243_v21  ;;  %13948 = vst [vmem:[#allocation45_spill] sm:$0xff] %v10509_v56  ;;  %v2359_v22 = vand.u32 2139095040, %v10509_v56  ;;  %v2239_v42 = vsel %vm2237_vm15, %v2227_v19, 2102212464 }
 0x365   :  { %v2248_v28 = vsel %vm2236_vm0, %v2230_v44, %v2247_v37  ;;  %v2245_v43 = vsel %vm2235_vm5, %v2242_v10, %v2244_v35  ;;  %v2218_v21 = vshrl.u32 %v13553_v54, %v10454_v40  ;;  %v13538_v40 = vand.u32 2147483647, %v10509_v56 }
 0x366   :  { %v2249_v15 = vsel %vm2235_vm5, %v2246_v49, %v2248_v28  ;;  %v2276_v25 = vshrl.u32 %v2245_v43, 16  ;;  %v2275_v6 = vand.u32 65535, %v2245_v43  ;;  %v2360_v49 = vshrl.u32 %v2359_v22, 23 }
 0x367   :  { %v2254_v62 = vshrl.u32 %v2249_v15, 16  ;;  %v2253_v63 = vand.u32 65535, %v2249_v15  ;;  %v2238_v60 = vsel %vm2234_vm9, %v2218_v21, %v10473_v52  ;;  %v2240_v28 = vsel %vm2236_vm0, %v10475_v3, %v2239_v42  ;;  %v2002_v21 = vpop.f32.mrf.mxu0 }
 0x368   :  { %v2278_v23 = vmul.u32 %v2276_v25, %v2251_v45  ;;  %v2277_v59 = vmul.u32 %v2275_v6, %v2251_v45  ;;  %v2279_v17 = vmul.u32 %v2275_v6, %v2252_v58  ;;  %v2280_v36 = vmul.u32 %v2276_v25, %v2252_v58 }
 0x369   :  { %v2256_v39 = vmul.u32 %v2254_v62, %v2251_v45  ;;  %v2255_v46 = vmul.u32 %v2253_v63, %v2251_v45  ;;  %v2257_v13 = vmul.u32 %v2253_v63, %v2252_v58  ;;  %v2258_v20 = vmul.u32 %v2254_v62, %v2252_v58  ;;  %v10529_v62 = vpop.permute.xlu2 %1979 }
 0x36a   :  { %v2281_v27 = vshll.u32 %v2278_v23, 16  ;;  %v2283_v38 = vshll.u32 %v2279_v17, 16  ;;  %v2282_v5 = vshrl.u32 %v2278_v23, 16  ;;  %v2284_v50 = vshrl.u32 %v2279_v17, 16  ;;  %13949 = vst [vmem:[#allocation52_spill] sm:$0xff] %v10529_v62 }
 0x36b   :  { %v2259_v34 = vshll.u32 %v2256_v39, 16  ;;  %v2261_v31 = vshll.u32 %v2257_v13, 16  ;;  %v2260_v32 = vshrl.u32 %v2256_v39, 16  ;;  %v2262_v44 = vshrl.u32 %v2257_v13, 16 }
 0x36c   :  { %vm2285_vm10 = vc.u32 %v2277_v59, %v2281_v27  ;;  %v2287_v47 = vadd.s32 %v2281_v27, %v2277_v59  ;;  %v7959_v35 = vadd.s32 4294967169, %v2360_v49  ;;  %v2241_v25 = vsel %vm2235_vm5, %v2238_v60, %v2240_v28 }
 0x36d   :  { %vm2263_vm7 = vc.u32 %v2255_v46, %v2259_v34  ;;  %v2265_v1 = vadd.s32 %v2259_v34, %v2255_v46  ;;  %v2286_v53 = vsel %vm2285_vm10, 1, %v13947_v14  ;;  %v2295_v3 = vmul.u32 %v10491_v30, %v2241_v25 }
 0x36e   :  { %v2264_v2 = vsel %vm2263_vm7, 1, %v13947_v14  ;;  %vm2289_vm11 = vc.u32 %v2287_v47, %v2283_v38  ;;  %v2288_v12 = vadd.s32 %v2286_v53, %v2280_v36  ;;  %v10524_v43 = vadd.s32 %v2287_v47, %v2283_v38 }
 0x36f   :  { %vm2267_vm8 = vc.u32 %v2265_v1, %v2261_v31  ;;  %v2266_v26 = vadd.s32 %v2264_v2, %v2258_v20  ;;  %v2290_v8 = vsel %vm2289_vm11, 1, %v13947_v14  ;;  %v2366_v19 = vadd.s32 1, %v7959_v35 }
 0x370   :  { %v2268_v0 = vsel %vm2267_vm8, 1, %v13947_v14  ;;  %v2292_v33 = vadd.s32 %v2290_v8, %v2288_v12  ;;  %v2363_v23 = vand.u32 8388607, %v13538_v40 }
 0x371   :  { %v2270_v57 = vadd.s32 %v2268_v0, %v2266_v26  ;;  %vm2367_vm1 = vcmp.gt.s32.totalorder %v2366_v19, 0  ;;  %v10559_v20 = vpop.permute.xlu2 %1964 }
 0x372   :  { %v2293_v11 = vadd.s32 %v2292_v33, %v2282_v5  ;;  %v2368_v52 = vsel %vm2367_vm1, %v2366_v19, 0  ;;  %v2364_v17 = vor.u32 8388608, %v2363_v23 }
 0x373   :  { %v2271_v7 = vadd.s32 %v2270_v57, %v2260_v32  ;;  %v2370_v39 = vand.u32 31, %v2368_v52  ;;  %v10547_v46 = vshrl.u32 %v2368_v52, 5 }
 0x374   :  { %v2294_v10 = vadd.s32 %v2293_v11, %v2284_v50  ;;  %v10563_v8 = vshll.u32 %v2364_v17, 8 }
 0x375   :  { %v10516_v37 = vadd.s32 %v2271_v7, %v2262_v44  ;;  %v10536_v6 = vsub.s32 32, %v2370_v39  ;;  %v2373_v58 = vshll.u32 %v13553_v54, %v2370_v39  ;;  %v2376_v27 = vshll.u32 %v13547_v9, %v2370_v39 }
 0x376   :  { %v2298_v15 = vadd.s32 1, %v2294_v10  ;;  %v2379_v59 = vshll.u32 %v13545_v24, %v2370_v39  ;;  %v2382_v13 = vshll.u32 %v13543_v48, %v2370_v39  ;;  %v2385_v2 = vshll.u32 %v13549_v55, %v2370_v39 }
 0x377   :  { %vm2297_vm12 = vc.u32 %v10516_v37, %v10524_v43  ;;  %v2374_v61 = vshrl.u32 %v13547_v9, %v10536_v6  ;;  %v2377_v34 = vshrl.u32 %v13545_v24, %v10536_v6  ;;  %v2380_v30 = vshrl.u32 %v13543_v48, %v10536_v6 }
 0x378   :  { %v2299_v45 = vsel %vm2297_vm12, %v2298_v15, %v2294_v10  ;;  %v2383_v47 = vshrl.u32 %v13549_v55, %v10536_v6  ;;  %v2386_v36 = vshrl.u32 %v13551_v4, %v10536_v6  ;;  %vm2388_vm4 = vcmp.lt.s32.totalorder %v10547_v46, 1 }
 0x379   :  { %v2300_v63 = vadd.s32 %v2299_v45, %v2295_v3  ;;  %v10552_v1 = vor.u32 %v2374_v61, %v2373_v58  ;;  %v10554_v38 = vor.u32 %v2377_v34, %v2376_v27  ;;  %v2381_v31 = vor.u32 %v2380_v30, %v2379_v59  ;;  %v1950_v15 = vpop.permute.xlu2 %1949 }
 0x37a   :  { %v2384_v53 = vor.u32 %v2383_v47, %v2382_v13  ;;  %v2387_v26 = vor.u32 %v2386_v36, %v2385_v2  ;;  %vm2391_vm6 = vcmp.lt.s32.totalorder %v10547_v46, 4  ;;  %vm2390_vm14 = vcmp.lt.s32.totalorder %v10547_v46, 3 }
 0x37b   :  { %v2301_v12 = vadd.s32 536870912, %v2300_v63  ;;  %v2396_v0 = vsel %vm2388_vm4, %v10552_v1, %v10554_v38  ;;  %v2400_v57 = vsel %vm2388_vm4, %v10554_v38, %v2381_v31  ;;  %vm2389_vm13 = vcmp.lt.s32.totalorder %v10547_v46, 2 }
 0x37c   :  { %v2397_v33 = vsel %vm2391_vm6, %v2384_v53, 920167782  ;;  %v2401_v32 = vsel %vm2391_vm6, %v2387_v26, 1326507024  ;;  %v2405_v50 = vand.u32 65535, %v10563_v8  ;;  %v2406_v35 = vshrl.u32 %v10563_v8, 16 }
 0x37d   :  { %v2398_v5 = vsel %vm2390_vm14, %v2381_v31, %v2397_v33  ;;  %v2402_v11 = vsel %vm2390_vm14, %v2384_v53, %v2401_v32  ;;  %v10587_v44 = vshrl.u32 %v2301_v12, 30  ;;  %v10595_v39 = vadd.f32 %v2002_v21, %v1950_v15 }
 0x37e   :  { %v2399_v51 = vsel %vm2389_vm13, %v2396_v0, %v2398_v5  ;;  %v2403_v7 = vsel %vm2389_vm13, %v2400_v57, %v2402_v11  ;;  %v2393_v53 = vsel %vm2391_vm6, %v2381_v31, 2102212464  ;;  %v2372_v26 = vshrl.u32 %v13553_v54, %v10536_v6  ;;  %v2043_v5 = vpop.f32.mrf.mxu1 }
 0x37f   :  { %v2430_v22 = vshrl.u32 %v2399_v51, 16  ;;  %13950 = vst [vmem:[#allocation49_spill] sm:$0xff] %v10587_v44  ;;  %v2408_v42 = vshrl.u32 %v2403_v7, 16  ;;  %v2429_v10 = vand.u32 65535, %v2399_v51  ;;  %v2303_v19 = vshll.u32 %v10587_v44, 30 }
 0x380   :  { %v2407_v25 = vand.u32 65535, %v2403_v7  ;;  %13951 = vst [vmem:[#allocation57_spill] sm:$0xff] %v10595_v39  ;;  %v2513_v59 = vand.u32 2139095040, %v10595_v39  ;;  %v13542_v57 = vand.u32 2147483647, %v10595_v39  ;;  %v2392_v31 = vsel %vm2388_vm4, %v2372_v26, %v10552_v1 }
 0x381   :  { %v2432_v49 = vmul.u32 %v2430_v22, %v2405_v50  ;;  %v10590_v60 = vmul.u32 %v2408_v42, %v2405_v50  ;;  %v2431_v52 = vmul.u32 %v2429_v10, %v2405_v50  ;;  %v10593_v45 = vmul.u32 %v2429_v10, %v2406_v35 }
 0x382   :  { %v10600_v58 = vsub.s32 %v2300_v63, %v2303_v19  ;;  %v2409_v27 = vmul.u32 %v2407_v25, %v2405_v50  ;;  %v10602_v61 = vmul.u32 %v2407_v25, %v2406_v35  ;;  %v2434_v30 = vmul.u32 %v2430_v22, %v2406_v35 }
 0x383   :  { %v2435_v28 = vshll.u32 %v2432_v49, 16  ;;  %v2413_v3 = vshll.u32 %v10590_v60, 16  ;;  %v2437_v34 = vshll.u32 %v10593_v45, 16  ;;  %v2514_v47 = vshrl.u32 %v2513_v59, 23 }
 0x384   :  { %vm2305_vm15 = vcmp.lt.s32.totalorder %v10600_v58, 0  ;;  %v2306_v63 = vsub.s32 0, %v10600_v58  ;;  %v2415_v2 = vshll.u32 %v10602_v61, 16  ;;  %v2412_v32 = vmul.u32 %v2408_v42, %v2406_v35 }
 0x385   :  { %vm2439_vm2 = vc.u32 %v2431_v52, %v2435_v28  ;;  %v10598_v23 = vadd.s32 %v2435_v28, %v2431_v52  ;;  %vm2417_vm3 = vc.u32 %v2409_v27, %v2413_v3  ;;  %v2419_v13 = vadd.s32 %v2413_v3, %v2409_v27 }
 0x386   :  { %v2440_v17 = vsel %vm2439_vm2, 1, %v13947_v14  ;;  %v7962_v12 = vadd.s32 4294967169, %v2514_v47  ;;  %v2418_v0 = vsel %vm2417_vm3, 1, %v13947_v14  ;;  %v10621_v11 = vsel %vm2305_vm15, %v2306_v63, %v10600_v58 }
 0x387   :  { %vm2443_vm9 = vc.u32 %v10598_v23, %v2437_v34  ;;  %v2442_v36 = vadd.s32 %v2440_v17, %v2434_v30  ;;  %vm2421_vm0 = vc.u32 %v2419_v13, %v2415_v2  ;;  %v2394_v6 = vsel %vm2390_vm14, %v10554_v38, %v2393_v53 }
 0x388   :  { %v2444_v33 = vsel %vm2443_vm9, 1, %v13947_v14  ;;  %v2520_v51 = vadd.s32 1, %v7962_v12  ;;  %v2420_v7 = vadd.s32 %v2418_v0, %v2412_v32  ;;  %v10629_v22 = vadd.f32 %v2043_v5, %v1950_v15 }
 0x389   :  { %v2446_v50 = vadd.s32 %v2444_v33, %v2442_v36  ;;  %v2422_v42 = vsel %vm2421_vm0, 1, %v13947_v14  ;;  %v2517_v10 = vand.u32 8388607, %v13542_v57  ;;  %v2308_v35 = vclz %v10621_v11 }
 0x38a   :  { %vm2521_vm5 = vcmp.gt.s32.totalorder %v2520_v51, 0  ;;  %13952 = vst [vmem:[#allocation58_spill] sm:$0xff] %v10629_v22  ;;  %v2436_v28 = vshrl.u32 %v2432_v49, 16  ;;  %v10637_v1 = vsel %vm2389_vm13, %v2392_v31, %v2394_v6  ;;  %v2414_v38 = vshrl.u32 %v10590_v60, 16 }
 0x38b   :  { %v2522_v21 = vsel %vm2521_vm5, %v2520_v51, 0  ;;  %v2416_v25 = vshrl.u32 %v10602_v61, 16  ;;  %v2438_v15 = vshrl.u32 %v10593_v45, 16  ;;  %v2424_v52 = vadd.s32 %v2422_v42, %v2420_v7 }
 0x38c   :  { %v2524_v19 = vand.u32 31, %v2522_v21  ;;  %v2447_v3 = vadd.s32 %v2446_v50, %v2436_v28  ;;  %v2667_v59 = vand.u32 2139095040, %v10629_v22  ;;  %v2518_v30 = vor.u32 8388608, %v2517_v10 }
 0x38d   :  { %v10643_v17 = vshrl.u32 %v2522_v21, 5  ;;  %v2425_v12 = vadd.s32 %v2424_v52, %v2414_v38 }
 0x38e   :  { %v2525_v27 = vsub.s32 32, %v2524_v19  ;;  %v2527_v49 = vshll.u32 %v13553_v54, %v2524_v19  ;;  %v2530_v46 = vshll.u32 %v13547_v9, %v2524_v19  ;;  %v2533_v61 = vshll.u32 %v13545_v24, %v2524_v19 }
 0x38f   :  { %v2536_v47 = vshll.u32 %v13543_v48, %v2524_v19  ;;  %v2539_v2 = vshll.u32 %v13549_v55, %v2524_v19  ;;  %v2668_v33 = vshrl.u32 %v2667_v59, 23  ;;  %vm2542_vm10 = vcmp.lt.s32.totalorder %v10643_v17, 1 }
 0x390   :  { %v2528_v13 = vshrl.u32 %v13547_v9, %v2525_v27  ;;  %v2531_v60 = vshrl.u32 %v13545_v24, %v2525_v27  ;;  %v2534_v63 = vshrl.u32 %v13543_v48, %v2525_v27  ;;  %v2537_v53 = vshrl.u32 %v13549_v55, %v2525_v27 }
 0x391   :  { %v2540_v36 = vshrl.u32 %v13551_v4, %v2525_v27  ;;  %v2448_v11 = vadd.s32 %v2447_v3, %v2438_v15  ;;  %vm2545_vm7 = vcmp.lt.s32.totalorder %v10643_v17, 4  ;;  %v10665_v6 = vshll.u32 %v2518_v30, 8 }
 0x392   :  { %v10655_v26 = vor.u32 %v2528_v13, %v2527_v49  ;;  %v10657_v0 = vor.u32 %v2531_v60, %v2530_v46  ;;  %v2535_v5 = vor.u32 %v2534_v63, %v2533_v61  ;;  %v2538_v32 = vor.u32 %v2537_v53, %v2536_v47 }
 0x393   :  { %v2541_v51 = vor.u32 %v2540_v36, %v2539_v2  ;;  %vm2544_vm11 = vcmp.lt.s32.totalorder %v10643_v17, 3  ;;  %v10675_v10 = vadd.s32 %v2425_v12, %v2416_v25  ;;  %vm2543_vm8 = vcmp.lt.s32.totalorder %v10643_v17, 2 }
 0x394   :  { %v2550_v31 = vsel %vm2542_vm10, %v10655_v26, %v10657_v0  ;;  %v2551_v7 = vsel %vm2545_vm7, %v2538_v32, 920167782  ;;  %v2554_v50 = vsel %vm2542_vm10, %v10657_v0, %v2535_v5  ;;  %v7965_v28 = vadd.s32 4294967169, %v2668_v33 }
 0x395   :  { %v2555_v42 = vsel %vm2545_vm7, %v2541_v51, 1326507024  ;;  %v2552_v21 = vsel %vm2544_vm11, %v2535_v5, %v2551_v7  ;;  %v10683_v19 = vadd.s32 %v10598_v23, %v2437_v34  ;;  %v13540_v25 = vand.u32 2147483647, %v10629_v22 }
 0x396   :  { %v2553_v38 = vsel %vm2543_vm8, %v2550_v31, %v2552_v21  ;;  %v2556_v15 = vsel %vm2544_vm11, %v2538_v32, %v2555_v42  ;;  %v2559_v3 = vand.u32 65535, %v10665_v6  ;;  %v2452_v49 = vadd.s32 1, %v2448_v11 }
 0x397   :  { %v2557_v52 = vsel %vm2543_vm8, %v2554_v50, %v2556_v15  ;;  %v2583_v59 = vand.u32 65535, %v2553_v38  ;;  %v2584_v30 = vshrl.u32 %v2553_v38, 16  ;;  %v2560_v45 = vshrl.u32 %v10665_v6, 16 }
 0x398   :  { %v2561_v23 = vand.u32 65535, %v2557_v52  ;;  %v2562_v34 = vshrl.u32 %v2557_v52, 16  ;;  %vm2451_vm12 = vc.u32 %v10675_v10, %v10683_v19  ;;  %v2674_v13 = vadd.s32 1, %v7965_v28 }
 0x399   :  { %v2586_v46 = vmul.u32 %v2584_v30, %v2559_v3  ;;  %v10696_v60 = vadd.s32 4294967294, %v2308_v35  ;;  %v2587_v63 = vmul.u32 %v2583_v59, %v2560_v45  ;;  %v2449_v53 = vmul.u32 %v10563_v8, %v10637_v1 }
 0x39a   :  { %v2564_v61 = vmul.u32 %v2562_v34, %v2559_v3  ;;  %v2565_v47 = vmul.u32 %v2561_v23, %v2560_v45  ;;  %v2585_v2 = vmul.u32 %v2583_v59, %v2559_v3  ;;  %v10702_v12 = vand.u32 8388607, %v13540_v25 }
 0x39b   :  { %v2589_v36 = vshll.u32 %v2586_v46, 16  ;;  %v2453_v33 = vsel %vm2451_vm12, %v2452_v49, %v2448_v11  ;;  %v2526_v32 = vshrl.u32 %v13553_v54, %v2525_v27  ;;  %v2563_v51 = vmul.u32 %v2561_v23, %v2559_v3 }
 0x39c   :  { %v2567_v31 = vshll.u32 %v2564_v61, 16  ;;  %v2547_v35 = vsel %vm2545_vm7, %v2535_v5, 2102212464  ;;  %v2588_v7 = vmul.u32 %v2584_v30, %v2560_v45  ;;  %vm2675_vm4 = vcmp.gt.s32.totalorder %v2674_v13, 0 }
 0x39d   :  { %vm2593_vm1 = vc.u32 %v2585_v2, %v2589_v36  ;;  %v2566_v50 = vmul.u32 %v2562_v34, %v2560_v45  ;;  %v2569_v42 = vshll.u32 %v2565_v47, 16  ;;  %v2591_v8 = vshll.u32 %v2587_v63, 16 }
 0x39e   :  { %vm2571_vm6 = vc.u32 %v2563_v51, %v2567_v31  ;;  %v2573_v21 = vadd.s32 %v2567_v31, %v2563_v51  ;;  %v2594_v28 = vsel %vm2593_vm1, 1, %v13947_v14  ;;  %v2595_v11 = vadd.s32 %v2589_v36, %v2585_v2 }
 0x39f   :  { %v2572_v1 = vsel %vm2571_vm6, 1, %v13947_v14  ;;  %v10709_v38 = vadd.s32 %v2453_v33, %v2449_v53  ;;  %v2596_v15 = vadd.s32 %v2594_v28, %v2588_v7  ;;  %v2676_v52 = vsel %vm2675_vm4, %v2674_v13, 0 }
 0x3a0   :  { %v2574_v27 = vadd.s32 %v2572_v1, %v2566_v50  ;;  %v2546_v5 = vsel %vm2542_vm10, %v2526_v32, %v10655_v26  ;;  %vm2575_vm14 = vc.u32 %v2573_v21, %v2569_v42  ;;  %vm2597_vm13 = vc.u32 %v2595_v11, %v2591_v8 }
 0x3a1   :  { %v2548_v3 = vsel %vm2544_vm11, %v10657_v0, %v2547_v35  ;;  %v2576_v59 = vsel %vm2575_vm14, 1, %v13947_v14  ;;  %v2590_v30 = vshrl.u32 %v2586_v46, 16  ;;  %v2598_v49 = vsel %vm2597_vm13, 1, %v13947_v14 }
 0x3a2   :  { %v2568_v45 = vshrl.u32 %v2564_v61, 16  ;;  %v2578_v23 = vadd.s32 %v2576_v59, %v2574_v27  ;;  %v2600_v34 = vadd.s32 %v2598_v49, %v2596_v15  ;;  %v2678_v53 = vand.u32 31, %v2676_v52  ;;  %v10760_v59 = vpop.permute.xlu1 %1969 }
 0x3a3   :  { %vm7958_vm2 = vcmp.lt.s32.totalorder %v10696_v60, 0  ;;  %v2455_v13 = vadd.s32 536870912, %v10709_v38  ;;  %v2570_v26 = vshrl.u32 %v2565_v47, 16  ;;  %v2672_v2 = vor.u32 8388608, %v10702_v12 }
 0x3a4   :  { %v2579_v36 = vadd.s32 %v2578_v23, %v2568_v45  ;;  %v2592_v33 = vshrl.u32 %v2587_v63, 16  ;;  %v2601_v32 = vadd.s32 %v2600_v34, %v2590_v30  ;;  %v10722_v0 = vsub.s32 32, %v2678_v53 }
 0x3a5   :  { %v2549_v46 = vsel %vm2543_vm8, %v2546_v5, %v2548_v3  ;;  %v10726_v51 = vadd.s32 %v2595_v11, %v2591_v8  ;;  %v10728_v61 = vshrl.u32 %v2676_v52, 5  ;;  %v2681_v31 = vshll.u32 %v13553_v54, %v2678_v53 }
 0x3a6   :  { %v10731_v35 = vadd.s32 %v2579_v36, %v2570_v26  ;;  %v2602_v7 = vadd.s32 %v2601_v32, %v2592_v33  ;;  %v2682_v47 = vshrl.u32 %v13547_v9, %v10722_v0  ;;  %v2684_v63 = vshll.u32 %v13547_v9, %v2678_v53 }
 0x3a7   :  { %v2685_v12 = vshrl.u32 %v13545_v24, %v10722_v0  ;;  %v2688_v17 = vshrl.u32 %v13543_v48, %v10722_v0  ;;  %v2690_v50 = vshll.u32 %v13543_v48, %v2678_v53  ;;  %v2691_v42 = vshrl.u32 %v13549_v55, %v10722_v0 }
 0x3a8   :  { %vm2605_vm3 = vc.u32 %v10731_v35, %v10726_v51  ;;  %v2606_v8 = vadd.s32 1, %v2602_v7  ;;  %v10745_v1 = vor.u32 %v2682_v47, %v2681_v31  ;;  %v2687_v21 = vshll.u32 %v13545_v24, %v2678_v53 }
 0x3a9   :  { %v10751_v28 = vsel %vm7958_vm2, 0, %v10696_v60  ;;  %v10753_v11 = vor.u32 %v2685_v12, %v2684_v63  ;;  %v2692_v27 = vor.u32 %v2691_v42, %v2690_v50  ;;  %v2693_v5 = vshll.u32 %v13549_v55, %v2678_v53 }
 0x3aa   :  { %v2607_v15 = vsel %vm2605_vm3, %v2606_v8, %v2602_v7  ;;  %v10755_v52 = vor.u32 %v2688_v17, %v2687_v21  ;;  %v2694_v3 = vshrl.u32 %v13551_v4, %v10722_v0  ;;  %v2296_v30 = vadd.s32 %v10524_v43, %v10516_v37 }
 0x3ab   :  { %v10764_v49 = vshrl.u32 %v2455_v13, 30  ;;  %v2603_v60 = vmul.u32 %v10665_v6, %v2549_v46  ;;  %vm2696_vm9 = vcmp.lt.s32.totalorder %v10728_v61, 1  ;;  %vm2699_vm15 = vcmp.lt.s32.totalorder %v10728_v61, 4 }
 0x3ac   :  { %v2695_v45 = vor.u32 %v2694_v3, %v2693_v5  ;;  %v2704_v23 = vsel %vm2696_vm9, %v10745_v1, %v10753_v11  ;;  %v10773_v34 = vshll.u32 %v2672_v2, 8  ;;  %v2312_v53 = vsub.s32 32, %v10751_v28  ;;  %v2005_v5 = vpop.f32.mrf.mxu0 }
 0x3ad   :  { %13953 = vst [vmem:[#allocation50_spill] sm:$0xff] %v10764_v49  ;;  %v10776_v26 = vadd.s32 %v2607_v15, %v2603_v60  ;;  %vm2698_vm0 = vcmp.lt.s32.totalorder %v10728_v61, 3  ;;  %v2705_v37 = vsel %vm2699_vm15, %v2692_v27, 920167782  ;;  %vm2697_vm5 = vcmp.lt.s32.totalorder %v10728_v61, 2 }
 0x3ae   :  { %v2706_v43 = vsel %vm2698_vm0, %v10755_v52, %v2705_v37  ;;  %v2708_v6 = vsel %vm2696_vm9, %v10753_v11, %v10755_v52  ;;  %v2709_v13 = vsel %vm2699_vm15, %v2695_v45, 1326507024  ;;  %v2316_v2 = vsub.s32 4294967266, %v10751_v28  ;;  %v10806_v37 = vpop.permute.xlu1 %1954 }
 0x3af   :  { %v2457_v36 = vshll.u32 %v10764_v49, 30  ;;  %v2707_v33 = vsel %vm2697_vm5, %v2704_v23, %v2706_v43  ;;  %v2710_v32 = vsel %vm2698_vm0, %v2692_v27, %v2709_v13  ;;  %v2713_v31 = vand.u32 65535, %v10773_v34  ;;  %v10804_v27 = vpop.f32.mrf.mxu2  ;;  %v10808_v43 = vpop.f32.mrf.mxu3 }
 0x3b0   :  { %v2711_v46 = vsel %vm2697_vm5, %v2708_v6, %v2710_v32  ;;  %v2737_v7 = vand.u32 65535, %v2707_v33  ;;  %v2738_v47 = vshrl.u32 %v2707_v33, 16  ;;  %v2609_v63 = vadd.s32 536870912, %v10776_v26  ;;  %13954 = vst [vmem:[#allocation48_spill] sm:$0xff] %v10804_v27 }
 0x3b1   :  { %v2714_v12 = vshrl.u32 %v10773_v34, 16  ;;  %v2715_v17 = vand.u32 65535, %v2711_v46  ;;  %v2716_v50 = vshrl.u32 %v2711_v46, 16  ;;  %v10802_v8 = vshrl.u32 %v2296_v30, %v2312_v53  ;;  %13955 = vst [vmem:[#allocation47_spill] sm:$0xff] %v10808_v43 }
 0x3b2   :  { %v2740_v42 = vmul.u32 %v2738_v47, %v2713_v31  ;;  %v2317_v3 = vadd.s32 127, %v2316_v2  ;;  %v2739_v60 = vmul.u32 %v2737_v7, %v2713_v31  ;;  %v10811_v6 = vsub.s32 %v10709_v38, %v2457_v36 }
 0x3b3   :  { %v2718_v21 = vmul.u32 %v2716_v50, %v2713_v31  ;;  %v2719_v15 = vmul.u32 %v2715_v17, %v2714_v12  ;;  %v2741_v45 = vmul.u32 %v2737_v7, %v2714_v12  ;;  %v10813_v13 = vshrl.u32 %v2609_v63, 30 }
 0x3b4   :  { %v2743_v23 = vshll.u32 %v2740_v42, 16  ;;  %v2717_v30 = vmul.u32 %v2715_v17, %v2713_v31  ;;  %v2720_v33 = vmul.u32 %v2716_v50, %v2714_v12  ;;  %v2742_v32 = vmul.u32 %v2738_v47, %v2714_v12 }
 0x3b5   :  { %13956 = vst [vmem:[#allocation61_spill] sm:$0xff] %v10813_v13  ;;  %v2721_v53 = vshll.u32 %v2718_v21, 16  ;;  %v10816_v46 = vadd.f32 %v2005_v5, %v10806_v37  ;;  %v2723_v2 = vshll.u32 %v2719_v15, 16  ;;  %v2745_v25 = vshll.u32 %v2741_v45, 16 }
 0x3b6   :  { %vm2747_vm10 = vc.u32 %v2739_v60, %v2743_v23  ;;  %v2749_v38 = vadd.s32 %v2743_v23, %v2739_v60  ;;  %v2318_v63 = vshll.u32 %v2317_v3, 23  ;;  %v2680_v31 = vshrl.u32 %v13553_v54, %v10722_v0 }
 0x3b7   :  { %13957 = vst [vmem:[#allocation27_spill] sm:$0xff] %v10816_v46  ;;  %vm2725_vm7 = vc.u32 %v2717_v30, %v2721_v53  ;;  %v2727_v7 = vadd.s32 %v2721_v53, %v2717_v30  ;;  %v2748_v40 = vsel %vm2747_vm10, 1, %v13947_v14  ;;  %v2611_v47 = vshll.u32 %v10813_v13, 30 }
 0x3b8   :  { %v2726_v16 = vsel %vm2725_vm7, 1, %v13947_v14  ;;  %v2750_v36 = vadd.s32 %v2748_v40, %v2742_v32  ;;  %v2701_v12 = vsel %vm2699_vm15, %v10755_v52, 2102212464  ;;  %vm2751_vm8 = vc.u32 %v2749_v38, %v2745_v25 }
 0x3b9   :  { %v2728_v17 = vadd.s32 %v2726_v16, %v2720_v33  ;;  %vm2729_vm11 = vc.u32 %v2727_v7, %v2723_v2  ;;  %v2722_v5 = vshrl.u32 %v2718_v21, 16  ;;  %v2752_v60 = vsel %vm2751_vm8, 1, %v13947_v14  ;;  %v10836_v33 = vpop.f32.mrf.mxu2 }
 0x3ba   :  { %v2730_v50 = vsel %vm2729_vm11, 1, %v13947_v14  ;;  %v2821_v40 = vand.u32 2139095040, %v10816_v46  ;;  %vm2459_vm12 = vcmp.lt.s32.totalorder %v10811_v6, 0  ;;  %v2700_v16 = vsel %vm2696_vm9, %v2680_v31, %v10745_v1  ;;  %13958 = vst [vmem:[#allocation54_spill] sm:$0xff] %v10836_v33 }
 0x3bb   :  { %v2732_v30 = vadd.s32 %v2730_v50, %v2728_v17  ;;  %v2744_v0 = vshrl.u32 %v2740_v42, 16  ;;  %v2754_v3 = vadd.s32 %v2752_v60, %v2750_v36  ;;  %v2702_v52 = vsel %vm2698_vm0, %v10753_v11, %v2701_v12  ;;  %v10842_v50 = vpop.f32.mrf.mxu3 }
 0x3bc   :  { %v2724_v23 = vshrl.u32 %v2719_v15, 16  ;;  %v2822_v21 = vshrl.u32 %v2821_v40, 23  ;;  %v2460_v32 = vsub.s32 0, %v10811_v6  ;;  %v10840_v2 = vsub.s32 %v10776_v26, %v2611_v47  ;;  %13959 = vst [vmem:[#allocation35_spill] sm:$0xff] %v10842_v50  ;;  %v10853_v26 = vpop.permute.xlu0 %2107 }
 0x3bd   :  { %v2733_v53 = vadd.s32 %v2732_v30, %v2722_v5  ;;  %v2746_v7 = vshrl.u32 %v2741_v45, 16  ;;  %v2755_v17 = vadd.s32 %v2754_v3, %v2744_v0  ;;  %v10846_v42 = vadd.s32 %v2749_v38, %v2745_v25 }
 0x3be   :  { %v13541_v11 = vand.u32 2147483647, %v10816_v46  ;;  %v7968_v15 = vadd.s32 4294967169, %v2822_v21  ;;  %v2313_v36 = vshll.u32 %v10600_v58, %v10751_v28  ;;  %v2703_v31 = vsel %vm2697_vm5, %v2700_v16, %v2702_v52 }
 0x3bf   :  { %v10844_v1 = vadd.s32 %v2733_v53, %v2724_v23  ;;  %v2756_v12 = vadd.s32 %v2755_v17, %v2746_v7  ;;  %v2319_v25 = vor.u32 4788187, %v2318_v63  ;;  %v2461_v38 = vsel %vm2459_vm12, %v2460_v32, %v10811_v6 }
 0x3c0   :  { %v2828_v45 = vadd.s32 1, %v7968_v15  ;;  %v2315_v47 = vor.u32 %v10802_v8, %v2313_v36  ;;  %v2614_v58 = vsub.s32 0, %v10840_v2  ;;  %v2757_v61 = vmul.u32 %v10773_v34, %v2703_v31  ;;  %v2046_v15 = vpop.f32.mrf.mxu1 }
 0x3c1   :  { %vm2759_vm1 = vc.u32 %v10844_v1, %v10846_v42  ;;  %v2760_v5 = vadd.s32 1, %v2756_v12  ;;  %v2825_v28 = vand.u32 8388607, %v13541_v11  ;;  %vm2613_vm6 = vcmp.lt.s32.totalorder %v10840_v2, 0  ;;  %v2143_v34 = vpop.f32.mrf.mxu2 }
 0x3c2   :  { %vm2829_vm4 = vcmp.gt.s32.totalorder %v2828_v45, 0  ;;  %v2320_v63 = vand.u32 2147483647, %v2319_v25  ;;  %v2322_v16 = vcvt.s32.f32 %v2315_v47  ;;  %v2462_v0 = vclz %v2461_v38  ;;  %v10881_v25 = vpop.permute.xlu2 %2112 }
 0x3c3   :  { %v2761_v30 = vsel %vm2759_vm1, %v2760_v5, %v2756_v12  ;;  %v2830_v60 = vsel %vm2829_vm4, %v2828_v45, 0  ;;  %v2615_v3 = vsel %vm2613_vm6, %v2614_v58, %v10840_v2  ;;  %v2826_v23 = vor.u32 8388608, %v2825_v28  ;;  %v2184_v36 = vpop.f32.mrf.mxu3 }
 0x3c4   :  { %v2762_v40 = vadd.s32 %v2761_v30, %v2757_v61  ;;  %v2832_v8 = vand.u32 31, %v2830_v60  ;;  %v10869_v21 = vshrl.u32 %v2830_v60, 5  ;;  %v2093_v28 = vpop.permute.xlu0 %2092  ;;  %v10896_v11 = vadd.f32 %v2046_v15, %v10806_v37 }
 0x3c5   :  { %v10898_v57 = vadd.f32 %v2143_v34, %v2093_v28  ;;  %v10910_v34 = vshll.u32 %v2826_v23, 8  ;;  %vm13617_vm9 = vcmp.lt.s32.totalorder %v10448_v18, 0 }
 0x3c6   :  { %v2763_v52 = vadd.s32 536870912, %v2762_v40  ;;  %v10867_v53 = vsub.s32 32, %v2832_v8  ;;  %v2835_v32 = vshll.u32 %v13553_v54, %v2832_v8  ;;  %v2838_v7 = vshll.u32 %v13547_v9, %v2832_v8  ;;  %13961 = vst [vmem:[#allocation65_spill] sm:$0xff] %v10896_v11 }
 0x3c7   :  { %v2841_v17 = vshll.u32 %v13545_v24, %v2832_v8  ;;  %v2844_v47 = vshll.u32 %v13543_v48, %v2832_v8  ;;  %v2847_v58 = vshll.u32 %v13549_v55, %v2832_v8  ;;  %13962 = vst [vmem:[#allocation33_spill] sm:$0xff] %v10898_v57  ;;  %v10902_v8 = vadd.f32 %v2184_v36, %v2093_v28 }
 0x3c8   :  { %v10874_v31 = vshrl.u32 %v2763_v52, 30  ;;  %v2836_v12 = vshrl.u32 %v13547_v9, %v10867_v53  ;;  %v2839_v45 = vshrl.u32 %v13545_v24, %v10867_v53  ;;  %v2842_v38 = vshrl.u32 %v13543_v48, %v10867_v53 }
 0x3c9   :  { %v2845_v5 = vshrl.u32 %v13549_v55, %v10867_v53  ;;  %v2848_v61 = vshrl.u32 %v13551_v4, %v10867_v53  ;;  %13963 = vst [vmem:[#allocation34_spill] sm:$0xff] %v10902_v8  ;;  %v2323_v55 = vmul.f32 %v2322_v16, %v2320_v63  ;;  %v7960_v4 = vadd.s32 4294967294, %v2462_v0  ;;  %v2146_v15 = vpop.f32.mrf.mxu2 }
 0x3ca   :  { %13960 = vst [vmem:[#allocation64_spill] sm:$0xff] %v10874_v31  ;;  %v2765_v30 = vshll.u32 %v10874_v31, 30  ;;  %v10891_v60 = vor.u32 %v2836_v12, %v2835_v32  ;;  %v10893_v52 = vor.u32 %v2839_v45, %v2838_v7  ;;  %v10900_v48 = vor.u32 %v2842_v38, %v2841_v17  ;;  %v2098_v28 = vpop.permute.xlu2 %2097 }
 0x3cb   :  { %v2846_v24 = vor.u32 %v2845_v5, %v2844_v47  ;;  %v2849_v9 = vor.u32 %v2848_v61, %v2847_v58  ;;  %vm2850_vm14 = vcmp.lt.s32.totalorder %v10869_v21, 1  ;;  %v2616_v54 = vclz %v2615_v3  ;;  %v2187_v38 = vpop.f32.mrf.mxu3 }
 0x3cc   :  { %vm2853_vm13 = vcmp.lt.s32.totalorder %v10869_v21, 4  ;;  %v2858_v37 = vsel %vm2850_vm14, %v10891_v60, %v10893_v52  ;;  %v10912_v32 = vsub.s32 %v2762_v40, %v2765_v30  ;;  %vm2852_vm2 = vcmp.lt.s32.totalorder %v10869_v21, 3 }
 0x3cd   :  { %v2859_v63 = vsel %vm2853_vm13, %v2846_v24, 920167782  ;;  %v2975_v16 = vand.u32 2139095040, %v10896_v11  ;;  %vm2851_vm3 = vcmp.lt.s32.totalorder %v10869_v21, 2  ;;  %v2862_v3 = vsel %vm2850_vm14, %v10893_v52, %v10900_v48 }
 0x3ce   :  { %v2860_v0 = vsel %vm2852_vm2, %v10900_v48, %v2859_v63  ;;  %v2863_v40 = vsel %vm2853_vm13, %v2849_v9, 1326507024  ;;  %v2324_v23 = vxor.u32 2147483648, %v2323_v55  ;;  %v2867_v12 = vand.u32 65535, %v10910_v34 }
 0x3cf   :  { %v2861_v7 = vsel %vm2851_vm3, %v2858_v37, %v2860_v0  ;;  %v2864_v17 = vsel %vm2852_vm2, %v2846_v24, %v2863_v40  ;;  %v7963_v5 = vadd.s32 4294967294, %v2616_v54  ;;  %v2868_v9 = vshrl.u32 %v10910_v34, 16 }
 0x3d0   :  { %v2865_v36 = vsel %vm2851_vm3, %v2862_v3, %v2864_v17  ;;  %v2891_v45 = vand.u32 65535, %v2861_v7  ;;  %v2892_v47 = vshrl.u32 %v2861_v7, 16  ;;  %vm7961_vm15 = vcmp.lt.s32.totalorder %v7960_v4, 0 }
 0x3d1   :  { %v2869_v58 = vand.u32 65535, %v2865_v36  ;;  %v2870_v61 = vshrl.u32 %v2865_v36, 16  ;;  %v2768_v30 = vsub.s32 0, %v10912_v32  ;;  %v2976_v24 = vshrl.u32 %v2975_v16, 23 }
 0x3d2   :  { %v2894_v37 = vmul.u32 %v2892_v47, %v2867_v12  ;;  %v10938_v63 = vadd.f32 %v2146_v15, %v2098_v28  ;;  %vm2767_vm0 = vcmp.lt.s32.totalorder %v10912_v32, 0  ;;  %v10943_v40 = vsel %vm13617_vm9, %v2324_v23, %v2323_v55 }
 0x3d3   :  { %v2872_v0 = vmul.u32 %v2870_v61, %v2867_v12  ;;  %v2873_v3 = vmul.u32 %v2869_v58, %v2868_v9  ;;  %13965 = vst [vmem:[#allocation46_spill] sm:$0xff] %v10943_v40  ;;  %v10945_v54 = vadd.f32 %v2187_v38, %v2098_v28  ;;  %v2895_v7 = vmul.u32 %v2891_v45, %v2868_v9 }
 0x3d4   :  { %13964 = vst [vmem:[#allocation28_spill] sm:$0xff] %v10938_v63  ;;  %v2897_v17 = vshll.u32 %v2894_v37, 16  ;;  %v10947_v36 = vsel %vm7961_vm15, 0, %v7960_v4  ;;  %vm7964_vm5 = vcmp.lt.s32.totalorder %v7963_v5, 0  ;;  %v2871_v43 = vmul.u32 %v2869_v58, %v2867_v12 }
 0x3d5   :  { %13966 = vst [vmem:[#allocation36_spill] sm:$0xff] %v10945_v54  ;;  %v2875_v27 = vshll.u32 %v2872_v0, 16  ;;  %v2769_v16 = vsel %vm2767_vm0, %v2768_v30, %v10912_v32  ;;  %v2893_v15 = vmul.u32 %v2891_v45, %v2867_v12  ;;  %v13561_v49 = vand.u32 2147483647, %v10896_v11 }
 0x3d6   :  { %v7971_v44 = vadd.s32 4294967169, %v2976_v24  ;;  %v2874_v50 = vmul.u32 %v2870_v61, %v2868_v9  ;;  %v2877_v31 = vshll.u32 %v2873_v3, 16  ;;  %v2896_v38 = vmul.u32 %v2892_v47, %v2868_v9 }
 0x3d7   :  { %vm2879_vm10 = vc.u32 %v2871_v43, %v2875_v27  ;;  %v2881_v55 = vadd.s32 %v2875_v27, %v2871_v43  ;;  %v2899_v28 = vshll.u32 %v2895_v7, 16  ;;  %vm2901_vm7 = vc.u32 %v2893_v15, %v2897_v17 }
 0x3d8   :  { %v2880_v23 = vsel %vm2879_vm10, 1, %v13947_v14  ;;  %v2902_v58 = vsel %vm2901_vm7, 1, %v13947_v14  ;;  %v2903_v33 = vadd.s32 %v2897_v17, %v2893_v15  ;;  %v10954_v30 = vsel %vm7964_vm5, 0, %v7963_v5 }
 0x3d9   :  { %v2882_v4 = vadd.s32 %v2880_v23, %v2874_v50  ;;  %vm2883_vm11 = vc.u32 %v2881_v55, %v2877_v31  ;;  %v2770_v12 = vclz %v2769_v16  ;;  %v2904_v61 = vadd.s32 %v2902_v58, %v2896_v38 }
 0x3da   :  { %v2884_v45 = vsel %vm2883_vm11, 1, %v13947_v14  ;;  %v2855_v27 = vsel %vm2853_vm13, %v10900_v48, 2102212464  ;;  %v2876_v43 = vshrl.u32 %v2872_v0, 16  ;;  %vm2905_vm8 = vc.u32 %v2903_v33, %v2899_v28 }
 0x3db   :  { %v2886_v47 = vadd.s32 %v2884_v45, %v2882_v4  ;;  %v13967_v50 = vmov 683565275   ;;  %v2906_v9 = vsel %vm2905_vm8, 1, %v13947_v14  ;;  %v2979_v5 = vand.u32 8388607, %v13561_v49 }
 0x3dc   :  { %v2834_v31 = vshrl.u32 %v13967_v50, %v10867_v53  ;;  %v2982_v24 = vadd.s32 1, %v7971_v44  ;;  %v2878_v17 = vshrl.u32 %v2873_v3, 16  ;;  %v2898_v15 = vshrl.u32 %v2894_v37, 16 }
 0x3dd   :  { %v2887_v16 = vadd.s32 %v2886_v47, %v2876_v43  ;;  %v2908_v55 = vadd.s32 %v2906_v9, %v2904_v61  ;;  %v7966_v23 = vadd.s32 4294967294, %v2770_v12  ;;  %v2856_v0 = vsel %vm2852_vm2, %v10893_v52, %v2855_v27 }
 0x3de   :  { %v2854_v48 = vsel %vm2850_vm14, %v2834_v31, %v10891_v60  ;;  %vm2983_vm12 = vcmp.gt.s32.totalorder %v2982_v24, 0  ;;  %v2900_v38 = vshrl.u32 %v2895_v7, 16  ;;  %v10975_v44 = vadd.s32 %v10683_v19, %v10675_v10  ;;  %v2008_v31 = vpop.f32.mrf.mxu0 }
 0x3df   :  { %v10971_v53 = vadd.s32 %v2887_v16, %v2878_v17  ;;  %v2909_v4 = vadd.s32 %v2908_v55, %v2898_v15  ;;  %v2984_v58 = vsel %vm2983_vm12, %v2982_v24, 0  ;;  %v2470_v12 = vsub.s32 4294967266, %v10947_v36 }
 0x3e0   :  { %v2986_v60 = vand.u32 31, %v2984_v58  ;;  %v2620_v52 = vsub.s32 32, %v10954_v30  ;;  %v10982_v45 = vadd.s32 %v2903_v33, %v2899_v28  ;;  %v2624_v7 = vsub.s32 4294967266, %v10954_v30 }
 0x3e1   :  { %v2910_v61 = vadd.s32 %v2909_v4, %v2900_v38  ;;  %vm7967_vm1 = vcmp.lt.s32.totalorder %v7966_v23, 0  ;;  %v2857_v10 = vsel %vm2851_vm3, %v2854_v48, %v2856_v0  ;;  %v2980_v43 = vor.u32 8388608, %v2979_v5 }
 0x3e2   :  { %v10987_v19 = vsub.s32 32, %v2986_v60  ;;  %vm2913_vm4 = vc.u32 %v10971_v53, %v10982_v45  ;;  %v10991_v47 = vshrl.u32 %v2984_v58, 5  ;;  %v2989_v33 = vshll.u32 %v13967_v50, %v2986_v60 }
 0x3e3   :  { %v2914_v27 = vadd.s32 1, %v2910_v61  ;;  %v13968_v28 = vmov 2475754826   ;;  %v13969_v21 = vmov 2131351028   ;;  %v11011_v49 = vadd.f32 %v2008_v31, %v10443_v41 }
 0x3e4   :  { %v2990_v9 = vshrl.u32 %v13968_v28, %v10987_v19  ;;  %v2992_v24 = vshll.u32 %v13968_v28, %v2986_v60  ;;  %v2993_v17 = vshrl.u32 %v13969_v21, %v10987_v19  ;;  %v2995_v16 = vshll.u32 %v13969_v21, %v2986_v60 }
 0x3e5   :  { %v13970_v15 = vmov 2102212464   ;;  %v13971_v48 = vmov 920167782   ;;  %13972 = vst [vmem:[#allocation55_spill] sm:$0xff] %v11011_v49  ;;  %v2915_v3 = vsel %vm2913_vm4, %v2914_v27, %v2910_v61  ;;  %v2625_v56 = vadd.s32 127, %v2624_v7 }
 0x3e6   :  { %v2996_v55 = vshrl.u32 %v13970_v15, %v10987_v19  ;;  %v2998_v5 = vshll.u32 %v13970_v15, %v2986_v60  ;;  %v2999_v0 = vshrl.u32 %v13971_v48, %v10987_v19  ;;  %v11005_v38 = vor.u32 %v2990_v9, %v2989_v33 }
 0x3e7   :  { %v11007_v4 = vor.u32 %v2993_v17, %v2992_v24  ;;  %v3001_v58 = vshll.u32 %v13971_v48, %v2986_v60  ;;  %v13973_v40 = vmov 1326507024   ;;  %v11021_v33 = vsel %vm7967_vm1, 0, %v7966_v23 }
 0x3e8   :  { %v11016_v37 = vor.u32 %v2996_v55, %v2995_v16  ;;  %v3000_v8 = vor.u32 %v2999_v0, %v2998_v5  ;;  %v3002_v57 = vshrl.u32 %v13973_v40, %v10987_v19  ;;  %v2911_v9 = vmul.u32 %v10910_v34, %v2857_v10 }
 0x3e9   :  { %vm3004_vm6 = vcmp.lt.s32.totalorder %v10991_v47, 1  ;;  %vm3007_vm14 = vcmp.lt.s32.totalorder %v10991_v47, 4  ;;  %v11030_v27 = vshll.u32 %v2980_v43, 8  ;;  %vm3006_vm13 = vcmp.lt.s32.totalorder %v10991_v47, 3 }
 0x3ea   :  { %v3003_v60 = vor.u32 %v3002_v57, %v3001_v58  ;;  %v3012_v61 = vsel %vm3004_vm6, %v11005_v38, %v11007_v4  ;;  %v11032_v31 = vadd.s32 %v2915_v3, %v2911_v9  ;;  %v3013_v23 = vsel %vm3007_vm14, %v3000_v8, 920167782 }
 0x3eb   :  { %v3016_v57 = vsel %vm3004_vm6, %v11007_v4, %v11016_v37  ;;  %vm3005_vm2 = vcmp.lt.s32.totalorder %v10991_v47, 2  ;;  %v3014_v34 = vsel %vm3006_vm13, %v11016_v37, %v3013_v23  ;;  %v3129_v7 = vand.u32 2139095040, %v11011_v49 }
 0x3ec   :  { %v3017_v3 = vsel %vm3007_vm14, %v3003_v60, 1326507024  ;;  %v2604_v10 = vadd.s32 %v10726_v51, %v10731_v35  ;;  %v2778_v43 = vsub.s32 4294967266, %v11021_v33  ;;  %v3015_v24 = vsel %vm3005_vm2, %v3012_v61, %v3014_v34 }
 0x3ed   :  { %v3018_v17 = vsel %vm3006_vm13, %v3000_v8, %v3017_v3  ;;  %v3021_v55 = vand.u32 65535, %v11030_v27  ;;  %v3045_v5 = vand.u32 65535, %v3015_v24  ;;  %v3046_v0 = vshrl.u32 %v3015_v24, 16  ;;  %v11066_v24 = vpop.permute.xlu1 %2117 }
 0x3ee   :  { %v3019_v16 = vsel %vm3005_vm2, %v3016_v57, %v3018_v17  ;;  %v2622_v58 = vshrl.u32 %v2604_v10, %v2620_v52  ;;  %v2917_v9 = vadd.s32 536870912, %v11032_v31  ;;  %v2626_v35 = vshll.u32 %v2625_v56, 23 }
 0x3ef   :  { %v3023_v60 = vand.u32 65535, %v3019_v16  ;;  %v3024_v51 = vshrl.u32 %v3019_v16, 16  ;;  %v3022_v23 = vshrl.u32 %v11030_v27, 16  ;;  %v11060_v18 = vmul.u32 %v3046_v0, %v3021_v55 }
 0x3f0   :  { %v3130_v61 = vshrl.u32 %v3129_v7, 23  ;;  %v2471_v34 = vadd.s32 127, %v2470_v12  ;;  %v2621_v8 = vshll.u32 %v10840_v2, %v10954_v30  ;;  %v2758_v57 = vadd.s32 %v10846_v42, %v10844_v1 }
 0x3f1   :  { %v3026_v3 = vmul.u32 %v3024_v51, %v3021_v55  ;;  %v2779_v52 = vadd.s32 127, %v2778_v43  ;;  %v11068_v10 = vmul.u32 %v3023_v60, %v3022_v23  ;;  %v11070_v17 = vmul.u32 %v3045_v5, %v3022_v23 }
 0x3f2   :  { %v3051_v56 = vshll.u32 %v11060_v18, 16  ;;  %v11073_v16 = vshrl.u32 %v2917_v9, 30  ;;  %v3025_v7 = vmul.u32 %v3023_v60, %v3021_v55  ;;  %v3047_v13 = vmul.u32 %v3045_v5, %v3021_v55 }
 0x3f3   :  { %v3029_v12 = vshll.u32 %v3026_v3, 16  ;;  %v2623_v54 = vor.u32 %v2622_v58, %v2621_v8  ;;  %v2627_v2 = vor.u32 4788187, %v2626_v35  ;;  %v3031_v30 = vshll.u32 %v11068_v10, 16 }
 0x3f4   :  { %13974 = vst [vmem:[#allocation56_spill] sm:$0xff] %v11073_v16  ;;  %v7974_v1 = vadd.s32 4294967169, %v3130_v61  ;;  %vm3055_vm15 = vc.u32 %v3047_v13, %v3051_v56  ;;  %v11076_v43 = vadd.s32 %v3051_v56, %v3047_v13  ;;  %v2774_v63 = vsub.s32 32, %v11021_v33 }
 0x3f5   :  { %vm3033_vm3 = vc.u32 %v3025_v7, %v3029_v12  ;;  %v3035_v42 = vadd.s32 %v3029_v12, %v3025_v7  ;;  %v3028_v11 = vmul.u32 %v3024_v51, %v3022_v23  ;;  %v13575_v9 = vshll.u32 %v11070_v17, 16 }
 0x3f6   :  { %v3034_v62 = vsel %vm3033_vm3, 1, %v13947_v14  ;;  %v2780_v60 = vshll.u32 %v2779_v52, 23  ;;  %v2919_v55 = vshll.u32 %v11073_v16, 30  ;;  %v3056_v5 = vsel %vm3055_vm15, 1, %v13947_v14 }
 0x3f7   :  { %vm3037_vm0 = vc.u32 %v3035_v42, %v3031_v30  ;;  %v3036_v58 = vadd.s32 %v3034_v62, %v3028_v11  ;;  %v3050_v35 = vmul.u32 %v3046_v0, %v3022_v23  ;;  %vm3059_vm5 = vc.u32 %v11076_v43, %v13575_v9  ;;  %v2149_v42 = vpop.f32.mrf.mxu2  ;;  %v11097_v9 = vpop.permute.xlu1 %2102 }
 0x3f8   :  { %v13576_v13 = vand.u32 2147483647, %v11011_v49  ;;  %v13975_v51 = vsub.s32 32, %v10947_v36  ;;  %v2472_v8 = vshll.u32 %v2471_v34, 23  ;;  %v3038_v52 = vsel %vm3037_vm0, 1, %v13947_v14 }
 0x3f9   :  { %v3136_v56 = vadd.s32 1, %v7974_v1  ;;  %v2628_v7 = vand.u32 2147483647, %v2627_v2  ;;  %v2630_v12 = vcvt.s32.f32 %v2623_v54  ;;  %v2776_v30 = vshrl.u32 %v2758_v57, %v2774_v63 }
 0x3fa   :  { %v2468_v61 = vshrl.u32 %v10975_v44, %v13975_v51  ;;  %v3058_v62 = vadd.s32 %v3056_v5, %v3050_v35  ;;  %v11091_v11 = vor.u32 4788187, %v2780_v60  ;;  %v11094_v0 = vsub.s32 %v11032_v31, %v2919_v55 }
 0x3fb   :  { %v3060_v23 = vsel %vm3059_vm5, 1, %v13947_v14  ;;  %vm3137_vm10 = vcmp.gt.s32.totalorder %v3136_v56, 0  ;;  %v2775_v44 = vshll.u32 %v10912_v32, %v11021_v33  ;;  %v3040_v34 = vadd.s32 %v3038_v52, %v3036_v58 }
 0x3fc   :  { %v3133_v54 = vand.u32 8388607, %v13576_v13  ;;  %v3138_v63 = vsel %vm3137_vm10, %v3136_v56, 0  ;;  %v13976_v57 = vshll.u32 %v10811_v6, %v10947_v36  ;;  %v11108_v31 = vor.u32 4788187, %v2472_v8 }
 0x3fd   :  { %v11111_v1 = vadd.f32 %v2149_v42, %v11097_v9  ;;  %v3140_v60 = vand.u32 31, %v3138_v63  ;;  %v11113_v55 = vmul.f32 %v2630_v12, %v2628_v7  ;;  %v11115_v5 = vor.u32 %v2776_v30, %v2775_v44 }
 0x3fe   :  { %v11106_v2 = vor.u32 %v2468_v61, %v13976_v57  ;;  %v3030_v32 = vshrl.u32 %v3026_v3, 16  ;;  %v3062_v33 = vadd.s32 %v3060_v23, %v3058_v62  ;;  %v2782_v58 = vand.u32 2147483647, %v11091_v11 }
 0x3ff   :  { %13977 = vst [vmem:[#allocation17_spill] sm:$0xff] %v11111_v1  ;;  %vm2921_vm7 = vcmp.lt.s32.totalorder %v11094_v0, 0  ;;  %v2988_v6 = vshrl.u32 %v13967_v50, %v10987_v19  ;;  %v11121_v36 = vsub.s32 32, %v3140_v60  ;;  %v2922_v35 = vsub.s32 0, %v11094_v0 }
 0x400   :  { %v3041_v51 = vadd.s32 %v3040_v34, %v3030_v32  ;;  %v3052_v61 = vshrl.u32 %v11060_v18, 16  ;;  %v3134_v8 = vor.u32 8388608, %v3133_v54  ;;  %v3143_v52 = vshll.u32 %v13967_v50, %v3140_v60 }
 0x401   :  { %v3144_v3 = vshrl.u32 %v13968_v28, %v11121_v36  ;;  %v3146_v56 = vshll.u32 %v13968_v28, %v3140_v60  ;;  %v3147_v7 = vshrl.u32 %v13969_v21, %v11121_v36  ;;  %v11131_v19 = vshrl.u32 %v3138_v63, 5 }
 0x402   :  { %v3063_v12 = vadd.s32 %v3062_v33, %v3052_v61  ;;  %v3149_v30 = vshll.u32 %v13969_v21, %v3140_v60  ;;  %v3150_v42 = vshrl.u32 %v13970_v15, %v11121_v36  ;;  %v3152_v23 = vshll.u32 %v13970_v15, %v3140_v60 }
 0x403   :  { %v11136_v18 = vor.u32 %v3144_v3, %v3143_v52  ;;  %v11138_v62 = vor.u32 %v3147_v7, %v3146_v56  ;;  %v3153_v44 = vshrl.u32 %v13971_v48, %v11121_v36  ;;  %v2923_v34 = vsel %vm2921_vm7, %v2922_v35, %v11094_v0 }
 0x404   :  { %v3009_v54 = vsel %vm3007_vm14, %v11016_v37, 2102212464  ;;  %v3032_v63 = vshrl.u32 %v11068_v10, 16  ;;  %v3054_v57 = vshrl.u32 %v11070_v17, 16  ;;  %v11151_v32 = vor.u32 %v3150_v42, %v3149_v30 }
 0x405   :  { %v3154_v33 = vor.u32 %v3153_v44, %v3152_v23  ;;  %v3155_v61 = vshll.u32 %v13971_v48, %v3140_v60  ;;  %v3156_v52 = vshrl.u32 %v13973_v40, %v11121_v36  ;;  %v3008_v35 = vsel %vm3004_vm6, %v2988_v6, %v11005_v38 }
 0x406   :  { %v3064_v3 = vadd.s32 %v3063_v12, %v3054_v57  ;;  %vm3158_vm11 = vcmp.lt.s32.totalorder %v11131_v19, 1  ;;  %v11160_v37 = vshll.u32 %v3134_v8, 8  ;;  %v11162_v10 = vadd.s32 %v3041_v51, %v3032_v63 }
 0x407   :  { %v3157_v56 = vor.u32 %v3156_v52, %v3155_v61  ;;  %vm3161_vm8 = vcmp.lt.s32.totalorder %v11131_v19, 4  ;;  %v3166_v60 = vsel %vm3158_vm11, %v11136_v18, %v11138_v62  ;;  %v2924_v7 = vclz %v2923_v34 }
 0x408   :  { %v3010_v38 = vsel %vm3006_vm13, %v11007_v4, %v3009_v54  ;;  %vm3160_vm12 = vcmp.lt.s32.totalorder %v11131_v19, 3  ;;  %v3167_v6 = vsel %vm3161_vm8, %v3154_v33, 920167782  ;;  %v13978_v51 = vshll.u32 %v11070_v17, 16 }
 0x409   :  { %vm3159_vm1 = vcmp.lt.s32.totalorder %v11131_v19, 2  ;;  %v3168_v12 = vsel %vm3160_vm12, %v11151_v32, %v3167_v6  ;;  %v3170_v4 = vsel %vm3158_vm11, %v11138_v62, %v11151_v32  ;;  %v3068_v30 = vadd.s32 1, %v3064_v3 }
 0x40a   :  { %v11178_v8 = vadd.s32 %v11076_v43, %v13978_v51  ;;  %v3169_v42 = vsel %vm3159_vm1, %v3166_v60, %v3168_v12  ;;  %v3171_v17 = vsel %vm3161_vm8, %v3157_v56, 1326507024  ;;  %v3175_v43 = vand.u32 65535, %v11160_v37 }
 0x40b   :  { %v3172_v23 = vsel %vm3160_vm12, %v3154_v33, %v3171_v17  ;;  %v3199_v44 = vand.u32 65535, %v3169_v42  ;;  %v3200_v34 = vshrl.u32 %v3169_v42, 16  ;;  %v7969_v54 = vadd.s32 4294967294, %v2924_v7  ;;  %v2049_v7 = vpop.f32.mrf.mxu1 }
 0x40c   :  { %vm3067_vm4 = vc.u32 %v11162_v10, %v11178_v8  ;;  %v3011_v63 = vsel %vm3005_vm2, %v3008_v35, %v3010_v38  ;;  %v3173_v57 = vsel %vm3159_vm1, %v3170_v4, %v3172_v23  ;;  %v3176_v61 = vshrl.u32 %v11160_v37, 16 }
 0x40d   :  { %v2784_v52 = vcvt.s32.f32 %v11115_v5  ;;  %v3177_v56 = vand.u32 65535, %v3173_v57  ;;  %v3178_v60 = vshrl.u32 %v3173_v57, 16  ;;  %v3202_v6 = vmul.u32 %v3200_v34, %v3175_v43 }
 0x40e   :  { %v2474_v51 = vand.u32 2147483647, %v11108_v31  ;;  %v2476_v33 = vcvt.s32.f32 %v11106_v2  ;;  %v3069_v12 = vsel %vm3067_vm4, %v3068_v30, %v3064_v3  ;;  %v3203_v42 = vmul.u32 %v3199_v44, %v3176_v61 }
 0x40f   :  { %v2632_v47 = vxor.u32 2147483648, %v11113_v55  ;;  %v11208_v35 = vmul.f32 %v2784_v52, %v2782_v58  ;;  %v3065_v38 = vmul.u32 %v11030_v27, %v3011_v63  ;;  %v3180_v4 = vmul.u32 %v3178_v60, %v3175_v43 }
 0x410   :  { %vm7970_vm6 = vcmp.lt.s32.totalorder %v7969_v54, 0  ;;  %v3181_v5 = vmul.u32 %v3177_v56, %v3176_v61  ;;  %v3201_v17 = vmul.u32 %v3199_v44, %v3175_v43  ;;  %v3205_v23 = vshll.u32 %v3202_v6, 16  ;;  %v2190_v44 = vpop.f32.mrf.mxu3 }
 0x411   :  { %v11211_v57 = vadd.s32 %v3069_v12, %v3065_v38  ;;  %v3179_v31 = vmul.u32 %v3177_v56, %v3175_v43  ;;  %v3183_v2 = vshll.u32 %v3180_v4, 16  ;;  %v11214_v3 = vadd.f32 %v2049_v7, %v10443_v41 }
 0x412   :  { %v3204_v30 = vmul.u32 %v3200_v34, %v3176_v61  ;;  %v3207_v13 = vshll.u32 %v3203_v42, 16  ;;  %vm3209_vm14 = vc.u32 %v3201_v17, %v3205_v23  ;;  %v3211_v11 = vadd.s32 %v3205_v23, %v3201_v17 }
 0x413   :  { %13979 = vst [vmem:[#allocation40_spill] sm:$0xff] %v11214_v3  ;;  %v3182_v58 = vmul.u32 %v3178_v60, %v3176_v61  ;;  %vm3187_vm13 = vc.u32 %v3179_v31, %v3183_v2  ;;  %v3189_v52 = vadd.s32 %v3183_v2, %v3179_v31  ;;  %v3210_v27 = vsel %vm3209_vm14, 1, %v13947_v14 }
 0x414   :  { %vm13622_vm2 = vcmp.lt.s32.totalorder %v10595_v39, 0  ;;  %v3185_v63 = vshll.u32 %v3181_v5, 16  ;;  %v3188_v12 = vsel %vm3187_vm13, 1, %v13947_v14  ;;  %v3212_v43 = vadd.s32 %v3210_v27, %v3204_v30 }
 0x415   :  { %vm3213_vm3 = vc.u32 %v3211_v11, %v3207_v13  ;;  %v2927_v41 = vsel %vm7970_vm6, 0, %v7969_v54  ;;  %v3142_v34 = vshrl.u32 %v13967_v50, %v11121_v36  ;;  %v3163_v61 = vsel %vm3161_vm8, %v11151_v32, 2102212464 }
 0x416   :  { %v3190_v56 = vadd.s32 %v3188_v12, %v3182_v58  ;;  %v3071_v60 = vadd.s32 536870912, %v11211_v57  ;;  %vm3191_vm15 = vc.u32 %v3189_v52, %v3185_v63  ;;  %v3214_v7 = vsel %vm3213_vm3, 1, %v13947_v14 }
 0x417   :  { %v3283_v38 = vand.u32 2139095040, %v11214_v3  ;;  %v3162_v17 = vsel %vm3158_vm11, %v3142_v34, %v11136_v18  ;;  %v3192_v54 = vsel %vm3191_vm15, 1, %v13947_v14  ;;  %v3206_v23 = vshrl.u32 %v3202_v6, 16 }
 0x418   :  { %v3216_v36 = vadd.s32 %v3214_v7, %v3212_v43  ;;  %v13980_v31 = vand.u32 2147483647, %v10595_v39  ;;  %v13981_v32 = vmov 0  ;;  %v3164_v2 = vsel %vm3160_vm12, %v11138_v62, %v3163_v61 }
 0x419   :  { %v3184_v30 = vshrl.u32 %v3180_v4, 16  ;;  %v3194_v58 = vadd.s32 %v3192_v54, %v3190_v56  ;;  %v3284_v52 = vshrl.u32 %v3283_v38, 23  ;;  %vm13618_vm5 = vcmp.lt.s32.totalorder %v10629_v22, 0 }
 0x41a   :  { %vm11234_vm0 = vcmp.le.f32.partialorder %v13980_v31, 0.7853982  ;;  %v2912_v18 = vadd.s32 %v10982_v45, %v10971_v53  ;;  %v2928_v6 = vsub.s32 32, %v2927_v41  ;;  %v3208_v27 = vshrl.u32 %v3203_v42, 16 }
 0x41b   :  { %v13982_v32 = vsel %vm11234_vm0, 4294967295, %v13981_v32  ;;  %v3217_v63 = vadd.s32 %v3216_v36, %v3206_v23  ;;  %v2932_v12 = vsub.s32 4294967266, %v2927_v41  ;;  %v3186_v43 = vshrl.u32 %v3181_v5, 16  ;;  %v2193_v23 = vpop.f32.mrf.mxu3 }
 0x41c   :  { %13983 = vst [vmem:[#allocation41_spill] sm:$0xff] %v13982_v32  ;;  %v3195_v34 = vadd.s32 %v3194_v58, %v3184_v30  ;;  %v7977_v7 = vadd.s32 4294967169, %v3284_v52  ;;  %v11244_v31 = vshrl.u32 %v3071_v60, 30  ;;  %v3165_v62 = vsel %vm3159_vm1, %v3162_v17, %v3164_v2  ;;  %v2152_v17 = vpop.f32.mrf.mxu2 }
 0x41d   :  { %v3218_v4 = vadd.s32 %v3217_v63, %v3208_v27  ;;  %v13577_v61 = vand.u32 2147483647, %v11214_v3  ;;  %v11249_v56 = vmul.f32 %v2476_v33, %v2474_v51  ;;  %v11253_v53 = vadd.s32 %v3211_v11, %v3207_v13 }
 0x41e   :  { %13984 = vst [vmem:[#allocation19_spill] sm:$0xff] %v11244_v31  ;;  %v11251_v38 = vadd.s32 %v3195_v34, %v3186_v43  ;;  %v3290_v45 = vadd.s32 1, %v7977_v7  ;;  %v2633_v42 = vsel %vm13622_vm2, %v2632_v47, %v11113_v55  ;;  %v2786_v5 = vxor.u32 2147483648, %v11208_v35  ;;  %v2011_v43 = vpop.f32.mrf.mxu0 }
 0x41f   :  { %13985 = vst [vmem:[#allocation53_spill] sm:$0xff] %v11249_v56  ;;  %v2930_v60 = vshrl.u32 %v2912_v18, %v2928_v6  ;;  %v3222_v54 = vadd.s32 1, %v3218_v4  ;;  %v2933_v19 = vadd.s32 127, %v2932_v12  ;;  %v3219_v36 = vmul.u32 %v11160_v37, %v3165_v62 }
 0x420   :  { %vm3221_vm10 = vc.u32 %v11251_v38, %v11253_v53  ;;  %vm3291_vm7 = vcmp.gt.s32.totalorder %v3290_v45, 0  ;;  %v3073_v13 = vshll.u32 %v11244_v31, 30  ;;  %v3287_v33 = vand.u32 8388607, %v13577_v61 }
 0x421   :  { %v3223_v51 = vsel %vm3221_vm10, %v3222_v54, %v3218_v4  ;;  %v3292_v55 = vsel %vm3291_vm7, %v3290_v45, 0  ;;  %v11266_v47 = vadd.f32 %v2190_v44, %v11097_v9  ;;  %v2929_v11 = vshll.u32 %v11094_v0, %v2927_v41 }
 0x422   :  { %v3224_v2 = vadd.s32 %v3223_v51, %v3219_v36  ;;  %v3294_v30 = vand.u32 31, %v3292_v55  ;;  %v11273_v58 = vsel %vm11234_vm0, %v10595_v39, %v2633_v42  ;;  %v11276_v52 = vadd.f32 %v2152_v17, %v10853_v26 }
 0x423   :  { %13986 = vst [vmem:[#allocation62_spill] sm:$0xff] %v11266_v47  ;;  %v11279_v18 = vadd.f32 %v2193_v23, %v10853_v26  ;;  %v2787_v9 = vsel %vm13618_vm5, %v2786_v5, %v11208_v35  ;;  %v11284_v0 = vor.u32 %v2930_v60, %v2929_v11  ;;  %v2934_v44 = vshll.u32 %v2933_v19, 23 }
 0x424   :  { %13987 = vst [vmem:[#allocation63_spill] sm:$0xff] %v11273_v58  ;;  %v3295_v41 = vsub.s32 32, %v3294_v30  ;;  %v11287_v6 = vsub.s32 %v11211_v57, %v3073_v13  ;;  %v3225_v27 = vadd.s32 536870912, %v3224_v2  ;;  %v3288_v63 = vor.u32 8388608, %v3287_v33 }
 0x425   :  { %13988 = vst [vmem:[#allocation18_spill] sm:$0xff] %v11276_v52  ;;  %v11289_v12 = vshrl.u32 %v3292_v55, 5  ;;  %v3297_v34 = vshll.u32 %v13967_v50, %v3294_v30  ;;  %v3300_v7 = vshll.u32 %v13968_v28, %v3294_v30  ;;  %v3303_v35 = vshll.u32 %v13969_v21, %v3294_v30 }
 0x426   :  { %13989 = vst [vmem:[#allocation42_spill] sm:$0xff] %v11279_v18  ;;  %v3298_v26 = vshrl.u32 %v13968_v28, %v3295_v41  ;;  %v3301_v62 = vshrl.u32 %v13969_v21, %v3295_v41  ;;  %v3304_v4 = vshrl.u32 %v13970_v15, %v3295_v41  ;;  %v3306_v57 = vshll.u32 %v13970_v15, %v3294_v30 }
 0x427   :  { %v3307_v45 = vshrl.u32 %v13971_v48, %v3295_v41  ;;  %v13990_v42 = vand.u32 2147483647, %v10629_v22  ;;  %v13991_v5 = vmov 0  ;;  %v3309_v54 = vshll.u32 %v13971_v48, %v3294_v30 }
 0x428   :  { %v11305_v60 = vor.u32 %v3298_v26, %v3297_v34  ;;  %v3310_v19 = vshrl.u32 %v13973_v40, %v3295_v41  ;;  %v11310_v17 = vadd.f32 %v2011_v43, %v10559_v20  ;;  %v11312_v23 = vshrl.u32 %v3225_v27, 30 }
 0x429   :  { %vm11301_vm11 = vcmp.le.f32.partialorder %v13990_v42, 0.7853982  ;;  %v11314_v36 = vor.u32 %v3301_v62, %v3300_v7  ;;  %v3305_v13 = vor.u32 %v3304_v4, %v3303_v35  ;;  %v3308_v51 = vor.u32 %v3307_v45, %v3306_v57 }
 0x42a   :  { %v13992_v5 = vsel %vm11301_vm11, 4294967295, %v13991_v5  ;;  %13994 = vst [vmem:[#allocation20_spill] sm:$0xff] %v11312_v23  ;;  %v3311_v33 = vor.u32 %v3310_v19, %v3309_v54  ;;  %vm3312_vm8 = vcmp.lt.s32.totalorder %v11289_v12, 1  ;;  %vm3315_vm12 = vcmp.lt.s32.totalorder %v11289_v12, 4 }
 0x42b   :  { %13993 = vst [vmem:[#allocation43_spill] sm:$0xff] %v13992_v5  ;;  %v11318_v55 = vshll.u32 %v3288_v63, 8  ;;  %v3076_v11 = vsub.s32 0, %v11287_v6  ;;  %vm3314_vm1 = vcmp.lt.s32.totalorder %v11289_v12, 3  ;;  %v3320_v30 = vsel %vm3312_vm8, %v11305_v60, %v11314_v36 }
 0x42c   :  { %v3321_v27 = vsel %vm3315_vm12, %v3308_v51, 920167782  ;;  %vm3075_vm4 = vcmp.lt.s32.totalorder %v11287_v6, 0  ;;  %vm3313_vm6 = vcmp.lt.s32.totalorder %v11289_v12, 2  ;;  %v3437_v43 = vand.u32 2139095040, %v11310_v17 }
 0x42d   :  { %v3322_v63 = vsel %vm3314_vm1, %v3305_v13, %v3321_v27  ;;  %v3227_v34 = vshll.u32 %v11312_v23, 30  ;;  %v3324_v7 = vsel %vm3312_vm8, %v11314_v36, %v3305_v13  ;;  %v3325_v35 = vsel %vm3315_vm12, %v3311_v33, 1326507024 }
 0x42e   :  { %v3323_v26 = vsel %vm3313_vm6, %v3320_v30, %v3322_v63  ;;  %v2935_v62 = vor.u32 4788187, %v2934_v44  ;;  %v3326_v4 = vsel %vm3314_vm1, %v3308_v51, %v3325_v35  ;;  %v3329_v57 = vand.u32 65535, %v11318_v55 }
 0x42f   :  { %v3354_v45 = vshrl.u32 %v3323_v26, 16  ;;  %v11346_v42 = vmul.f32 %v11273_v58, %v11273_v58  ;;  %v3077_v54 = vsel %vm3075_vm4, %v3076_v11, %v11287_v6  ;;  %v3327_v19 = vsel %vm3313_vm6, %v3324_v7, %v3326_v4 }
 0x430   :  { %v3353_v30 = vand.u32 65535, %v3323_v26  ;;  %v3330_v27 = vshrl.u32 %v11318_v55, 16  ;;  %v3331_v33 = vand.u32 65535, %v3327_v19  ;;  %v3332_v44 = vshrl.u32 %v3327_v19, 16 }
 0x431   :  { %13995 = vst [vmem:[#allocation29_spill] sm:$0xff] %v11346_v42  ;;  %v3356_v63 = vmul.u32 %v3354_v45, %v3329_v57  ;;  %v11355_v51 = vsel %vm11301_vm11, %v10629_v22, %v2787_v9  ;;  %v2938_v35 = vcvt.s32.f32 %v11284_v0  ;;  %v11358_v37 = vsub.s32 %v3224_v2, %v3227_v34 }
 0x432   :  { %13996 = vst [vmem:[#allocation13_spill] sm:$0xff] %v11355_v51  ;;  %v3438_v61 = vshrl.u32 %v3437_v43, 23  ;;  %v2936_v11 = vand.u32 2147483647, %v2935_v62  ;;  %v3078_v58 = vclz %v3077_v54  ;;  %v3334_v32 = vmul.u32 %v3332_v44, %v3329_v57 }
 0x433   :  { %v3335_v7 = vmul.u32 %v3331_v33, %v3330_v27  ;;  %v3296_v26 = vshrl.u32 %v13967_v50, %v3295_v41  ;;  %v3357_v4 = vmul.u32 %v3353_v30, %v3330_v27  ;;  %v3359_v56 = vshll.u32 %v3356_v63, 16 }
 0x434   :  { %v3317_v5 = vsel %vm3315_vm12, %v3305_v13, 2102212464  ;;  %v3333_v9 = vmul.u32 %v3331_v33, %v3329_v57  ;;  %v3337_v22 = vshll.u32 %v3334_v32, 16  ;;  %v3355_v39 = vmul.u32 %v3353_v30, %v3329_v57 }
 0x435   :  { %vm3229_vm14 = vcmp.lt.s32.totalorder %v11358_v37, 0  ;;  %v3336_v2 = vmul.u32 %v3332_v44, %v3330_v27  ;;  %v3358_v0 = vmul.u32 %v3354_v45, %v3330_v27  ;;  %v7980_v43 = vadd.s32 4294967169, %v3438_v61 }
 0x436   :  { %v3339_v34 = vshll.u32 %v3335_v7, 16  ;;  %vm3341_vm13 = vc.u32 %v3333_v9, %v3337_v22  ;;  %v3343_v62 = vadd.s32 %v3337_v22, %v3333_v9  ;;  %vm3363_vm3 = vc.u32 %v3355_v39, %v3359_v56 }
 0x437   :  { %v3230_v41 = vsub.s32 0, %v11358_v37  ;;  %v3342_v54 = vsel %vm3341_vm13, 1, %v13947_v14  ;;  %v3361_v19 = vshll.u32 %v3357_v4, 16  ;;  %v3364_v42 = vsel %vm3363_vm3, 1, %v13947_v14 }
 0x438   :  { %v3344_v13 = vadd.s32 %v3342_v54, %v3336_v2  ;;  %vm3345_vm15 = vc.u32 %v3343_v62, %v3339_v34  ;;  %v3365_v33 = vadd.s32 %v3359_v56, %v3355_v39  ;;  %v3366_v57 = vadd.s32 %v3364_v42, %v3358_v0 }
 0x439   :  { %v3316_v45 = vsel %vm3312_vm8, %v3296_v26, %v11305_v60  ;;  %v3346_v61 = vsel %vm3345_vm15, 1, %v13947_v14  ;;  %v13997_v22 = vand.u32 2147483647, %v11310_v17  ;;  %v3444_v27 = vadd.s32 1, %v7980_v43 }
 0x43a   :  { %v3318_v44 = vsel %vm3314_vm1, %v11314_v36, %v3317_v5  ;;  %v3338_v9 = vshrl.u32 %v3334_v32, 16  ;;  %v3348_v31 = vadd.s32 %v3346_v61, %v3344_v13  ;;  %vm3367_vm10 = vc.u32 %v3365_v33, %v3361_v19  ;;  %v2052_v61 = vpop.f32.mrf.mxu1 }
 0x43b   :  { %v3441_v30 = vand.u32 8388607, %v13997_v22  ;;  %v3231_v39 = vsel %vm3229_vm14, %v3230_v41, %v11358_v37  ;;  %v3360_v56 = vshrl.u32 %v3356_v63, 16  ;;  %v3368_v60 = vsel %vm3367_vm10, 1, %v13947_v14 }
 0x43c   :  { %vm3445_vm7 = vcmp.gt.s32.totalorder %v3444_v27, 0  ;;  %v3340_v42 = vshrl.u32 %v3335_v7, 16  ;;  %v3349_v26 = vadd.s32 %v3348_v31, %v3338_v9  ;;  %v3370_v2 = vadd.s32 %v3368_v60, %v3366_v57 }
 0x43d   :  { %v3446_v0 = vsel %vm3445_vm7, %v3444_v27, 0  ;;  %v2939_v43 = vmul.f32 %v2938_v35, %v2936_v11  ;;  %v11383_v34 = vadd.s32 %v11178_v8, %v11162_v10  ;;  %v7972_v32 = vadd.s32 4294967294, %v3078_v58 }
 0x43e   :  { %v3448_v5 = vand.u32 31, %v3446_v0  ;;  %v3319_v36 = vsel %vm3313_vm6, %v3316_v45, %v3318_v44  ;;  %v11387_v62 = vadd.s32 %v3349_v26, %v3340_v42  ;;  %v3362_v63 = vshrl.u32 %v3357_v4, 16 }
 0x43f   :  { %v3371_v41 = vadd.s32 %v3370_v2, %v3360_v56  ;;  %v3232_v54 = vclz %v3231_v39  ;;  %v11389_v13 = vadd.s32 %v3365_v33, %v3361_v19  ;;  %v3442_v31 = vor.u32 8388608, %v3441_v30 }
 0x440   :  { %v11391_v7 = vsub.s32 32, %v3448_v5  ;;  %v11393_v11 = vshrl.u32 %v3446_v0, 5  ;;  %v3451_v10 = vshll.u32 %v13967_v50, %v3448_v5  ;;  %v3454_v8 = vshll.u32 %v13968_v28, %v3448_v5 }
 0x441   :  { %v3372_v35 = vadd.s32 %v3371_v41, %v3362_v63  ;;  %vm13624_vm8 = vcmp.lt.s32.totalorder %v10816_v46, 0  ;;  %vm3375_vm12 = vc.u32 %v11387_v62, %v11389_v13  ;;  %v3457_v4 = vshll.u32 %v13969_v21, %v3448_v5 }
 0x442   :  { %v3452_v58 = vshrl.u32 %v13968_v28, %v11391_v7  ;;  %v3455_v12 = vshrl.u32 %v13969_v21, %v11391_v7  ;;  %v3458_v33 = vshrl.u32 %v13970_v15, %v11391_v7  ;;  %v3460_v57 = vshll.u32 %v13970_v15, %v3448_v5 }
 0x443   :  { %v3376_v19 = vadd.s32 1, %v3372_v35  ;;  %v3461_v45 = vshrl.u32 %v13971_v48, %v11391_v7  ;;  %vm7973_vm1 = vcmp.lt.s32.totalorder %v7972_v32, 0  ;;  %v3373_v22 = vmul.u32 %v11318_v55, %v3319_v36 }
 0x444   :  { %v11411_v30 = vor.u32 %v3452_v58, %v3451_v10  ;;  %v11413_v27 = vor.u32 %v3455_v12, %v3454_v8  ;;  %v2940_v44 = vxor.u32 2147483648, %v2939_v43  ;;  %v3459_v39 = vor.u32 %v3458_v33, %v3457_v4 }
 0x445   :  { %v3377_v9 = vsel %vm3375_vm12, %v3376_v19, %v3372_v35  ;;  %v3462_v56 = vor.u32 %v3461_v45, %v3460_v57  ;;  %v3463_v42 = vshll.u32 %v13971_v48, %v3448_v5  ;;  %v3464_v26 = vshrl.u32 %v13973_v40, %v11391_v7 }
 0x446   :  { %v3378_v60 = vadd.s32 %v3377_v9, %v3373_v22  ;;  %v11419_v2 = vadd.f32 %v2052_v61, %v10559_v20  ;;  %v11421_v0 = vsel %vm7973_vm1, 0, %v7972_v32  ;;  %v7975_v55 = vadd.s32 4294967294, %v3232_v54 }
 0x447   :  { %vm3466_vm4 = vcmp.lt.s32.totalorder %v11393_v11, 1  ;;  %v11424_v36 = vshll.u32 %v3442_v31, 8  ;;  %v3465_v41 = vor.u32 %v3464_v26, %v3463_v42  ;;  %vm3469_vm6 = vcmp.lt.s32.totalorder %v11393_v11, 4 }
 0x448   :  { %13998 = vst [vmem:[#allocation30_spill] sm:$0xff] %v11419_v2  ;;  %v3379_v63 = vadd.s32 536870912, %v3378_v60  ;;  %v3474_v5 = vsel %vm3466_vm4, %v11411_v30, %v11413_v27  ;;  %vm3467_vm14 = vcmp.lt.s32.totalorder %v11393_v11, 2  ;;  %vm3468_vm13 = vcmp.lt.s32.totalorder %v11393_v11, 3 }
 0x449   :  { %v3475_v20 = vsel %vm3469_vm6, %v3462_v56, 920167782  ;;  %v3478_v32 = vsel %vm3466_vm4, %v11413_v27, %v3459_v39  ;;  %v3479_v35 = vsel %vm3469_vm6, %v3465_v41, 1326507024  ;;  %v3591_v10 = vand.u32 2139095040, %v11419_v2 }
 0x44a   :  { %v11438_v54 = vshrl.u32 %v3379_v63, 30  ;;  %v3476_v31 = vsel %vm3468_vm13, %v3459_v39, %v3475_v20  ;;  %v11447_v8 = vsel %vm13624_vm8, %v2940_v44, %v2939_v43  ;;  %v3082_v58 = vsub.s32 32, %v11421_v0 }
 0x44b   :  { %v3477_v12 = vsel %vm3467_vm14, %v3474_v5, %v3476_v31  ;;  %v3480_v4 = vsel %vm3468_vm13, %v3462_v56, %v3479_v35  ;;  %v3483_v33 = vand.u32 65535, %v11424_v36  ;;  %vm7976_vm3 = vcmp.lt.s32.totalorder %v7975_v55, 0 }
 0x44c   :  { %13999 = vst [vmem:[#allocation39_spill] sm:$0xff] %v11438_v54  ;;  %v3481_v19 = vsel %vm3467_vm14, %v3478_v32, %v3480_v4  ;;  %v3507_v57 = vand.u32 65535, %v3477_v12  ;;  %v3508_v45 = vshrl.u32 %v3477_v12, 16  ;;  %v3484_v61 = vshrl.u32 %v11424_v36, 16 }
 0x44d   :  { %v3485_v43 = vand.u32 65535, %v3481_v19  ;;  %v3486_v22 = vshrl.u32 %v3481_v19, 16  ;;  %v3086_v44 = vsub.s32 4294967266, %v11421_v0  ;;  %v3381_v9 = vshll.u32 %v11438_v54, 30 }
 0x44e   :  { %v3510_v42 = vmul.u32 %v3508_v45, %v3483_v33  ;;  %v3592_v26 = vshrl.u32 %v3591_v10, 23  ;;  %v3084_v56 = vshrl.u32 %v11383_v34, %v3082_v58  ;;  %v11462_v20 = vsel %vm7976_vm3, 0, %v7975_v55 }
 0x44f   :  { %v3488_v63 = vmul.u32 %v3486_v22, %v3483_v33  ;;  %v3489_v41 = vmul.u32 %v3485_v43, %v3484_v61  ;;  %v3450_v32 = vshrl.u32 %v13967_v50, %v11391_v7  ;;  %v3511_v31 = vmul.u32 %v3507_v57, %v3484_v61 }
 0x450   :  { %v3513_v35 = vshll.u32 %v3510_v42, 16  ;;  %v3471_v12 = vsel %vm3469_vm6, %v3459_v39, 2102212464  ;;  %v3487_v4 = vmul.u32 %v3485_v43, %v3483_v33  ;;  %v3509_v16 = vmul.u32 %v3507_v57, %v3483_v33 }
 0x451   :  { %v3491_v19 = vshll.u32 %v3488_v63, 16  ;;  %v11468_v10 = vsub.s32 %v3378_v60, %v3381_v9  ;;  %v3490_v34 = vmul.u32 %v3486_v22, %v3484_v61  ;;  %v3512_v58 = vmul.u32 %v3508_v45, %v3484_v61 }
 0x452   :  { %v7983_v47 = vadd.s32 4294967169, %v3592_v26  ;;  %v3493_v1 = vshll.u32 %v3489_v41, 16  ;;  %vm3517_vm10 = vc.u32 %v3509_v16, %v3513_v35  ;;  %v3515_v7 = vshll.u32 %v3511_v31, 16 }
 0x453   :  { %vm3495_vm15 = vc.u32 %v3487_v4, %v3491_v19  ;;  %v3497_v55 = vadd.s32 %v3491_v19, %v3487_v4  ;;  %v3518_v54 = vsel %vm3517_vm10, 1, %v13947_v14  ;;  %v3519_v23 = vadd.s32 %v3513_v35, %v3509_v16 }
 0x454   :  { %v3496_v5 = vsel %vm3495_vm15, 1, %v13947_v14  ;;  %v3470_v39 = vsel %vm3466_vm4, %v3450_v32, %v11411_v30  ;;  %v3520_v60 = vadd.s32 %v3518_v54, %v3512_v58  ;;  %v3472_v57 = vsel %vm3468_vm13, %v11413_v27, %v3471_v12 }
 0x455   :  { %v3498_v33 = vadd.s32 %v3496_v5, %v3490_v34  ;;  %vm3499_vm7 = vc.u32 %v3497_v55, %v3493_v1  ;;  %vm3521_vm12 = vc.u32 %v3519_v23, %v3515_v7  ;;  %v3598_v61 = vadd.s32 1, %v7983_v47 }
 0x456   :  { %v3500_v45 = vsel %vm3499_vm7, 1, %v13947_v14  ;;  %v3384_v43 = vsub.s32 0, %v11468_v10  ;;  %v3492_v22 = vshrl.u32 %v3488_v63, 16  ;;  %v3522_v16 = vsel %vm3521_vm12, 1, %v13947_v14 }
 0x457   :  { %v3502_v9 = vadd.s32 %v3500_v45, %v3498_v33  ;;  %vm3383_vm1 = vcmp.lt.s32.totalorder %v11468_v10, 0  ;;  %v3514_v30 = vshrl.u32 %v3510_v42, 16  ;;  %v3524_v26 = vadd.s32 %v3522_v16, %v3520_v60 }
 0x458   :  { %vm3599_vm4 = vcmp.gt.s32.totalorder %v3598_v61, 0  ;;  %v3083_v1 = vshll.u32 %v11287_v6, %v11421_v0  ;;  %v3240_v27 = vsub.s32 4294967266, %v11462_v20  ;;  %v3494_v54 = vshrl.u32 %v3489_v41, 16 }
 0x459   :  { %v3503_v5 = vadd.s32 %v3502_v9, %v3492_v22  ;;  %v3473_v47 = vsel %vm3467_vm14, %v3470_v39, %v3472_v57  ;;  %v3516_v32 = vshrl.u32 %v3511_v31, 16  ;;  %v3525_v63 = vadd.s32 %v3524_v26, %v3514_v30 }
 0x45a   :  { %v3600_v35 = vsel %vm3599_vm4, %v3598_v61, 0  ;;  %v3385_v12 = vsel %vm3383_vm1, %v3384_v43, %v11468_v10  ;;  %v11490_v42 = vadd.s32 %v3519_v23, %v3515_v7  ;;  %v14000_v19 = vand.u32 2147483647, %v11419_v2 }
 0x45b   :  { %v11488_v4 = vadd.s32 %v3503_v5, %v3494_v54  ;;  %v11494_v6 = vor.u32 %v3084_v56, %v3083_v1  ;;  %v3087_v0 = vadd.s32 127, %v3086_v44  ;;  %v3526_v41 = vadd.s32 %v3525_v63, %v3516_v32 }
 0x45c   :  { %v3595_v34 = vand.u32 8388607, %v14000_v19  ;;  %v3602_v58 = vand.u32 31, %v3600_v35  ;;  %v3220_v11 = vadd.s32 %v11253_v53, %v11251_v38  ;;  %v3236_v31 = vsub.s32 32, %v11462_v20 }
 0x45d   :  { %v3241_v55 = vadd.s32 127, %v3240_v27  ;;  %vm3529_vm6 = vc.u32 %v11488_v4, %v11490_v42  ;;  %v3386_v39 = vclz %v3385_v12  ;;  %v3527_v23 = vmul.u32 %v11424_v36, %v3473_v47 }
 0x45e   :  { %v3530_v7 = vadd.s32 1, %v3526_v41  ;;  %v11502_v33 = vsub.s32 32, %v3602_v58  ;;  %v3596_v56 = vor.u32 8388608, %v3595_v34  ;;  %v11504_v60 = vshrl.u32 %v3600_v35, 5 }
 0x45f   :  { %v3605_v44 = vshll.u32 %v13967_v50, %v3602_v58  ;;  %v3608_v57 = vshll.u32 %v13968_v28, %v3602_v58  ;;  %v3611_v61 = vshll.u32 %v13969_v21, %v3602_v58  ;;  %v3614_v22 = vshll.u32 %v13970_v15, %v3602_v58 }
 0x460   :  { %v3531_v38 = vsel %vm3529_vm6, %v3530_v7, %v3526_v41  ;;  %v3606_v53 = vshrl.u32 %v13968_v28, %v11502_v33  ;;  %v3609_v45 = vshrl.u32 %v13969_v21, %v11502_v33  ;;  %v3612_v43 = vshrl.u32 %v13970_v15, %v11502_v33 }
 0x461   :  { %v3532_v36 = vadd.s32 %v3531_v38, %v3527_v23  ;;  %v3615_v9 = vshrl.u32 %v13971_v48, %v11502_v33  ;;  %v14001_v16 = vand.u32 2147483647, %v10816_v46  ;;  %v14002_v30 = vmov 0 }
 0x462   :  { %v11524_v26 = vor.u32 %v3606_v53, %v3605_v44  ;;  %v11526_v1 = vor.u32 %v3609_v45, %v3608_v57  ;;  %v3617_v27 = vshll.u32 %v13971_v48, %v3602_v58  ;;  %v3618_v54 = vshrl.u32 %v13973_v40, %v11502_v33 }
 0x463   :  { %vm11520_vm14 = vcmp.le.f32.partialorder %v14001_v16, 0.7853982  ;;  %v3088_v5 = vshll.u32 %v3087_v0, 23  ;;  %v3533_v47 = vadd.s32 536870912, %v3532_v36  ;;  %v11531_v32 = vor.u32 %v3612_v43, %v3611_v61 }
 0x464   :  { %v14003_v30 = vsel %vm11520_vm14, 4294967295, %v14002_v30  ;;  %v3616_v63 = vor.u32 %v3615_v9, %v3614_v22  ;;  %v3237_v35 = vshll.u32 %v11358_v37, %v11462_v20  ;;  %v3238_v12 = vshrl.u32 %v3220_v11, %v3236_v31 }
 0x465   :  { %14004 = vst [vmem:[#allocation15_spill] sm:$0xff] %v14003_v30  ;;  %v3242_v19 = vshll.u32 %v3241_v55, 23  ;;  %v3619_v34 = vor.u32 %v3618_v54, %v3617_v27  ;;  %v11535_v41 = vshrl.u32 %v3533_v47, 30  ;;  %vm3620_vm13 = vcmp.lt.s32.totalorder %v11504_v60, 1 }
 0x466   :  { %vm3623_vm3 = vcmp.lt.s32.totalorder %v11504_v60, 4  ;;  %v11539_v58 = vshll.u32 %v3596_v56, 8  ;;  %v7978_v23 = vadd.s32 4294967294, %v3386_v39  ;;  %vm3622_vm15 = vcmp.lt.s32.totalorder %v11504_v60, 3 }
 0x467   :  { %14005 = vst [vmem:[#allocation37_spill] sm:$0xff] %v11535_v41  ;;  %v3628_v0 = vsel %vm3620_vm13, %v11524_v26, %v11526_v1  ;;  %v3629_v37 = vsel %vm3623_vm3, %v3616_v63, 920167782  ;;  %v3535_v20 = vshll.u32 %v11535_v41, 30  ;;  %vm3621_vm10 = vcmp.lt.s32.totalorder %v11504_v60, 2 }
 0x468   :  { %v3630_v11 = vsel %vm3622_vm15, %v11531_v32, %v3629_v37  ;;  %v3632_v31 = vsel %vm3620_vm13, %v11526_v1, %v11531_v32  ;;  %v11557_v55 = vor.u32 4788187, %v3088_v5  ;;  %v11559_v39 = vor.u32 %v3238_v12, %v3237_v35 }
 0x469   :  { %v3631_v7 = vsel %vm3621_vm10, %v3628_v0, %v3630_v11  ;;  %v3633_v56 = vsel %vm3623_vm3, %v3619_v34, 1326507024  ;;  %v11565_v44 = vor.u32 4788187, %v3242_v19  ;;  %v3637_v38 = vand.u32 65535, %v11539_v58 }
 0x46a   :  { %v3634_v57 = vsel %vm3622_vm15, %v3616_v63, %v3633_v56  ;;  %v3661_v53 = vand.u32 65535, %v3631_v7  ;;  %v11570_v45 = vsub.s32 %v3532_v36, %v3535_v20  ;;  %v3638_v43 = vshrl.u32 %v11539_v58, 16 }
 0x46b   :  { %v3635_v61 = vsel %vm3621_vm10, %v3632_v31, %v3634_v57  ;;  %v3662_v22 = vshrl.u32 %v3631_v7, 16  ;;  %v11579_v9 = vsel %vm11520_vm14, %v10816_v46, %v11447_v8  ;;  %vm7979_vm7 = vcmp.lt.s32.totalorder %v7978_v23, 0  ;;  %v2014_v7 = vpop.f32.mrf.mxu0 }
 0x46c   :  { %14006 = vst [vmem:[#allocation38_spill] sm:$0xff] %v11579_v9  ;;  %v3639_v16 = vand.u32 65535, %v3635_v61  ;;  %v3640_v27 = vshrl.u32 %v3635_v61, 16  ;;  %v3665_v47 = vmul.u32 %v3661_v53, %v3638_v43  ;;  %v3244_v63 = vand.u32 2147483647, %v11565_v44 }
 0x46d   :  { %v3664_v5 = vmul.u32 %v3662_v22, %v3637_v38  ;;  %v3246_v35 = vcvt.s32.f32 %v11559_v39  ;;  %v11585_v34 = vsel %vm7979_vm7, 0, %v7978_v23  ;;  %vm3537_vm12 = vcmp.lt.s32.totalorder %v11570_v45, 0 }
 0x46e   :  { %v3642_v12 = vmul.u32 %v3640_v27, %v3637_v38  ;;  %v3643_v19 = vmul.u32 %v3639_v16, %v3638_v43  ;;  %v3663_v8 = vmul.u32 %v3661_v53, %v3637_v38  ;;  %v3538_v37 = vsub.s32 0, %v11570_v45 }
 0x46f   :  { %v3667_v0 = vshll.u32 %v3664_v5, 16  ;;  %v3641_v20 = vmul.u32 %v3639_v16, %v3637_v38  ;;  %v3666_v31 = vmul.u32 %v3662_v22, %v3638_v43  ;;  %v3644_v56 = vmul.u32 %v3640_v27, %v3638_v43  ;;  %v2155_v16 = vpop.f32.mrf.mxu2 }
 0x470   :  { %v3645_v11 = vshll.u32 %v3642_v12, 16  ;;  %v3647_v57 = vshll.u32 %v3643_v19, 16  ;;  %v3669_v61 = vshll.u32 %v3665_v47, 16  ;;  %v3374_v36 = vadd.s32 %v11389_v13, %v11387_v62 }
 0x471   :  { %vm3671_vm1 = vc.u32 %v3663_v8, %v3667_v0  ;;  %v3673_v23 = vadd.s32 %v3667_v0, %v3663_v8  ;;  %v11594_v38 = vadd.f32 %v2014_v7, %v10760_v59  ;;  %v3390_v22 = vsub.s32 32, %v11585_v34 }
 0x472   :  { %vm3649_vm4 = vc.u32 %v3641_v20, %v3645_v11  ;;  %v3651_v39 = vadd.s32 %v3645_v11, %v3641_v20  ;;  %v3672_v44 = vsel %vm3671_vm1, 1, %v13947_v14  ;;  %v3539_v27 = vsel %vm3537_vm12, %v3538_v37, %v11570_v45 }
 0x473   :  { %v3650_v53 = vsel %vm3649_vm4, 1, %v13947_v14  ;;  %v3674_v54 = vadd.s32 %v3672_v44, %v3666_v31  ;;  %vm3675_vm7 = vc.u32 %v3673_v23, %v3669_v61  ;;  %v3604_v8 = vshrl.u32 %v13967_v50, %v11502_v33 }
 0x474   :  { %v3652_v43 = vadd.s32 %v3650_v53, %v3644_v56  ;;  %vm3653_vm6 = vc.u32 %v3651_v39, %v3647_v57  ;;  %v3625_v62 = vsel %vm3623_vm3, %v11531_v32, 2102212464  ;;  %v3394_v0 = vsub.s32 4294967266, %v11585_v34 }
 0x475   :  { %v3654_v13 = vsel %vm3653_vm6, 1, %v13947_v14  ;;  %v3646_v20 = vshrl.u32 %v3642_v12, 16  ;;  %v3676_v31 = vsel %vm3675_vm7, 1, %v13947_v14  ;;  %v3624_v7 = vsel %vm3620_vm13, %v3604_v8, %v11524_v26 }
 0x476   :  { %v3656_v11 = vadd.s32 %v3654_v13, %v3652_v43  ;;  %v3668_v37 = vshrl.u32 %v3664_v5, 16  ;;  %v3678_v56 = vadd.s32 %v3676_v31, %v3674_v54  ;;  %v3745_v33 = vand.u32 2139095040, %v11594_v38 }
 0x477   :  { %v3540_v57 = vclz %v3539_v27  ;;  %v3626_v32 = vsel %vm3622_vm15, %v11526_v1, %v3625_v62  ;;  %v3648_v39 = vshrl.u32 %v3643_v19, 16  ;;  %v3247_v53 = vmul.f32 %v3246_v35, %v3244_v63  ;;  %v2158_v31 = vpop.f32.mrf.mxu2 }
 0x478   :  { %v3657_v44 = vadd.s32 %v3656_v11, %v3646_v20  ;;  %v3670_v12 = vshrl.u32 %v3665_v47, 16  ;;  %v3679_v43 = vadd.s32 %v3678_v56, %v3668_v37  ;;  %v3746_v13 = vshrl.u32 %v3745_v33, 23  ;;  %v2196_v20 = vpop.f32.mrf.mxu3 }
 0x479   :  { %v3392_v30 = vshrl.u32 %v3374_v36, %v3390_v22  ;;  %v3395_v46 = vadd.s32 127, %v3394_v0  ;;  %v11617_v26 = vadd.s32 %v3673_v23, %v3669_v61  ;;  %v3627_v54 = vsel %vm3621_vm10, %v3624_v7, %v3626_v32  ;;  %v2055_v23 = vpop.f32.mrf.mxu1 }
 0x47a   :  { %v11615_v18 = vadd.s32 %v3657_v44, %v3648_v39  ;;  %v3680_v5 = vadd.s32 %v3679_v43, %v3670_v12  ;;  %v13602_v27 = vand.u32 2147483647, %v11594_v38  ;;  %v7986_v8 = vadd.s32 4294967169, %v3746_v13 }
 0x47b   :  { %v11624_v1 = vmul.f32 %v11355_v51, %v11355_v51  ;;  %vm13631_vm13 = vcmp.lt.s32.totalorder %v11011_v49, 0  ;;  %v7981_v47 = vadd.s32 4294967294, %v3540_v57  ;;  %v14008_v36 = vand.u32 2147483647, %v11557_v55 }
 0x47c   :  { %vm3683_vm3 = vc.u32 %v11615_v18, %v11617_v26  ;;  %v14009_v63 = vcvt.s32.f32 %v11494_v6  ;;  %v3391_v35 = vshll.u32 %v11468_v10, %v11585_v34  ;;  %v3684_v19 = vadd.s32 1, %v3680_v5 }
 0x47d   :  { %14007 = vst [vmem:[#allocation14_spill] sm:$0xff] %v11624_v1  ;;  %v3752_v61 = vadd.s32 1, %v7986_v8  ;;  %v11639_v22 = vmul.f32 %v11579_v9, %v11579_v9  ;;  %v3248_v62 = vxor.u32 2147483648, %v3247_v53  ;;  %v3396_v0 = vshll.u32 %v3395_v46, 23 }
 0x47e   :  { %v11633_v60 = vmul.f32 %v14009_v63, %v14008_v36  ;;  %v3681_v11 = vmul.u32 %v11539_v58, %v3627_v54  ;;  %v11642_v55 = vor.u32 %v3392_v30, %v3391_v35  ;;  %v3685_v6 = vsel %vm3683_vm3, %v3684_v19, %v3680_v5 }
 0x47f   :  { %14011 = vst [vmem:[#allocation24_spill] sm:$0xff] %v11639_v22  ;;  %v3749_v7 = vand.u32 8388607, %v13602_v27  ;;  %vm3753_vm15 = vcmp.gt.s32.totalorder %v3752_v61, 0  ;;  %vm7982_vm10 = vcmp.lt.s32.totalorder %v7981_v47, 0  ;;  %v11647_v37 = vadd.f32 %v2055_v23, %v10760_v59 }
 0x480   :  { %14010 = vst [vmem:[#allocation16_spill] sm:$0xff] %v11633_v60  ;;  %v3686_v10 = vadd.s32 %v3685_v6, %v3681_v11  ;;  %v3754_v34 = vsel %vm3753_vm15, %v3752_v61, 0  ;;  %v11651_v46 = vadd.f32 %v2155_v16, %v10881_v25  ;;  %v11654_v30 = vadd.f32 %v2196_v20, %v10881_v25 }
 0x481   :  { %v3756_v58 = vand.u32 31, %v3754_v34  ;;  %v11658_v33 = vsel %vm13631_vm13, %v3248_v62, %v3247_v53  ;;  %v3397_v57 = vor.u32 4788187, %v3396_v0  ;;  %v11661_v39 = vadd.f32 %v2158_v31, %v11066_v24 }
 0x482   :  { %14012 = vst [vmem:[#allocation25_spill] sm:$0xff] %v11658_v33  ;;  %v3687_v32 = vadd.s32 536870912, %v3686_v10  ;;  %v3400_v59 = vcvt.s32.f32 %v11642_v55  ;;  %v11664_v44 = vsel %vm7982_vm10, 0, %v7981_v47  ;;  %v3750_v12 = vor.u32 8388608, %v3749_v7 }
 0x483   :  { %v3757_v16 = vsub.s32 32, %v3756_v58  ;;  %v11668_v25 = vshrl.u32 %v3754_v34, 5  ;;  %v3759_v13 = vshll.u32 %v13967_v50, %v3756_v58  ;;  %v3899_v53 = vand.u32 2139095040, %v11647_v37 }
 0x484   :  { %v11666_v43 = vshrl.u32 %v3687_v32, 30  ;;  %v3762_v5 = vshll.u32 %v13968_v28, %v3756_v58  ;;  %v3765_v36 = vshll.u32 %v13969_v21, %v3756_v58  ;;  %v3768_v35 = vshll.u32 %v13970_v15, %v3756_v58 }
 0x485   :  { %v3760_v54 = vshrl.u32 %v13968_v28, %v3757_v16  ;;  %v3763_v8 = vshrl.u32 %v13969_v21, %v3757_v16  ;;  %v3766_v63 = vshrl.u32 %v13970_v15, %v3757_v16  ;;  %v3769_v19 = vshrl.u32 %v13971_v48, %v3757_v16 }
 0x486   :  { %14013 = vst [vmem:[#allocation9_spill] sm:$0xff] %v11666_v43  ;;  %v3689_v47 = vshll.u32 %v11666_v43, 30  ;;  %v3771_v62 = vshll.u32 %v13971_v48, %v3756_v58  ;;  %v3772_v0 = vshrl.u32 %v13973_v40, %v3757_v16  ;;  %v3398_v20 = vand.u32 2147483647, %v3397_v57 }
 0x487   :  { %v3761_v61 = vor.u32 %v3760_v54, %v3759_v13  ;;  %v11680_v23 = vor.u32 %v3763_v8, %v3762_v5  ;;  %v3544_v11 = vsub.s32 32, %v11664_v44  ;;  %v3767_v55 = vor.u32 %v3766_v63, %v3765_v36 }
 0x488   :  { %v3770_v6 = vor.u32 %v3769_v19, %v3768_v35  ;;  %v3548_v31 = vsub.s32 4294967266, %v11664_v44  ;;  %v3773_v7 = vor.u32 %v3772_v0, %v3771_v62  ;;  %vm3774_vm12 = vcmp.lt.s32.totalorder %v11668_v25, 1 }
 0x489   :  { %v11687_v34 = vshll.u32 %v3750_v12, 8  ;;  %v11689_v32 = vsub.s32 %v3686_v10, %v3689_v47  ;;  %vm3777_vm1 = vcmp.lt.s32.totalorder %v11668_v25, 4  ;;  %v3782_v58 = vsel %vm3774_vm12, %v3761_v61, %v11680_v23 }
 0x48a   :  { %v3900_v57 = vshrl.u32 %v3899_v53, 23  ;;  %vm3776_vm4 = vcmp.lt.s32.totalorder %v11668_v25, 3  ;;  %v3783_v13 = vsel %vm3777_vm1, %v3770_v6, 920167782  ;;  %v3786_v54 = vsel %vm3774_vm12, %v11680_v23, %v3767_v55 }
 0x48b   :  { %v3787_v10 = vsel %vm3777_vm1, %v3773_v7, 1326507024  ;;  %vm3775_vm6 = vcmp.lt.s32.totalorder %v11668_v25, 2  ;;  %v3784_v12 = vsel %vm3776_vm4, %v3767_v55, %v3783_v13  ;;  %v13605_v5 = vand.u32 2147483647, %v11647_v37 }
 0x48c   :  { %v3788_v53 = vsel %vm3776_vm4, %v3770_v6, %v3787_v10  ;;  %v3785_v8 = vsel %vm3775_vm6, %v3782_v58, %v3784_v12  ;;  %v3791_v47 = vand.u32 65535, %v11687_v34  ;;  %v3792_v63 = vshrl.u32 %v11687_v34, 16  ;;  %v2017_v58 = vpop.f32.mrf.mxu0 }
 0x48d   :  { %v3789_v36 = vsel %vm3775_vm6, %v3786_v54, %v3788_v53  ;;  %v3692_v35 = vsub.s32 0, %v11689_v32  ;;  %v3816_v0 = vshrl.u32 %v3785_v8, 16  ;;  %v3528_v6 = vadd.s32 %v11490_v42, %v11488_v4 }
 0x48e   :  { %v3793_v19 = vand.u32 65535, %v3789_v36  ;;  %v3794_v62 = vshrl.u32 %v3789_v36, 16  ;;  %vm3691_vm7 = vcmp.lt.s32.totalorder %v11689_v32, 0  ;;  %v3815_v7 = vand.u32 65535, %v3785_v8 }
 0x48f   :  { %v7989_v13 = vadd.s32 4294967169, %v3900_v57  ;;  %v11719_v10 = vmul.f32 %v3400_v59, %v3398_v20  ;;  %v3545_v54 = vshll.u32 %v11570_v45, %v11664_v44  ;;  %v3546_v56 = vshrl.u32 %v3528_v6, %v3544_v11 }
 0x490   :  { %v3796_v12 = vmul.u32 %v3794_v62, %v3791_v47  ;;  %v3797_v53 = vmul.u32 %v3793_v19, %v3792_v63  ;;  %v11723_v27 = vadd.s32 127, %v3548_v31  ;;  %v3818_v36 = vmul.u32 %v3816_v0, %v3791_v47 }
 0x491   :  { %v11727_v51 = vand.u32 8388607, %v13605_v5  ;;  %v3693_v4 = vsel %vm3691_vm7, %v3692_v35, %v11689_v32  ;;  %v3795_v42 = vmul.u32 %v3793_v19, %v3791_v47  ;;  %v11731_v59 = vadd.f32 %v2017_v58, %v10441_v29 }
 0x492   :  { %v3799_v57 = vshll.u32 %v3796_v12, 16  ;;  %v3758_v20 = vshrl.u32 %v13967_v50, %v3757_v16  ;;  %v3798_v45 = vmul.u32 %v3794_v62, %v3792_v63  ;;  %v3819_v44 = vmul.u32 %v3815_v7, %v3792_v63 }
 0x493   :  { %v3906_v8 = vadd.s32 1, %v7989_v13  ;;  %v3801_v11 = vshll.u32 %v3797_v53, 16  ;;  %v3821_v6 = vshll.u32 %v3818_v36, 16  ;;  %v3694_v1 = vclz %v3693_v4 }
 0x494   :  { %vm3803_vm3 = vc.u32 %v3795_v42, %v3799_v57  ;;  %v3805_v31 = vadd.s32 %v3799_v57, %v3795_v42  ;;  %v3778_v5 = vsel %vm3774_vm12, %v3758_v20, %v3761_v61  ;;  %v3817_v19 = vmul.u32 %v3815_v7, %v3791_v47 }
 0x495   :  { %v3804_v35 = vsel %vm3803_vm3, 1, %v13947_v14  ;;  %v3779_v58 = vsel %vm3777_vm1, %v3767_v55, 2102212464  ;;  %v3800_v9 = vshrl.u32 %v3796_v12, 16  ;;  %v3820_v62 = vmul.u32 %v3816_v0, %v3792_v63 }
 0x496   :  { %v3806_v22 = vadd.s32 %v3804_v35, %v3798_v45  ;;  %vm3807_vm15 = vc.u32 %v3805_v31, %v3801_v11  ;;  %v3823_v13 = vshll.u32 %v3819_v44, 16  ;;  %vm3825_vm10 = vc.u32 %v3817_v19, %v3821_v6 }
 0x497   :  { %v3808_v16 = vsel %vm3807_vm15, 1, %v13947_v14  ;;  %v3826_v4 = vsel %vm3825_vm10, 1, %v13947_v14  ;;  %v3827_v57 = vadd.s32 %v3821_v6, %v3817_v19  ;;  %vm3907_vm7 = vcmp.gt.s32.totalorder %v3906_v8, 0 }
 0x498   :  { %v3810_v42 = vadd.s32 %v3808_v16, %v3806_v22  ;;  %v7984_v61 = vadd.s32 4294967294, %v3694_v1  ;;  %v3780_v47 = vsel %vm3776_vm4, %v11680_v23, %v3779_v58  ;;  %v3828_v7 = vadd.s32 %v3826_v4, %v3820_v62 }
 0x499   :  { %v3908_v55 = vsel %vm3907_vm7, %v3906_v8, 0  ;;  %v11744_v12 = vor.u32 %v3546_v56, %v3545_v54  ;;  %vm3829_vm12 = vc.u32 %v3827_v57, %v3823_v13  ;;  %v3802_v63 = vshrl.u32 %v3797_v53, 16 }
 0x49a   :  { %v3811_v45 = vadd.s32 %v3810_v42, %v3800_v9  ;;  %v3830_v22 = vsel %vm3829_vm12, 1, %v13947_v14  ;;  %v3904_v0 = vor.u32 8388608, %v11727_v51  ;;  %v3910_v11 = vand.u32 31, %v3908_v55 }
 0x49b   :  { %v3781_v1 = vsel %vm3775_vm6, %v3778_v5, %v3780_v47  ;;  %v3822_v31 = vshrl.u32 %v3818_v36, 16  ;;  %v3832_v6 = vadd.s32 %v3830_v22, %v3828_v7  ;;  %vm7985_vm1 = vcmp.lt.s32.totalorder %v7984_v61, 0 }
 0x49c   :  { %v11752_v56 = vadd.s32 %v3811_v45, %v3802_v63  ;;  %v3824_v54 = vshrl.u32 %v3819_v44, 16  ;;  %v3911_v8 = vsub.s32 32, %v3910_v11  ;;  %v11754_v9 = vadd.s32 %v3827_v57, %v3823_v13 }
 0x49d   :  { %v3833_v53 = vadd.s32 %v3832_v6, %v3822_v31  ;;  %v11756_v35 = vshrl.u32 %v3908_v55, 5  ;;  %v3913_v51 = vshll.u32 %v13967_v50, %v3910_v11  ;;  %v3916_v25 = vshll.u32 %v13968_v28, %v3910_v11 }
 0x49e   :  { %v3914_v19 = vshrl.u32 %v13968_v28, %v3911_v8  ;;  %v3917_v5 = vshrl.u32 %v13969_v21, %v3911_v8  ;;  %v3919_v36 = vshll.u32 %v13969_v21, %v3910_v11  ;;  %v3920_v16 = vshrl.u32 %v13970_v15, %v3911_v8 }
 0x49f   :  { %v3834_v58 = vadd.s32 %v3833_v53, %v3824_v54  ;;  %v3922_v44 = vshll.u32 %v13970_v15, %v3910_v11  ;;  %v3923_v62 = vshrl.u32 %v13971_v48, %v3911_v8  ;;  %vm3837_vm4 = vc.u32 %v11752_v56, %v11754_v9 }
 0x4a0   :  { %v3915_v13 = vor.u32 %v3914_v19, %v3913_v51  ;;  %v3918_v42 = vor.u32 %v3917_v5, %v3916_v25  ;;  %v11768_v4 = vshll.u32 %v3904_v0, 8  ;;  %v3835_v57 = vmul.u32 %v11687_v34, %v3781_v1 }
 0x4a1   :  { %v3838_v47 = vadd.s32 1, %v3834_v58  ;;  %v3921_v7 = vor.u32 %v3920_v16, %v3919_v36  ;;  %v3924_v55 = vor.u32 %v3923_v62, %v3922_v44  ;;  %v11772_v45 = vsel %vm7985_vm1, 0, %v7984_v61 }
 0x4a2   :  { %v3925_v63 = vshll.u32 %v13971_v48, %v3910_v11  ;;  %v3926_v22 = vshrl.u32 %v13973_v40, %v3911_v8  ;;  %vm3928_vm6 = vcmp.lt.s32.totalorder %v11756_v35, 1  ;;  %vm3931_vm3 = vcmp.lt.s32.totalorder %v11756_v35, 4 }
 0x4a3   :  { %v3839_v31 = vsel %vm3837_vm4, %v3838_v47, %v3834_v58  ;;  %v3936_v0 = vsel %vm3928_vm6, %v3915_v13, %v3918_v42  ;;  %v4053_v34 = vand.u32 2139095040, %v11731_v59  ;;  %vm3930_vm15 = vcmp.lt.s32.totalorder %v11756_v35, 3 }
 0x4a4   :  { %v3840_v1 = vadd.s32 %v3839_v31, %v3835_v57  ;;  %v3927_v6 = vor.u32 %v3926_v22, %v3925_v63  ;;  %v3937_v61 = vsel %vm3931_vm3, %v3924_v55, 920167782  ;;  %vm3929_vm10 = vcmp.lt.s32.totalorder %v11756_v35, 2 }
 0x4a5   :  { %v3938_v11 = vsel %vm3930_vm15, %v3921_v7, %v3937_v61  ;;  %v3940_v54 = vsel %vm3928_vm6, %v3918_v42, %v3921_v7  ;;  %v3945_v53 = vand.u32 65535, %v11768_v4  ;;  %v3702_v51 = vsub.s32 4294967266, %v11772_v45 }
 0x4a6   :  { %v3841_v19 = vadd.s32 536870912, %v3840_v1  ;;  %v3939_v25 = vsel %vm3929_vm10, %v3936_v0, %v3938_v11  ;;  %v3941_v5 = vsel %vm3931_vm3, %v3927_v6, 1326507024  ;;  %v3946_v58 = vshrl.u32 %v11768_v4, 16 }
 0x4a7   :  { %v3942_v36 = vsel %vm3930_vm15, %v3924_v55, %v3941_v5  ;;  %v3969_v16 = vand.u32 65535, %v3939_v25  ;;  %v3970_v44 = vshrl.u32 %v3939_v25, 16  ;;  %v3933_v57 = vsel %vm3931_vm3, %v3921_v7, 2102212464 }
 0x4a8   :  { %v11798_v62 = vshrl.u32 %v3841_v19, 30  ;;  %v3943_v47 = vsel %vm3929_vm10, %v3940_v54, %v3942_v36  ;;  %v4054_v63 = vshrl.u32 %v4053_v34, 23  ;;  %v3912_v22 = vshrl.u32 %v13967_v50, %v3911_v8 }
 0x4a9   :  { %v3947_v31 = vand.u32 65535, %v3943_v47  ;;  %v3948_v0 = vshrl.u32 %v3943_v47, 16  ;;  %v3972_v6 = vmul.u32 %v3970_v44, %v3945_v53  ;;  %v3698_v55 = vsub.s32 32, %v11772_v45 }
 0x4aa   :  { %v11806_v61 = vadd.s32 127, %v3702_v51  ;;  %v3843_v11 = vshll.u32 %v11798_v62, 30  ;;  %v3973_v19 = vmul.u32 %v3969_v16, %v3946_v58  ;;  %v3932_v25 = vsel %vm3928_vm6, %v3912_v22, %v3915_v13 }
 0x4ab   :  { %v3934_v7 = vsel %vm3930_vm15, %v3918_v42, %v3933_v57  ;;  %v3950_v54 = vmul.u32 %v3948_v0, %v3945_v53  ;;  %v3951_v34 = vmul.u32 %v3947_v31, %v3946_v58  ;;  %v3971_v8 = vmul.u32 %v3969_v16, %v3945_v53 }
 0x4ac   :  { %v11813_v5 = vsub.s32 %v3840_v1, %v3843_v11  ;;  %v3975_v36 = vshll.u32 %v3972_v6, 16  ;;  %v7992_v47 = vadd.s32 4294967169, %v4054_v63  ;;  %v3949_v23 = vmul.u32 %v3947_v31, %v3945_v53 }
 0x4ad   :  { %v3952_v20 = vmul.u32 %v3948_v0, %v3946_v58  ;;  %v3953_v51 = vshll.u32 %v3950_v54, 16  ;;  %v3974_v60 = vmul.u32 %v3970_v44, %v3946_v58  ;;  %v3955_v43 = vshll.u32 %v3951_v34, 16 }
 0x4ae   :  { %v3846_v33 = vsub.s32 0, %v11813_v5  ;;  %v3977_v49 = vshll.u32 %v3973_v19, 16  ;;  %vm3979_vm7 = vc.u32 %v3971_v8, %v3975_v36  ;;  %v3981_v57 = vadd.s32 %v3975_v36, %v3971_v8 }
 0x4af   :  { %vm3957_vm12 = vc.u32 %v3949_v23, %v3953_v51  ;;  %v3959_v13 = vadd.s32 %v3953_v51, %v3949_v23  ;;  %v3980_v42 = vsel %vm3979_vm7, 1, %v13947_v14  ;;  %vm3845_vm1 = vcmp.lt.s32.totalorder %v11813_v5, 0 }
 0x4b0   :  { %v3958_v1 = vsel %vm3957_vm12, 1, %v13947_v14  ;;  %v3982_v16 = vadd.s32 %v3980_v42, %v3974_v60  ;;  %v4060_v63 = vadd.s32 1, %v7992_v47  ;;  %v3976_v22 = vshrl.u32 %v3972_v6, 16 }
 0x4b1   :  { %v3960_v53 = vadd.s32 %v3958_v1, %v3952_v20  ;;  %vm3961_vm4 = vc.u32 %v3959_v13, %v3955_v43  ;;  %vm3983_vm6 = vc.u32 %v3981_v57, %v3977_v49  ;;  %v3954_v58 = vshrl.u32 %v3950_v54, 16 }
 0x4b2   :  { %v3962_v44 = vsel %vm3961_vm4, 1, %v13947_v14  ;;  %v3984_v31 = vsel %vm3983_vm6, 1, %v13947_v14  ;;  %vm4061_vm3 = vcmp.gt.s32.totalorder %v4060_v63, 0  ;;  %v3847_v23 = vsel %vm3845_vm1, %v3846_v33, %v11813_v5 }
 0x4b3   :  { %v3964_v0 = vadd.s32 %v3962_v44, %v3960_v53  ;;  %v3986_v11 = vadd.s32 %v3984_v31, %v3982_v16  ;;  %v4062_v8 = vsel %vm4061_vm3, %v4060_v63, 0  ;;  %v14014_v36 = vshll.u32 %v11723_v27, 23 }
 0x4b4   :  { %v3682_v60 = vadd.s32 %v11617_v26, %v11615_v18  ;;  %v3699_v43 = vshll.u32 %v11689_v32, %v11772_v45  ;;  %v4064_v20 = vand.u32 31, %v4062_v8  ;;  %v3956_v6 = vshrl.u32 %v3951_v34, 16 }
 0x4b5   :  { %v3551_v51 = vor.u32 4788187, %v14014_v36  ;;  %v3965_v54 = vadd.s32 %v3964_v0, %v3954_v58  ;;  %v3987_v47 = vadd.s32 %v3986_v11, %v3976_v22  ;;  %v14015_v13 = vand.u32 2147483647, %v11731_v59 }
 0x4b6   :  { %v3848_v33 = vclz %v3847_v23  ;;  %v3935_v1 = vsel %vm3929_vm10, %v3932_v25, %v3934_v7  ;;  %v3978_v16 = vshrl.u32 %v3973_v19, 16  ;;  %v11832_v27 = vsub.s32 32, %v4064_v20 }
 0x4b7   :  { %v4057_v42 = vand.u32 8388607, %v14015_v13  ;;  %v3700_v63 = vshrl.u32 %v3682_v60, %v3698_v55  ;;  %v3704_v18 = vshll.u32 %v11806_v61, 23  ;;  %v11835_v26 = vadd.s32 %v3965_v54, %v3956_v6 }
 0x4b8   :  { %v11837_v32 = vadd.s32 %v3981_v57, %v3977_v49  ;;  %v3988_v45 = vadd.s32 %v3987_v47, %v3978_v16  ;;  %v4067_v34 = vshll.u32 %v13967_v50, %v4064_v20  ;;  %v4068_v53 = vshrl.u32 %v13968_v28, %v11832_v27 }
 0x4b9   :  { %v4071_v35 = vshrl.u32 %v13969_v21, %v11832_v27  ;;  %v3989_v19 = vmul.u32 %v11768_v4, %v3935_v1  ;;  %v4058_v55 = vor.u32 8388608, %v4057_v42  ;;  %v4070_v61 = vshll.u32 %v13968_v28, %v4064_v20 }
 0x4ba   :  { %vm3991_vm15 = vc.u32 %v11835_v26, %v11837_v32  ;;  %v7987_v25 = vadd.s32 4294967294, %v3848_v33  ;;  %v3992_v49 = vadd.s32 1, %v3988_v45  ;;  %v11848_v7 = vshrl.u32 %v4062_v8, 5 }
 0x4bb   :  { %v11850_v57 = vor.u32 %v4068_v53, %v4067_v34  ;;  %v11852_v22 = vor.u32 %v4071_v35, %v4070_v61  ;;  %v4073_v58 = vshll.u32 %v13969_v21, %v4064_v20  ;;  %v4074_v44 = vshrl.u32 %v13970_v15, %v11832_v27 }
 0x4bc   :  { %v4076_v4 = vshll.u32 %v13970_v15, %v4064_v20  ;;  %v3993_v31 = vsel %vm3991_vm15, %v3992_v49, %v3988_v45  ;;  %v4077_v23 = vshrl.u32 %v13971_v48, %v11832_v27  ;;  %v4079_v0 = vshll.u32 %v13971_v48, %v4064_v20 }
 0x4bd   :  { %v4080_v11 = vshrl.u32 %v13973_v40, %v11832_v27  ;;  %v3552_v8 = vand.u32 2147483647, %v3551_v51  ;;  %v3554_v36 = vcvt.s32.f32 %v11744_v12  ;;  %v3994_v60 = vadd.s32 %v3993_v31, %v3989_v19 }
 0x4be   :  { %v11864_v6 = vor.u32 %v4074_v44, %v4073_v58  ;;  %v3701_v54 = vor.u32 %v3700_v63, %v3699_v43  ;;  %v3705_v47 = vor.u32 4788187, %v3704_v18  ;;  %v4078_v13 = vor.u32 %v4077_v23, %v4076_v4  ;;  %v2058_v4 = vpop.f32.mrf.mxu1 }
 0x4bf   :  { %v4081_v42 = vor.u32 %v4080_v11, %v4079_v0  ;;  %v3995_v33 = vadd.s32 536870912, %v3994_v60  ;;  %vm4082_vm10 = vcmp.lt.s32.totalorder %v11848_v7, 1  ;;  %vm4085_vm7 = vcmp.lt.s32.totalorder %v11848_v7, 4 }
 0x4c0   :  { %v11868_v1 = vshll.u32 %v4058_v55, 8  ;;  %vm7988_vm12 = vcmp.lt.s32.totalorder %v7987_v25, 0  ;;  %vm4084_vm1 = vcmp.lt.s32.totalorder %v11848_v7, 3  ;;  %v4090_v12 = vsel %vm4082_vm10, %v11850_v57, %v11852_v22 }
 0x4c1   :  { %v4091_v51 = vsel %vm4085_vm7, %v4078_v13, 920167782  ;;  %v11877_v43 = vmul.f32 %v3554_v36, %v3552_v8  ;;  %v11879_v20 = vshrl.u32 %v3995_v33, 30  ;;  %vm4083_vm4 = vcmp.lt.s32.totalorder %v11848_v7, 2 }
 0x4c2   :  { %v4092_v16 = vsel %vm4084_vm1, %v11864_v6, %v4091_v51  ;;  %v3706_v63 = vand.u32 2147483647, %v3705_v47  ;;  %v4094_v45 = vsel %vm4082_vm10, %v11852_v22, %v11864_v6  ;;  %v4095_v34 = vsel %vm4085_vm7, %v4081_v42, 1326507024 }
 0x4c3   :  { %v4093_v18 = vsel %vm4083_vm4, %v4090_v12, %v4092_v16  ;;  %v3708_v53 = vcvt.s32.f32 %v3701_v54  ;;  %v11893_v35 = vsel %vm7988_vm12, 0, %v7987_v25  ;;  %v3997_v19 = vshll.u32 %v11879_v20, 30 }
 0x4c4   :  { %v4096_v55 = vsel %vm4084_vm1, %v4078_v13, %v4095_v34  ;;  %v4099_v49 = vand.u32 65535, %v11868_v1  ;;  %v4123_v58 = vand.u32 65535, %v4093_v18  ;;  %v4124_v44 = vshrl.u32 %v4093_v18, 16 }
 0x4c5   :  { %v4097_v61 = vsel %vm4083_vm4, %v4094_v45, %v4096_v55  ;;  %v11901_v31 = vsub.s32 %v3994_v60, %v3997_v19  ;;  %v4100_v23 = vshrl.u32 %v11868_v1, 16  ;;  %v3556_v8 = vxor.u32 2147483648, %v11877_v43 }
 0x4c6   :  { %v4101_v0 = vand.u32 65535, %v4097_v61  ;;  %v4102_v25 = vshrl.u32 %v4097_v61, 16  ;;  %v11906_v36 = vmul.f32 %v3708_v53, %v3706_v63  ;;  %v4126_v54 = vmul.u32 %v4124_v44, %v4099_v49 }
 0x4c7   :  { %vm3999_vm6 = vcmp.lt.s32.totalorder %v11901_v31, 0  ;;  %v4000_v47 = vsub.s32 0, %v11901_v31  ;;  %v4127_v13 = vmul.u32 %v4123_v58, %v4100_v23  ;;  %v11911_v42 = vadd.f32 %v2058_v4, %v10441_v29 }
 0x4c8   :  { %vm13633_vm3 = vcmp.lt.s32.totalorder %v11310_v17, 0  ;;  %v3852_v60 = vsub.s32 32, %v11893_v35  ;;  %v3856_v33 = vsub.s32 4294967266, %v11893_v35  ;;  %v4104_v12 = vmul.u32 %v4102_v25, %v4099_v49 }
 0x4c9   :  { %v4105_v51 = vmul.u32 %v4101_v0, %v4100_v23  ;;  %v4001_v16 = vsel %vm3999_vm6, %v4000_v47, %v11901_v31  ;;  %v4066_v63 = vshrl.u32 %v13967_v50, %v11832_v27  ;;  %v4125_v18 = vmul.u32 %v4123_v58, %v4099_v49 }
 0x4ca   :  { %v4129_v45 = vshll.u32 %v4126_v54, 16  ;;  %v4103_v34 = vmul.u32 %v4101_v0, %v4099_v49  ;;  %v4106_v53 = vmul.u32 %v4102_v25, %v4100_v23  ;;  %v4107_v19 = vshll.u32 %v4104_v12, 16 }
 0x4cb   :  { %v4128_v29 = vmul.u32 %v4124_v44, %v4100_v23  ;;  %v4002_v55 = vclz %v4001_v16  ;;  %v4131_v61 = vshll.u32 %v4127_v13, 16  ;;  %v4109_v11 = vshll.u32 %v4105_v51, 16  ;;  %v14074_v44 = vld [vmem:[#allocation42_spill] sm:$0xff] }
 0x4cc   :  { %vm4133_vm15 = vc.u32 %v4125_v18, %v4129_v45  ;;  %v4135_v4 = vadd.s32 %v4129_v45, %v4125_v18  ;;  %vm4111_vm12 = vc.u32 %v4103_v34, %v4107_v19  ;;  %v4113_v52 = vadd.s32 %v4107_v19, %v4103_v34 }
 0x4cd   :  { %v4134_v41 = vsel %vm4133_vm15, 1, %v13947_v14  ;;  %v4087_v47 = vsel %vm4085_vm7, %v11864_v6, 2102212464  ;;  %v4112_v27 = vsel %vm4111_vm12, 1, %v13947_v14  ;;  %v14016_v49 = vand.u32 2147483647, %v11310_v17 }
 0x4ce   :  { %v4136_v58 = vadd.s32 %v4134_v41, %v4128_v29  ;;  %vm4137_vm6 = vc.u32 %v4135_v4, %v4131_v61  ;;  %v3857_v23 = vadd.s32 127, %v3856_v33  ;;  %v4114_v0 = vadd.s32 %v4112_v27, %v4106_v53  ;;  %v2199_v27 = vpop.f32.mrf.mxu3 }
 0x4cf   :  { %vm11926_vm9 = vcmp.le.f32.partialorder %v14016_v49, 0.7853982  ;;  %vm4115_vm5 = vc.u32 %v4113_v52, %v4109_v11  ;;  %v4138_v25 = vsel %vm4137_vm6, 1, %v13947_v14  ;;  %vm13632_vm15 = vcmp.lt.s32.totalorder %v11419_v2, 0 }
 0x4d0   :  { %v7990_v16 = vadd.s32 4294967294, %v4002_v55  ;;  %v4116_v6 = vsel %vm4115_vm5, 1, %v13947_v14  ;;  %v4130_v18 = vshrl.u32 %v4126_v54, 16  ;;  %v4140_v45 = vadd.s32 %v4138_v25, %v4136_v58 }
 0x4d1   :  { %v4086_v41 = vsel %vm4082_vm10, %v4066_v63, %v11850_v57  ;;  %v4088_v34 = vsel %vm4084_vm1, %v11852_v22, %v4087_v47  ;;  %v4108_v33 = vshrl.u32 %v4104_v12, 16  ;;  %v4118_v53 = vadd.s32 %v4116_v6, %v4114_v0  ;;  %v2020_v47 = vpop.f32.mrf.mxu0 }
 0x4d2   :  { %vm13630_vm7 = vcmp.lt.s32.totalorder %v11214_v3, 0  ;;  %v3557_v52 = vsel %vm13633_vm3, %v3556_v8, %v11877_v43  ;;  %v4132_v11 = vshrl.u32 %v4127_v13, 16  ;;  %v4141_v19 = vadd.s32 %v4140_v45, %v4130_v18 }
 0x4d3   :  { %v4207_v54 = vand.u32 2139095040, %v11911_v42  ;;  %v14019_v29 = vand.u32 2147483647, %v11419_v2  ;;  %v14020_v57 = vmov 0  ;;  %v3710_v22 = vxor.u32 2147483648, %v11906_v36 }
 0x4d4   :  { %v3836_v12 = vadd.s32 %v11754_v9, %v11752_v56  ;;  %v4110_v63 = vshrl.u32 %v4105_v51, 16  ;;  %v4119_v55 = vadd.s32 %v4118_v53, %v4108_v33  ;;  %vm7991_vm10 = vcmp.lt.s32.totalorder %v7990_v16, 0 }
 0x4d5   :  { %vm11946_vm5 = vcmp.le.f32.partialorder %v14019_v29, 0.7853982  ;;  %v4089_v43 = vsel %vm4083_vm4, %v4086_v41, %v4088_v34  ;;  %v4142_v8 = vadd.s32 %v4141_v19, %v4132_v11  ;;  %v4208_v13 = vshrl.u32 %v4207_v54, 23 }
 0x4d6   :  { %v14021_v57 = vsel %vm11946_vm5, 4294967295, %v14020_v57  ;;  %v3854_v58 = vshrl.u32 %v3836_v12, %v3852_v60  ;;  %v3858_v49 = vshll.u32 %v3857_v23, 23  ;;  %v11955_v0 = vadd.s32 %v4119_v55, %v4110_v63  ;;  %v14023_v60 = vld [vmem:[#allocation52_spill] sm:$0xff] }
 0x4d7   :  { %14022 = vst [vmem:[#allocation11_spill] sm:$0xff] %v14021_v57  ;;  %v11957_v25 = vadd.s32 %v4135_v4, %v4131_v61  ;;  %v3853_v6 = vshll.u32 %v11813_v5, %v11893_v35  ;;  %v4146_v56 = vadd.s32 1, %v4142_v8  ;;  %v13619_v9 = vand.u32 2147483647, %v11911_v42 }
 0x4d8   :  { %v7995_v51 = vadd.s32 4294967169, %v4208_v13  ;;  %v11962_v18 = vsel %vm7991_vm10, 0, %v7990_v16  ;;  %v4143_v7 = vmul.u32 %v11868_v1, %v4089_v43  ;;  %v11968_v23 = vadd.f32 %v2020_v47, %v14023_v60 }
 0x4d9   :  { %vm4145_vm1 = vc.u32 %v11955_v0, %v11957_v25  ;;  %v11973_v61 = vsel %vm11926_vm9, %v11310_v17, %v3557_v52  ;;  %v11976_v5 = vadd.f32 %v2199_v27, %v11066_v24  ;;  %v3711_v1 = vsel %vm13632_vm15, %v3710_v22, %v11906_v36 }
 0x4da   :  { %14024 = vst [vmem:[#allocation31_spill] sm:$0xff] %v11973_v61  ;;  %v4147_v35 = vsel %vm4145_vm1, %v4146_v56, %v4142_v8  ;;  %v4214_v4 = vadd.s32 1, %v7995_v51  ;;  %v11981_v16 = vor.u32 %v3854_v58, %v3853_v6  ;;  %v11983_v45 = vor.u32 4788187, %v3858_v49 }
 0x4db   :  { %v4148_v41 = vadd.s32 %v4147_v35, %v4143_v7  ;;  %v4006_v34 = vsub.s32 32, %v11962_v18  ;;  %v4010_v33 = vsub.s32 4294967266, %v11962_v18  ;;  %v4211_v53 = vand.u32 8388607, %v13619_v9 }
 0x4dc   :  { %vm4215_vm4 = vcmp.gt.s32.totalorder %v4214_v4, 0  ;;  %v14025_v24 = vxor.u32 2147483648, %v11719_v10  ;;  %v4361_v19 = vand.u32 2139095040, %v11968_v23  ;;  %v11999_v54 = vmul.f32 %v11973_v61, %v11973_v61 }
 0x4dd   :  { %v4149_v36 = vadd.s32 536870912, %v4148_v41  ;;  %v4216_v11 = vsel %vm4215_vm4, %v4214_v4, 0  ;;  %v12004_v29 = vsel %vm11946_vm5, %v11419_v2, %v3711_v1  ;;  %v3990_v22 = vadd.s32 %v11837_v32, %v11835_v26 }
 0x4de   :  { %v11994_v52 = vsel %vm13630_vm7, %v14025_v24, %v11719_v10  ;;  %14027 = vst [vmem:[#allocation10_spill] sm:$0xff] %v11999_v54  ;;  %v4218_v12 = vand.u32 31, %v4216_v11  ;;  %v3860_v10 = vand.u32 2147483647, %v11983_v45  ;;  %v3862_v63 = vcvt.s32.f32 %v11981_v16 }
 0x4df   :  { %14026 = vst [vmem:[#allocation32_spill] sm:$0xff] %v11994_v52  ;;  %v4007_v55 = vshll.u32 %v11901_v31, %v11962_v18  ;;  %v12012_v43 = vshrl.u32 %v4149_v36, 30  ;;  %v4008_v8 = vshrl.u32 %v3990_v22, %v4006_v34  ;;  %v4011_v13 = vadd.s32 127, %v4010_v33 }
 0x4e0   :  { %v4212_v47 = vor.u32 8388608, %v4211_v53  ;;  %v4219_v27 = vsub.s32 32, %v4218_v12  ;;  %v12015_v49 = vshrl.u32 %v4216_v11, 5  ;;  %v4221_v26 = vshll.u32 %v13967_v50, %v4218_v12 }
 0x4e1   :  { %v4151_v58 = vshll.u32 %v12012_v43, 30  ;;  %v4362_v32 = vshrl.u32 %v4361_v19, 23  ;;  %v4224_v56 = vshll.u32 %v13968_v28, %v4218_v12  ;;  %v4227_v31 = vshll.u32 %v13969_v21, %v4218_v12 }
 0x4e2   :  { %v4222_v6 = vshrl.u32 %v13968_v28, %v4219_v27  ;;  %v4225_v51 = vshrl.u32 %v13969_v21, %v4219_v27  ;;  %v4228_v7 = vshrl.u32 %v13970_v15, %v4219_v27  ;;  %v4230_v35 = vshll.u32 %v13970_v15, %v4218_v12 }
 0x4e3   :  { %v12022_v18 = vsub.s32 %v4148_v41, %v4151_v58  ;;  %v4231_v4 = vshrl.u32 %v13971_v48, %v4219_v27  ;;  %v4233_v45 = vshll.u32 %v13971_v48, %v4218_v12  ;;  %v4234_v34 = vshrl.u32 %v13973_v40, %v4219_v27 }
 0x4e4   :  { %v4223_v1 = vor.u32 %v4222_v6, %v4221_v26  ;;  %v4226_v16 = vor.u32 %v4225_v51, %v4224_v56  ;;  %v4229_v53 = vor.u32 %v4228_v7, %v4227_v31  ;;  %vm4236_vm6 = vcmp.lt.s32.totalorder %v12015_v49, 1 }
 0x4e5   :  { %vm4153_vm12 = vcmp.lt.s32.totalorder %v12022_v18, 0  ;;  %v4154_v33 = vsub.s32 0, %v12022_v18  ;;  %v4232_v24 = vor.u32 %v4231_v4, %v4230_v35  ;;  %v4235_v41 = vor.u32 %v4234_v34, %v4233_v45 }
 0x4e6   :  { %v12032_v36 = vshll.u32 %v4212_v47, 8  ;;  %v13620_v11 = vand.u32 2147483647, %v11968_v23  ;;  %vm4239_vm10 = vcmp.lt.s32.totalorder %v12015_v49, 4  ;;  %v4244_v22 = vsel %vm4236_vm6, %v4223_v1, %v4226_v16 }
 0x4e7   :  { %v4155_v19 = vsel %vm4153_vm12, %v4154_v33, %v12022_v18  ;;  %v7998_v12 = vadd.s32 4294967169, %v4362_v32  ;;  %vm4238_vm1 = vcmp.lt.s32.totalorder %v12015_v49, 3  ;;  %v4245_v26 = vsel %vm4239_vm10, %v4232_v24, 920167782 }
 0x4e8   :  { %v4156_v58 = vclz %v4155_v19  ;;  %v4248_v47 = vsel %vm4236_vm6, %v4226_v16, %v4229_v53  ;;  %v4012_v6 = vshll.u32 %v4011_v13, 23  ;;  %vm4237_vm4 = vcmp.lt.s32.totalorder %v12015_v49, 2 }
 0x4e9   :  { %v4246_v56 = vsel %vm4238_vm1, %v4229_v53, %v4245_v26  ;;  %v4249_v51 = vsel %vm4239_vm10, %v4235_v41, 1326507024  ;;  %v4253_v35 = vand.u32 65535, %v12032_v36  ;;  %v12058_v34 = vand.u32 8388607, %v13620_v11 }
 0x4ea   :  { %v7993_v31 = vadd.s32 4294967294, %v4156_v58  ;;  %v4247_v32 = vsel %vm4237_vm4, %v4244_v22, %v4246_v56  ;;  %v4250_v7 = vsel %vm4238_vm1, %v4232_v24, %v4249_v51  ;;  %v4254_v33 = vshrl.u32 %v12032_v36, 16 }
 0x4eb   :  { %v4251_v13 = vsel %vm4237_vm4, %v4248_v47, %v4250_v7  ;;  %v4277_v4 = vand.u32 65535, %v4247_v32  ;;  %v4278_v45 = vshrl.u32 %v4247_v32, 16  ;;  %v4368_v58 = vadd.s32 1, %v7998_v12 }
 0x4ec   :  { %v4255_v41 = vand.u32 65535, %v4251_v13  ;;  %v4256_v19 = vshrl.u32 %v4251_v13, 16  ;;  %v12061_v22 = vmul.f32 %v3862_v63, %v3860_v10  ;;  %v12063_v26 = vor.u32 %v4008_v8, %v4007_v55 }
 0x4ed   :  { %v4241_v24 = vsel %vm4239_vm10, %v4229_v53, 2102212464  ;;  %v4280_v56 = vmul.u32 %v4278_v45, %v4253_v35  ;;  %v12067_v47 = vor.u32 4788187, %v4012_v6  ;;  %vm7994_vm12 = vcmp.lt.s32.totalorder %v7993_v31, 0 }
 0x4ee   :  { %v4220_v51 = vshrl.u32 %v13967_v50, %v4219_v27  ;;  %v4281_v32 = vmul.u32 %v4277_v4, %v4254_v33  ;;  %v4144_v7 = vadd.s32 %v11957_v25, %v11955_v0  ;;  %v4258_v9 = vmul.u32 %v4256_v19, %v4253_v35 }
 0x4ef   :  { %v4259_v13 = vmul.u32 %v4255_v41, %v4254_v33  ;;  %v4242_v55 = vsel %vm4238_vm1, %v4226_v16, %v4241_v24  ;;  %v4283_v8 = vshll.u32 %v4280_v56, 16  ;;  %vm4369_vm10 = vcmp.gt.s32.totalorder %v4368_v58, 0 }
 0x4f0   :  { %v4240_v63 = vsel %vm4236_vm6, %v4220_v51, %v4223_v1  ;;  %v12077_v53 = vsel %vm7994_vm12, 0, %v7993_v31  ;;  %v4257_v12 = vmul.u32 %v4255_v41, %v4253_v35  ;;  %v4261_v27 = vshll.u32 %v4258_v9, 16 }
 0x4f1   :  { %v4279_v6 = vmul.u32 %v4277_v4, %v4253_v35  ;;  %v4260_v11 = vmul.u32 %v4256_v19, %v4254_v33  ;;  %v4263_v61 = vshll.u32 %v4259_v13, 16  ;;  %v4282_v0 = vmul.u32 %v4278_v45, %v4254_v33 }
 0x4f2   :  { %v4285_v25 = vshll.u32 %v4281_v32, 16  ;;  %vm4265_vm2 = vc.u32 %v4257_v12, %v4261_v27  ;;  %v4267_v57 = vadd.s32 %v4261_v27, %v4257_v12  ;;  %v4243_v1 = vsel %vm4237_vm4, %v4240_v63, %v4242_v55 }
 0x4f3   :  { %vm4287_vm8 = vc.u32 %v4279_v6, %v4283_v8  ;;  %v4289_v10 = vadd.s32 %v4283_v8, %v4279_v6  ;;  %v4266_v16 = vsel %vm4265_vm2, 1, %v13947_v14  ;;  %v4370_v31 = vsel %vm4369_vm10, %v4368_v58, 0 }
 0x4f4   :  { %v4288_v24 = vsel %vm4287_vm8, 1, %v13947_v14  ;;  %v4268_v41 = vadd.s32 %v4266_v16, %v4260_v11  ;;  %vm4269_vm6 = vc.u32 %v4267_v57, %v4263_v61  ;;  %v4164_v4 = vsub.s32 4294967266, %v12077_v53 }
 0x4f5   :  { %v4290_v35 = vadd.s32 %v4288_v24, %v4282_v0  ;;  %vm4291_vm1 = vc.u32 %v4289_v10, %v4285_v25  ;;  %v4270_v45 = vsel %vm4269_vm6, 1, %v13947_v14  ;;  %v4284_v33 = vshrl.u32 %v4280_v56, 16 }
 0x4f6   :  { %v4292_v19 = vsel %vm4291_vm1, 1, %v13947_v14  ;;  %v4262_v51 = vshrl.u32 %v4258_v9, 16  ;;  %v4272_v49 = vadd.s32 %v4270_v45, %v4268_v41  ;;  %v4372_v55 = vand.u32 31, %v4370_v31 }
 0x4f7   :  { %v4294_v63 = vadd.s32 %v4292_v19, %v4290_v35  ;;  %v4160_v8 = vsub.s32 32, %v12077_v53  ;;  %v4161_v58 = vshll.u32 %v12022_v18, %v12077_v53  ;;  %v4264_v11 = vshrl.u32 %v4259_v13, 16 }
 0x4f8   :  { %v4297_v57 = vmul.u32 %v12032_v36, %v4243_v1  ;;  %v4273_v61 = vadd.s32 %v4272_v49, %v4262_v51  ;;  %v4286_v12 = vshrl.u32 %v4281_v32, 16  ;;  %v4373_v6 = vsub.s32 32, %v4372_v55 }
 0x4f9   :  { %v4295_v27 = vadd.s32 %v4294_v63, %v4284_v33  ;;  %v4165_v0 = vadd.s32 127, %v4164_v4  ;;  %v12091_v56 = vadd.s32 %v4289_v10, %v4285_v25  ;;  %v12093_v16 = vshrl.u32 %v4370_v31, 5  ;;  %v2061_v31 = vpop.f32.mrf.mxu1 }
 0x4fa   :  { %v4375_v9 = vshll.u32 %v13967_v50, %v4372_v55  ;;  %v12096_v24 = vadd.s32 %v4273_v61, %v4264_v11  ;;  %v4376_v35 = vshrl.u32 %v13968_v28, %v4373_v6  ;;  %v4378_v18 = vshll.u32 %v13968_v28, %v4372_v55 }
 0x4fb   :  { %v4296_v41 = vadd.s32 %v4295_v27, %v4286_v12  ;;  %v4379_v36 = vshrl.u32 %v13969_v21, %v4373_v6  ;;  %v4381_v32 = vshll.u32 %v13969_v21, %v4372_v55  ;;  %v4382_v13 = vshrl.u32 %v13970_v15, %v4373_v6 }
 0x4fc   :  { %v4385_v10 = vshrl.u32 %v13971_v48, %v4373_v6  ;;  %v4162_v53 = vshrl.u32 %v4144_v7, %v4160_v8  ;;  %vm4299_vm2 = vc.u32 %v12096_v24, %v12091_v56  ;;  %v4384_v1 = vshll.u32 %v13970_v15, %v4372_v55 }
 0x4fd   :  { %v4300_v25 = vadd.s32 1, %v4296_v41  ;;  %v4166_v4 = vshll.u32 %v4165_v0, 23  ;;  %v12107_v45 = vor.u32 %v4376_v35, %v4375_v9  ;;  %v12109_v33 = vor.u32 %v4379_v36, %v4378_v18 }
 0x4fe   :  { %v4383_v19 = vor.u32 %v4382_v13, %v4381_v32  ;;  %v4386_v49 = vor.u32 %v4385_v10, %v4384_v1  ;;  %v4387_v63 = vshll.u32 %v13971_v48, %v4372_v55  ;;  %v4388_v11 = vshrl.u32 %v13973_v40, %v4373_v6 }
 0x4ff   :  { %v4301_v51 = vsel %vm4299_vm2, %v4300_v25, %v4296_v41  ;;  %vm4390_vm8 = vcmp.lt.s32.totalorder %v12093_v16, 1  ;;  %v14028_v8 = vor.u32 8388608, %v12058_v34  ;;  %v12119_v12 = vadd.f32 %v2061_v31, %v14023_v60 }
 0x500   :  { %v4302_v7 = vadd.s32 %v4301_v51, %v4297_v57  ;;  %v12121_v27 = vor.u32 %v4162_v53, %v4161_v58  ;;  %v4389_v0 = vor.u32 %v4388_v11, %v4387_v63  ;;  %vm4393_vm4 = vcmp.lt.s32.totalorder %v12093_v16, 4 }
 0x501   :  { %v12116_v61 = vshll.u32 %v14028_v8, 8  ;;  %v4398_v55 = vsel %vm4390_vm8, %v12107_v45, %v12109_v33  ;;  %vm4392_vm12 = vcmp.lt.s32.totalorder %v12093_v16, 3  ;;  %v4399_v34 = vsel %vm4393_vm4, %v4386_v49, 920167782 }
 0x502   :  { %v4303_v57 = vadd.s32 536870912, %v4302_v7  ;;  %v4402_v60 = vsel %vm4390_vm8, %v12109_v33, %v4383_v19  ;;  %v12134_v58 = vor.u32 4788187, %v4166_v4  ;;  %vm4391_vm10 = vcmp.lt.s32.totalorder %v12093_v16, 2 }
 0x503   :  { %v4400_v9 = vsel %vm4392_vm12, %v4383_v19, %v4399_v34  ;;  %v4403_v41 = vsel %vm4393_vm4, %v4389_v0, 1326507024  ;;  %v4407_v32 = vand.u32 65535, %v12116_v61  ;;  %v4408_v10 = vshrl.u32 %v12116_v61, 16 }
 0x504   :  { %v12141_v35 = vshrl.u32 %v4303_v57, 30  ;;  %v4401_v18 = vsel %vm4391_vm10, %v4398_v55, %v4400_v9  ;;  %v4404_v36 = vsel %vm4392_vm12, %v4386_v49, %v4403_v41  ;;  %v4168_v63 = vand.u32 2147483647, %v12134_v58 }
 0x505   :  { %v4405_v13 = vsel %vm4391_vm10, %v4402_v60, %v4404_v36  ;;  %v4431_v53 = vand.u32 65535, %v4401_v18  ;;  %v4432_v25 = vshrl.u32 %v4401_v18, 16  ;;  %v4170_v11 = vcvt.s32.f32 %v12121_v27 }
 0x506   :  { %v4305_v1 = vshll.u32 %v12141_v35, 30  ;;  %v4409_v31 = vand.u32 65535, %v4405_v13  ;;  %v4410_v4 = vshrl.u32 %v4405_v13, 16  ;;  %v4515_v34 = vand.u32 2139095040, %v12119_v12 }
 0x507   :  { %v4434_v49 = vmul.u32 %v4432_v25, %v4407_v32  ;;  %v4435_v8 = vmul.u32 %v4431_v53, %v4408_v10  ;;  %v4374_v60 = vshrl.u32 %v13967_v50, %v4373_v6  ;;  %v4433_v9 = vmul.u32 %v4431_v53, %v4407_v32 }
 0x508   :  { %v12155_v0 = vsub.s32 %v4302_v7, %v4305_v1  ;;  %v4412_v55 = vmul.u32 %v4410_v4, %v4407_v32  ;;  %v4413_v57 = vmul.u32 %v4409_v31, %v4408_v10  ;;  %v4436_v41 = vmul.u32 %v4432_v25, %v4408_v10 }
 0x509   :  { %v4437_v18 = vshll.u32 %v4434_v49, 16  ;;  %v4411_v58 = vmul.u32 %v4409_v31, %v4407_v32  ;;  %v4414_v27 = vmul.u32 %v4410_v4, %v4408_v10  ;;  %v4439_v2 = vshll.u32 %v4435_v8, 16 }
 0x50a   :  { %vm4307_vm6 = vcmp.lt.s32.totalorder %v12155_v0, 0  ;;  %v4308_v36 = vsub.s32 0, %v12155_v0  ;;  %v4415_v13 = vshll.u32 %v4412_v55, 16  ;;  %v4417_v51 = vshll.u32 %v4413_v57, 16 }
 0x50b   :  { %vm4441_vm1 = vc.u32 %v4433_v9, %v4437_v18  ;;  %v4443_v25 = vadd.s32 %v4437_v18, %v4433_v9  ;;  %v4395_v54 = vsel %vm4393_vm4, %v4383_v19, 2102212464  ;;  %v4516_v10 = vshrl.u32 %v4515_v34, 23 }
 0x50c   :  { %v4309_v7 = vsel %vm4307_vm6, %v4308_v36, %v12155_v0  ;;  %vm4419_vm2 = vc.u32 %v4411_v58, %v4415_v13  ;;  %v4421_v1 = vadd.s32 %v4415_v13, %v4411_v58  ;;  %v4442_v52 = vsel %vm4441_vm1, 1, %v13947_v14 }
 0x50d   :  { %v4310_v6 = vclz %v4309_v7  ;;  %v4420_v53 = vsel %vm4419_vm2, 1, %v13947_v14  ;;  %v4444_v3 = vadd.s32 %v4442_v52, %v4436_v41  ;;  %v4394_v4 = vsel %vm4390_vm8, %v4374_v60, %v12107_v45 }
 0x50e   :  { %v4422_v32 = vadd.s32 %v4420_v53, %v4414_v27  ;;  %vm4423_vm7 = vc.u32 %v4421_v1, %v4417_v51  ;;  %vm4445_vm6 = vc.u32 %v4443_v25, %v4439_v2  ;;  %v4416_v58 = vshrl.u32 %v4412_v55, 16 }
 0x50f   :  { %v7996_v31 = vadd.s32 4294967294, %v4310_v6  ;;  %v4424_v36 = vsel %vm4423_vm7, 1, %v13947_v14  ;;  %v4446_v7 = vsel %vm4445_vm6, 1, %v13947_v14  ;;  %v8001_v9 = vadd.s32 4294967169, %v4516_v10 }
 0x510   :  { %v4426_v13 = vadd.s32 %v4424_v36, %v4422_v32  ;;  %v4396_v52 = vsel %vm4392_vm12, %v12109_v33, %v4395_v54  ;;  %v4438_v19 = vshrl.u32 %v4434_v49, 16  ;;  %v4448_v51 = vadd.s32 %v4446_v7, %v4444_v3 }
 0x511   :  { %vm7997_vm1 = vcmp.lt.s32.totalorder %v7996_v31, 0  ;;  %v4418_v41 = vshrl.u32 %v4413_v57, 16  ;;  %v4522_v45 = vadd.s32 1, %v8001_v9  ;;  %v4171_v60 = vmul.f32 %v4170_v11, %v4168_v63 }
 0x512   :  { %v12174_v34 = vsel %vm7997_vm1, 0, %v7996_v31  ;;  %v4427_v18 = vadd.s32 %v4426_v13, %v4416_v58  ;;  %v4440_v55 = vshrl.u32 %v4435_v8, 16  ;;  %v4449_v1 = vadd.s32 %v4448_v51, %v4438_v19 }
 0x513   :  { %v4318_v27 = vsub.s32 4294967266, %v12174_v34  ;;  %v12179_v53 = vadd.s32 %v4443_v25, %v4439_v2  ;;  %v14029_v32 = vand.u32 2147483647, %v12119_v12  ;;  %vm4523_vm7 = vcmp.gt.s32.totalorder %v4522_v45, 0 }
 0x514   :  { %v12177_v6 = vadd.s32 %v4427_v18, %v4418_v41  ;;  %vm4052_vm8 = vcmp.lt.s32.totalorder %v11731_v59, 0  ;;  %v4397_v54 = vsel %vm4391_vm10, %v4394_v4, %v4396_v52  ;;  %v4450_v33 = vadd.s32 %v4449_v1, %v4440_v55 }
 0x515   :  { %v4519_v10 = vand.u32 8388607, %v14029_v32  ;;  %v4319_v3 = vadd.s32 127, %v4318_v27  ;;  %v4524_v63 = vsel %vm4523_vm7, %v4522_v45, 0  ;;  %v3864_v11 = vxor.u32 2147483648, %v12061_v22 }
 0x516   :  { %v4016_v49 = vcvt.s32.f32 %v12063_v26  ;;  %vm4453_vm4 = vc.u32 %v12177_v6, %v12179_v53  ;;  %v4526_v2 = vand.u32 31, %v4524_v63  ;;  %v4014_v8 = vand.u32 2147483647, %v12067_v47 }
 0x517   :  { %v4172_v57 = vxor.u32 2147483648, %v4171_v60  ;;  %v4298_v25 = vadd.s32 %v12091_v56, %v12096_v24  ;;  %v4454_v31 = vadd.s32 1, %v4450_v33  ;;  %v14030_v16 = vand.u32 2147483647, %v11731_v59 }
 0x518   :  { %v4314_v36 = vsub.s32 32, %v12174_v34  ;;  %v4451_v26 = vmul.u32 %v12116_v61, %v4397_v54  ;;  %v4520_v58 = vor.u32 8388608, %v4519_v10  ;;  %v4527_v13 = vsub.s32 32, %v4526_v2 }
 0x519   :  { %vm12195_vm12 = vcmp.le.f32.partialorder %v14030_v16, 0.7853982  ;;  %v4320_v7 = vshll.u32 %v4319_v3, 23  ;;  %v4455_v9 = vsel %vm4453_vm4, %v4454_v31, %v4450_v33  ;;  %v12201_v47 = vshrl.u32 %v4524_v63, 5 }
 0x51a   :  { %v4529_v52 = vshll.u32 %v13967_v50, %v4526_v2  ;;  %v4456_v56 = vadd.s32 %v4455_v9, %v4451_v26  ;;  %v4530_v24 = vshrl.u32 %v13968_v28, %v4527_v13  ;;  %v4532_v19 = vshll.u32 %v13968_v28, %v4526_v2 }
 0x51b   :  { %v4533_v51 = vshrl.u32 %v13969_v21, %v4527_v13  ;;  %v4535_v41 = vshll.u32 %v13969_v21, %v4526_v2  ;;  %v4536_v18 = vshrl.u32 %v13970_v15, %v4527_v13  ;;  %v4538_v61 = vshll.u32 %v13970_v15, %v4526_v2 }
 0x51c   :  { %v4539_v45 = vshrl.u32 %v13971_v48, %v4527_v13  ;;  %v4457_v27 = vadd.s32 536870912, %v4456_v56  ;;  %v4531_v55 = vor.u32 %v4530_v24, %v4529_v52  ;;  %v4542_v32 = vshrl.u32 %v13973_v40, %v4527_v13 }
 0x51d   :  { %v12211_v1 = vor.u32 %v4533_v51, %v4532_v19  ;;  %v4316_v10 = vshrl.u32 %v4298_v25, %v4314_v36  ;;  %v4537_v3 = vor.u32 %v4536_v18, %v4535_v41  ;;  %v4541_v28 = vshll.u32 %v13971_v48, %v4526_v2 }
 0x51e   :  { %v4540_v54 = vor.u32 %v4539_v45, %v4538_v61  ;;  %v4173_v21 = vsel %vm4052_vm8, %v4172_v57, %v4171_v60  ;;  %v4315_v33 = vshll.u32 %v12155_v0, %v12174_v34  ;;  %v12219_v15 = vshrl.u32 %v4457_v27, 30 }
 0x51f   :  { %v12221_v63 = vshll.u32 %v4520_v58, 8  ;;  %v4321_v31 = vor.u32 4788187, %v4320_v7  ;;  %v4543_v16 = vor.u32 %v4542_v32, %v4541_v28  ;;  %vm4544_vm10 = vcmp.lt.s32.totalorder %v12201_v47, 1 }
 0x520   :  { %vm4547_vm2 = vcmp.lt.s32.totalorder %v12201_v47, 4  ;;  %v4459_v40 = vshll.u32 %v12219_v15, 30  ;;  %vm4546_vm6 = vcmp.lt.s32.totalorder %v12201_v47, 3  ;;  %v4552_v48 = vsel %vm4544_vm10, %v4531_v55, %v12211_v1 }
 0x521   :  { %v4553_v0 = vsel %vm4547_vm2, %v4540_v54, 920167782  ;;  %v12232_v34 = vmul.f32 %v4016_v49, %v4014_v8  ;;  %v12237_v60 = vsel %vm12195_vm12, %v11731_v59, %v4173_v21  ;;  %v4317_v2 = vor.u32 %v4316_v10, %v4315_v33 }
 0x522   :  { %v4554_v57 = vsel %vm4546_vm6, %v4537_v3, %v4553_v0  ;;  %v12241_v25 = vsub.s32 %v4456_v56, %v4459_v40  ;;  %vm4545_vm1 = vcmp.lt.s32.totalorder %v12201_v47, 2  ;;  %v4556_v36 = vsel %vm4544_vm10, %v12211_v1, %v4537_v3 }
 0x523   :  { %v4561_v49 = vand.u32 65535, %v12221_v63  ;;  %v4322_v8 = vand.u32 2147483647, %v4321_v31  ;;  %v4555_v26 = vsel %vm4545_vm1, %v4552_v48, %v4554_v57  ;;  %v4557_v58 = vsel %vm4547_vm2, %v4543_v16, 1326507024 }
 0x524   :  { %v4562_v7 = vshrl.u32 %v12221_v63, 16  ;;  %vm4461_vm7 = vcmp.lt.s32.totalorder %v12241_v25, 0  ;;  %v4462_v9 = vsub.s32 0, %v12241_v25  ;;  %v4558_v52 = vsel %vm4546_vm6, %v4540_v54, %v4557_v58 }
 0x525   :  { %v4585_v56 = vand.u32 65535, %v4555_v26  ;;  %v4324_v24 = vcvt.s32.f32 %v4317_v2  ;;  %v4452_v19 = vadd.s32 %v12179_v53, %v12177_v6  ;;  %v4559_v51 = vsel %vm4545_vm1, %v4556_v36, %v4558_v52 }
 0x526   :  { %v4586_v41 = vshrl.u32 %v4555_v26, 16  ;;  %v4463_v18 = vsel %vm4461_vm7, %v4462_v9, %v12241_v25  ;;  %v4528_v61 = vshrl.u32 %v13967_v50, %v4527_v13  ;;  %v4563_v45 = vand.u32 65535, %v4559_v51 }
 0x527   :  { %v4564_v27 = vshrl.u32 %v4559_v51, 16  ;;  %v12263_v32 = vmul.f32 %v4324_v24, %v4322_v8  ;;  %v4464_v10 = vclz %v4463_v18  ;;  %v4589_v54 = vmul.u32 %v4585_v56, %v4562_v7 }
 0x528   :  { %v4588_v28 = vmul.u32 %v4586_v41, %v4561_v49  ;;  %v4548_v21 = vsel %vm4544_vm10, %v4528_v61, %v4531_v55  ;;  %v4549_v6 = vsel %vm4547_vm2, %v4537_v3, 2102212464  ;;  %v4567_v33 = vmul.u32 %v4563_v45, %v4562_v7 }
 0x529   :  { %v4566_v53 = vmul.u32 %v4564_v27, %v4561_v49  ;;  %v7999_v31 = vadd.s32 4294967294, %v4464_v10  ;;  %v4587_v16 = vmul.u32 %v4585_v56, %v4561_v49  ;;  %v4590_v40 = vmul.u32 %v4586_v41, %v4562_v7 }
 0x52a   :  { %v4591_v48 = vshll.u32 %v4588_v28, 16  ;;  %v4565_v50 = vmul.u32 %v4563_v45, %v4561_v49  ;;  %v4568_v13 = vmul.u32 %v4564_v27, %v4562_v7  ;;  %v4593_v2 = vshll.u32 %v4589_v54, 16 }
 0x52b   :  { %v4569_v0 = vshll.u32 %v4566_v53, 16  ;;  %vm8000_vm4 = vcmp.lt.s32.totalorder %v7999_v31, 0  ;;  %v4571_v57 = vshll.u32 %v4567_v33, 16  ;;  %vm3744_vm10 = vcmp.lt.s32.totalorder %v11594_v38, 0 }
 0x52c   :  { %vm4595_vm7 = vc.u32 %v4587_v16, %v4591_v48  ;;  %v4597_v36 = vadd.s32 %v4591_v48, %v4587_v16  ;;  %v4467_v8 = vsel %vm8000_vm4, 0, %v7999_v31  ;;  %vm13634_vm2 = vcmp.lt.s32.totalorder %v11647_v37, 0 }
 0x52d   :  { %vm4573_vm13 = vc.u32 %v4565_v50, %v4569_v0  ;;  %v4575_v55 = vadd.s32 %v4569_v0, %v4565_v50  ;;  %v4596_v26 = vsel %vm4595_vm7, 1, %v13947_v14  ;;  %v4468_v3 = vsub.s32 32, %v4467_v8 }
 0x52e   :  { %v4469_v58 = vshll.u32 %v12241_v25, %v4467_v8  ;;  %v4472_v9 = vsub.s32 4294967266, %v4467_v8  ;;  %v4574_v49 = vsel %vm4573_vm13, 1, %v13947_v14  ;;  %v4598_v52 = vadd.s32 %v4596_v26, %v4590_v40 }
 0x52f   :  { %v4576_v7 = vadd.s32 %v4574_v49, %v4568_v13  ;;  %vm4577_vm15 = vc.u32 %v4575_v55, %v4571_v57  ;;  %vm4599_vm3 = vc.u32 %v4597_v36, %v4593_v2  ;;  %v4470_v56 = vshrl.u32 %v4452_v19, %v4468_v3 }
 0x530   :  { %v4473_v24 = vadd.s32 127, %v4472_v9  ;;  %v4578_v51 = vsel %vm4577_vm15, 1, %v13947_v14  ;;  %v4600_v41 = vsel %vm4599_vm3, 1, %v13947_v14  ;;  %v14033_v18 = vand.u32 2147483647, %v11594_v38 }
 0x531   :  { %v4570_v25 = vshrl.u32 %v4566_v53, 16  ;;  %v4580_v45 = vadd.s32 %v4578_v51, %v4576_v7  ;;  %v4592_v27 = vshrl.u32 %v4588_v28, 16  ;;  %v4602_v10 = vadd.s32 %v4600_v41, %v4598_v52 }
 0x532   :  { %vm12278_vm4 = vcmp.le.f32.partialorder %v14033_v18, 0.7853982  ;;  %v14036_v31 = vand.u32 2147483647, %v11647_v37  ;;  %v4471_v19 = vor.u32 %v4470_v56, %v4469_v58  ;;  %v4474_v40 = vshll.u32 %v4473_v24, 23 }
 0x533   :  { %v4482_v14 = vsub.s32 4, %v12219_v15  ;;  %v4550_v48 = vsel %vm4546_vm6, %v12211_v1, %v4549_v6  ;;  %v4572_v50 = vshrl.u32 %v4567_v33, 16  ;;  %v4581_v13 = vadd.s32 %v4580_v45, %v4570_v25 }
 0x534   :  { %vm12284_vm13 = vcmp.le.f32.partialorder %v14036_v31, 0.7853982  ;;  %v4594_v53 = vshrl.u32 %v4589_v54, 16  ;;  %v4603_v0 = vadd.s32 %v4602_v10, %v4592_v27  ;;  %v4018_v28 = vxor.u32 2147483648, %v12232_v34 }
 0x535   :  { %v12295_v57 = vmul.f32 %v12237_v60, %v12237_v60  ;;  %v4326_v8 = vxor.u32 2147483648, %v12263_v32  ;;  %v4475_v55 = vor.u32 4788187, %v4474_v40  ;;  %v4551_v26 = vsel %vm4545_vm1, %v4548_v21, %v4550_v48 }
 0x536   :  { %v12300_v3 = vadd.s32 %v4581_v13, %v4572_v50  ;;  %v12302_v58 = vadd.s32 %v4597_v36, %v4593_v2  ;;  %v4604_v1 = vadd.s32 %v4603_v0, %v4594_v53  ;;  %vm4206_vm3 = vcmp.lt.s32.totalorder %v11911_v42, 0 }
 0x537   :  { %vm4360_vm15 = vcmp.lt.s32.totalorder %v11968_v23, 0  ;;  %v4476_v54 = vand.u32 2147483647, %v4475_v55  ;;  %v4478_v6 = vcvt.s32.f32 %v4471_v19  ;;  %v3865_v33 = vsel %vm3744_vm10, %v3864_v11, %v12061_v22 }
 0x538   :  { %v4483_v47 = vsel %vm4360_vm15, %v4482_v14, %v12219_v15  ;;  %vm4607_vm6 = vc.u32 %v12300_v3, %v12302_v58  ;;  %v4608_v21 = vadd.s32 1, %v4604_v1  ;;  %v4019_v2 = vsel %vm13634_vm2, %v4018_v28, %v12232_v34 }
 0x539   :  { %v14039_v36 = vand.u32 2147483647, %v11968_v23  ;;  %v4479_v49 = vmul.f32 %v4478_v6, %v4476_v54  ;;  %v4605_v22 = vmul.u32 %v12221_v63, %v4551_v26  ;;  %v4327_v11 = vsel %vm4206_vm3, %v4326_v8, %v12263_v32 }
 0x53a   :  { %v4609_v15 = vsel %vm4607_vm6, %v4608_v21, %v4604_v1  ;;  %v4179_v7 = vmul.f32 -0.001358992, %v12295_v57  ;;  %v4186_v52 = vmul.f32 -0.00019511016, %v12295_v57  ;;  %v12334_v34 = vsel %vm12278_vm4, %v11594_v38, %v3865_v33 }
 0x53b   :  { %vm12321_vm1 = vcmp.le.f32.partialorder %v14039_v36, 0.7853982  ;;  %v4480_v56 = vxor.u32 2147483648, %v4479_v49  ;;  %v4610_v51 = vadd.s32 %v4609_v15, %v4605_v22  ;;  %v12341_v63 = vsel %vm12284_vm13, %v11647_v37, %v4019_v2 }
 0x53c   :  { %v4485_v24 = vsel %vm12321_vm1, 0, %v4483_v47  ;;  %v14042_v32 = vand.u32 2147483647, %v11911_v42  ;;  %v4180_v18 = vadd.f32 0.041655596, %v4179_v7  ;;  %v4174_v31 = vsub.s32 4, %v12012_v43 }
 0x53d   :  { %v4187_v25 = vadd.f32 0.008332121, %v4186_v52  ;;  %v4481_v27 = vsel %vm4360_vm15, %v4480_v56, %v4479_v49  ;;  %v4611_v10 = vadd.s32 536870912, %v4610_v51  ;;  %v12359_v19 = vmul.f32 %v12004_v29, %v12004_v29 }
 0x53e   :  { %vm12345_vm7 = vcmp.le.f32.partialorder %v14042_v32, 0.7853982  ;;  %v12364_v40 = vsel %vm12321_vm1, %v11968_v23, %v4481_v27  ;;  %v6996_v14 = vadd.s32 3, %v4485_v24  ;;  %v12369_v50 = vmul.f32 %v12334_v34, %v12334_v34 }
 0x53f   :  { %v12352_v45 = vsel %vm12345_vm7, %v11911_v42, %v4327_v11  ;;  %v4188_v48 = vmul.f32 %v4187_v25, %v12295_v57  ;;  %v4486_v13 = vmul.f32 %v12364_v40, %v12364_v40  ;;  %v4612_v53 = vshrl.u32 %v4611_v10, 30 }
 0x540   :  { %v4181_v0 = vmul.f32 %v4180_v18, %v12295_v57  ;;  %v12376_v28 = vmul.f32 %v12341_v63, %v12341_v63  ;;  %v12380_v8 = vmul.f32 %v12352_v45, %v12352_v45  ;;  %vm13635_vm15 = vcmp.lt.s32.totalorder %v12119_v12, 0 }
 0x541   :  { %v4189_v55 = vadd.f32 -0.16666654, %v4188_v48  ;;  %v4494_v26 = vmul.f32 -0.00019511016, %v4486_v13  ;;  %v4613_v1 = vshll.u32 %v4612_v53, 30  ;;  %v4175_v54 = vsel %vm4052_vm8, %v4174_v31, %v12012_v43 }
 0x542   :  { %v4328_v6 = vsub.s32 4, %v12141_v35  ;;  %v4636_v33 = vsub.s32 4, %v4612_v53  ;;  %v4487_v47 = vmul.f32 -0.001358992, %v4486_v13  ;;  %v12387_v21 = vand.u32 3, %v4485_v24 }
 0x543   :  { %v12389_v2 = vand.u32 3, %v6996_v14  ;;  %v4495_v36 = vadd.f32 0.008332121, %v4494_v26  ;;  %v12391_v9 = vsub.s32 %v4610_v51, %v4613_v1  ;;  %v4182_v49 = vadd.f32 -0.4999988, %v4181_v0 }
 0x544   :  { %v3866_v22 = vsub.s32 4, %v11798_v62  ;;  %v14045_v11 = vand.u32 2147483647, %v12119_v12  ;;  %v4488_v43 = vadd.f32 0.041655596, %v4487_v47  ;;  %v12402_v7 = vsel %vm12195_vm12, 0, %v4175_v54 }
 0x545   :  { %v4190_v52 = vmul.f32 %v4189_v55, %v12295_v57  ;;  %v4496_v56 = vmul.f32 %v4495_v36, %v4486_v13  ;;  %vm4615_vm8 = vcmp.lt.s32.totalorder %v12391_v9, 0  ;;  %v4616_v24 = vsub.s32 0, %v12391_v9 }
 0x546   :  { %vm12396_vm6 = vcmp.le.f32.partialorder %v14045_v11, 0.7853982  ;;  %v4329_v51 = vsel %vm4206_vm3, %v4328_v6, %v12141_v35  ;;  %v4606_v32 = vadd.s32 %v12302_v58, %v12300_v3  ;;  %v4637_v18 = vsel %vm13635_vm15, %v4636_v33, %v4612_v53 }
 0x547   :  { %v4489_v4 = vmul.f32 %v4488_v43, %v4486_v13  ;;  %v4333_v25 = vmul.f32 -0.001358992, %v12380_v8  ;;  %v4497_v27 = vadd.f32 -0.16666654, %v4496_v56  ;;  %v4617_v10 = vsel %vm4615_vm8, %v4616_v24, %v12391_v9 }
 0x548   :  { %vm4507_vm12 = vcmp.eq.s32.totalorder %v12387_v21, 2  ;;  %vm7002_vm1 = vcmp.eq.s32.totalorder %v12389_v2, 2  ;;  %v4183_v31 = vmul.f32 %v4182_v49, %v12295_v57  ;;  %v3867_v35 = vsel %vm3744_vm10, %v3866_v22, %v11798_v62 }
 0x549   :  { %v4618_v3 = vclz %v4617_v10  ;;  %v4490_v58 = vadd.f32 -0.4999988, %v4489_v4  ;;  %vm4504_vm3 = vcmp.eq.s32.totalorder %v12387_v21, 0  ;;  %v4191_v14 = vadd.f32 1.0, %v4190_v52 }
 0x54a   :  { %v12424_v48 = vand.u32 3, %v12402_v7  ;;  %v4498_v53 = vmul.f32 %v4497_v27, %v4486_v13  ;;  %v12428_v0 = vsel %vm12396_vm6, 0, %v4637_v18  ;;  %vm4503_vm8 = vcmp.lt.s32.totalorder %v12387_v21, 2 }
 0x54b   :  { %v4334_v57 = vadd.f32 0.041655596, %v4333_v25  ;;  %v4340_v62 = vmul.f32 -0.00019511016, %v12380_v8  ;;  %v8002_v55 = vadd.s32 4294967294, %v4618_v3  ;;  %v4491_v26 = vmul.f32 %v4490_v58, %v4486_v13 }
 0x54c   :  { %vm4501_vm10 = vweird.f32 %v11968_v23  ;;  %v4331_v1 = vsel %vm12345_vm7, 0, %v4329_v51  ;;  %v12439_v54 = vsel %vm12278_vm4, 0, %v3867_v35  ;;  %v4499_v6 = vadd.f32 1.0, %v4498_v53 }
 0x54d   :  { %v12441_v33 = vadd.f32 1.0, %v4183_v31  ;;  %v4335_v47 = vmul.f32 %v4334_v57, %v12380_v8  ;;  %v4341_v36 = vadd.f32 0.008332121, %v4340_v62  ;;  %vm8003_vm2 = vcmp.lt.s32.totalorder %v8002_v55, 0 }
 0x54e   :  { %v4492_v49 = vadd.f32 1.0, %v4491_v26  ;;  %v12445_v13 = vadd.s32 3, %v12428_v0  ;;  %v12448_v22 = vmul.f32 %v4191_v14, %v12237_v60  ;;  %v4500_v41 = vmul.f32 %v4499_v6, %v12364_v40 }
 0x54f   :  { %v4621_v11 = vsel %vm8003_vm2, 0, %v8002_v55  ;;  %vm4199_vm4 = vcmp.eq.s32.totalorder %v12424_v48, 2  ;;  %v4336_v61 = vadd.f32 -0.4999988, %v4335_v47  ;;  %v4342_v43 = vmul.f32 %v4341_v36, %v12380_v8 }
 0x550   :  { %v4622_v52 = vsub.s32 32, %v4621_v11  ;;  %v4626_v56 = vsub.s32 4294967266, %v4621_v11  ;;  %v4508_v24 = vxor.u32 2147483648, %v4492_v49  ;;  %vm4196_vm7 = vcmp.eq.s32.totalorder %v12424_v48, 0 }
 0x551   :  { %v12454_v51 = vand.u32 3, %v4331_v1  ;;  %v4623_v18 = vshll.u32 %v12391_v9, %v4621_v11  ;;  %v4505_v4 = vxor.u32 2147483648, %v4500_v41  ;;  %vm4195_vm15 = vcmp.lt.s32.totalorder %v12424_v48, 2 }
 0x552   :  { %v4337_v60 = vmul.f32 %v4336_v61, %v12380_v8  ;;  %v4343_v40 = vadd.f32 -0.16666654, %v4342_v43  ;;  %v4624_v25 = vshrl.u32 %v4606_v32, %v4622_v52  ;;  %v4627_v27 = vadd.s32 127, %v4626_v56 }
 0x553   :  { %v4509_v10 = vsel %vm4507_vm12, %v4508_v24, %v4500_v41  ;;  %v7004_v31 = vsel %vm7002_vm1, %v4508_v24, %v4500_v41  ;;  %vm4193_vm2 = vweird.f32 %v11731_v59  ;;  %v4506_v35 = vsel %vm4504_vm3, %v4492_v49, %v4505_v4 }
 0x554   :  { %v4338_v9 = vadd.f32 1.0, %v4337_v60  ;;  %v4344_v3 = vmul.f32 %v4343_v40, %v12380_v8  ;;  %v6686_v58 = vadd.s32 3, %v12402_v7  ;;  %v4625_v14 = vor.u32 %v4624_v25, %v4623_v18 }
 0x555   :  { %v4628_v53 = vshll.u32 %v4627_v27, 23  ;;  %v4510_v32 = vsel %vm4503_vm8, %v4506_v35, %v4509_v10  ;;  %vm14048_vm12 = vcmp.eq.s32.totalorder %v12389_v2, 0  ;;  %vm14049_vm1 = vcmp.lt.s32.totalorder %v12389_v2, 2 }
 0x556   :  { %v7001_v57 = vsel %vm14048_vm12, %v4492_v49, %v4505_v4  ;;  %v4511_v62 = vsel %vm4501_vm10, nan, %v4510_v32  ;;  %v4200_v26 = vxor.u32 2147483648, %v12441_v33  ;;  %v4345_v6 = vadd.f32 1.0, %v4344_v3 }
 0x557   :  { %v7005_v55 = vsel %vm14049_vm1, %v7001_v57, %v7004_v31  ;;  %vm4349_vm3 = vcmp.lt.s32.totalorder %v12454_v51, 2  ;;  %v4629_v8 = vor.u32 4788187, %v4628_v53  ;;  %v12479_v7 = vmul.f32 %v4511_v62, %v11661_v39 }
 0x558   :  { %v7006_v21 = vsel %vm4501_vm10, nan, %v7005_v55  ;;  %vm4350_vm8 = vcmp.eq.s32.totalorder %v12454_v51, 0  ;;  %v4632_v47 = vcvt.s32.f32 %v4625_v14  ;;  %v4197_v2 = vxor.u32 2147483648, %v12448_v22 }
 0x559   :  { %v12485_v36 = vmul.f32 %v7006_v21, %v11661_v39  ;;  %v4346_v49 = vmul.f32 %v4345_v6, %v12352_v45  ;;  %v4630_v41 = vand.u32 2147483647, %v4629_v8  ;;  %7226 = vmatpush.msrb.mxu0 %v12479_v7  ;;  %v4201_v11 = vsel %vm4199_vm4, %v4200_v26, %v12448_v22 }
 0x55a   :  { %v4354_v61 = vxor.u32 2147483648, %v4338_v9  ;;  %v6687_v23 = vand.u32 3, %v6686_v58  ;;  %v4198_v39 = vsel %vm4196_vm7, %v12441_v33, %v4197_v2  ;;  %v6841_v52 = vadd.s32 3, %v4331_v1 }
 0x55b   :  { %7332 = vmatpush.msrb.mxu2 %v12485_v36  ;;  %v4351_v43 = vxor.u32 2147483648, %v4346_v49  ;;  %v3871_v56 = vmul.f32 -0.001358992, %v12369_v50  ;;  %v4633_v45 = vmul.f32 %v4632_v47, %v4630_v41  ;;  %v4202_v24 = vsel %vm4195_vm15, %v4198_v39, %v4201_v11 }
 0x55c   :  { %vm4353_vm10 = vcmp.eq.s32.totalorder %v12454_v51, 2  ;;  %v3878_v18 = vmul.f32 -0.00019511016, %v12369_v50  ;;  %v4203_v4 = vsel %vm4193_vm2, nan, %v4202_v24  ;;  %vm4347_vm4 = vweird.f32 %v11911_v42 }
 0x55d   :  { %v4352_v60 = vsel %vm4350_vm8, %v4338_v9, %v4351_v43  ;;  %v4355_v40 = vsel %vm4353_vm10, %v4354_v61, %v4346_v49  ;;  %vm6689_vm7 = vcmp.eq.s32.totalorder %v6687_v23, 0  ;;  %v4634_v1 = vxor.u32 2147483648, %v4633_v45 }
 0x55e   :  { %v12508_v25 = vmul.f32 %v4203_v4, %v11651_v46  ;;  %v6691_v48 = vsel %vm6689_vm7, %v12441_v33, %v4197_v2  ;;  %vm6692_vm15 = vcmp.eq.s32.totalorder %v6687_v23, 2  ;;  %vm6688_vm12 = vcmp.lt.s32.totalorder %v6687_v23, 2 }
 0x55f   :  { %v6694_v27 = vsel %vm6692_vm15, %v4200_v26, %v12448_v22  ;;  %v6842_v10 = vand.u32 3, %v6841_v52  ;;  %v3872_v31 = vadd.f32 0.041655596, %v3871_v56  ;;  %vm14050_vm1 = vcmp.lt.s32.totalorder %v12119_v12, 0 }
 0x560   :  { %v4635_v35 = vsel %vm14050_vm1, %v4634_v1, %v4633_v45  ;;  %7227 = vmatpush.msrb.mxu0 %v12508_v25  ;;  %v4356_v3 = vsel %vm4349_vm3, %v4352_v60, %v4355_v40  ;;  %v6695_v58 = vsel %vm6688_vm12, %v6691_v48, %v6694_v27  ;;  %v3879_v14 = vadd.f32 0.008332121, %v3878_v18 }
 0x561   :  { %v12520_v33 = vsel %vm12396_vm6, %v12119_v12, %v4635_v35  ;;  %v6696_v22 = vsel %vm4193_vm2, nan, %v6695_v58  ;;  %vm6843_vm8 = vcmp.lt.s32.totalorder %v6842_v10, 2  ;;  %vm6844_vm10 = vcmp.eq.s32.totalorder %v6842_v10, 0 }
 0x562   :  { %v4640_v53 = vmul.f32 %v12520_v33, %v12520_v33  ;;  %v12527_v32 = vmul.f32 %v6696_v22, %v11651_v46  ;;  %v6846_v51 = vsel %vm6844_vm10, %v4338_v9, %v4351_v43  ;;  %vm6847_vm3 = vcmp.eq.s32.totalorder %v6842_v10, 2 }
 0x563   :  { %v6849_v57 = vsel %vm6847_vm3, %v4354_v61, %v4346_v49  ;;  %v3873_v62 = vmul.f32 %v3872_v31, %v12369_v50  ;;  %v3880_v15 = vmul.f32 %v3879_v14, %v12369_v50  ;;  %v12532_v55 = vand.u32 3, %v12439_v54 }
 0x564   :  { %v4648_v59 = vmul.f32 -0.00019511016, %v4640_v53  ;;  %v4641_v26 = vmul.f32 -0.001358992, %v4640_v53  ;;  %7333 = vmatpush.msrb.mxu2 %v12527_v32  ;;  %v6850_v6 = vsel %vm6843_vm8, %v6846_v51, %v6849_v57  ;;  %v4020_v8 = vsub.s32 4, %v11879_v20  ;;  %v14052_v57 = vld [vmem:[#allocation37_spill] sm:$0xff] }
 0x565   :  { %v12537_v46 = vand.u32 3, %v12428_v0  ;;  %v12540_v9 = vand.u32 3, %v12445_v13  ;;  %v3874_v21 = vadd.f32 -0.4999988, %v3873_v62  ;;  %v3881_v47 = vadd.f32 -0.16666654, %v3880_v15 }
 0x566   :  { %v4649_v2 = vadd.f32 0.008332121, %v4648_v59  ;;  %v4642_v49 = vadd.f32 0.041655596, %v4641_v26  ;;  %v4357_v41 = vsel %vm4347_vm4, nan, %v4356_v3  ;;  %v6851_v11 = vsel %vm4347_vm4, nan, %v6850_v6 }
 0x567   :  { %v3875_v61 = vmul.f32 %v3874_v21, %v12369_v50  ;;  %v3882_v23 = vmul.f32 %v3881_v47, %v12369_v50  ;;  %vm3887_vm6 = vcmp.lt.s32.totalorder %v12532_v55, 2  ;;  %vm14051_vm2 = vcmp.lt.s32.totalorder %v11647_v37, 0 }
 0x568   :  { %v4021_v0 = vsel %vm14051_vm2, %v4020_v8, %v11879_v20  ;;  %v4650_v13 = vmul.f32 %v4649_v2, %v4640_v53  ;;  %v4643_v39 = vmul.f32 %v4642_v49, %v4640_v53  ;;  %vm13636_vm7 = vweird.f32 %v11594_v38  ;;  %v14053_v49 = vld [vmem:[#allocation18_spill] sm:$0xff] }
 0x569   :  { %v4023_v43 = vsel %vm12284_vm13, 0, %v4021_v0  ;;  %v4025_v42 = vmul.f32 -0.001358992, %v12376_v28  ;;  %vm4661_vm4 = vcmp.eq.s32.totalorder %v12537_v46, 2  ;;  %vm7157_vm15 = vcmp.eq.s32.totalorder %v12540_v9, 2 }
 0x56a   :  { %v12558_v50 = vadd.f32 1.0, %v3875_v61  ;;  %v3883_v52 = vadd.f32 1.0, %v3882_v23  ;;  %v4032_v56 = vmul.f32 -0.00019511016, %v12376_v28  ;;  %v12561_v45 = vand.u32 3, %v4023_v43 }
 0x56b   :  { %v4651_v20 = vadd.f32 -0.16666654, %v4650_v13  ;;  %v4644_v24 = vadd.f32 -0.4999988, %v4643_v39  ;;  %v12564_v18 = vmul.f32 %v4357_v41, %v11654_v30  ;;  %v4026_v16 = vadd.f32 0.041655596, %v4025_v42 }
 0x56c   :  { %vm4658_vm13 = vcmp.eq.s32.totalorder %v12537_v46, 0  ;;  %v12569_v4 = vmul.f32 %v6851_v11, %v11654_v30  ;;  %v3884_v60 = vmul.f32 %v3883_v52, %v12334_v34  ;;  %v3892_v40 = vxor.u32 2147483648, %v12558_v50  ;;  %v14059_v42 = vld [vmem:[#allocation65_spill] sm:$0xff] }
 0x56d   :  { %v4033_v1 = vadd.f32 0.008332121, %v4032_v56  ;;  %v4652_v48 = vmul.f32 %v4651_v20, %v4640_v53  ;;  %v4645_v27 = vmul.f32 %v4644_v24, %v4640_v53  ;;  %vm4657_vm1 = vcmp.lt.s32.totalorder %v12537_v46, 2 }
 0x56e   :  { %vm7153_vm8 = vcmp.lt.s32.totalorder %v12540_v9, 2  ;;  %vm3891_vm10 = vcmp.eq.s32.totalorder %v12532_v55, 2  ;;  %v4027_v10 = vmul.f32 %v4026_v16, %v12376_v28  ;;  %vm4655_vm3 = vweird.f32 %v12119_v12 }
 0x56f   :  { %vm3888_vm2 = vcmp.eq.s32.totalorder %v12532_v55, 0  ;;  %v3889_v30 = vxor.u32 2147483648, %v3884_v60  ;;  %v3893_v31 = vsel %vm3891_vm10, %v3892_v40, %v3884_v60  ;;  %v4034_v34 = vmul.f32 %v4033_v1, %v12376_v28 }
 0x570   :  { %v4653_v35 = vadd.f32 1.0, %v4652_v48  ;;  %v4646_v3 = vadd.f32 1.0, %v4645_v27  ;;  %v4028_v58 = vadd.f32 -0.4999988, %v4027_v10  ;;  %vm4045_vm12 = vcmp.eq.s32.totalorder %v12561_v45, 2 }
 0x571   :  { %v6376_v14 = vadd.s32 3, %v12439_v54  ;;  %v3890_v22 = vsel %vm3888_vm2, %v12558_v50, %v3889_v30  ;;  %v4035_v53 = vadd.f32 -0.16666654, %v4034_v34  ;;  %v6531_v51 = vadd.s32 3, %v4023_v43 }
 0x572   :  { %v3558_v62 = vsub.s32 4, %v14052_v57  ;;  %v4654_v15 = vmul.f32 %v4653_v35, %v12520_v33  ;;  %v4662_v59 = vxor.u32 2147483648, %v4646_v3  ;;  %v3894_v26 = vsel %vm3887_vm6, %v3890_v22, %v3893_v31 }
 0x573   :  { %v4029_v6 = vmul.f32 %v4028_v58, %v12376_v28  ;;  %v3895_v8 = vsel %vm13636_vm7, nan, %v3894_v26  ;;  %v4036_v54 = vmul.f32 %v4035_v53, %v12376_v28  ;;  %v6377_v21 = vand.u32 3, %v6376_v14  ;;  %v14054_v28 = vld [vmem:[#allocation55_spill] sm:$0xff] }
 0x574   :  { %v6532_v47 = vand.u32 3, %v6531_v51  ;;  %v4659_v2 = vxor.u32 2147483648, %v4654_v15  ;;  %v4663_v33 = vsel %vm4661_vm4, %v4662_v59, %v4654_v15  ;;  %v7159_v55 = vsel %vm7157_vm15, %v4662_v59, %v4654_v15  ;;  %v14070_v51 = vld [vmem:[#allocation40_spill] sm:$0xff] }
 0x575   :  { %v12598_v41 = vmul.f32 %v3895_v8, %v14053_v49  ;;  %v4030_v11 = vadd.f32 1.0, %v4029_v6  ;;  %v4037_v61 = vadd.f32 1.0, %v4036_v54  ;;  %vm6378_vm7 = vcmp.lt.s32.totalorder %v6377_v21, 2  ;;  %v14076_v6 = vld [vmem:[#allocation25_spill] sm:$0xff] }
 0x576   :  { %vm6379_vm10 = vcmp.eq.s32.totalorder %v6377_v21, 0  ;;  %v14055_v23 = vand.u32 2147483647, %v14054_v28  ;;  %v4660_v13 = vsel %vm4658_vm13, %v4646_v3, %v4659_v2  ;;  %vm14058_vm4 = vcmp.eq.s32.totalorder %v12540_v9, 0 }
 0x577   :  { %v7156_v39 = vsel %vm14058_vm4, %v4646_v3, %v4659_v2  ;;  %7228 = vmatpush.msrb.mxu0 %v12598_v41  ;;  %v6381_v43 = vsel %vm6379_vm10, %v12558_v50, %v3889_v30  ;;  %vm6382_vm15 = vcmp.eq.s32.totalorder %v6377_v21, 2  ;;  %vm13637_vm6 = vcmp.lt.s32.totalorder %v14059_v42, 0  ;;  %v14077_v2 = vld [vmem:[#allocation16_spill] sm:$0xff] }
 0x578   :  { %vm12603_vm2 = vcmp.le.f32.partialorder %v14055_v23, 0.7853982  ;;  %v4664_v52 = vsel %vm4657_vm1, %v4660_v13, %v4663_v33  ;;  %v7160_v56 = vsel %vm7153_vm8, %v7156_v39, %v7159_v55  ;;  %v4038_v20 = vmul.f32 %v4037_v61, %v12341_v63  ;;  %v14080_v23 = vld [vmem:[#allocation30_spill] sm:$0xff] }
 0x579   :  { %v4046_v24 = vxor.u32 2147483648, %v4030_v11  ;;  %v4665_v16 = vsel %vm4655_vm3, nan, %v4664_v52  ;;  %v7161_v1 = vsel %vm4655_vm3, nan, %v7160_v56  ;;  %v6384_v48 = vsel %vm6382_vm15, %v3892_v40, %v3884_v60 }
 0x57a   :  { %vm6533_vm13 = vcmp.lt.s32.totalorder %v6532_v47, 2  ;;  %v12624_v50 = vmul.f32 %v4665_v16, %v11976_v5  ;;  %v12627_v46 = vmul.f32 %v7161_v1, %v11976_v5  ;;  %v4043_v27 = vxor.u32 2147483648, %v4038_v20 }
 0x57b   :  { %v4047_v9 = vsel %vm4045_vm12, %v4046_v24, %v4038_v20  ;;  %v14060_v63 = vand.u32 2147483647, %v14059_v42  ;;  %v6385_v12 = vsel %vm6378_vm7, %v6381_v43, %v6384_v48  ;;  %vm6534_vm8 = vcmp.eq.s32.totalorder %v6532_v47, 0 }
 0x57c   :  { %vm6537_vm3 = vcmp.eq.s32.totalorder %v6532_v47, 2  ;;  %vm14063_vm10 = vcmp.lt.s32.totalorder %v11310_v17, 0  ;;  %7267 = vmatpush.msrb.mxu1 %v12624_v50  ;;  %7373 = vmatpush.msrb.mxu3 %v12627_v46  ;;  %vm14064_vm12 = vcmp.eq.s32.totalorder %v12561_v45, 0  ;;  %vm14065_vm4 = vweird.f32 %v11594_v38 }
 0x57d   :  { %vm12633_vm1 = vcmp.le.f32.partialorder %v14060_v63, 0.7853982  ;;  %v3559_v60 = vsel %vm14063_vm10, %v3558_v62, %v14052_v57  ;;  %v4044_v5 = vsel %vm14064_vm12, %v4030_v11, %v4043_v27  ;;  %v6386_v40 = vsel %vm14065_vm4, nan, %v6385_v12 }
 0x57e   :  { %v6536_v30 = vsel %vm6534_vm8, %v4030_v11, %v4043_v27  ;;  %v6539_v31 = vsel %vm6537_vm3, %v4046_v24, %v4038_v20  ;;  %vm14066_vm7 = vcmp.lt.s32.totalorder %v12561_v45, 2  ;;  %v12650_v35 = vmul.f32 %v6386_v40, %v14053_v49  ;;  %7268 = vmatpush.msrb.mxu1 %v12564_v18  ;;  %7374 = vmatpush.msrb.mxu3 %v12569_v4  ;;  %v14069_v45 = vld [vmem:[#allocation10_spill] sm:$0xff]  ;;  %v14079_v49 = vld [vmem:[#allocation32_spill] sm:$0xff] }
 0x57f   :  { %v4048_v34 = vsel %vm14066_vm7, %v4044_v5, %v4047_v9  ;;  %v6540_v3 = vsel %vm6533_vm13, %v6536_v30, %v6539_v31  ;;  %v3561_v58 = vsel %vm11926_vm9, 0, %v3559_v60  ;;  %vm14067_vm15 = vweird.f32 %v11647_v37  ;;  %v14075_v37 = vld [vmem:[#allocation9_spill] sm:$0xff]  ;;  %v14083_v30 = vld [vmem:[#allocation20_spill] sm:$0xff] }
 0x580   :  { %v4049_v38 = vsel %vm14067_vm15, nan, %v4048_v34  ;;  %vm14068_vm8 = vmmov %vm14067_vm15  ;;  %v3563_v22 = vmul.f32 -0.001358992, %v14069_v45  ;;  %v3570_v53 = vmul.f32 -0.00019511016, %v14069_v45  ;;  %7334 = vmatpush.msrb.mxu2 %v12650_v35  ;;  %v3712_v26 = vsub.s32 4, %v14075_v37 }
 0x581   :  { %v6541_v14 = vsel %vm14068_vm8, nan, %v6540_v3  ;;  %v14071_v57 = vand.u32 2147483647, %v14070_v51  ;;  %v12670_v15 = vmul.f32 %v4049_v38, %v14074_v44  ;;  %v12681_v8 = vsel %vm12603_vm2, %v14054_v28, %v14076_v6  ;;  %v14085_v6 = vld [vmem:[#allocation31_spill] sm:$0xff] }
 0x582   :  { %v12674_v59 = vmul.f32 %v6541_v14, %v14074_v44  ;;  %v3564_v54 = vadd.f32 0.041655596, %v3563_v22  ;;  %v3571_v21 = vadd.f32 0.008332121, %v3570_v53  ;;  %v3717_v47 = vmul.f32 -0.001358992, %v12359_v19 }
 0x583   :  { %vm12665_vm13 = vcmp.le.f32.partialorder %v14071_v57, 0.7853982  ;;  %v14078_v33 = vxor.u32 2147483648, %v14077_v2  ;;  %7269 = vmatpush.msrb.mxu1 %v12670_v15  ;;  %v3578_v61 = vand.u32 3, %v3561_v58  ;;  %vm14081_vm9 = vcmp.lt.s32.totalorder %v14080_v23, 0 }
 0x584   :  { %v12693_v11 = vsel %vm12665_vm13, %v14070_v51, %v14079_v49  ;;  %7375 = vmatpush.msrb.mxu3 %v12674_v59  ;;  %v3713_v13 = vsel %vm14081_vm9, %v3712_v26, %v14075_v37  ;;  %v3565_v39 = vmul.f32 %v3564_v54, %v14069_v45  ;;  %v3572_v43 = vmul.f32 %v3571_v21, %v14069_v45 }
 0x585   :  { %v3095_v55 = vsel %vm13637_vm6, %v14078_v33, %v14077_v2  ;;  %v3715_v56 = vsel %vm11946_vm5, 0, %v3713_v13  ;;  %v3718_v20 = vadd.f32 0.041655596, %v3717_v47  ;;  %v12706_v24 = vmul.f32 %v12681_v8, %v12681_v8 }
 0x586   :  { %v3724_v16 = vmul.f32 -0.00019511016, %v12359_v19  ;;  %v6066_v1 = vadd.s32 3, %v3561_v58  ;;  %v6221_v48 = vadd.s32 3, %v3715_v56  ;;  %v12712_v27 = vsel %vm12633_vm1, %v14059_v42, %v3095_v55 }
 0x587   :  { %v3566_v9 = vadd.f32 -0.4999988, %v3565_v39  ;;  %v3573_v63 = vadd.f32 -0.16666654, %v3572_v43  ;;  %v3719_v12 = vmul.f32 %v3718_v20, %v12359_v19  ;;  %v12717_v60 = vmul.f32 %v12693_v11, %v12693_v11 }
 0x588   :  { %v3725_v5 = vadd.f32 0.008332121, %v3724_v16  ;;  %v12719_v40 = vand.u32 3, %v3715_v56  ;;  %v3250_v31 = vsub.s32 4, %v14083_v30  ;;  %v6067_v38 = vand.u32 3, %v6066_v1  ;;  %v14086_v16 = vld [vmem:[#allocation39_spill] sm:$0xff] }
 0x589   :  { %v3567_v34 = vmul.f32 %v3566_v9, %v14069_v45  ;;  %v3574_v3 = vmul.f32 %v3573_v63, %v14069_v45  ;;  %v3720_v58 = vadd.f32 -0.4999988, %v3719_v12  ;;  %vm3580_vm10 = vcmp.eq.s32.totalorder %v3578_v61, 0 }
 0x58a   :  { %v3726_v14 = vmul.f32 %v3725_v5, %v12359_v19  ;;  %v6222_v22 = vand.u32 3, %v6221_v48  ;;  %v3255_v53 = vmul.f32 -0.001358992, %v12706_v24  ;;  %vm3583_vm12 = vcmp.eq.s32.totalorder %v3578_v61, 2 }
 0x58b   :  { %v3568_v57 = vadd.f32 1.0, %v3567_v34  ;;  %v3575_v44 = vadd.f32 1.0, %v3574_v3  ;;  %v3721_v37 = vmul.f32 %v3720_v58, %v12359_v19  ;;  %vm14084_vm15 = vcmp.lt.s32.totalorder %v14054_v28, 0  ;;  %v14091_v3 = vld [vmem:[#allocation17_spill] sm:$0xff] }
 0x58c   :  { %v3727_v26 = vadd.f32 -0.16666654, %v3726_v14  ;;  %v3251_v45 = vsel %vm14084_vm15, %v3250_v31, %v14083_v30  ;;  %vm3734_vm8 = vcmp.eq.s32.totalorder %v12719_v40, 0  ;;  %vm6069_vm9 = vcmp.eq.s32.totalorder %v6067_v38, 0 }
 0x58d   :  { %v3576_v54 = vmul.f32 %v3575_v44, %v14085_v6  ;;  %v3584_v21 = vxor.u32 2147483648, %v3568_v57  ;;  %v3722_v47 = vadd.f32 1.0, %v3721_v37  ;;  %vm6072_vm3 = vcmp.eq.s32.totalorder %v6067_v38, 2 }
 0x58e   :  { %v3728_v2 = vmul.f32 %v3727_v26, %v12359_v19  ;;  %v3256_v33 = vadd.f32 0.041655596, %v3255_v53  ;;  %vm6224_vm15 = vcmp.eq.s32.totalorder %v6222_v22, 0  ;;  %vm6227_vm7 = vcmp.eq.s32.totalorder %v6222_v22, 2 }
 0x58f   :  { %v3581_v55 = vxor.u32 2147483648, %v3576_v54  ;;  %v3585_v49 = vsel %vm3583_vm12, %v3584_v21, %v3576_v54  ;;  %v3738_v39 = vxor.u32 2147483648, %v3722_v47  ;;  %v3262_v52 = vmul.f32 -0.00019511016, %v12706_v24 }
 0x590   :  { %v3729_v13 = vadd.f32 1.0, %v3728_v2  ;;  %v3257_v43 = vmul.f32 %v3256_v33, %v12706_v24  ;;  %v6074_v20 = vsel %vm6072_vm3, %v3584_v21, %v3576_v54  ;;  %v3404_v1 = vsub.s32 4, %v14086_v16 }
 0x591   :  { %v3582_v19 = vsel %vm3580_vm10, %v3568_v57, %v3581_v55  ;;  %v6071_v56 = vsel %vm6069_vm9, %v3568_v57, %v3581_v55  ;;  %vm14087_vm5 = vcmp.lt.s32.totalorder %v3578_v61, 2  ;;  %vm14088_vm12 = vcmp.lt.s32.totalorder %v6067_v38, 2 }
 0x592   :  { %v3586_v48 = vsel %vm14087_vm5, %v3582_v19, %v3585_v49  ;;  %v3730_v9 = vmul.f32 %v3729_v13, %v12004_v29  ;;  %v6075_v63 = vsel %vm14088_vm12, %v6071_v56, %v6074_v20  ;;  %v3258_v12 = vadd.f32 -0.4999988, %v3257_v43  ;;  %v14099_v20 = vld [vmem:[#allocation56_spill] sm:$0xff] }
 0x593   :  { %vm14089_vm4 = vweird.f32 %v11310_v17  ;;  %v3253_v31 = vsel %vm12603_vm2, 0, %v3251_v45  ;;  %v3263_v34 = vadd.f32 0.008332121, %v3262_v52  ;;  %v3409_v29 = vmul.f32 -0.001358992, %v12717_v60 }
 0x594   :  { %v3587_v5 = vsel %vm14089_vm4, nan, %v3586_v48  ;;  %vm14090_vm6 = vmmov %vm14089_vm4  ;;  %v3735_v61 = vxor.u32 2147483648, %v3730_v9  ;;  %vm14092_vm5 = vcmp.eq.s32.totalorder %v12719_v40, 2  ;;  %v6229_v53 = vsel %vm6227_vm7, %v3738_v39, %v3730_v9 }
 0x595   :  { %v6076_v30 = vsel %vm14090_vm6, nan, %v6075_v63  ;;  %v12753_v58 = vmul.f32 %v3587_v5, %v14091_v3  ;;  %v3739_v38 = vsel %vm14092_vm5, %v3738_v39, %v3730_v9  ;;  %v3259_v17 = vmul.f32 %v3258_v12, %v12706_v24 }
 0x596   :  { %v12756_v14 = vmul.f32 %v6076_v30, %v14091_v3  ;;  %v3264_v0 = vmul.f32 %v3263_v34, %v12706_v24  ;;  %v3736_v57 = vsel %vm3734_vm8, %v3722_v47, %v3735_v61  ;;  %v6226_v44 = vsel %vm6224_vm15, %v3722_v47, %v3735_v61 }
 0x597   :  { %7229 = vmatpush.msrb.mxu0 %v12753_v58  ;;  %v3270_v37 = vand.u32 3, %v3253_v31  ;;  %vm14093_vm2 = vcmp.lt.s32.totalorder %v14070_v51, 0  ;;  %vm14094_vm6 = vcmp.lt.s32.totalorder %v12719_v40, 2  ;;  %vm14095_vm3 = vcmp.lt.s32.totalorder %v6222_v22, 2  ;;  %v14098_v40 = vld [vmem:[#allocation62_spill] sm:$0xff] }
 0x598   :  { %7335 = vmatpush.msrb.mxu2 %v12756_v14  ;;  %v3405_v26 = vsel %vm14093_vm2, %v3404_v1, %v14086_v16  ;;  %v3740_v45 = vsel %vm14094_vm6, %v3736_v57, %v3739_v38  ;;  %v6230_v6 = vsel %vm14095_vm3, %v6226_v44, %v6229_v53  ;;  %v3260_v54 = vadd.f32 1.0, %v3259_v17  ;;  %v14100_v1 = vld [vmem:[#allocation24_spill] sm:$0xff] }
 0x599   :  { %v3265_v21 = vadd.f32 -0.16666654, %v3264_v0  ;;  %vm14096_vm10 = vweird.f32 %v14080_v23  ;;  %v3407_v47 = vsel %vm12665_vm13, 0, %v3405_v26  ;;  %v3410_v55 = vadd.f32 0.041655596, %v3409_v29  ;;  %v14101_v29 = vld [vmem:[#allocation27_spill] sm:$0xff] }
 0x59a   :  { %v3741_v2 = vsel %vm14096_vm10, nan, %v3740_v45  ;;  %vm14097_vm4 = vmmov %vm14096_vm10  ;;  %v12783_v49 = vmul.f32 %v12712_v27, %v12712_v27  ;;  %v3276_v43 = vxor.u32 2147483648, %v3260_v54  ;;  %v3416_v52 = vmul.f32 -0.00019511016, %v12717_v60 }
 0x59b   :  { %v6231_v33 = vsel %vm14097_vm4, nan, %v6230_v6  ;;  %v12786_v13 = vmul.f32 %v3741_v2, %v14098_v40  ;;  %v3266_v39 = vmul.f32 %v3265_v21, %v12706_v24  ;;  %v3411_v23 = vmul.f32 %v3410_v55, %v12717_v60  ;;  %v14104_v55 = vld [vmem:[#allocation28_spill] sm:$0xff] }
 0x59c   :  { %v12789_v22 = vmul.f32 %v6231_v33, %v14098_v40  ;;  %v5756_v62 = vadd.s32 3, %v3253_v31  ;;  %v5911_v56 = vadd.s32 3, %v3407_v47  ;;  %v2942_v16 = vsub.s32 4, %v14099_v20 }
 0x59d   :  { %7270 = vmatpush.msrb.mxu1 %v12786_v13  ;;  %v3267_v19 = vadd.f32 1.0, %v3266_v39  ;;  %v2947_v48 = vmul.f32 -0.001358992, %v14100_v1  ;;  %vm3269_vm13 = vweird.f32 %v14054_v28  ;;  %vm3271_vm7 = vcmp.lt.s32.totalorder %v3270_v37, 2 }
 0x59e   :  { %7376 = vmatpush.msrb.mxu3 %v12789_v22  ;;  %v3412_v24 = vadd.f32 -0.4999988, %v3411_v23  ;;  %v3417_v9 = vadd.f32 0.008332121, %v3416_v52  ;;  %vm3272_vm8 = vcmp.eq.s32.totalorder %v3270_v37, 0  ;;  %v3424_v12 = vand.u32 3, %v3407_v47 }
 0x59f   :  { %v3268_v63 = vmul.f32 %v3267_v19, %v12681_v8  ;;  %v5757_v5 = vand.u32 3, %v5756_v62  ;;  %vm3275_vm9 = vcmp.eq.s32.totalorder %v3270_v37, 2  ;;  %v5912_v34 = vand.u32 3, %v5911_v56  ;;  %v14105_v23 = vld [vmem:[#allocation19_spill] sm:$0xff] }
 0x5a0   :  { %v3413_v30 = vmul.f32 %v3412_v24, %v12717_v60  ;;  %v3418_v31 = vmul.f32 %v3417_v9, %v12717_v60  ;;  %vm14102_vm15 = vcmp.lt.s32.totalorder %v14101_v29, 0  ;;  %v2948_v53 = vadd.f32 0.041655596, %v2947_v48 }
 0x5a1   :  { %v3273_v3 = vxor.u32 2147483648, %v3268_v63  ;;  %v3277_v61 = vsel %vm3275_vm9, %v3276_v43, %v3268_v63  ;;  %v2943_v38 = vsel %vm14102_vm15, %v2942_v16, %v14099_v20  ;;  %vm5759_vm12 = vcmp.eq.s32.totalorder %v5757_v5, 0 }
 0x5a2   :  { %v3414_v17 = vadd.f32 1.0, %v3413_v30  ;;  %v3419_v0 = vadd.f32 -0.16666654, %v3418_v31  ;;  %vm5762_vm5 = vcmp.eq.s32.totalorder %v5757_v5, 2  ;;  %vm3426_vm2 = vcmp.eq.s32.totalorder %v3424_v12, 0 }
 0x5a3   :  { %v3274_v8 = vsel %vm3272_vm8, %v3260_v54, %v3273_v3  ;;  %vm5758_vm6 = vcmp.lt.s32.totalorder %v5757_v5, 2  ;;  %v5761_v57 = vsel %vm5759_vm12, %v3260_v54, %v3273_v3  ;;  %v5764_v44 = vsel %vm5762_vm5, %v3276_v43, %v3268_v63 }
 0x5a4   :  { %v3278_v26 = vsel %vm3271_vm7, %v3274_v8, %v3277_v61  ;;  %v3420_v45 = vmul.f32 %v3419_v0, %v12717_v60  ;;  %vm3425_vm3 = vcmp.lt.s32.totalorder %v3424_v12, 2  ;;  %vm3429_vm10 = vcmp.eq.s32.totalorder %v3424_v12, 2 }
 0x5a5   :  { %v5765_v6 = vsel %vm5758_vm6, %v5761_v57, %v5764_v44  ;;  %v3279_v21 = vsel %vm3269_vm13, nan, %v3278_v26  ;;  %vm3423_vm4 = vweird.f32 %v14070_v51  ;;  %v3430_v2 = vxor.u32 2147483648, %v3414_v17 }
 0x5a6   :  { %v5766_v33 = vsel %vm3269_vm13, nan, %v5765_v6  ;;  %v2945_v54 = vsel %vm11520_vm14, 0, %v2943_v38  ;;  %v12815_v37 = vmul.f32 %v3279_v21, %v14104_v55  ;;  %v3421_v40 = vadd.f32 1.0, %v3420_v45 }
 0x5a7   :  { %v12818_v60 = vmul.f32 %v5766_v33, %v14104_v55  ;;  %v2949_v39 = vmul.f32 %v2948_v53, %v14100_v1  ;;  %vm5913_vm7 = vcmp.lt.s32.totalorder %v5912_v34, 2  ;;  %v2954_v43 = vmul.f32 -0.00019511016, %v14100_v1 }
 0x5a8   :  { %v3096_v52 = vsub.s32 4, %v14105_v23  ;;  %v3101_v28 = vmul.f32 -0.001358992, %v12783_v49  ;;  %7230 = vmatpush.msrb.mxu0 %v12815_v37  ;;  %v3422_v62 = vmul.f32 %v3421_v40, %v12693_v11  ;;  %vm5914_vm14 = vcmp.eq.s32.totalorder %v5912_v34, 0 }
 0x5a9   :  { %7336 = vmatpush.msrb.mxu2 %v12818_v60  ;;  %v2950_v19 = vadd.f32 -0.4999988, %v2949_v39  ;;  %v3108_v56 = vmul.f32 -0.00019511016, %v12783_v49  ;;  %vm5917_vm13 = vcmp.eq.s32.totalorder %v5912_v34, 2  ;;  %v12828_v16 = vand.u32 3, %v2945_v54 }
 0x5aa   :  { %v2955_v20 = vadd.f32 0.008332121, %v2954_v43  ;;  %v5446_v48 = vadd.s32 3, %v2945_v54  ;;  %v3427_v24 = vxor.u32 2147483648, %v3422_v62  ;;  %v3431_v9 = vsel %vm3429_vm10, %v3430_v2, %v3422_v62  ;;  %v14108_v43 = vld [vmem:[#allocation61_spill] sm:$0xff] }
 0x5ab   :  { %v5919_v63 = vsel %vm5917_vm13, %v3430_v2, %v3422_v62  ;;  %v2951_v5 = vmul.f32 %v2950_v19, %v14100_v1  ;;  %vm14106_vm8 = vcmp.lt.s32.totalorder %v14059_v42, 0  ;;  %v3102_v31 = vadd.f32 0.041655596, %v3101_v28  ;;  %v14110_v62 = vld [vmem:[#allocation80_spill] sm:$0xff] }
 0x5ac   :  { %v2956_v30 = vmul.f32 %v2955_v20, %v14100_v1  ;;  %v3097_v11 = vsel %vm14106_vm8, %v3096_v52, %v14105_v23  ;;  %v3109_v3 = vadd.f32 0.008332121, %v3108_v56  ;;  %v3428_v61 = vsel %vm3426_vm2, %v3414_v17, %v3427_v24  ;;  %v14109_v52 = vld [vmem:[#allocation29_spill] sm:$0xff] }
 0x5ad   :  { %v5916_v38 = vsel %vm5914_vm14, %v3414_v17, %v3427_v24  ;;  %v2952_v53 = vadd.f32 1.0, %v2951_v5  ;;  %v3099_v0 = vsel %vm12633_vm1, 0, %v3097_v11  ;;  %v3432_v8 = vsel %vm3425_vm3, %v3428_v61, %v3431_v9  ;;  %v14107_v17 = vld [vmem:[#allocation36_spill] sm:$0xff]  ;;  %v14114_v20 = vld [vmem:[#allocation45_spill] sm:$0xff] }
 0x5ae   :  { %v5920_v57 = vsel %vm5913_vm7, %v5916_v38, %v5919_v63  ;;  %v2957_v44 = vadd.f32 -0.16666654, %v2956_v30  ;;  %v3103_v26 = vmul.f32 %v3102_v31, %v12783_v49  ;;  %v3433_v45 = vsel %vm3423_vm4, nan, %v3432_v8  ;;  %v14116_v31 = vld [vmem:[#allocation57_spill] sm:$0xff] }
 0x5af   :  { %v5921_v6 = vsel %vm3423_vm4, nan, %v5920_v57  ;;  %vm2964_vm9 = vcmp.eq.s32.totalorder %v12828_v16, 0  ;;  %vm2967_vm15 = vcmp.eq.s32.totalorder %v12828_v16, 2  ;;  %v3110_v10 = vmul.f32 %v3109_v3, %v12783_v49 }
 0x5b0   :  { %v12851_v12 = vmul.f32 %v3433_v45, %v14107_v17  ;;  %v12854_v34 = vmul.f32 %v5921_v6, %v14107_v17  ;;  %v2958_v21 = vmul.f32 %v2957_v44, %v14100_v1  ;;  %vm2963_vm1 = vcmp.lt.s32.totalorder %v12828_v16, 2 }
 0x5b1   :  { %v3104_v2 = vadd.f32 -0.4999988, %v3103_v26  ;;  %vm2961_vm12 = vweird.f32 %v14101_v29  ;;  %v3111_v51 = vadd.f32 -0.16666654, %v3110_v10  ;;  %v3116_v33 = vand.u32 3, %v3099_v0 }
 0x5b2   :  { %v5447_v47 = vand.u32 3, %v5446_v48  ;;  %v5601_v54 = vadd.s32 3, %v3099_v0  ;;  %7271 = vmatpush.msrb.mxu1 %v12851_v12  ;;  %7377 = vmatpush.msrb.mxu3 %v12854_v34  ;;  %v2959_v55 = vadd.f32 1.0, %v2958_v21  ;;  %v2968_v40 = vxor.u32 2147483648, %v2952_v53  ;;  %v14115_v48 = vld [vmem:[#allocation38_spill] sm:$0xff] }
 0x5b3   :  { %v3105_v39 = vmul.f32 %v3104_v2, %v12783_v49  ;;  %v2634_v23 = vsub.s32 4, %v14108_v43  ;;  %v3112_v1 = vmul.f32 %v3111_v51, %v12783_v49  ;;  %vm3118_vm2 = vcmp.eq.s32.totalorder %v3116_v33, 0 }
 0x5b4   :  { %v2639_v28 = vmul.f32 -0.001358992, %v14109_v52  ;;  %v14111_v19 = vand.u32 2147483647, %v14110_v62  ;;  %v2960_v24 = vmul.f32 %v2959_v55, %v14115_v48  ;;  %vm3121_vm4 = vcmp.eq.s32.totalorder %v3116_v33, 2  ;;  %v2088_v48 = vpop.permute.xlu1 %2087 }
 0x5b5   :  { %v3106_v9 = vadd.f32 1.0, %v3105_v39  ;;  %vm5448_vm7 = vcmp.lt.s32.totalorder %v5447_v47, 2  ;;  %v3113_v49 = vadd.f32 1.0, %v3112_v1  ;;  %vm5449_vm14 = vcmp.eq.s32.totalorder %v5447_v47, 0  ;;  %v14120_v39 = vld [vmem:[#allocation46_spill] sm:$0xff] }
 0x5b6   :  { %vm12867_vm6 = vcmp.le.f32.partialorder %v14111_v19, 0.7853982  ;;  %vm5452_vm13 = vcmp.eq.s32.totalorder %v5447_v47, 2  ;;  %v5602_v63 = vand.u32 3, %v5601_v54  ;;  %v2965_v5 = vxor.u32 2147483648, %v2960_v24 }
 0x5b7   :  { %v2969_v30 = vsel %vm2967_vm15, %v2968_v40, %v2960_v24  ;;  %v3122_v11 = vxor.u32 2147483648, %v3106_v9  ;;  %vm14117_vm8 = vcmp.lt.s32.totalorder %v14116_v31, 0  ;;  %v3114_v61 = vmul.f32 %v3113_v49, %v12712_v27 }
 0x5b8   :  { %v2635_v3 = vsel %vm14117_vm8, %v2634_v23, %v14108_v43  ;;  %v5454_v38 = vsel %vm5452_vm13, %v2968_v40, %v2960_v24  ;;  %vm5603_vm3 = vcmp.lt.s32.totalorder %v5602_v63, 2  ;;  %vm5604_vm10 = vcmp.eq.s32.totalorder %v5602_v63, 0  ;;  %v14121_v23 = vld [vmem:[#allocation53_spill] sm:$0xff]  ;;  %v14126_v24 = vld [vmem:[#allocation34_spill] sm:$0xff] }
 0x5b9   :  { %v2966_v0 = vsel %vm2964_vm9, %v2952_v53, %v2965_v5  ;;  %v5451_v8 = vsel %vm5449_vm14, %v2952_v53, %v2965_v5  ;;  %vm5607_vm5 = vcmp.eq.s32.totalorder %v5602_v63, 2  ;;  %v2640_v57 = vadd.f32 0.041655596, %v2639_v28  ;;  %v14118_v53 = vld [vmem:[#allocation33_spill] sm:$0xff] }
 0x5ba   :  { %v2970_v44 = vsel %vm2963_vm1, %v2966_v0, %v2969_v30  ;;  %v3119_v26 = vxor.u32 2147483648, %v3114_v61  ;;  %v3123_v45 = vsel %vm3121_vm4, %v3122_v11, %v3114_v61  ;;  %v5455_v6 = vsel %vm5448_vm7, %v5451_v8, %v5454_v38  ;;  %v14132_v8 = vld [vmem:[#allocation64_spill] sm:$0xff] }
 0x5bb   :  { %v2971_v27 = vsel %vm2961_vm12, nan, %v2970_v44  ;;  %v5456_v10 = vsel %vm2961_vm12, nan, %v5455_v6  ;;  %v5609_v17 = vsel %vm5607_vm5, %v3122_v11, %v3114_v61  ;;  %v2641_v21 = vmul.f32 %v2640_v57, %v14109_v52  ;;  %v14128_v11 = vld [vmem:[#allocation54_spill] sm:$0xff] }
 0x5bc   :  { %v12892_v2 = vmul.f32 %v2971_v27, %v14118_v53  ;;  %v3120_v16 = vsel %vm3118_vm2, %v3106_v9, %v3119_v26  ;;  %v12896_v51 = vmul.f32 %v5456_v10, %v14118_v53  ;;  %v5606_v47 = vsel %vm5604_vm10, %v3106_v9, %v3119_v26  ;;  %v14133_v26 = vld [vmem:[#allocation14_spill] sm:$0xff] }
 0x5bd   :  { %vm14119_vm9 = vcmp.lt.s32.totalorder %v3116_v33, 2  ;;  %v5610_v55 = vsel %vm5603_vm3, %v5606_v47, %v5609_v17  ;;  %v2642_v40 = vadd.f32 -0.4999988, %v2641_v21  ;;  %v2646_v29 = vmul.f32 -0.00019511016, %v14109_v52  ;;  %v14134_v17 = vld [vmem:[#allocation58_spill] sm:$0xff] }
 0x5be   :  { %v3124_v54 = vsel %vm14119_vm9, %v3120_v16, %v3123_v45  ;;  %v12906_v43 = vsel %vm12867_vm6, %v14110_v62, %v14120_v39  ;;  %v14122_v1 = vxor.u32 2147483648, %v14121_v23  ;;  %vm14123_vm15 = vcmp.lt.s32.totalorder %v14114_v20, 0  ;;  %7231 = vmatpush.msrb.mxu0 %v12892_v2  ;;  %7337 = vmatpush.msrb.mxu2 %v12896_v51  ;;  %v14136_v16 = vld [vmem:[#allocation35_spill] sm:$0xff] }
 0x5bf   :  { %vm14124_vm1 = vweird.f32 %v14059_v42  ;;  %v2637_v5 = vsel %vm11234_vm0, 0, %v2635_v3  ;;  %v2647_v30 = vadd.f32 0.008332121, %v2646_v29  ;;  %v12928_v61 = vadd.f32 %v14128_v11, %v2088_v48 }
 0x5c0   :  { %v2479_v28 = vsel %vm14123_vm15, %v14122_v1, %v14121_v23  ;;  %v3125_v33 = vsel %vm14124_vm1, nan, %v3124_v54  ;;  %vm14125_vm12 = vmmov %vm14124_vm1  ;;  %v14129_v38 = vand.u32 2147483647, %v14114_v20  ;;  %v2643_v42 = vmul.f32 %v2642_v40, %v14109_v52 }
 0x5c1   :  { %v5611_v19 = vsel %vm14125_vm12, nan, %v5610_v55  ;;  %v12920_v9 = vmul.f32 %v3125_v33, %v14126_v24  ;;  %v2788_v57 = vsub.s32 4, %v14132_v8  ;;  %v12940_v44 = vmul.f32 %v12906_v43, %v12906_v43 }
 0x5c2   :  { %v12923_v49 = vmul.f32 %v5611_v19, %v14126_v24  ;;  %vm12932_vm5 = vcmp.le.f32.partialorder %v14129_v38, 0.7853982  ;;  %v2648_v3 = vmul.f32 %v2647_v30, %v14109_v52  ;;  %v2793_v45 = vmul.f32 -0.001358992, %v14133_v26 }
 0x5c3   :  { %7272 = vmatpush.msrb.mxu1 %v12920_v9  ;;  %v2800_v6 = vmul.f32 -0.00019511016, %v14133_v26  ;;  %v12950_v27 = vsel %vm12932_vm5, %v14114_v20, %v2479_v28  ;;  %v2654_v10 = vand.u32 3, %v2637_v5  ;;  %vm14135_vm0 = vcmp.lt.s32.totalorder %v14134_v17, 0  ;;  %v14138_v28 = vld [vmem:[#allocation49_spill] sm:$0xff] }
 0x5c4   :  { %7378 = vmatpush.msrb.mxu3 %v12923_v49  ;;  %v2789_v21 = vsel %vm14135_vm0, %v2788_v57, %v14132_v8  ;;  %v5136_v53 = vadd.s32 3, %v2637_v5  ;;  %v12956_v47 = vadd.f32 %v14136_v16, %v2088_v48  ;;  %v2649_v54 = vadd.f32 -0.16666654, %v2648_v3  ;;  %v14140_v3 = vld [vmem:[#allocation63_spill] sm:$0xff] }
 0x5c5   :  { %v2791_v40 = vsel %vm11301_vm11, 0, %v2789_v21  ;;  %v2794_v29 = vadd.f32 0.041655596, %v2793_v45  ;;  %v2644_v39 = vadd.f32 1.0, %v2643_v42  ;;  %v2801_v23 = vadd.f32 0.008332121, %v2800_v6 }
 0x5c6   :  { %v12960_v1 = vand.u32 3, %v2791_v40  ;;  %v2326_v33 = vsub.s32 4, %v14138_v28  ;;  %v12965_v19 = vmul.f32 %v12950_v27, %v12950_v27  ;;  %v2650_v24 = vmul.f32 %v2649_v54, %v14109_v52 }
 0x5c7   :  { %v2795_v48 = vmul.f32 %v2794_v29, %v14133_v26  ;;  %v2331_v63 = vmul.f32 -0.001358992, %v12940_v44  ;;  %vm2653_vm2 = vweird.f32 %v14116_v31  ;;  %vm2655_vm11 = vcmp.lt.s32.totalorder %v2654_v10, 2 }
 0x5c8   :  { %vm2656_vm3 = vcmp.eq.s32.totalorder %v2654_v10, 0  ;;  %v2802_v5 = vmul.f32 %v2801_v23, %v14133_v26  ;;  %v5137_v30 = vand.u32 3, %v5136_v53  ;;  %v2651_v11 = vadd.f32 1.0, %v2650_v24 }
 0x5c9   :  { %vm2659_vm10 = vcmp.eq.s32.totalorder %v2654_v10, 2  ;;  %v2796_v38 = vadd.f32 -0.4999988, %v2795_v48  ;;  %v5291_v42 = vadd.s32 3, %v2791_v40  ;;  %v2660_v8 = vxor.u32 2147483648, %v2644_v39 }
 0x5ca   :  { %v2803_v57 = vadd.f32 -0.16666654, %v2802_v5  ;;  %vm2813_vm4 = vcmp.eq.s32.totalorder %v12960_v1, 2  ;;  %vm14139_vm7 = vcmp.lt.s32.totalorder %v14110_v62, 0  ;;  %v2652_v45 = vmul.f32 %v2651_v11, %v14140_v3 }
 0x5cb   :  { %v2327_v52 = vsel %vm14139_vm7, %v2326_v33, %v14138_v28  ;;  %v2797_v6 = vmul.f32 %v2796_v38, %v14133_v26  ;;  %vm2810_vm14 = vcmp.eq.s32.totalorder %v12960_v1, 0  ;;  %v2332_v21 = vadd.f32 0.041655596, %v2331_v63  ;;  %v14141_v38 = vld [vmem:[#allocation13_spill] sm:$0xff] }
 0x5cc   :  { %v2338_v53 = vmul.f32 -0.00019511016, %v12940_v44  ;;  %v2804_v16 = vmul.f32 %v2803_v57, %v14133_v26  ;;  %vm2809_vm13 = vcmp.lt.s32.totalorder %v12960_v1, 2  ;;  %vm5138_vm8 = vcmp.lt.s32.totalorder %v5137_v30, 2 }
 0x5cd   :  { %vm5139_vm9 = vcmp.eq.s32.totalorder %v5137_v30, 0  ;;  %vm5142_vm15 = vcmp.eq.s32.totalorder %v5137_v30, 2  ;;  %v2657_v54 = vxor.u32 2147483648, %v2652_v45  ;;  %v2798_v55 = vadd.f32 1.0, %v2797_v6 }
 0x5ce   :  { %vm2807_vm1 = vweird.f32 %v14134_v17  ;;  %v5292_v40 = vand.u32 3, %v5291_v42  ;;  %v2329_v29 = vsel %vm12867_vm6, 0, %v2327_v52  ;;  %v2661_v23 = vsel %vm2659_vm10, %v2660_v8, %v2652_v45 }
 0x5cf   :  { %v2805_v28 = vadd.f32 1.0, %v2804_v16  ;;  %v2333_v33 = vmul.f32 %v2332_v21, %v12940_v44  ;;  %v2339_v24 = vadd.f32 0.008332121, %v2338_v53  ;;  %v2658_v26 = vsel %vm2656_vm3, %v2644_v39, %v2657_v54 }
 0x5d0   :  { %v2814_v48 = vxor.u32 2147483648, %v2798_v55  ;;  %v5141_v63 = vsel %vm5139_vm9, %v2644_v39, %v2657_v54  ;;  %v5144_v5 = vsel %vm5142_vm15, %v2660_v8, %v2652_v45  ;;  %v2662_v11 = vsel %vm2655_vm11, %v2658_v26, %v2661_v23  ;;  %v14142_v54 = vld [vmem:[#allocation50_spill] sm:$0xff] }
 0x5d1   :  { %v2806_v57 = vmul.f32 %v2805_v28, %v14141_v38  ;;  %v5145_v42 = vsel %vm5138_vm8, %v5141_v63, %v5144_v5  ;;  %v2334_v3 = vadd.f32 -0.4999988, %v2333_v33  ;;  %v2663_v56 = vsel %vm2653_vm2, nan, %v2662_v11 }
 0x5d2   :  { %v5146_v52 = vsel %vm2653_vm2, nan, %v5145_v42  ;;  %vm5293_vm6 = vcmp.lt.s32.totalorder %v5292_v40, 2  ;;  %v2340_v6 = vmul.f32 %v2339_v24, %v12940_v44  ;;  %v12997_v21 = vmul.f32 %v2663_v56, %v12928_v61 }
 0x5d3   :  { %v2811_v39 = vxor.u32 2147483648, %v2806_v57  ;;  %v13000_v10 = vmul.f32 %v5146_v52, %v12928_v61  ;;  %vm5294_vm12 = vcmp.eq.s32.totalorder %v5292_v40, 0  ;;  %v2815_v30 = vsel %vm2813_vm4, %v2814_v48, %v2806_v57  ;;  %v2083_v52 = vpop.permute.xlu2 %2082 }
 0x5d4   :  { %vm5297_vm0 = vcmp.eq.s32.totalorder %v5292_v40, 2  ;;  %v2335_v8 = vmul.f32 %v2334_v3, %v12940_v44  ;;  %v2341_v45 = vadd.f32 -0.16666654, %v2340_v6  ;;  %7232 = vmatpush.msrb.mxu0 %v12997_v21  ;;  %v2480_v61 = vsub.s32 4, %v14142_v54 }
 0x5d5   :  { %v2812_v31 = vsel %vm2810_vm14, %v2798_v55, %v2811_v39  ;;  %7338 = vmatpush.msrb.mxu2 %v13000_v10  ;;  %v5296_v53 = vsel %vm5294_vm12, %v2798_v55, %v2811_v39  ;;  %v5299_v16 = vsel %vm5297_vm0, %v2814_v48, %v2806_v57  ;;  %v2485_v5 = vmul.f32 -0.001358992, %v12965_v19 }
 0x5d6   :  { %v2816_v23 = vsel %vm2809_vm13, %v2812_v31, %v2815_v30  ;;  %v5300_v28 = vsel %vm5293_vm6, %v5296_v53, %v5299_v16  ;;  %v2336_v33 = vadd.f32 1.0, %v2335_v8  ;;  %v2342_v24 = vmul.f32 %v2341_v45, %v12940_v44  ;;  %v14144_v8 = vld [vmem:[#allocation48_spill] sm:$0xff] }
 0x5d7   :  { %v2817_v26 = vsel %vm2807_vm1, nan, %v2816_v23  ;;  %v5301_v63 = vsel %vm2807_vm1, nan, %v5300_v28  ;;  %v2346_v40 = vand.u32 3, %v2329_v29  ;;  %v2486_v11 = vadd.f32 0.041655596, %v2485_v5  ;;  %v13047_v5 = vld [vmem:[%s13411_s11] sm:$0xff] }
 0x5d8   :  { %v13020_v55 = vmul.f32 %v2817_v26, %v12956_v47  ;;  %v13023_v48 = vmul.f32 %v5301_v63, %v12956_v47  ;;  %v2343_v1 = vadd.f32 1.0, %v2342_v24  ;;  %v2492_v38 = vmul.f32 -0.00019511016, %v12965_v19 }
 0x5d9   :  { %v2352_v17 = vxor.u32 2147483648, %v2336_v33  ;;  %vm14143_vm2 = vcmp.lt.s32.totalorder %v14114_v20, 0  ;;  %v4826_v42 = vadd.s32 3, %v2329_v29  ;;  %v2487_v47 = vmul.f32 %v2486_v11, %v12965_v19 }
 0x5da   :  { %7273 = vmatpush.msrb.mxu1 %v13020_v55  ;;  %7379 = vmatpush.msrb.mxu3 %v13023_v48  ;;  %v2344_v44 = vmul.f32 %v2343_v1, %v12906_v43  ;;  %v2481_v57 = vsel %vm14143_vm2, %v2480_v61, %v14142_v54  ;;  %v2493_v3 = vadd.f32 0.008332121, %v2492_v38  ;;  %vm2348_vm11 = vcmp.eq.s32.totalorder %v2346_v40, 0 }
 0x5db   :  { %vm2351_vm3 = vcmp.eq.s32.totalorder %v2346_v40, 2  ;;  %v2483_v6 = vsel %vm12932_vm5, 0, %v2481_v57  ;;  %v2488_v39 = vadd.f32 -0.4999988, %v2487_v47  ;;  %v4827_v43 = vand.u32 3, %v4826_v42  ;;  %v14147_v47 = vld [vmem:[#allocation47_spill] sm:$0xff] }
 0x5dc   :  { %v2349_v56 = vxor.u32 2147483648, %v2344_v44  ;;  %v2494_v30 = vmul.f32 %v2493_v3, %v12965_v19  ;;  %v2138_v45 = vadd.f32 %v14144_v8, %v2083_v52  ;;  %vm2347_vm10 = vcmp.lt.s32.totalorder %v2346_v40, 2 }
 0x5dd   :  { %v2353_v53 = vsel %vm2351_vm3, %v2352_v17, %v2344_v44  ;;  %vm2345_vm4 = vweird.f32 %v14110_v62  ;;  %v2489_v16 = vmul.f32 %v2488_v39, %v12965_v19  ;;  %vm4829_vm7 = vcmp.eq.s32.totalorder %v4827_v43, 0 }
 0x5de   :  { %v2350_v31 = vsel %vm2348_vm11, %v2336_v33, %v2349_v56  ;;  %v2495_v54 = vadd.f32 -0.16666654, %v2494_v30  ;;  %vm4832_vm5 = vcmp.eq.s32.totalorder %v4827_v43, 2  ;;  %v4981_v0 = vadd.s32 3, %v2483_v6 }
 0x5df   :  { %v2354_v29 = vsel %vm2347_vm10, %v2350_v31, %v2353_v53  ;;  %v2490_v28 = vadd.f32 1.0, %v2489_v16  ;;  %v4831_v26 = vsel %vm4829_vm7, %v2336_v33, %v2349_v56  ;;  %vm4828_vm14 = vcmp.lt.s32.totalorder %v4827_v43, 2 }
 0x5e0   :  { %v2355_v61 = vsel %vm2345_vm4, nan, %v2354_v29  ;;  %v2496_v24 = vmul.f32 %v2495_v54, %v12965_v19  ;;  %v4834_v63 = vsel %vm4832_vm5, %v2352_v17, %v2344_v44  ;;  %v2500_v40 = vand.u32 3, %v2483_v6  ;;  %v13060_v17 = vld [vmem:[%s13412_s12] sm:$0xff] }
 0x5e1   :  { %v13041_v23 = vmul.f32 %v2355_v61, %v2138_v45  ;;  %v4835_v11 = vsel %vm4828_vm14, %v4831_v26, %v4834_v63  ;;  %v4982_v57 = vand.u32 3, %v4981_v0  ;;  %v2506_v33 = vxor.u32 2147483648, %v2490_v28 }
 0x5e2   :  { %v2497_v1 = vadd.f32 1.0, %v2496_v24  ;;  %v4836_v38 = vsel %vm2345_vm4, nan, %v4835_v11  ;;  %vm14145_vm13 = vcmask 523264   ;;  %vm2501_vm8 = vcmp.lt.s32.totalorder %v2500_v40, 2 }
 0x5e3   :  { %7233 = vmatpush.msrb.mxu0 %v13041_v23  ;;  %v7162_v44 = vmul.f32 %v4836_v38, %v2138_v45  ;;  %vm2502_vm9 = vcmp.eq.s32.totalorder %v2500_v40, 0  ;;  %vm2505_vm15 = vcmp.eq.s32.totalorder %v2500_v40, 2  ;;  %vm4983_vm1 = vcmp.lt.s32.totalorder %v4982_v57, 2  ;;  %vm14146_vm0 = vmmov %vm14145_vm13 }
 0x5e4   :  { %v2498_v19 = vmul.f32 %v2497_v1, %v12950_v27  ;;  %8052 = vmatmul.msk.f32.vlgmr.msrb.gmra.mxu0 %vm14145_vm13, %v13047_v5  ;;  %vm4984_vm6 = vcmp.eq.s32.totalorder %v4982_v57, 0  ;;  %vm4987_vm12 = vcmp.eq.s32.totalorder %v4982_v57, 2  ;;  %v2179_v3 = vadd.f32 %v14147_v47, %v2083_v52  ;;  %vm14148_vm11 = vmmov %vm14146_vm0 }
 0x5e5   :  { %7430 = vmatpush.msra.mxu0 %v12485_v36  ;;  %7339 = vmatpush.msrb.mxu2 %v7162_v44  ;;  %vm2499_vm2 = vweird.f32 %v14114_v20  ;;  %vm14149_vm3 = vmmov %vm14146_vm0 }
 0x5e6   :  { %v2503_v62 = vxor.u32 2147483648, %v2498_v19  ;;  %v2507_v27 = vsel %vm2505_vm15, %v2506_v33, %v2498_v19  ;;  %v4989_v42 = vsel %vm4987_vm12, %v2506_v33, %v2498_v19  ;;  %8068 = vmatmul.msk.f32.vlgmr.msrb.gmra.mxu2 %vm14146_vm0, %v13060_v17  ;;  %vm14150_vm10 = vmmov %vm14146_vm0 }
 0x5e7   :  { %7431 = vmatpush.msra.mxu0 %v12527_v32  ;;  %7512 = vmatpush.msra.mxu2 %v12479_v7  ;;  %v13074_v7 = vld [vmem:[%s13411_s11 + $0x8] sm:$0xff]  ;;  %vm14151_vm4 = vmmov %vm14146_vm0 }
 0x5e8   :  { %v2504_v36 = vsel %vm2502_vm9, %v2490_v28, %v2503_v62  ;;  %v4986_v32 = vsel %vm4984_vm6, %v2490_v28, %v2503_v62  ;;  %vm14152_vm7 = vmmov %vm14146_vm0 }
 0x5e9   :  { %7432 = vmatpush.msra.mxu0 %v12650_v35  ;;  %v2508_v56 = vsel %vm2501_vm8, %v2504_v36, %v2507_v27  ;;  %v4990_v6 = vsel %vm4983_vm1, %v4986_v32, %v4989_v42  ;;  %7513 = vmatpush.msra.mxu2 %v12508_v25  ;;  %v7187_v25 = vld [vmem:[%s13412_s12 + $0x8] sm:$0xff]  ;;  %vm14153_vm5 = vmmov %vm14146_vm0 }
 0x5ea   :  { %v2509_v35 = vsel %vm2499_vm2, nan, %v2508_v56  ;;  %v4991_v39 = vsel %vm2499_vm2, nan, %v4990_v6  ;;  %vm14154_vm14 = vmmov %vm14146_vm0 }
 0x5eb   :  { %7433 = vmatpush.msra.mxu0 %v12756_v14  ;;  %v4667_v30 = vmul.f32 %v2509_v35, %v2179_v3  ;;  %v7163_v43 = vmul.f32 %v4991_v39, %v2179_v3  ;;  %7514 = vmatpush.msra.mxu2 %v12598_v41  ;;  %v7181_v41 = vld [vmem:[%s13411_s11 + $0x18] sm:$0xff]  ;;  %vm14155_vm13 = vmmov %vm14146_vm0  ;;  %v7184_v14 = vld [vmem:[%s13411_s11 + $0x30] sm:$0xff] }
 0x5ec   :  { %8053 = vmatmul.msk.f32.gmra.mxu0 %vm14148_vm11, %v13074_v7  ;;  %vm14156_vm8 = vmmov %vm14146_vm0 }
 0x5ed   :  { %7434 = vmatpush.msra.mxu0 %v12818_v60  ;;  %7274 = vmatpush.msrb.mxu1 %v4667_v30  ;;  %vm14157_vm9 = vmmov %vm14146_vm0 }
 0x5ee   :  { %7380 = vmatpush.msrb.mxu3 %v7163_v43  ;;  %7515 = vmatpush.msra.mxu2 %v12753_v58  ;;  %vm14158_vm15 = vmmov %vm14146_vm0  ;;  %v7191_v58 = vld [vmem:[%s13412_s12 + $0x28] sm:$0xff] }
 0x5ef   :  { %7471 = vmatpush.msra.mxu1 %v12627_v46  ;;  %7435 = vmatpush.msra.mxu0 %v12896_v51  ;;  %v7182_v46 = vld [vmem:[%s13411_s11 + $0x20] sm:$0xff]  ;;  %vm14159_vm1 = vmmov %vm14146_vm0 }
 0x5f0   :  { %7553 = vmatpush.msra.mxu3 %v12624_v50  ;;  %7516 = vmatpush.msra.mxu2 %v12815_v37  ;;  %v7189_v50 = vld [vmem:[%s13412_s12 + $0x18] sm:$0xff]  ;;  %vm14160_vm6 = vmmov %vm14146_vm0 }
 0x5f1   :  { %7472 = vmatpush.msra.mxu1 %v12569_v4  ;;  %7436 = vmatpush.msra.mxu0 %v13000_v10  ;;  %v7188_v4 = vld [vmem:[%s13412_s12 + $0x10] sm:$0xff]  ;;  %vm14161_vm12 = vmmov %vm14146_vm0  ;;  %v7193_v37 = vld [vmem:[%s13412_s12 + $0x38] sm:$0xff] }
 0x5f2   :  { %7554 = vmatpush.msra.mxu3 %v12564_v18  ;;  %7517 = vmatpush.msra.mxu2 %v12892_v2  ;;  %v7180_v18 = vld [vmem:[%s13411_s11 + $0x10] sm:$0xff]  ;;  %vm14162_vm2 = vmmov %vm14146_vm0 }
 0x5f3   :  { %7473 = vmatpush.msra.mxu1 %v12674_v59  ;;  %8076 = vmatmul.msk.f32.vlgmr.msrb.gmra.mxu3 %vm14149_vm3, %v13060_v17  ;;  %v7183_v59 = vld [vmem:[%s13411_s11 + $0x28] sm:$0xff]  ;;  %vm14163_vm11 = vmmov %vm14146_vm0 }
 0x5f4   :  { %7555 = vmatpush.msra.mxu3 %v12670_v15  ;;  %7518 = vmatpush.msra.mxu2 %v12997_v21  ;;  %v7190_v15 = vld [vmem:[%s13412_s12 + $0x20] sm:$0xff]  ;;  %vm14164_vm3 = vmmov %vm14146_vm0 }
 0x5f5   :  { %7474 = vmatpush.msra.mxu1 %v12789_v22  ;;  %7437 = vmatpush.msra.mxu0 %v7162_v44  ;;  %v7185_v22 = vld [vmem:[%s13411_s11 + $0x38] sm:$0xff]  ;;  %s8260_s11 = smov [#allocation2]  }
 0x5f6   :  { %7556 = vmatpush.msra.mxu3 %v12786_v13  ;;  %7519 = vmatpush.msra.mxu2 %v13041_v23  ;;  %v7192_v13 = vld [vmem:[%s13412_s12 + $0x30] sm:$0xff]  ;;  %s7846_s12 = sshll.u32 %s8260_s11, 4  ;;  %s7847_s12 = int_to_ptr.vmem [resolvable:$true] %s7846_s12 }
 0x5f7   :  { %7475 = vmatpush.msra.mxu1 %v12854_v34  ;;  %8069 = vmatmul.msk.f32.gmra.mxu2 %vm14151_vm4, %v7187_v25  ;;  %vm14166_vm4 = vmmov %vm14146_vm0 }
 0x5f8   :  { %7557 = vmatpush.msra.mxu3 %v12851_v12  ;;  %8060 = vmatmul.msk.f32.vlgmr.msrb.gmra.mxu1 %vm14150_vm10, %v13047_v5  ;;  %vm14165_vm10 = vmmov %vm14146_vm0 }
 0x5f9   :  { %7476 = vmatpush.msra.mxu1 %v12923_v49  ;;  %8054 = vmatmul.msk.f32.gmra.mxu0 %vm14152_vm7, %v7180_v18  ;;  %vm14167_vm7 = vmmov %vm14146_vm0 }
 0x5fa   :  { %7558 = vmatpush.msra.mxu3 %v12920_v9 }
 0x5fb   :  { %7477 = vmatpush.msra.mxu1 %v13023_v48  ;;  %8077 = vmatmul.msk.f32.gmra.mxu3 %vm14153_vm5, %v7187_v25  ;;  %vm14168_vm5 = vmmov %vm14146_vm0 }
 0x5fc   :  { %7559 = vmatpush.msra.mxu3 %v13020_v55 }
 0x5fd   :  { %7478 = vmatpush.msra.mxu1 %v7163_v43 }
 0x5fe   :  { %7560 = vmatpush.msra.mxu3 %v4667_v30 }
 0x5ff   :  { %8070 = vmatmul.msk.f32.gmra.mxu2 %vm14155_vm13, %v7188_v4  ;;  %vm14170_vm13 = vmmov %vm14146_vm0 }
 0x600   :  { %8061 = vmatmul.msk.f32.gmra.mxu1 %vm14154_vm14, %v13074_v7  ;;  %vm14169_vm14 = vmmov %vm14146_vm0 }
 0x601   :  { %8055 = vmatmul.msk.f32.gmra.mxu0 %vm14156_vm8, %v7181_v41  ;;  %vm14171_vm8 = vmmov %vm14146_vm0 }
 0x603   :  { %8078 = vmatmul.msk.f32.gmra.mxu3 %vm14157_vm9, %v7188_v4  ;;  %vm14172_vm9 = vmmov %vm14146_vm0 }
 0x607   :  { %8071 = vmatmul.msk.f32.gmra.mxu2 %vm14159_vm1, %v7189_v50  ;;  %vm14174_vm1 = vmmov %vm14146_vm0 }
 0x608   :  { %8062 = vmatmul.msk.f32.gmra.mxu1 %vm14158_vm15, %v7180_v18  ;;  %vm14173_vm15 = vmmov %vm14146_vm0 }
 0x609   :  { %8056 = vmatmul.msk.f32.gmra.mxu0 %vm14160_vm6, %v7182_v46  ;;  %vm14175_vm6 = vmmov %vm14146_vm0 }
 0x60b   :  { %8079 = vmatmul.msk.f32.gmra.mxu3 %vm14161_vm12, %v7189_v50  ;;  %vm14176_vm12 = vmmov %vm14146_vm0 }
 0x60f   :  { %8072 = vmatmul.msk.f32.gmra.mxu2 %vm14162_vm2, %v7190_v15  ;;  %vm14177_vm2 = vmmov %vm14146_vm0 }
 0x610   :  { %8063 = vmatmul.msk.f32.gmra.mxu1 %vm14146_vm0, %v7181_v41 }
 0x611   :  { %8057 = vmatmul.msk.f32.gmra.mxu0 %vm14163_vm11, %v7183_v59  ;;  %vm14178_vm11 = vmmov %vm14146_vm0 }
 0x613   :  { %8080 = vmatmul.msk.f32.gmra.mxu3 %vm14164_vm3, %v7190_v15  ;;  %vm14179_vm3 = vmmov %vm14146_vm0 }
 0x617   :  { %8073 = vmatmul.msk.f32.gmra.mxu2 %vm14166_vm4, %v7191_v58  ;;  %vm14181_vm4 = vmmov %vm14146_vm0 }
 0x618   :  { %8064 = vmatmul.msk.f32.gmra.mxu1 %vm14165_vm10, %v7182_v46  ;;  %vm14180_vm10 = vmmov %vm14146_vm0 }
 0x619   :  { %8058 = vmatmul.msk.f32.gmra.mxu0 %vm14167_vm7, %v7184_v14  ;;  %vm14182_vm7 = vmmov %vm14146_vm0 }
 0x61b   :  { %8081 = vmatmul.msk.f32.gmra.mxu3 %vm14168_vm5, %v7191_v58  ;;  %vm14183_vm5 = vmmov %vm14146_vm0 }
 0x61f   :  { %8074 = vmatmul.msk.f32.gmra.mxu2 %vm14170_vm13, %v7192_v13  ;;  %vm14185_vm13 = vmmov %vm14146_vm0 }
 0x620   :  { %8065 = vmatmul.msk.f32.gmra.mxu1 %vm14169_vm14, %v7183_v59  ;;  %vm14184_vm14 = vmmov %vm14146_vm0 }
 0x621   :  { %8059 = vmatmul.msk.f32.gmra.mxu0 %vm14171_vm8, %v7185_v22  ;;  %vm14186_vm8 = vmmov %vm14146_vm0 }
 0x623   :  { %8082 = vmatmul.msk.f32.gmra.mxu3 %vm14172_vm9, %v7192_v13  ;;  %vm14187_vm9 = vmmov %vm14146_vm0 }
 0x627   :  { %8075 = vmatmul.msk.f32.gmra.mxu2 %vm14174_vm1, %v7193_v37  ;;  %vm14189_vm1 = vmmov %vm14146_vm0 }
 0x628   :  { %8066 = vmatmul.msk.f32.gmra.mxu1 %vm14173_vm15, %v7184_v14  ;;  %vm14188_vm15 = vmmov %vm14146_vm0 }
 0x629   :  { %8084 = vmatmul.msk.f32.vlgmr.msra.gmra.mxu0 %vm14175_vm6, %v13047_v5  ;;  %vm14190_vm6 = vmmov %vm14146_vm0 }
 0x62b   :  { %8083 = vmatmul.msk.f32.gmra.mxu3 %vm14176_vm12, %v7193_v37  ;;  %vm14191_vm12 = vmmov %vm14146_vm0 }
 0x62f   :  { %8100 = vmatmul.msk.f32.vlgmr.msra.gmra.mxu2 %vm14177_vm2, %v13060_v17  ;;  %vm14192_vm2 = vmmov %vm14146_vm0 }
 0x630   :  { %8067 = vmatmul.msk.f32.gmra.mxu1 %vm14146_vm0, %v7185_v22 }
 0x631   :  { %8085 = vmatmul.msk.f32.gmra.mxu0 %vm14178_vm11, %v13074_v7  ;;  %vm14193_vm11 = vmmov %vm14146_vm0 }
 0x633   :  { %8108 = vmatmul.msk.f32.vlgmr.msra.gmra.mxu3 %vm14179_vm3, %v13060_v17  ;;  %vm14194_vm3 = vmmov %vm14146_vm0 }
 0x637   :  { %8101 = vmatmul.msk.f32.gmra.mxu2 %vm14181_vm4, %v7187_v25  ;;  %vm14196_vm4 = vmmov %vm14146_vm0 }
 0x638   :  { %8092 = vmatmul.msk.f32.vlgmr.msra.gmra.mxu1 %vm14180_vm10, %v13047_v5  ;;  %vm14195_vm10 = vmmov %vm14146_vm0 }
 0x639   :  { %8086 = vmatmul.msk.f32.gmra.mxu0 %vm14182_vm7, %v7180_v18  ;;  %vm14197_vm7 = vmmov %vm14146_vm0 }
 0x63b   :  { %8109 = vmatmul.msk.f32.gmra.mxu3 %vm14183_vm5, %v7187_v25  ;;  %vm14198_vm5 = vmmov %vm14146_vm0 }
 0x63f   :  { %8102 = vmatmul.msk.f32.gmra.mxu2 %vm14185_vm13, %v7188_v4  ;;  %vm14200_vm13 = vmmov %vm14146_vm0 }
 0x640   :  { %8093 = vmatmul.msk.f32.gmra.mxu1 %vm14184_vm14, %v13074_v7  ;;  %vm14199_vm14 = vmmov %vm14146_vm0 }
 0x641   :  { %8087 = vmatmul.msk.f32.gmra.mxu0 %vm14186_vm8, %v7181_v41  ;;  %vm14201_vm8 = vmmov %vm14146_vm0 }
 0x643   :  { %8110 = vmatmul.msk.f32.gmra.mxu3 %vm14187_vm9, %v7188_v4  ;;  %vm14202_vm9 = vmmov %vm14146_vm0 }
 0x647   :  { %8103 = vmatmul.msk.f32.gmra.mxu2 %vm14189_vm1, %v7189_v50  ;;  %vm14204_vm1 = vmmov %vm14146_vm0 }
 0x648   :  { %8094 = vmatmul.msk.f32.gmra.mxu1 %vm14188_vm15, %v7180_v18  ;;  %vm14203_vm15 = vmmov %vm14146_vm0 }
 0x649   :  { %8088 = vmatmul.msk.f32.gmra.mxu0 %vm14190_vm6, %v7182_v46  ;;  %vm14205_vm6 = vmmov %vm14146_vm0 }
 0x64b   :  { %8111 = vmatmul.msk.f32.gmra.mxu3 %vm14191_vm12, %v7189_v50  ;;  %vm14206_vm12 = vmmov %vm14146_vm0 }
 0x64f   :  { %8104 = vmatmul.msk.f32.gmra.mxu2 %vm14192_vm2, %v7190_v15 }
 0x650   :  { %8095 = vmatmul.msk.f32.gmra.mxu1 %vm14146_vm0, %v7181_v41 }
 0x651   :  { %8089 = vmatmul.msk.f32.gmra.mxu0 %vm14193_vm11, %v7183_v59 }
 0x653   :  { %8112 = vmatmul.msk.f32.gmra.mxu3 %vm14194_vm3, %v7190_v15 }
 0x657   :  { %8105 = vmatmul.msk.f32.gmra.mxu2 %vm14196_vm4, %v7191_v58 }
 0x658   :  { %8096 = vmatmul.msk.f32.gmra.mxu1 %vm14195_vm10, %v7182_v46 }
 0x659   :  { %8090 = vmatmul.msk.f32.gmra.mxu0 %vm14197_vm7, %v7184_v14 }
 0x65b   :  { %8113 = vmatmul.msk.f32.gmra.mxu3 %vm14198_vm5, %v7191_v58 }
 0x65f   :  { %8106 = vmatmul.msk.f32.gmra.mxu2 %vm14200_vm13, %v7192_v13 }
 0x660   :  { %8097 = vmatmul.msk.f32.gmra.mxu1 %vm14199_vm14, %v7183_v59 }
 0x661   :  { %8091 = vmatmul.msk.f32.gmra.mxu0 %vm14201_vm8, %v7185_v22  ;;  %v7235_v60 = vpop.f32.mrf.mxu0 }
 0x663   :  { %8114 = vmatmul.msk.f32.gmra.mxu3 %vm14202_vm9, %v7192_v13 }
 0x667   :  { %8107 = vmatmul.msk.f32.gmra.mxu2 %vm14204_vm1, %v7193_v37 }
 0x668   :  { %8098 = vmatmul.msk.f32.gmra.mxu1 %vm14203_vm15, %v7184_v14 }
 0x669   :  { %v7341_v12 = vpop.f32.mrf.mxu2  ;;  %v7238_v20 = vpop.f32.mrf.mxu0 }
 0x66a   :  { %v7406_v34 = vsub.f32 %v7235_v60, %v7341_v12 }
 0x66b   :  { %8115 = vmatmul.msk.f32.gmra.mxu3 %vm14205_vm6, %v7193_v37 }
 0x66c   :  { %v7586_v41 = vmul.f32 %v7406_v34, %v7406_v34 }
 0x670   :  { %8099 = vmatmul.msk.f32.gmra.mxu1 %vm14206_vm12, %v7185_v22 }
 0x675   :  { %v7276_v2 = vpop.f32.mrf.mxu1 }
 0x676   :  { %v7382_v51 = vpop.f32.mrf.mxu3  ;;  %v7241_v9 = vpop.f32.mrf.mxu0 }
 0x677   :  { %v7407_v49 = vsub.f32 %v7276_v2, %v7382_v51 }
 0x679   :  { %v7587_v58 = vmul.f32 %v7407_v49, %v7407_v49 }
 0x67a   :  { %v7344_v10 = vpop.f32.mrf.mxu2 }
 0x67b   :  { %v7408_v55 = vsub.f32 %v7238_v20, %v7344_v10 }
 0x67d   :  { %v7279_v21 = vpop.f32.mrf.mxu1  ;;  %v7588_v20 = vmul.f32 %v7408_v55, %v7408_v55 }
 0x67e   :  { %v7385_v48 = vpop.f32.mrf.mxu3  ;;  %v7244_v52 = vpop.f32.mrf.mxu0 }
 0x67f   :  { %v7409_v8 = vsub.f32 %v7279_v21, %v7385_v48 }
 0x681   :  { %v7589_v10 = vmul.f32 %v7409_v8, %v7409_v8 }
 0x682   :  { %v7347_v31 = vpop.f32.mrf.mxu2 }
 0x683   :  { %v13210_v53 = vsub.f32 %v7241_v9, %v7347_v31 }
 0x685   :  { %v7282_v45 = vpop.f32.mrf.mxu1  ;;  %v7590_v8 = vmul.f32 %v13210_v53, %v13210_v53 }
 0x686   :  { %v7388_v29 = vpop.f32.mrf.mxu3  ;;  %v7247_v16 = vpop.f32.mrf.mxu0 }
 0x687   :  { %v13212_v54 = vsub.f32 %v7282_v45, %v7388_v29 }
 0x68a   :  { %v7350_v0 = vpop.f32.mrf.mxu2 }
 0x68b   :  { %v13214_v23 = vsub.f32 %v7244_v52, %v7350_v0 }
 0x68d   :  { %v7285_v61 = vpop.f32.mrf.mxu1 }
 0x68e   :  { %v7391_v28 = vpop.f32.mrf.mxu3  ;;  %v7250_v24 = vpop.f32.mrf.mxu0 }
 0x68f   :  { %v13216_v26 = vsub.f32 %v7285_v61, %v7391_v28 }
 0x692   :  { %v7353_v5 = vpop.f32.mrf.mxu2 }
 0x693   :  { %v13218_v1 = vsub.f32 %v7247_v16, %v7353_v5 }
 0x695   :  { %v7288_v63 = vpop.f32.mrf.mxu1 }
 0x696   :  { %v7394_v40 = vpop.f32.mrf.mxu3  ;;  %v7253_v11 = vpop.f32.mrf.mxu0 }
 0x697   :  { %v13220_v38 = vsub.f32 %v7288_v63, %v7394_v40 }
 0x69a   :  { %v7356_v19 = vpop.f32.mrf.mxu2 }
 0x69b   :  { %v13222_v33 = vsub.f32 %v7250_v24, %v7356_v19 }
 0x69d   :  { %v7291_v57 = vpop.f32.mrf.mxu1 }
 0x69e   :  { %v7397_v44 = vpop.f32.mrf.mxu3  ;;  %v7256_v62 = vpop.f32.mrf.mxu0 }
 0x69f   :  { %v13224_v17 = vsub.f32 %v7291_v57, %v7397_v44 }
 0x6a2   :  { %v7359_v27 = vpop.f32.mrf.mxu2 }
 0x6a3   :  { %v13226_v32 = vsub.f32 %v7253_v11, %v7359_v27 }
 0x6a5   :  { %v7294_v36 = vpop.f32.mrf.mxu1 }
 0x6a6   :  { %v7400_v42 = vpop.f32.mrf.mxu3  ;;  %v7439_v3 = vpop.f32.mrf.mxu0 }
 0x6a7   :  { %v13228_v47 = vsub.f32 %v7294_v36, %v7400_v42  ;;  %v7592_v42 = vmul.f32 %v13214_v23, %v13214_v23 }
 0x6aa   :  { %v7362_v6 = vpop.f32.mrf.mxu2 }
 0x6ab   :  { %v13230_v7 = vsub.f32 %v7256_v62, %v7362_v6  ;;  %v7591_v62 = vmul.f32 %v13212_v54, %v13212_v54 }
 0x6ad   :  { %v7297_v56 = vpop.f32.mrf.mxu1 }
 0x6ae   :  { %v7403_v35 = vpop.f32.mrf.mxu3  ;;  %v7442_v30 = vpop.f32.mrf.mxu0 }
 0x6af   :  { %v13232_v39 = vsub.f32 %v7297_v56, %v7403_v35 }
 0x6b2   :  { %v7521_v25 = vpop.f32.mrf.mxu2 }
 0x6b3   :  { %v7522_v18 = vadd.f32 %v7521_v25, %v7439_v3 }
 0x6b5   :  { %v7480_v43 = vpop.f32.mrf.mxu1  ;;  %v7602_v50 = vmul.f32 %v7522_v18, %v7522_v18 }
 0x6b6   :  { %v7562_v4 = vpop.f32.mrf.mxu3  ;;  %v7445_v14 = vpop.f32.mrf.mxu0 }
 0x6b7   :  { %v7563_v46 = vadd.f32 %v7562_v4, %v7480_v43  ;;  %v13234_v15 = vadd.f32 %v7602_v50, %v7586_v41 }
 0x6b9   :  { %v7603_v59 = vmul.f32 %v7563_v46, %v7563_v46  ;;  %8194 = vrsqrt.f32 %v13234_v15  ;;  %vm7641_vm0 = vcmp.eq.f32.partialorder %v13234_v15, inf  ;;  %v7644_v54 = vand.u32 2147483648, %v13234_v15 }
 0x6ba   :  { %v7524_v37 = vpop.f32.mrf.mxu2  ;;  %vm7643_vm2 = vcmp.eq.f32.partialorder %v13234_v15, 0.0 }
 0x6bb   :  { %v13237_v13 = vadd.f32 %v7603_v59, %v7587_v58  ;;  %v7525_v60 = vadd.f32 %v7524_v37, %v7442_v30 }
 0x6bd   :  { %v7483_v22 = vpop.f32.mrf.mxu1  ;;  %8196 = vrsqrt.f32 %v13237_v13  ;;  %v7604_v2 = vmul.f32 %v7525_v60, %v7525_v60  ;;  %vm7653_vm11 = vcmp.eq.f32.partialorder %v13237_v13, inf  ;;  %vm7655_vm3 = vcmp.eq.f32.partialorder %v13237_v13, 0.0 }
 0x6be   :  { %v7565_v12 = vpop.f32.mrf.mxu3  ;;  %v7448_v48 = vpop.f32.mrf.mxu0 }
 0x6bf   :  { %v7566_v34 = vadd.f32 %v7565_v12, %v7483_v22  ;;  %v8195_v51 = vpop.eup %8194  ;;  %v13240_v9 = vadd.f32 %v7604_v2, %v7588_v20  ;;  %v7656_v22 = vand.u32 2147483648, %v13237_v13 }
 0x6c0   :  { %v7635_v49 = vmul.f32 %v8195_v51, %v13234_v15 }
 0x6c1   :  { %v7605_v21 = vmul.f32 %v7566_v34, %v7566_v34  ;;  %8198 = vrsqrt.f32 %v13240_v9  ;;  %vm7665_vm10 = vcmp.eq.f32.partialorder %v13240_v9, inf  ;;  %vm7667_vm4 = vcmp.eq.f32.partialorder %v13240_v9, 0.0 }
 0x6c2   :  { %v7636_v45 = vmul.f32 %v8195_v51, %v7635_v49  ;;  %v7527_v16 = vpop.f32.mrf.mxu2  ;;  %v7593_v49 = vmul.f32 %v13216_v26, %v13216_v26  ;;  %v7668_v26 = vand.u32 2147483648, %v13240_v9 }
 0x6c3   :  { %v8197_v52 = vpop.eup %8196  ;;  %v13244_v31 = vadd.f32 %v7605_v21, %v7589_v10  ;;  %v7528_v61 = vadd.f32 %v7527_v16, %v7445_v14 }
 0x6c4   :  { %v7647_v55 = vmul.f32 %v8197_v52, %v13237_v13  ;;  %v7637_v0 = vmul.f32 0.5, %v7636_v45 }
 0x6c5   :  { %v7486_v29 = vpop.f32.mrf.mxu1  ;;  %8200 = vrsqrt.f32 %v13244_v31  ;;  %v7606_v63 = vmul.f32 %v7528_v61, %v7528_v61  ;;  %vm7677_vm7 = vcmp.eq.f32.partialorder %v13244_v31, inf  ;;  %vm7679_vm5 = vcmp.eq.f32.partialorder %v13244_v31, 0.0 }
 0x6c6   :  { %v7568_v28 = vpop.f32.mrf.mxu3  ;;  %v7648_v24 = vmul.f32 %v8197_v52, %v7647_v55  ;;  %v7638_v40 = vsub.f32 1.5, %v7637_v0  ;;  %v7451_v23 = vpop.f32.mrf.mxu0 }
 0x6c7   :  { %v7569_v5 = vadd.f32 %v7568_v28, %v7486_v29  ;;  %v8199_v11 = vpop.eup %8198  ;;  %v13250_v19 = vadd.f32 %v7606_v63, %v7590_v8 }
 0x6c8   :  { %v7649_v57 = vmul.f32 0.5, %v7648_v24  ;;  %v7639_v36 = vmul.f32 %v8195_v51, %v7638_v40  ;;  %v7659_v27 = vmul.f32 %v8199_v11, %v13240_v9 }
 0x6c9   :  { %v7607_v44 = vmul.f32 %v7569_v5, %v7569_v5  ;;  %8202 = vrsqrt.f32 %v13250_v19  ;;  %vm7689_vm14 = vcmp.eq.f32.partialorder %v13250_v19, inf  ;;  %vm7691_vm13 = vcmp.eq.f32.partialorder %v13250_v19, 0.0 }
 0x6ca   :  { %v7650_v3 = vsub.f32 1.5, %v7649_v57  ;;  %v7640_v56 = vmul.f32 %v7639_v36, %v13234_v15  ;;  %v7660_v6 = vmul.f32 %v8199_v11, %v7659_v27  ;;  %v7530_v43 = vpop.f32.mrf.mxu2  ;;  %v7680_v36 = vand.u32 2147483648, %v13244_v31 }
 0x6cb   :  { %v8201_v53 = vpop.eup %8200  ;;  %v13260_v35 = vadd.f32 %v7607_v44, %v7591_v62  ;;  %v7531_v4 = vadd.f32 %v7530_v43, %v7448_v48  ;;  %v7594_v48 = vmul.f32 %v13218_v1, %v13218_v1 }
 0x6cc   :  { %v7651_v25 = vmul.f32 %v8197_v52, %v7650_v3  ;;  %v7671_v18 = vmul.f32 %v8201_v53, %v13244_v31  ;;  %v7642_v41 = vsel %vm7641_vm0, %v13234_v15, %v7640_v56  ;;  %v7661_v50 = vmul.f32 0.5, %v7660_v6 }
 0x6cd   :  { %v7489_v30 = vpop.f32.mrf.mxu1  ;;  %8204 = vrsqrt.f32 %v13260_v35  ;;  %v7645_v59 = vsel %vm7643_vm2, %v7644_v54, %v7642_v41  ;;  %v7608_v60 = vmul.f32 %v7531_v4, %v7531_v4  ;;  %v7595_v56 = vmul.f32 %v13220_v38, %v13220_v38 }
 0x6ce   :  { %v7571_v46 = vpop.f32.mrf.mxu3  ;;  %v7652_v58 = vmul.f32 %v7651_v25, %v13237_v13  ;;  %v7672_v14 = vmul.f32 %v8201_v53, %v7671_v18  ;;  %7826 = vst [vmem:[#allocation2] sm:$0xff] %v7645_v59  ;;  %v7662_v37 = vsub.f32 1.5, %v7661_v50  ;;  %v7454_v40 = vpop.f32.mrf.mxu0  ;;  %v7692_v41 = vand.u32 2147483648, %v13250_v19 }
 0x6cf   :  { %v7572_v12 = vadd.f32 %v7571_v46, %v7489_v30  ;;  %v8203_v20 = vpop.eup %8202  ;;  %v13273_v10 = vadd.f32 %v7608_v60, %v7592_v42  ;;  %vm7701_vm8 = vcmp.eq.f32.partialorder %v13260_v35, inf  ;;  %vm7703_vm9 = vcmp.eq.f32.partialorder %v13260_v35, 0.0 }
 0x6d0   :  { %v7654_v2 = vsel %vm7653_vm11, %v13237_v13, %v7652_v58  ;;  %v7673_v15 = vmul.f32 0.5, %v7672_v14  ;;  %v7663_v51 = vmul.f32 %v8199_v11, %v7662_v37  ;;  %v7683_v21 = vmul.f32 %v8203_v20, %v13250_v19 }
 0x6d1   :  { %v7657_v34 = vsel %vm7655_vm3, %v7656_v22, %v7654_v2  ;;  %v7609_v45 = vmul.f32 %v7572_v12, %v7572_v12  ;;  %8206 = vrsqrt.f32 %v13273_v10  ;;  %vm7713_vm15 = vcmp.eq.f32.partialorder %v13273_v10, inf }
 0x6d2   :  { %7827 = vst [vmem:[#allocation2 + $0x8] sm:$0xff] %v7657_v34  ;;  %v7674_v52 = vsub.f32 1.5, %v7673_v15  ;;  %v7664_v16 = vmul.f32 %v7663_v51, %v13240_v9  ;;  %v7684_v13 = vmul.f32 %v8203_v20, %v7683_v21  ;;  %v7533_v61 = vpop.f32.mrf.mxu2  ;;  %vm7715_vm1 = vcmp.eq.f32.partialorder %v13273_v10, 0.0 }
 0x6d3   :  { %v8205_v29 = vpop.eup %8204  ;;  %v13286_v24 = vadd.f32 %v7609_v45, %v7593_v49  ;;  %v7534_v63 = vadd.f32 %v7533_v61, %v7451_v23  ;;  %v7596_v49 = vmul.f32 %v13222_v33, %v13222_v33 }
 0x6d4   :  { %v7675_v0 = vmul.f32 %v8201_v53, %v7674_v52  ;;  %v7695_v1 = vmul.f32 %v8205_v29, %v13260_v35  ;;  %v7666_v28 = vsel %vm7665_vm10, %v13240_v9, %v7664_v16  ;;  %v7685_v8 = vmul.f32 0.5, %v7684_v13 }
 0x6d5   :  { %v7492_v55 = vpop.f32.mrf.mxu1  ;;  %v7669_v11 = vsel %vm7667_vm4, %v7668_v26, %v7666_v28  ;;  %8208 = vrsqrt.f32 %v13286_v24  ;;  %v7610_v3 = vmul.f32 %v7534_v63, %v7534_v63  ;;  %vm7725_vm6 = vcmp.eq.f32.partialorder %v13286_v24, inf }
 0x6d6   :  { %v7574_v5 = vpop.f32.mrf.mxu3  ;;  %v7676_v57 = vmul.f32 %v7675_v0, %v13244_v31  ;;  %v7696_v44 = vmul.f32 %v8205_v29, %v7695_v1  ;;  %7828 = vst [vmem:[#allocation2 + $0x10] sm:$0xff] %v7669_v11  ;;  %v7686_v27 = vsub.f32 1.5, %v7685_v8  ;;  %v7457_v15 = vpop.f32.mrf.mxu0  ;;  %vm7727_vm12 = vcmp.eq.f32.partialorder %v13286_v24, 0.0 }
 0x6d7   :  { %v7575_v62 = vadd.f32 %v7574_v5, %v7492_v55  ;;  %v8207_v53 = vpop.eup %8206  ;;  %v13297_v18 = vadd.f32 %v7610_v3, %v7594_v48 }
 0x6d8   :  { %v7678_v9 = vsel %vm7677_vm7, %v13244_v31, %v7676_v57  ;;  %v7697_v42 = vmul.f32 0.5, %v7696_v44  ;;  %v7687_v30 = vmul.f32 %v8203_v20, %v7686_v27  ;;  %v7707_v25 = vmul.f32 %v8207_v53, %v13273_v10 }
 0x6d9   :  { %v7681_v6 = vsel %vm7679_vm5, %v7680_v36, %v7678_v9  ;;  %v7611_v43 = vmul.f32 %v7575_v62, %v7575_v62  ;;  %8210 = vrsqrt.f32 %v13297_v18  ;;  %v7704_v20 = vand.u32 2147483648, %v13260_v35 }
 0x6da   :  { %7829 = vst [vmem:[#allocation2 + $0x18] sm:$0xff] %v7681_v6  ;;  %v7698_v54 = vsub.f32 1.5, %v7697_v42  ;;  %v7688_v4 = vmul.f32 %v7687_v30, %v13250_v19  ;;  %v7536_v23 = vpop.f32.mrf.mxu2  ;;  %v7708_v38 = vmul.f32 %v8207_v53, %v7707_v25  ;;  %v7599_v62 = vmul.f32 %v13228_v47, %v13228_v47 }
 0x6db   :  { %v13301_v31 = vadd.f32 %v7611_v43, %v7595_v56  ;;  %v8209_v59 = vpop.eup %8208  ;;  %v7537_v2 = vadd.f32 %v7536_v23, %v7454_v40  ;;  %vm7737_vm0 = vcmp.eq.f32.partialorder %v13297_v18, inf  ;;  %vm7739_vm2 = vcmp.eq.f32.partialorder %v13297_v18, 0.0 }
 0x6dc   :  { %v7699_v50 = vmul.f32 %v8205_v29, %v7698_v54  ;;  %v7690_v58 = vsel %vm7689_vm14, %v13250_v19, %v7688_v4  ;;  %v7709_v60 = vmul.f32 0.5, %v7708_v38  ;;  %v7719_v12 = vmul.f32 %v8209_v59, %v13286_v24 }
 0x6dd   :  { %v7495_v46 = vpop.f32.mrf.mxu1  ;;  %8212 = vrsqrt.f32 %v13301_v31  ;;  %v7693_v22 = vsel %vm7691_vm13, %v7692_v41, %v7690_v58  ;;  %v7612_v52 = vmul.f32 %v7537_v2, %v7537_v2  ;;  %v7597_v29 = vmul.f32 %v13224_v17, %v13224_v17 }
 0x6de   :  { %v7577_v14 = vpop.f32.mrf.mxu3  ;;  %v7700_v37 = vmul.f32 %v7699_v50, %v13260_v35  ;;  %7830 = vst [vmem:[#allocation2 + $0x20] sm:$0xff] %v7693_v22  ;;  %v7710_v34 = vsub.f32 1.5, %v7709_v60  ;;  %v7720_v51 = vmul.f32 %v8209_v59, %v7719_v12  ;;  %v7716_v17 = vand.u32 2147483648, %v13273_v10  ;;  %v7460_v6 = vpop.f32.mrf.mxu0 }
 0x6df   :  { %v7578_v21 = vadd.f32 %v7577_v14, %v7495_v46  ;;  %v8211_v45 = vpop.eup %8210  ;;  %v13321_v0 = vadd.f32 %v7612_v52, %v7596_v49  ;;  %v7740_v50 = vand.u32 2147483648, %v13297_v18  ;;  %vm7749_vm11 = vcmp.eq.f32.partialorder %v13301_v31, inf }
 0x6e0   :  { %v7702_v19 = vsel %vm7701_vm8, %v13260_v35, %v7700_v37  ;;  %v7711_v16 = vmul.f32 %v8207_v53, %v7710_v34  ;;  %v7721_v13 = vmul.f32 0.5, %v7720_v51  ;;  %v7598_v35 = vmul.f32 %v13226_v32, %v13226_v32 }
 0x6e1   :  { %v7705_v48 = vsel %vm7703_vm9, %v7704_v20, %v7702_v19  ;;  %v7613_v55 = vmul.f32 %v7578_v21, %v7578_v21  ;;  %v7731_v26 = vmul.f32 %v8211_v45, %v13297_v18  ;;  %8214 = vrsqrt.f32 %v13321_v0 }
 0x6e2   :  { %7831 = vst [vmem:[#allocation2 + $0x28] sm:$0xff] %v7705_v48  ;;  %v7539_v1 = vpop.f32.mrf.mxu2  ;;  %v7712_v33 = vmul.f32 %v7711_v16, %v13273_v10  ;;  %v7722_v28 = vsub.f32 1.5, %v7721_v13  ;;  %vm7751_vm3 = vcmp.eq.f32.partialorder %v13301_v31, 0.0  ;;  %v7752_v2 = vand.u32 2147483648, %v13301_v31 }
 0x6e3   :  { %v8213_v61 = vpop.eup %8212  ;;  %v13325_v63 = vadd.f32 %v7613_v55, %v7597_v29  ;;  %v7732_v5 = vmul.f32 %v8211_v45, %v7731_v26  ;;  %v7540_v53 = vadd.f32 %v7539_v1, %v7457_v15  ;;  %v7600_v52 = vmul.f32 %v13230_v7, %v13230_v7 }
 0x6e4   :  { %v7743_v8 = vmul.f32 %v8213_v61, %v13301_v31  ;;  %v7714_v32 = vsel %vm7713_vm15, %v13273_v10, %v7712_v33  ;;  %v7723_v40 = vmul.f32 %v8209_v59, %v7722_v28  ;;  %v7728_v10 = vand.u32 2147483648, %v13286_v24 }
 0x6e5   :  { %v7498_v57 = vpop.f32.mrf.mxu1  ;;  %v7717_v36 = vsel %vm7715_vm1, %v7716_v17, %v7714_v32  ;;  %v7733_v27 = vmul.f32 0.5, %v7732_v5  ;;  %8216 = vrsqrt.f32 %v13325_v63  ;;  %v7614_v4 = vmul.f32 %v7540_v53, %v7540_v53 }
 0x6e6   :  { %v7744_v11 = vmul.f32 %v8213_v61, %v7743_v8  ;;  %v7580_v44 = vpop.f32.mrf.mxu3  ;;  %7832 = vst [vmem:[#allocation2 + $0x30] sm:$0xff] %v7717_v36  ;;  %v7724_v9 = vmul.f32 %v7723_v40, %v13286_v24  ;;  %v7601_v28 = vmul.f32 %v13232_v39, %v13232_v39  ;;  %vm7761_vm10 = vcmp.eq.f32.partialorder %v13321_v0, inf }
 0x6e7   :  { %v7734_v3 = vsub.f32 1.5, %v7733_v27  ;;  %v7581_v56 = vadd.f32 %v7580_v44, %v7498_v57  ;;  %v8215_v43 = vpop.eup %8214  ;;  %v13346_v14 = vadd.f32 %v7614_v4, %v7598_v35  ;;  %vm7763_vm4 = vcmp.eq.f32.partialorder %v13321_v0, 0.0 }
 0x6e8   :  { %v7745_v42 = vmul.f32 0.5, %v7744_v11  ;;  %v7726_v47 = vsel %vm7725_vm6, %v13286_v24, %v7724_v9  ;;  %v7755_v46 = vmul.f32 %v8215_v43, %v13321_v0  ;;  %v7764_v8 = vand.u32 2147483648, %v13321_v0 }
 0x6e9   :  { %v7729_v54 = vsel %vm7727_vm12, %v7728_v10, %v7726_v47  ;;  %v7735_v25 = vmul.f32 %v8211_v45, %v7734_v3  ;;  %v7615_v23 = vmul.f32 %v7581_v56, %v7581_v56  ;;  %8218 = vrsqrt.f32 %v13346_v14 }
 0x6ea   :  { %v7746_v30 = vsub.f32 1.5, %v7745_v42  ;;  %v7542_v41 = vpop.f32.mrf.mxu2  ;;  %7833 = vst [vmem:[#allocation2 + $0x38] sm:$0xff] %v7729_v54  ;;  %v7756_v60 = vmul.f32 %v8215_v43, %v7755_v46  ;;  %vm7773_vm7 = vcmp.eq.f32.partialorder %v13325_v63, inf  ;;  %v7776_v57 = vand.u32 2147483648, %v13325_v63 }
 0x6eb   :  { %v7543_v59 = vadd.f32 %v7542_v41, %v7460_v6  ;;  %v8217_v58 = vpop.eup %8216  ;;  %v7736_v24 = vmul.f32 %v7735_v25, %v13297_v18  ;;  %v13348_v22 = vadd.f32 %v7615_v23, %v7599_v62  ;;  %vm7775_vm5 = vcmp.eq.f32.partialorder %v13325_v63, 0.0 }
 0x6ec   :  { %v7747_v38 = vmul.f32 %v8213_v61, %v7746_v30  ;;  %v7767_v12 = vmul.f32 %v8217_v58, %v13325_v63  ;;  %v7757_v51 = vmul.f32 0.5, %v7756_v60  ;;  %vm7785_vm14 = vcmp.eq.f32.partialorder %v13346_v14, inf }
 0x6ed   :  { %v7738_v20 = vsel %vm7737_vm0, %v13297_v18, %v7736_v24  ;;  %v7616_v15 = vmul.f32 %v7543_v59, %v7543_v59  ;;  %v7501_v49 = vpop.f32.mrf.mxu1  ;;  %8220 = vrsqrt.f32 %v13348_v22  ;;  %vm7787_vm13 = vcmp.eq.f32.partialorder %v13346_v14, 0.0 }
 0x6ee   :  { %v7748_v37 = vmul.f32 %v7747_v38, %v13301_v31  ;;  %v7741_v19 = vsel %vm7739_vm2, %v7740_v50, %v7738_v20  ;;  %v7768_v21 = vmul.f32 %v8217_v58, %v7767_v12  ;;  %v7583_v48 = vpop.f32.mrf.mxu3  ;;  %v7758_v29 = vsub.f32 1.5, %v7757_v51 }
 0x6ef   :  { %7834 = vst [vmem:[#allocation2 + $0x40] sm:$0xff] %v7741_v19  ;;  %v13364_v13 = vadd.f32 %v7616_v15, %v7600_v52  ;;  %v7584_v18 = vadd.f32 %v7583_v48, %v7501_v49  ;;  %vm7797_vm8 = vcmp.eq.f32.partialorder %v13348_v22, inf  ;;  %v7800_v50 = vand.u32 2147483648, %v13348_v22 }
 0x6f0   :  { %v7750_v34 = vsel %vm7749_vm11, %v13301_v31, %v7748_v37  ;;  %v7769_v16 = vmul.f32 0.5, %v7768_v21  ;;  %v7759_v55 = vmul.f32 %v8215_v43, %v7758_v29  ;;  %v8219_v31 = vpop.eup %8218  ;;  %vm7799_vm9 = vcmp.eq.f32.partialorder %v13348_v22, 0.0 }
 0x6f1   :  { %v7753_v45 = vsel %vm7751_vm3, %v7752_v2, %v7750_v34  ;;  %8222 = vrsqrt.f32 %v13364_v13  ;;  %v7779_v7 = vmul.f32 %v8219_v31, %v13346_v14  ;;  %v7617_v1 = vmul.f32 %v7584_v18, %v7584_v18 }
 0x6f2   :  { %7835 = vst [vmem:[#allocation2 + $0x48] sm:$0xff] %v7753_v45  ;;  %v7770_v61 = vsub.f32 1.5, %v7769_v16  ;;  %v7760_v35 = vmul.f32 %v7759_v55, %v13321_v0  ;;  %vm7809_vm15 = vcmp.eq.f32.partialorder %v13364_v13, inf  ;;  %v7812_v37 = vand.u32 2147483648, %v13364_v13 }
 0x6f3   :  { %v8221_v33 = vpop.eup %8220  ;;  %v7780_v32 = vmul.f32 %v8219_v31, %v7779_v7  ;;  %v7633_v44 = vadd.f32 %v7617_v1, %v7601_v28  ;;  %vm7811_vm1 = vcmp.eq.f32.partialorder %v13364_v13, 0.0 }
 0x6f4   :  { %v7771_v26 = vmul.f32 %v8217_v58, %v7770_v61  ;;  %v7762_v17 = vsel %vm7761_vm10, %v13321_v0, %v7760_v35  ;;  %v7791_v40 = vmul.f32 %v8221_v33, %v13348_v22 }
 0x6f5   :  { %v7765_v11 = vsel %vm7763_vm4, %v7764_v8, %v7762_v17  ;;  %v7781_v62 = vmul.f32 0.5, %v7780_v32  ;;  %8224 = vrsqrt.f32 %v7633_v44  ;;  %vm7821_vm6 = vcmp.eq.f32.partialorder %v7633_v44, inf }
 0x6f6   :  { %v7772_v5 = vmul.f32 %v7771_v26, %v13325_v63  ;;  %7836 = vst [vmem:[#allocation2 + $0x50] sm:$0xff] %v7765_v11  ;;  %v7792_v36 = vmul.f32 %v8221_v33, %v7791_v40  ;;  %v7824_v15 = vand.u32 2147483648, %v7633_v44  ;;  %vm7823_vm12 = vcmp.eq.f32.partialorder %v7633_v44, 0.0 }
 0x6f7   :  { %v8223_v27 = vpop.eup %8222  ;;  %v7782_v9 = vsub.f32 1.5, %v7781_v62 }
 0x6f8   :  { %v7774_v39 = vsel %vm7773_vm7, %v13325_v63, %v7772_v5  ;;  %v7793_v42 = vmul.f32 0.5, %v7792_v36  ;;  %v7803_v10 = vmul.f32 %v8223_v27, %v13364_v13  ;;  %v7788_v63 = vand.u32 2147483648, %v13346_v14 }
 0x6f9   :  { %v7777_v0 = vsel %vm7775_vm5, %v7776_v57, %v7774_v39  ;;  %v7783_v3 = vmul.f32 %v8219_v31, %v7782_v9 }
 0x6fa   :  { %7837 = vst [vmem:[#allocation2 + $0x58] sm:$0xff] %v7777_v0  ;;  %v7794_v53 = vsub.f32 1.5, %v7793_v42  ;;  %v7804_v56 = vmul.f32 %v8223_v27, %v7803_v10 }
 0x6fb   :  { %v7784_v6 = vmul.f32 %v7783_v3, %v13346_v14  ;;  %v8225_v43 = vpop.eup %8224 }
 0x6fc   :  { %v7795_v47 = vmul.f32 %v8221_v33, %v7794_v53  ;;  %v7805_v30 = vmul.f32 0.5, %v7804_v56  ;;  %v7815_v23 = vmul.f32 %v8225_v43, %v7633_v44 }
 0x6fd   :  { %v7786_v54 = vsel %vm7785_vm14, %v13346_v14, %v7784_v6 }
 0x6fe   :  { %v7796_v25 = vmul.f32 %v7795_v47, %v13348_v22  ;;  %v7806_v4 = vsub.f32 1.5, %v7805_v30  ;;  %v7789_v41 = vsel %vm7787_vm13, %v7788_v63, %v7786_v54  ;;  %v7816_v59 = vmul.f32 %v8225_v43, %v7815_v23 }
 0x6ff   :  { %7838 = vst [vmem:[#allocation2 + $0x60] sm:$0xff] %v7789_v41 }
 0x700   :  { %v7798_v38 = vsel %vm7797_vm8, %v13348_v22, %v7796_v25  ;;  %v7807_v46 = vmul.f32 %v8223_v27, %v7806_v4  ;;  %v7817_v14 = vmul.f32 0.5, %v7816_v59 }
 0x701   :  { %v7801_v58 = vsel %vm7799_vm9, %v7800_v50, %v7798_v38 }
 0x702   :  { %7839 = vst [vmem:[#allocation2 + $0x68] sm:$0xff] %v7801_v58  ;;  %v7808_v24 = vmul.f32 %v7807_v46, %v13364_v13  ;;  %v7818_v12 = vsub.f32 1.5, %v7817_v14 }
 0x704   :  { %v7810_v60 = vsel %vm7809_vm15, %v13364_v13, %v7808_v24  ;;  %v7819_v2 = vmul.f32 %v8225_v43, %v7818_v12 }
 0x705   :  { %v7813_v20 = vsel %vm7811_vm1, %v7812_v37, %v7810_v60 }
 0x706   :  { %7840 = vst [vmem:[#allocation2 + $0x70] sm:$0xff] %v7813_v20  ;;  %v7820_v22 = vmul.f32 %v7819_v2, %v7633_v44 }
 0x708   :  { %v7822_v19 = vsel %vm7821_vm6, %v7633_v44, %v7820_v22 }
 0x709   :  { %v7825_v34 = vsel %vm7823_vm12, %v7824_v15, %v7822_v19 }
 0x70a   :  { %7841 = vst [vmem:[#allocation2 + $0x78] sm:$0xff] %v7825_v34 }
 0x70b   :  { %7854 = dma.vmem_to_hbm [thread:$0]  %s7847_s12, 2048, %s7849_s17, [#allocation3], %s8261_s5, %s8261_s5, %s8262_s18  }
 0x70c   :  { %8250 = dma.done.wait [#allocation3], 2048  }
 0x70d   :  { %8251 = vsyncadd [#allocation3], 4294965248 }
 0x70e   :  { %7859 = vsyncpa [#allocation3], 1 }

</bundles_post_ra>
